<compile_context>
chip_gen: v7x
topology: tpu7x:2x2x1
jax: 0.10.0
libtpu: 0.0.40
codegen_flags: <defaults>
</compile_context>

<pallas_src>
import math

import jax
import jax.numpy as jnp
from jax import lax
from jax.experimental import pallas as pl
from jax.experimental.pallas import tpu as pltpu


# ---------------------------------------------------------------------------
# Pallas kernel
# ---------------------------------------------------------------------------
def _make_decoder_lstm_kernel(num_layers: int, T: int, Bp: int, Hp: int):
    """Ref order (L = num_layers):
      inputs : x(T*Bp, Din), h0(L, Bp, Hp), c0(L, Bp, Hp),
               w_ih0T(Din, 4Hp), w_hh0T(Hp, 4Hp),                # VMEM
               [w_ihT_l(Hp, 4Hp), w_hhT_l(Hp, 4Hp)] * (L-1),     # HBM (ANY)
               bias_l(1, 4Hp) * L,                               # VMEM
               w_outT(Hp, Opad)  (HBM/ANY),  b_out(1, Opad)      # VMEM
      outputs: res(T*Bp, Opad), hn(L, Bp, Hp), cn(L, Bp, Hp)
      scratch: prebuf(T*Bp, 4Hp), hbuf(T*Bp, Hp),
               [w_ih_buf_l, w_hh_buf_l] * (L-1), w_out_buf, sem(DMA, n_dma)
    Gate column order is (i, f, o, g), each block padded to Hp lanes.
    """
    L = num_layers
    n_dma = 2 * (L - 1) + 1

    def kernel(*refs):
        # ---- unpack -------------------------------------------------------
        x_ref, h0_ref, c0_ref, w_ih0, w_hh0 = refs[0:5]
        p = 5
        w_ih_hbm = [refs[p + 2 * i] for i in range(L - 1)]
        w_hh_hbm = [refs[p + 2 * i + 1] for i in range(L - 1)]
        p += 2 * (L - 1)
        bias = [refs[p + l] for l in range(L)]
        p += L
        w_out_hbm = refs[p]
        b_out = refs[p + 1]
        p += 2
        res_ref, hn_ref, cn_ref = refs[p], refs[p + 1], refs[p + 2]
        p += 3
        prebuf, hbuf = refs[p], refs[p + 1]
        p += 2
        w_ih_buf = [refs[p + 2 * i] for i in range(L - 1)]
        w_hh_buf = [refs[p + 2 * i + 1] for i in range(L - 1)]
        p += 2 * (L - 1)
        w_out_buf = refs[p]
        sem = refs[p + 1]

        # ---- start weight prefetch DMAs (deep layers + output projection) --
        copies = []
        for i in range(L - 1):
            copies.append(pltpu.make_async_copy(w_ih_hbm[i], w_ih_buf[i], sem.at[2 * i]))
            copies.append(pltpu.make_async_copy(w_hh_hbm[i], w_hh_buf[i], sem.at[2 * i + 1]))
        cp_out = pltpu.make_async_copy(w_out_hbm, w_out_buf, sem.at[n_dma - 1])
        for cp in copies:
            cp.start()
        cp_out.start()

        # ---- layer-0 non-recurrent projection, batched over all timesteps --
        prebuf[...] = (
            jnp.dot(x_ref[...], w_ih0[...], preferred_element_type=jnp.float32)
            + bias[0][...]
        )

        # recurrent state carried in registers (one vreg each at Bp=8, Hp=128)
        h = [h0_ref[l] for l in range(L)]
        c = [c0_ref[l] for l in range(L)]
        h_out = [None] * L          # layer-l output, consumed by layer l+1 next wave
        waited = [False] * (L - 1)  # per deep layer: weight DMA already waited on

        # ---- wavefront over (layer, time): two independent chains in flight
        for s in range(T + L - 1):
            for l in reversed(range(L)):          # deep layers first within a wave
                t = s - l
                if t < 0 or t >= T:
                    continue
                if l == 0:
                    pre = prebuf[t * Bp:(t + 1) * Bp, :]
                    w_hh_ref = w_hh0
                else:
                    if not waited[l - 1]:
                        copies[2 * (l - 1)].wait()
                        copies[2 * (l - 1) + 1].wait()
                        waited[l - 1] = True
                    # per-step input projection (depends only on previous wave)
                    pre = (
                        jnp.dot(h_out[l - 1], w_ih_buf[l - 1][...],
                                preferred_element_type=jnp.float32)
                        + bias[l][...]
                    )
                    w_hh_ref = w_hh_buf[l - 1]

                # recurrent weight re-read inside the loop (no 64-vreg pin)
                gates = pre + jnp.dot(h[l], w_hh_ref[...],
                                      preferred_element_type=jnp.float32)
                # gate order (i, f, o, g), each block one full 128-lane tile
                sig = jax.nn.sigmoid(gates[:, :3 * Hp])
                g_g = jnp.tanh(gates[:, 3 * Hp:])
                i_g = sig[:, :Hp]
                f_g = sig[:, Hp:2 * Hp]
                o_g = sig[:, 2 * Hp:]
                c[l] = f_g * c[l] + i_g * g_g
                h[l] = o_g * jnp.tanh(c[l])
                h_out[l] = h[l]
                if l == L - 1:
                    hbuf[t * Bp:(t + 1) * Bp, :] = h[l]   # lane-dense (8,128) store

        for l in range(L):
            hn_ref[l] = h[l]        # written once per layer, lane-dense
            cn_ref[l] = c[l]

        # ---- output projection: one lane-dense (T*Bp, Hp) x (Hp, Opad) matmul
        cp_out.wait()
        res_ref[...] = (
            jnp.dot(hbuf[...], w_out_buf[...], preferred_element_type=jnp.float32)
            + b_out[...]
        )

    return kernel


# ---------------------------------------------------------------------------
# Parameter init (deterministic, mirrors the PyTorch module's shapes)
# ---------------------------------------------------------------------------
def init_params(key, vocab, hidden_size, num_layers, vector_size, output_size):
    h2 = 2 * hidden_size
    d_in = vector_size + h2
    n_keys = 1 + 4 * num_layers + 2
    keys = jax.random.split(key, n_keys)
    params = {}
    # Embedding(num_embeddings, 100); padding_idx only affects training and its
    # weights come from load_state_dict, so a plain table is identical for fwd.
    params["embedding"] = 0.1 * jax.random.normal(keys[0], (vocab, 100), jnp.float32)

    k = 1.0 / math.sqrt(h2)
    lstm = []
    idx = 1
    for l in range(num_layers):
        in_dim = d_in if l == 0 else h2
        w_ih = jax.random.uniform(keys[idx], (4 * h2, in_dim), jnp.float32, -k, k); idx += 1
        w_hh = jax.random.uniform(keys[idx], (4 * h2, h2), jnp.float32, -k, k); idx += 1
        b_ih = jax.random.uniform(keys[idx], (4 * h2,), jnp.float32, -k, k); idx += 1
        b_hh = jax.random.uniform(keys[idx], (4 * h2,), jnp.float32, -k, k); idx += 1
        lstm.append((w_ih, w_hh, b_ih, b_hh))
    params["lstm"] = lstm

    params["w_out"] = jax.random.uniform(keys[idx], (output_size, h2), jnp.float32, -k, k); idx += 1
    params["b_out"] = jax.random.uniform(keys[idx], (output_size,), jnp.float32, -k, k)
    return params


# ---------------------------------------------------------------------------
# Weight packing: PyTorch (i,f,g,o) -> (i,f,o,g), gate blocks padded h2 -> Hp
# ---------------------------------------------------------------------------
def _pack_lstm_weight(w, h2, Hp, pad_in):
    """w: (4*h2, in_dim) -> transposed, gate-permuted, padded (in_dim_p, 4*Hp)."""
    blocks = [w[0 * h2:1 * h2], w[1 * h2:2 * h2], w[3 * h2:4 * h2], w[2 * h2:3 * h2]]
    padded = [jnp.pad(b, ((0, Hp - h2), (0, 0))) for b in blocks]
    wp = jnp.concatenate(padded, axis=0)                    # (4*Hp, in_dim)
    if pad_in:
        wp = jnp.pad(wp, ((0, 0), (0, Hp - wp.shape[1])))   # in_dim h2 -> Hp
    return jnp.transpose(wp)                                # (in_dim_p, 4*Hp)


def _pack_lstm_bias(b_ih, b_hh, h2, Hp):
    b = b_ih + b_hh
    blocks = [b[0 * h2:1 * h2], b[1 * h2:2 * h2], b[3 * h2:4 * h2], b[2 * h2:3 * h2]]
    padded = [jnp.pad(x, (0, Hp - h2)) for x in blocks]
    return jnp.concatenate(padded).reshape(1, -1)           # (1, 4*Hp)


# ---------------------------------------------------------------------------
# Forward (wrapper around pallas_call)
# ---------------------------------------------------------------------------
def decoder_lstm_forward(params, encoder_representation, hidden_state, token,
                         *, hidden_size, num_layers):
    h2 = 2 * hidden_size
    Hp = ((h2 + 127) // 128) * 128            # hidden padded to full lane tiles
    Bp = 8                                    # batch padded to one sublane tile

    # Embedding lookup (gather) + concat: plain JAX glue.
    emb = jnp.take(params["embedding"], token, axis=0)                # (B, T, 100)
    inputs = jnp.concatenate(
        [encoder_representation.astype(jnp.float32), emb], axis=2)    # (B, T, D_in)
    B, T, d_in = inputs.shape

    # time-major, batch padded to Bp, flattened: row t*Bp + b
    x_tm = jnp.transpose(inputs, (1, 0, 2))                           # (T, B, D_in)
    x_flat = jnp.pad(x_tm, ((0, 0), (0, Bp - B), (0, 0))).reshape(T * Bp, d_in)

    h0, c0 = hidden_state
    h0p = jnp.pad(h0.astype(jnp.float32), ((0, 0), (0, Bp - B), (0, Hp - h2)))
    c0p = jnp.pad(c0.astype(jnp.float32), ((0, 0), (0, Bp - B), (0, Hp - h2)))

    output_size = params["w_out"].shape[0]
    o_pad = ((output_size + 127) // 128) * 128                        # lane-dense output

    # Pack / pad / transpose weights (would be done once offline in practice).
    w_ihT, w_hhT, biases = [], [], []
    for l, (w_ih, w_hh, b_ih, b_hh) in enumerate(params["lstm"]):
        w_ihT.append(_pack_lstm_weight(w_ih, h2, Hp, pad_in=(l > 0)))
        w_hhT.append(_pack_lstm_weight(w_hh, h2, Hp, pad_in=True))
        biases.append(_pack_lstm_bias(b_ih, b_hh, h2, Hp))
    w_out_p = jnp.zeros((o_pad, Hp), jnp.float32).at[:output_size, :h2].set(params["w_out"])
    b_out_p = jnp.zeros((1, o_pad), jnp.float32).at[0, :output_size].set(params["b_out"])
    w_outT = jnp.transpose(w_out_p)                                   # (Hp, O_pad)

    vmem = pl.BlockSpec(memory_space=pltpu.MemorySpace.VMEM)
    hbm = pl.BlockSpec(memory_space=pl.ANY)   # deep-layer / output weights: manual DMA

    flat = [x_flat, h0p, c0p, w_ihT[0], w_hhT[0]]
    in_specs = [vmem] * 5
    for l in range(1, num_layers):
        flat += [w_ihT[l], w_hhT[l]]
        in_specs += [hbm, hbm]
    flat += biases
    in_specs += [vmem] * num_layers
    flat += [w_outT, b_out_p]
    in_specs += [hbm, vmem]

    n_dma = 2 * (num_layers - 1) + 1
    scratch = [
        pltpu.VMEM((T * Bp, 4 * Hp), jnp.float32),   # layer-0 batched gate pre-acts
        pltpu.VMEM((T * Bp, Hp), jnp.float32),       # final-layer h outputs over time
    ]
    for l in range(1, num_layers):
        scratch.append(pltpu.VMEM((Hp, 4 * Hp), jnp.float32))   # w_ih_l landing buffer
        scratch.append(pltpu.VMEM((Hp, 4 * Hp), jnp.float32))   # w_hh_l landing buffer
    scratch.append(pltpu.VMEM((Hp, o_pad), jnp.float32))        # w_out landing buffer
    scratch.append(pltpu.SemaphoreType.DMA((n_dma,)))

    out_shape = (
        jax.ShapeDtypeStruct((T * Bp, o_pad), jnp.float32),
        jax.ShapeDtypeStruct((num_layers, Bp, Hp), jnp.float32),
        jax.ShapeDtypeStruct((num_layers, Bp, Hp), jnp.float32),
    )

    kernel = _make_decoder_lstm_kernel(num_layers, T, Bp, Hp)
    res_flat, hn_p, cn_p = pl.pallas_call(
        kernel,
        out_shape=out_shape,
        in_specs=in_specs,
        out_specs=(vmem, vmem, vmem),
        scratch_shapes=scratch,
    )(*flat)

    # Strip batch / hidden / lane padding, back to batch_first (B, T, O).
    res = res_flat.reshape(T, Bp, o_pad)[:, :B, :output_size]
    results = jnp.transpose(res, (1, 0, 2))
    hn = hn_p[:, :B, :h2]
    cn = cn_p[:, :B, :h2]
    return results, (hn, cn)


# ---------------------------------------------------------------------------
# Pure-JAX reference (for numerical validation)
# ---------------------------------------------------------------------------
def reference_forward(params, encoder_representation, hidden_state, token,
                      *, hidden_size, num_layers):
    h2 = 2 * hidden_size
    emb = params["embedding"][token]
    x = jnp.concatenate([encoder_representation, emb], axis=2)
    h = [hidden_state[0][l] for l in range(num_layers)]
    c = [hidden_state[1][l] for l in range(num_layers)]
    B, T, _ = x.shape
    outs = []
    hp = jax.lax.Precision.HIGHEST
    for t in range(T):
        inp = x[:, t, :]
        for l in range(num_layers):
            w_ih, w_hh, b_ih, b_hh = params["lstm"][l]
            gates = (jnp.dot(inp, w_ih.T, precision=hp)
                     + jnp.dot(h[l], w_hh.T, precision=hp) + b_ih + b_hh)
            i = jax.nn.sigmoid(gates[:, :h2])
            f = jax.nn.sigmoid(gates[:, h2:2 * h2])
            g = jnp.tanh(gates[:, 2 * h2:3 * h2])
            o = jax.nn.sigmoid(gates[:, 3 * h2:])
            c[l] = f * c[l] + i * g
            h[l] = o * jnp.tanh(c[l])
            inp = h[l]
        outs.append(jnp.dot(inp, params["w_out"].T, precision=hp) + params["b_out"])
    results = jnp.stack(outs, axis=1)
    return results, (jnp.stack(h), jnp.stack(c))


# ---------------------------------------------------------------------------
if __name__ == "__main__":
    # Module hyperparameters (small but consistent with the forward semantics)
    vocab = 20
    hidden_size = 32          # -> LSTM hidden = 2*hidden_size = 64
    num_layers = 2
    vector_size = 100         # must equal embedding dim (cat along dim=2)
    output_size = 50
    MAX_SEQ_LENGTH = 8        # unused in forward
    B, T = 2, 8
    h2 = 2 * hidden_size

    key = jax.random.PRNGKey(0)
    k_par, k_enc, k_h, k_c, k_tok = jax.random.split(key, 5)

    params = init_params(k_par, vocab, hidden_size, num_layers, vector_size, output_size)

    encoder_representation = 0.5 * jax.random.normal(k_enc, (B, T, h2), jnp.float32)
    h0 = 0.1 * jax.random.normal(k_h, (num_layers, B, h2), jnp.float32)
    c0 = 0.1 * jax.random.normal(k_c, (num_layers, B, h2), jnp.float32)
    token = jax.random.randint(k_tok, (B, T), 0, vocab, dtype=jnp.int32)

    results, (hn, cn) = decoder_lstm_forward(
        params, encoder_representation, (h0, c0), token,
        hidden_size=hidden_size, num_layers=num_layers)
    jax.block_until_ready((results, hn, cn))

    ref_results, (ref_hn, ref_cn) = reference_forward(
        params, encoder_representation, (h0, c0), token,
        hidden_size=hidden_size, num_layers=num_layers)

    assert results.shape == (B, T, output_size)
    assert hn.shape == (num_layers, B, h2) and cn.shape == (num_layers, B, h2)
    assert jnp.allclose(results, ref_results, atol=1e-2, rtol=1e-2)
    assert jnp.allclose(hn, ref_hn, atol=1e-2, rtol=1e-2)
    assert jnp.allclose(cn, ref_cn, atol=1e-2, rtol=1e-2)

    print("KERNEL_OK")
</pallas_src>

<mosaic_0001>
module attributes {stable_mosaic.version = 11 : i64} {
  func.func @kernel(%arg0: memref<64x164xf32, #tpu.memory_space<vmem>>, %arg1: memref<2x8x128xf32, #tpu.memory_space<vmem>>, %arg2: memref<2x8x128xf32, #tpu.memory_space<vmem>>, %arg3: memref<164x512xf32, #tpu.memory_space<vmem>>, %arg4: memref<128x512xf32, #tpu.memory_space<vmem>>, %arg5: memref<128x512xf32, #tpu.memory_space<any>>, %arg6: memref<128x512xf32, #tpu.memory_space<any>>, %arg7: memref<1x512xf32, #tpu.memory_space<vmem>>, %arg8: memref<1x512xf32, #tpu.memory_space<vmem>>, %arg9: memref<128x128xf32, #tpu.memory_space<any>>, %arg10: memref<1x128xf32, #tpu.memory_space<vmem>>, %arg11: memref<64x128xf32, #tpu.memory_space<vmem>>, %arg12: memref<2x8x128xf32, #tpu.memory_space<vmem>>, %arg13: memref<2x8x128xf32, #tpu.memory_space<vmem>>, %arg14: memref<64x512xf32, #tpu.memory_space<vmem>>, %arg15: memref<64x128xf32, #tpu.memory_space<vmem>>, %arg16: memref<128x512xf32, #tpu.memory_space<vmem>>, %arg17: memref<128x512xf32, #tpu.memory_space<vmem>>, %arg18: memref<128x128xf32, #tpu.memory_space<vmem>>, %arg19: memref<3x!tpu.dma_semaphore, #tpu.memory_space<semaphore_mem>>) attributes {dimension_semantics = [], scalar_prefetch = 0 : i64, scratch_operands = 6 : i64, tpu.core_type = #tpu.core_type<tc>} {
    %c0_i32 = arith.constant 0 : i32
    %0 = tpu.memref_slice %arg19[%c0_i32] : memref<3x!tpu.dma_semaphore, #tpu.memory_space<semaphore_mem>> -> memref<1x!tpu.dma_semaphore, #tpu.memory_space<semaphore_mem>>
    %1 = tpu.memref_squeeze %0 : memref<1x!tpu.dma_semaphore, #tpu.memory_space<semaphore_mem>> -> memref<!tpu.dma_semaphore, #tpu.memory_space<semaphore_mem>>
    tpu.enqueue_dma source(%arg5 : memref<128x512xf32, #tpu.memory_space<any>>) target(%arg16 : memref<128x512xf32, #tpu.memory_space<vmem>>) target_semaphore(%1 : memref<!tpu.dma_semaphore, #tpu.memory_space<semaphore_mem>>)
    %c1_i32 = arith.constant 1 : i32
    %2 = tpu.memref_slice %arg19[%c1_i32] : memref<3x!tpu.dma_semaphore, #tpu.memory_space<semaphore_mem>> -> memref<1x!tpu.dma_semaphore, #tpu.memory_space<semaphore_mem>>
    %3 = tpu.memref_squeeze %2 : memref<1x!tpu.dma_semaphore, #tpu.memory_space<semaphore_mem>> -> memref<!tpu.dma_semaphore, #tpu.memory_space<semaphore_mem>>
    tpu.enqueue_dma source(%arg6 : memref<128x512xf32, #tpu.memory_space<any>>) target(%arg17 : memref<128x512xf32, #tpu.memory_space<vmem>>) target_semaphore(%3 : memref<!tpu.dma_semaphore, #tpu.memory_space<semaphore_mem>>)
    %c2_i32 = arith.constant 2 : i32
    %4 = tpu.memref_slice %arg19[%c2_i32] : memref<3x!tpu.dma_semaphore, #tpu.memory_space<semaphore_mem>> -> memref<1x!tpu.dma_semaphore, #tpu.memory_space<semaphore_mem>>
    %5 = tpu.memref_squeeze %4 : memref<1x!tpu.dma_semaphore, #tpu.memory_space<semaphore_mem>> -> memref<!tpu.dma_semaphore, #tpu.memory_space<semaphore_mem>>
    tpu.enqueue_dma source(%arg9 : memref<128x128xf32, #tpu.memory_space<any>>) target(%arg18 : memref<128x128xf32, #tpu.memory_space<vmem>>) target_semaphore(%5 : memref<!tpu.dma_semaphore, #tpu.memory_space<semaphore_mem>>)
    %c0 = arith.constant 0 : index
    %c0_0 = arith.constant 0 : index
    %6 = vector.load %arg0[%c0, %c0_0] : memref<64x164xf32, #tpu.memory_space<vmem>>, vector<64x164xf32>
    %c0_1 = arith.constant 0 : index
    %c0_2 = arith.constant 0 : index
    %7 = vector.load %arg3[%c0_1, %c0_2] : memref<164x512xf32, #tpu.memory_space<vmem>>, vector<164x512xf32>
    %cst = arith.constant dense<0.000000e+00> : vector<64x512xf32>
    %8 = tpu.matmul %6, %7, %cst {dimension_numbers = #tpu.dot_dimension_numbers<[1], [0], [0], [1], [0, 0, 1, 1], [], []>} : vector<64x164xf32>, vector<164x512xf32>, vector<64x512xf32> -> vector<64x512xf32>
    %c0_3 = arith.constant 0 : index
    %c0_4 = arith.constant 0 : index
    %9 = vector.load %arg7[%c0_3, %c0_4] : memref<1x512xf32, #tpu.memory_space<vmem>>, vector<1x512xf32>
    %10 = vector.broadcast %9 : vector<1x512xf32> to vector<64x512xf32>
    %11 = arith.addf %8, %10 : vector<64x512xf32>
    %c0_5 = arith.constant 0 : index
    %c0_6 = arith.constant 0 : index
    %12 = vector.load %arg14[%c0_5, %c0_6] : memref<64x512xf32, #tpu.memory_space<vmem>>, vector<64x512xf32>
    tpu.vector_store %arg14[%c0_5, %c0_6], %11 {strides = array<i32>} : memref<64x512xf32, #tpu.memory_space<vmem>>, vector<64x512xf32>,
    %c0_7 = arith.constant 0 : index
    %c0_8 = arith.constant 0 : index
    %c0_9 = arith.constant 0 : index
    %13 = vector.load %arg1[%c0_7, %c0_8, %c0_9] : memref<2x8x128xf32, #tpu.memory_space<vmem>>, vector<1x8x128xf32>
    %14 = vector.shape_cast %13 : vector<1x8x128xf32> to vector<8x128xf32>
    %c1 = arith.constant 1 : index
    %c0_10 = arith.constant 0 : index
    %c0_11 = arith.constant 0 : index
    %15 = vector.load %arg1[%c1, %c0_10, %c0_11] : memref<2x8x128xf32, #tpu.memory_space<vmem>>, vector<1x8x128xf32>
    %16 = vector.shape_cast %15 : vector<1x8x128xf32> to vector<8x128xf32>
    %c0_12 = arith.constant 0 : index
    %c0_13 = arith.constant 0 : index
    %c0_14 = arith.constant 0 : index
    %17 = vector.load %arg2[%c0_12, %c0_13, %c0_14] : memref<2x8x128xf32, #tpu.memory_space<vmem>>, vector<1x8x128xf32>
    %18 = vector.shape_cast %17 : vector<1x8x128xf32> to vector<8x128xf32>
    %c1_15 = arith.constant 1 : index
    %c0_16 = arith.constant 0 : index
    %c0_17 = arith.constant 0 : index
    %19 = vector.load %arg2[%c1_15, %c0_16, %c0_17] : memref<2x8x128xf32, #tpu.memory_space<vmem>>, vector<1x8x128xf32>
    %20 = vector.shape_cast %19 : vector<1x8x128xf32> to vector<8x128xf32>
    %c0_18 = arith.constant 0 : index
    %c0_19 = arith.constant 0 : index
    %21 = vector.load %arg14[%c0_18, %c0_19] : memref<64x512xf32, #tpu.memory_space<vmem>>, vector<8x512xf32>
    %c0_20 = arith.constant 0 : index
    %c0_21 = arith.constant 0 : index
    %22 = vector.load %arg4[%c0_20, %c0_21] : memref<128x512xf32, #tpu.memory_space<vmem>>, vector<128x512xf32>
    %cst_22 = arith.constant dense<0.000000e+00> : vector<8x512xf32>
    %23 = tpu.matmul %14, %22, %cst_22 {dimension_numbers = #tpu.dot_dimension_numbers<[1], [0], [0], [1], [0, 0, 1, 1], [], []>} : vector<8x128xf32>, vector<128x512xf32>, vector<8x512xf32> -> vector<8x512xf32>
    %24 = arith.addf %21, %23 : vector<8x512xf32>
    %25 = vector.extract_strided_slice %24 {offsets = [0, 0], sizes = [8, 384], strides = [1, 1]} : vector<8x512xf32> to vector<8x384xf32>
    %26 = arith.negf %25 : vector<8x384xf32>
    %27 = math.exp %26 : vector<8x384xf32>
    %cst_23 = arith.constant 1.000000e+00 : f32
    %28 = vector.broadcast %cst_23 : f32 to vector<8x384xf32>
    %29 = arith.addf %28, %27 : vector<8x384xf32>
    %30 = arith.divf %28, %29 : vector<8x384xf32>
    %31 = vector.extract_strided_slice %24 {offsets = [0, 384], sizes = [8, 128], strides = [1, 1]} : vector<8x512xf32> to vector<8x128xf32>
    %32 = math.tanh %31 : vector<8x128xf32>
    %33 = vector.extract_strided_slice %30 {offsets = [0, 0], sizes = [8, 128], strides = [1, 1]} : vector<8x384xf32> to vector<8x128xf32>
    %34 = vector.extract_strided_slice %30 {offsets = [0, 128], sizes = [8, 128], strides = [1, 1]} : vector<8x384xf32> to vector<8x128xf32>
    %35 = vector.extract_strided_slice %30 {offsets = [0, 256], sizes = [8, 128], strides = [1, 1]} : vector<8x384xf32> to vector<8x128xf32>
    %36 = arith.mulf %34, %18 : vector<8x128xf32>
    %37 = arith.mulf %33, %32 : vector<8x128xf32>
    %38 = arith.addf %36, %37 : vector<8x128xf32>
    %39 = math.tanh %38 : vector<8x128xf32>
    %40 = arith.mulf %35, %39 : vector<8x128xf32>
    %c0_i32_24 = arith.constant 0 : i32
    %41 = tpu.memref_slice %arg19[%c0_i32_24] : memref<3x!tpu.dma_semaphore, #tpu.memory_space<semaphore_mem>> -> memref<1x!tpu.dma_semaphore, #tpu.memory_space<semaphore_mem>>
    %42 = tpu.memref_squeeze %41 : memref<1x!tpu.dma_semaphore, #tpu.memory_space<semaphore_mem>> -> memref<!tpu.dma_semaphore, #tpu.memory_space<semaphore_mem>>
    tpu.wait_dma2 semaphore(%42 : memref<!tpu.dma_semaphore, #tpu.memory_space<semaphore_mem>>) src(%arg5 : memref<128x512xf32, #tpu.memory_space<any>>) dst(%arg16 : memref<128x512xf32, #tpu.memory_space<vmem>>)
    %c1_i32_25 = arith.constant 1 : i32
    %43 = tpu.memref_slice %arg19[%c1_i32_25] : memref<3x!tpu.dma_semaphore, #tpu.memory_space<semaphore_mem>> -> memref<1x!tpu.dma_semaphore, #tpu.memory_space<semaphore_mem>>
    %44 = tpu.memref_squeeze %43 : memref<1x!tpu.dma_semaphore, #tpu.memory_space<semaphore_mem>> -> memref<!tpu.dma_semaphore, #tpu.memory_space<semaphore_mem>>
    tpu.wait_dma2 semaphore(%44 : memref<!tpu.dma_semaphore, #tpu.memory_space<semaphore_mem>>) src(%arg6 : memref<128x512xf32, #tpu.memory_space<any>>) dst(%arg17 : memref<128x512xf32, #tpu.memory_space<vmem>>)
    %c0_26 = arith.constant 0 : index
    %c0_27 = arith.constant 0 : index
    %45 = vector.load %arg16[%c0_26, %c0_27] : memref<128x512xf32, #tpu.memory_space<vmem>>, vector<128x512xf32>
    %cst_28 = arith.constant dense<0.000000e+00> : vector<8x512xf32>
    %46 = tpu.matmul %40, %45, %cst_28 {dimension_numbers = #tpu.dot_dimension_numbers<[1], [0], [0], [1], [0, 0, 1, 1], [], []>} : vector<8x128xf32>, vector<128x512xf32>, vector<8x512xf32> -> vector<8x512xf32>
    %c0_29 = arith.constant 0 : index
    %c0_30 = arith.constant 0 : index
    %47 = vector.load %arg8[%c0_29, %c0_30] : memref<1x512xf32, #tpu.memory_space<vmem>>, vector<1x512xf32>
    %48 = vector.broadcast %47 : vector<1x512xf32> to vector<8x512xf32>
    %49 = arith.addf %46, %48 : vector<8x512xf32>
    %c0_31 = arith.constant 0 : index
    %c0_32 = arith.constant 0 : index
    %50 = vector.load %arg17[%c0_31, %c0_32] : memref<128x512xf32, #tpu.memory_space<vmem>>, vector<128x512xf32>
    %cst_33 = arith.constant dense<0.000000e+00> : vector<8x512xf32>
    %51 = tpu.matmul %16, %50, %cst_33 {dimension_numbers = #tpu.dot_dimension_numbers<[1], [0], [0], [1], [0, 0, 1, 1], [], []>} : vector<8x128xf32>, vector<128x512xf32>, vector<8x512xf32> -> vector<8x512xf32>
    %52 = arith.addf %49, %51 : vector<8x512xf32>
    %53 = vector.extract_strided_slice %52 {offsets = [0, 0], sizes = [8, 384], strides = [1, 1]} : vector<8x512xf32> to vector<8x384xf32>
    %54 = arith.negf %53 : vector<8x384xf32>
    %55 = math.exp %54 : vector<8x384xf32>
    %cst_34 = arith.constant 1.000000e+00 : f32
    %56 = vector.broadcast %cst_34 : f32 to vector<8x384xf32>
    %57 = arith.addf %56, %55 : vector<8x384xf32>
    %58 = arith.divf %56, %57 : vector<8x384xf32>
    %59 = vector.extract_strided_slice %52 {offsets = [0, 384], sizes = [8, 128], strides = [1, 1]} : vector<8x512xf32> to vector<8x128xf32>
    %60 = math.tanh %59 : vector<8x128xf32>
    %61 = vector.extract_strided_slice %58 {offsets = [0, 0], sizes = [8, 128], strides = [1, 1]} : vector<8x384xf32> to vector<8x128xf32>
    %62 = vector.extract_strided_slice %58 {offsets = [0, 128], sizes = [8, 128], strides = [1, 1]} : vector<8x384xf32> to vector<8x128xf32>
    %63 = vector.extract_strided_slice %58 {offsets = [0, 256], sizes = [8, 128], strides = [1, 1]} : vector<8x384xf32> to vector<8x128xf32>
    %64 = arith.mulf %62, %20 : vector<8x128xf32>
    %65 = arith.mulf %61, %60 : vector<8x128xf32>
    %66 = arith.addf %64, %65 : vector<8x128xf32>
    %67 = math.tanh %66 : vector<8x128xf32>
    %68 = arith.mulf %63, %67 : vector<8x128xf32>
    %c0_35 = arith.constant 0 : index
    %c0_36 = arith.constant 0 : index
    %69 = vector.load %arg15[%c0_35, %c0_36] : memref<64x128xf32, #tpu.memory_space<vmem>>, vector<8x128xf32>
    tpu.vector_store %arg15[%c0_35, %c0_36], %68 {strides = array<i32>} : memref<64x128xf32, #tpu.memory_space<vmem>>, vector<8x128xf32>,
    %c8 = arith.constant 8 : index
    %c0_37 = arith.constant 0 : index
    %70 = vector.load %arg14[%c8, %c0_37] : memref<64x512xf32, #tpu.memory_space<vmem>>, vector<8x512xf32>
    %c0_38 = arith.constant 0 : index
    %c0_39 = arith.constant 0 : index
    %71 = vector.load %arg4[%c0_38, %c0_39] : memref<128x512xf32, #tpu.memory_space<vmem>>, vector<128x512xf32>
    %cst_40 = arith.constant dense<0.000000e+00> : vector<8x512xf32>
    %72 = tpu.matmul %40, %71, %cst_40 {dimension_numbers = #tpu.dot_dimension_numbers<[1], [0], [0], [1], [0, 0, 1, 1], [], []>} : vector<8x128xf32>, vector<128x512xf32>, vector<8x512xf32> -> vector<8x512xf32>
    %73 = arith.addf %70, %72 : vector<8x512xf32>
    %74 = vector.extract_strided_slice %73 {offsets = [0, 0], sizes = [8, 384], strides = [1, 1]} : vector<8x512xf32> to vector<8x384xf32>
    %75 = arith.negf %74 : vector<8x384xf32>
    %76 = math.exp %75 : vector<8x384xf32>
    %cst_41 = arith.constant 1.000000e+00 : f32
    %77 = vector.broadcast %cst_41 : f32 to vector<8x384xf32>
    %78 = arith.addf %77, %76 : vector<8x384xf32>
    %79 = arith.divf %77, %78 : vector<8x384xf32>
    %80 = vector.extract_strided_slice %73 {offsets = [0, 384], sizes = [8, 128], strides = [1, 1]} : vector<8x512xf32> to vector<8x128xf32>
    %81 = math.tanh %80 : vector<8x128xf32>
    %82 = vector.extract_strided_slice %79 {offsets = [0, 0], sizes = [8, 128], strides = [1, 1]} : vector<8x384xf32> to vector<8x128xf32>
    %83 = vector.extract_strided_slice %79 {offsets = [0, 128], sizes = [8, 128], strides = [1, 1]} : vector<8x384xf32> to vector<8x128xf32>
    %84 = vector.extract_strided_slice %79 {offsets = [0, 256], sizes = [8, 128], strides = [1, 1]} : vector<8x384xf32> to vector<8x128xf32>
    %85 = arith.mulf %83, %38 : vector<8x128xf32>
    %86 = arith.mulf %82, %81 : vector<8x128xf32>
    %87 = arith.addf %85, %86 : vector<8x128xf32>
    %88 = math.tanh %87 : vector<8x128xf32>
    %89 = arith.mulf %84, %88 : vector<8x128xf32>
    %c0_42 = arith.constant 0 : index
    %c0_43 = arith.constant 0 : index
    %90 = vector.load %arg16[%c0_42, %c0_43] : memref<128x512xf32, #tpu.memory_space<vmem>>, vector<128x512xf32>
    %cst_44 = arith.constant dense<0.000000e+00> : vector<8x512xf32>
    %91 = tpu.matmul %89, %90, %cst_44 {dimension_numbers = #tpu.dot_dimension_numbers<[1], [0], [0], [1], [0, 0, 1, 1], [], []>} : vector<8x128xf32>, vector<128x512xf32>, vector<8x512xf32> -> vector<8x512xf32>
    %c0_45 = arith.constant 0 : index
    %c0_46 = arith.constant 0 : index
    %92 = vector.load %arg8[%c0_45, %c0_46] : memref<1x512xf32, #tpu.memory_space<vmem>>, vector<1x512xf32>
    %93 = vector.broadcast %92 : vector<1x512xf32> to vector<8x512xf32>
    %94 = arith.addf %91, %93 : vector<8x512xf32>
    %c0_47 = arith.constant 0 : index
    %c0_48 = arith.constant 0 : index
    %95 = vector.load %arg17[%c0_47, %c0_48] : memref<128x512xf32, #tpu.memory_space<vmem>>, vector<128x512xf32>
    %cst_49 = arith.constant dense<0.000000e+00> : vector<8x512xf32>
    %96 = tpu.matmul %68, %95, %cst_49 {dimension_numbers = #tpu.dot_dimension_numbers<[1], [0], [0], [1], [0, 0, 1, 1], [], []>} : vector<8x128xf32>, vector<128x512xf32>, vector<8x512xf32> -> vector<8x512xf32>
    %97 = arith.addf %94, %96 : vector<8x512xf32>
    %98 = vector.extract_strided_slice %97 {offsets = [0, 0], sizes = [8, 384], strides = [1, 1]} : vector<8x512xf32> to vector<8x384xf32>
    %99 = arith.negf %98 : vector<8x384xf32>
    %100 = math.exp %99 : vector<8x384xf32>
    %cst_50 = arith.constant 1.000000e+00 : f32
    %101 = vector.broadcast %cst_50 : f32 to vector<8x384xf32>
    %102 = arith.addf %101, %100 : vector<8x384xf32>
    %103 = arith.divf %101, %102 : vector<8x384xf32>
    %104 = vector.extract_strided_slice %97 {offsets = [0, 384], sizes = [8, 128], strides = [1, 1]} : vector<8x512xf32> to vector<8x128xf32>
    %105 = math.tanh %104 : vector<8x128xf32>
    %106 = vector.extract_strided_slice %103 {offsets = [0, 0], sizes = [8, 128], strides = [1, 1]} : vector<8x384xf32> to vector<8x128xf32>
    %107 = vector.extract_strided_slice %103 {offsets = [0, 128], sizes = [8, 128], strides = [1, 1]} : vector<8x384xf32> to vector<8x128xf32>
    %108 = vector.extract_strided_slice %103 {offsets = [0, 256], sizes = [8, 128], strides = [1, 1]} : vector<8x384xf32> to vector<8x128xf32>
    %109 = arith.mulf %107, %66 : vector<8x128xf32>
    %110 = arith.mulf %106, %105 : vector<8x128xf32>
    %111 = arith.addf %109, %110 : vector<8x128xf32>
    %112 = math.tanh %111 : vector<8x128xf32>
    %113 = arith.mulf %108, %112 : vector<8x128xf32>
    %c8_51 = arith.constant 8 : index
    %c0_52 = arith.constant 0 : index
    %114 = vector.load %arg15[%c8_51, %c0_52] : memref<64x128xf32, #tpu.memory_space<vmem>>, vector<8x128xf32>
    tpu.vector_store %arg15[%c8_51, %c0_52], %113 {strides = array<i32>} : memref<64x128xf32, #tpu.memory_space<vmem>>, vector<8x128xf32>,
    %c16 = arith.constant 16 : index
    %c0_53 = arith.constant 0 : index
    %115 = vector.load %arg14[%c16, %c0_53] : memref<64x512xf32, #tpu.memory_space<vmem>>, vector<8x512xf32>
    %c0_54 = arith.constant 0 : index
    %c0_55 = arith.constant 0 : index
    %116 = vector.load %arg4[%c0_54, %c0_55] : memref<128x512xf32, #tpu.memory_space<vmem>>, vector<128x512xf32>
    %cst_56 = arith.constant dense<0.000000e+00> : vector<8x512xf32>
    %117 = tpu.matmul %89, %116, %cst_56 {dimension_numbers = #tpu.dot_dimension_numbers<[1], [0], [0], [1], [0, 0, 1, 1], [], []>} : vector<8x128xf32>, vector<128x512xf32>, vector<8x512xf32> -> vector<8x512xf32>
    %118 = arith.addf %115, %117 : vector<8x512xf32>
    %119 = vector.extract_strided_slice %118 {offsets = [0, 0], sizes = [8, 384], strides = [1, 1]} : vector<8x512xf32> to vector<8x384xf32>
    %120 = arith.negf %119 : vector<8x384xf32>
    %121 = math.exp %120 : vector<8x384xf32>
    %cst_57 = arith.constant 1.000000e+00 : f32
    %122 = vector.broadcast %cst_57 : f32 to vector<8x384xf32>
    %123 = arith.addf %122, %121 : vector<8x384xf32>
    %124 = arith.divf %122, %123 : vector<8x384xf32>
    %125 = vector.extract_strided_slice %118 {offsets = [0, 384], sizes = [8, 128], strides = [1, 1]} : vector<8x512xf32> to vector<8x128xf32>
    %126 = math.tanh %125 : vector<8x128xf32>
    %127 = vector.extract_strided_slice %124 {offsets = [0, 0], sizes = [8, 128], strides = [1, 1]} : vector<8x384xf32> to vector<8x128xf32>
    %128 = vector.extract_strided_slice %124 {offsets = [0, 128], sizes = [8, 128], strides = [1, 1]} : vector<8x384xf32> to vector<8x128xf32>
    %129 = vector.extract_strided_slice %124 {offsets = [0, 256], sizes = [8, 128], strides = [1, 1]} : vector<8x384xf32> to vector<8x128xf32>
    %130 = arith.mulf %128, %87 : vector<8x128xf32>
    %131 = arith.mulf %127, %126 : vector<8x128xf32>
    %132 = arith.addf %130, %131 : vector<8x128xf32>
    %133 = math.tanh %132 : vector<8x128xf32>
    %134 = arith.mulf %129, %133 : vector<8x128xf32>
    %c0_58 = arith.constant 0 : index
    %c0_59 = arith.constant 0 : index
    %135 = vector.load %arg16[%c0_58, %c0_59] : memref<128x512xf32, #tpu.memory_space<vmem>>, vector<128x512xf32>
    %cst_60 = arith.constant dense<0.000000e+00> : vector<8x512xf32>
    %136 = tpu.matmul %134, %135, %cst_60 {dimension_numbers = #tpu.dot_dimension_numbers<[1], [0], [0], [1], [0, 0, 1, 1], [], []>} : vector<8x128xf32>, vector<128x512xf32>, vector<8x512xf32> -> vector<8x512xf32>
    %c0_61 = arith.constant 0 : index
    %c0_62 = arith.constant 0 : index
    %137 = vector.load %arg8[%c0_61, %c0_62] : memref<1x512xf32, #tpu.memory_space<vmem>>, vector<1x512xf32>
    %138 = vector.broadcast %137 : vector<1x512xf32> to vector<8x512xf32>
    %139 = arith.addf %136, %138 : vector<8x512xf32>
    %c0_63 = arith.constant 0 : index
    %c0_64 = arith.constant 0 : index
    %140 = vector.load %arg17[%c0_63, %c0_64] : memref<128x512xf32, #tpu.memory_space<vmem>>, vector<128x512xf32>
    %cst_65 = arith.constant dense<0.000000e+00> : vector<8x512xf32>
    %141 = tpu.matmul %113, %140, %cst_65 {dimension_numbers = #tpu.dot_dimension_numbers<[1], [0], [0], [1], [0, 0, 1, 1], [], []>} : vector<8x128xf32>, vector<128x512xf32>, vector<8x512xf32> -> vector<8x512xf32>
    %142 = arith.addf %139, %141 : vector<8x512xf32>
    %143 = vector.extract_strided_slice %142 {offsets = [0, 0], sizes = [8, 384], strides = [1, 1]} : vector<8x512xf32> to vector<8x384xf32>
    %144 = arith.negf %143 : vector<8x384xf32>
    %145 = math.exp %144 : vector<8x384xf32>
    %cst_66 = arith.constant 1.000000e+00 : f32
    %146 = vector.broadcast %cst_66 : f32 to vector<8x384xf32>
    %147 = arith.addf %146, %145 : vector<8x384xf32>
    %148 = arith.divf %146, %147 : vector<8x384xf32>
    %149 = vector.extract_strided_slice %142 {offsets = [0, 384], sizes = [8, 128], strides = [1, 1]} : vector<8x512xf32> to vector<8x128xf32>
    %150 = math.tanh %149 : vector<8x128xf32>
    %151 = vector.extract_strided_slice %148 {offsets = [0, 0], sizes = [8, 128], strides = [1, 1]} : vector<8x384xf32> to vector<8x128xf32>
    %152 = vector.extract_strided_slice %148 {offsets = [0, 128], sizes = [8, 128], strides = [1, 1]} : vector<8x384xf32> to vector<8x128xf32>
    %153 = vector.extract_strided_slice %148 {offsets = [0, 256], sizes = [8, 128], strides = [1, 1]} : vector<8x384xf32> to vector<8x128xf32>
    %154 = arith.mulf %152, %111 : vector<8x128xf32>
    %155 = arith.mulf %151, %150 : vector<8x128xf32>
    %156 = arith.addf %154, %155 : vector<8x128xf32>
    %157 = math.tanh %156 : vector<8x128xf32>
    %158 = arith.mulf %153, %157 : vector<8x128xf32>
    %c16_67 = arith.constant 16 : index
    %c0_68 = arith.constant 0 : index
    %159 = vector.load %arg15[%c16_67, %c0_68] : memref<64x128xf32, #tpu.memory_space<vmem>>, vector<8x128xf32>
    tpu.vector_store %arg15[%c16_67, %c0_68], %158 {strides = array<i32>} : memref<64x128xf32, #tpu.memory_space<vmem>>, vector<8x128xf32>,
    %c24 = arith.constant 24 : index
    %c0_69 = arith.constant 0 : index
    %160 = vector.load %arg14[%c24, %c0_69] : memref<64x512xf32, #tpu.memory_space<vmem>>, vector<8x512xf32>
    %c0_70 = arith.constant 0 : index
    %c0_71 = arith.constant 0 : index
    %161 = vector.load %arg4[%c0_70, %c0_71] : memref<128x512xf32, #tpu.memory_space<vmem>>, vector<128x512xf32>
    %cst_72 = arith.constant dense<0.000000e+00> : vector<8x512xf32>
    %162 = tpu.matmul %134, %161, %cst_72 {dimension_numbers = #tpu.dot_dimension_numbers<[1], [0], [0], [1], [0, 0, 1, 1], [], []>} : vector<8x128xf32>, vector<128x512xf32>, vector<8x512xf32> -> vector<8x512xf32>
    %163 = arith.addf %160, %162 : vector<8x512xf32>
    %164 = vector.extract_strided_slice %163 {offsets = [0, 0], sizes = [8, 384], strides = [1, 1]} : vector<8x512xf32> to vector<8x384xf32>
    %165 = arith.negf %164 : vector<8x384xf32>
    %166 = math.exp %165 : vector<8x384xf32>
    %cst_73 = arith.constant 1.000000e+00 : f32
    %167 = vector.broadcast %cst_73 : f32 to vector<8x384xf32>
    %168 = arith.addf %167, %166 : vector<8x384xf32>
    %169 = arith.divf %167, %168 : vector<8x384xf32>
    %170 = vector.extract_strided_slice %163 {offsets = [0, 384], sizes = [8, 128], strides = [1, 1]} : vector<8x512xf32> to vector<8x128xf32>
    %171 = math.tanh %170 : vector<8x128xf32>
    %172 = vector.extract_strided_slice %169 {offsets = [0, 0], sizes = [8, 128], strides = [1, 1]} : vector<8x384xf32> to vector<8x128xf32>
    %173 = vector.extract_strided_slice %169 {offsets = [0, 128], sizes = [8, 128], strides = [1, 1]} : vector<8x384xf32> to vector<8x128xf32>
    %174 = vector.extract_strided_slice %169 {offsets = [0, 256], sizes = [8, 128], strides = [1, 1]} : vector<8x384xf32> to vector<8x128xf32>
    %175 = arith.mulf %173, %132 : vector<8x128xf32>
    %176 = arith.mulf %172, %171 : vector<8x128xf32>
    %177 = arith.addf %175, %176 : vector<8x128xf32>
    %178 = math.tanh %177 : vector<8x128xf32>
    %179 = arith.mulf %174, %178 : vector<8x128xf32>
    %c0_74 = arith.constant 0 : index
    %c0_75 = arith.constant 0 : index
    %180 = vector.load %arg16[%c0_74, %c0_75] : memref<128x512xf32, #tpu.memory_space<vmem>>, vector<128x512xf32>
    %cst_76 = arith.constant dense<0.000000e+00> : vector<8x512xf32>
    %181 = tpu.matmul %179, %180, %cst_76 {dimension_numbers = #tpu.dot_dimension_numbers<[1], [0], [0], [1], [0, 0, 1, 1], [], []>} : vector<8x128xf32>, vector<128x512xf32>, vector<8x512xf32> -> vector<8x512xf32>
    %c0_77 = arith.constant 0 : index
    %c0_78 = arith.constant 0 : index
    %182 = vector.load %arg8[%c0_77, %c0_78] : memref<1x512xf32, #tpu.memory_space<vmem>>, vector<1x512xf32>
    %183 = vector.broadcast %182 : vector<1x512xf32> to vector<8x512xf32>
    %184 = arith.addf %181, %183 : vector<8x512xf32>
    %c0_79 = arith.constant 0 : index
    %c0_80 = arith.constant 0 : index
    %185 = vector.load %arg17[%c0_79, %c0_80] : memref<128x512xf32, #tpu.memory_space<vmem>>, vector<128x512xf32>
    %cst_81 = arith.constant dense<0.000000e+00> : vector<8x512xf32>
    %186 = tpu.matmul %158, %185, %cst_81 {dimension_numbers = #tpu.dot_dimension_numbers<[1], [0], [0], [1], [0, 0, 1, 1], [], []>} : vector<8x128xf32>, vector<128x512xf32>, vector<8x512xf32> -> vector<8x512xf32>
    %187 = arith.addf %184, %186 : vector<8x512xf32>
    %188 = vector.extract_strided_slice %187 {offsets = [0, 0], sizes = [8, 384], strides = [1, 1]} : vector<8x512xf32> to vector<8x384xf32>
    %189 = arith.negf %188 : vector<8x384xf32>
    %190 = math.exp %189 : vector<8x384xf32>
    %cst_82 = arith.constant 1.000000e+00 : f32
    %191 = vector.broadcast %cst_82 : f32 to vector<8x384xf32>
    %192 = arith.addf %191, %190 : vector<8x384xf32>
    %193 = arith.divf %191, %192 : vector<8x384xf32>
    %194 = vector.extract_strided_slice %187 {offsets = [0, 384], sizes = [8, 128], strides = [1, 1]} : vector<8x512xf32> to vector<8x128xf32>
    %195 = math.tanh %194 : vector<8x128xf32>
    %196 = vector.extract_strided_slice %193 {offsets = [0, 0], sizes = [8, 128], strides = [1, 1]} : vector<8x384xf32> to vector<8x128xf32>
    %197 = vector.extract_strided_slice %193 {offsets = [0, 128], sizes = [8, 128], strides = [1, 1]} : vector<8x384xf32> to vector<8x128xf32>
    %198 = vector.extract_strided_slice %193 {offsets = [0, 256], sizes = [8, 128], strides = [1, 1]} : vector<8x384xf32> to vector<8x128xf32>
    %199 = arith.mulf %197, %156 : vector<8x128xf32>
    %200 = arith.mulf %196, %195 : vector<8x128xf32>
    %201 = arith.addf %199, %200 : vector<8x128xf32>
    %202 = math.tanh %201 : vector<8x128xf32>
    %203 = arith.mulf %198, %202 : vector<8x128xf32>
    %c24_83 = arith.constant 24 : index
    %c0_84 = arith.constant 0 : index
    %204 = vector.load %arg15[%c24_83, %c0_84] : memref<64x128xf32, #tpu.memory_space<vmem>>, vector<8x128xf32>
    tpu.vector_store %arg15[%c24_83, %c0_84], %203 {strides = array<i32>} : memref<64x128xf32, #tpu.memory_space<vmem>>, vector<8x128xf32>,
    %c32 = arith.constant 32 : index
    %c0_85 = arith.constant 0 : index
    %205 = vector.load %arg14[%c32, %c0_85] : memref<64x512xf32, #tpu.memory_space<vmem>>, vector<8x512xf32>
    %c0_86 = arith.constant 0 : index
    %c0_87 = arith.constant 0 : index
    %206 = vector.load %arg4[%c0_86, %c0_87] : memref<128x512xf32, #tpu.memory_space<vmem>>, vector<128x512xf32>
    %cst_88 = arith.constant dense<0.000000e+00> : vector<8x512xf32>
    %207 = tpu.matmul %179, %206, %cst_88 {dimension_numbers = #tpu.dot_dimension_numbers<[1], [0], [0], [1], [0, 0, 1, 1], [], []>} : vector<8x128xf32>, vector<128x512xf32>, vector<8x512xf32> -> vector<8x512xf32>
    %208 = arith.addf %205, %207 : vector<8x512xf32>
    %209 = vector.extract_strided_slice %208 {offsets = [0, 0], sizes = [8, 384], strides = [1, 1]} : vector<8x512xf32> to vector<8x384xf32>
    %210 = arith.negf %209 : vector<8x384xf32>
    %211 = math.exp %210 : vector<8x384xf32>
    %cst_89 = arith.constant 1.000000e+00 : f32
    %212 = vector.broadcast %cst_89 : f32 to vector<8x384xf32>
    %213 = arith.addf %212, %211 : vector<8x384xf32>
    %214 = arith.divf %212, %213 : vector<8x384xf32>
    %215 = vector.extract_strided_slice %208 {offsets = [0, 384], sizes = [8, 128], strides = [1, 1]} : vector<8x512xf32> to vector<8x128xf32>
    %216 = math.tanh %215 : vector<8x128xf32>
    %217 = vector.extract_strided_slice %214 {offsets = [0, 0], sizes = [8, 128], strides = [1, 1]} : vector<8x384xf32> to vector<8x128xf32>
    %218 = vector.extract_strided_slice %214 {offsets = [0, 128], sizes = [8, 128], strides = [1, 1]} : vector<8x384xf32> to vector<8x128xf32>
    %219 = vector.extract_strided_slice %214 {offsets = [0, 256], sizes = [8, 128], strides = [1, 1]} : vector<8x384xf32> to vector<8x128xf32>
    %220 = arith.mulf %218, %177 : vector<8x128xf32>
    %221 = arith.mulf %217, %216 : vector<8x128xf32>
    %222 = arith.addf %220, %221 : vector<8x128xf32>
    %223 = math.tanh %222 : vector<8x128xf32>
    %224 = arith.mulf %219, %223 : vector<8x128xf32>
    %c0_90 = arith.constant 0 : index
    %c0_91 = arith.constant 0 : index
    %225 = vector.load %arg16[%c0_90, %c0_91] : memref<128x512xf32, #tpu.memory_space<vmem>>, vector<128x512xf32>
    %cst_92 = arith.constant dense<0.000000e+00> : vector<8x512xf32>
    %226 = tpu.matmul %224, %225, %cst_92 {dimension_numbers = #tpu.dot_dimension_numbers<[1], [0], [0], [1], [0, 0, 1, 1], [], []>} : vector<8x128xf32>, vector<128x512xf32>, vector<8x512xf32> -> vector<8x512xf32>
    %c0_93 = arith.constant 0 : index
    %c0_94 = arith.constant 0 : index
    %227 = vector.load %arg8[%c0_93, %c0_94] : memref<1x512xf32, #tpu.memory_space<vmem>>, vector<1x512xf32>
    %228 = vector.broadcast %227 : vector<1x512xf32> to vector<8x512xf32>
    %229 = arith.addf %226, %228 : vector<8x512xf32>
    %c0_95 = arith.constant 0 : index
    %c0_96 = arith.constant 0 : index
    %230 = vector.load %arg17[%c0_95, %c0_96] : memref<128x512xf32, #tpu.memory_space<vmem>>, vector<128x512xf32>
    %cst_97 = arith.constant dense<0.000000e+00> : vector<8x512xf32>
    %231 = tpu.matmul %203, %230, %cst_97 {dimension_numbers = #tpu.dot_dimension_numbers<[1], [0], [0], [1], [0, 0, 1, 1], [], []>} : vector<8x128xf32>, vector<128x512xf32>, vector<8x512xf32> -> vector<8x512xf32>
    %232 = arith.addf %229, %231 : vector<8x512xf32>
    %233 = vector.extract_strided_slice %232 {offsets = [0, 0], sizes = [8, 384], strides = [1, 1]} : vector<8x512xf32> to vector<8x384xf32>
    %234 = arith.negf %233 : vector<8x384xf32>
    %235 = math.exp %234 : vector<8x384xf32>
    %cst_98 = arith.constant 1.000000e+00 : f32
    %236 = vector.broadcast %cst_98 : f32 to vector<8x384xf32>
    %237 = arith.addf %236, %235 : vector<8x384xf32>
    %238 = arith.divf %236, %237 : vector<8x384xf32>
    %239 = vector.extract_strided_slice %232 {offsets = [0, 384], sizes = [8, 128], strides = [1, 1]} : vector<8x512xf32> to vector<8x128xf32>
    %240 = math.tanh %239 : vector<8x128xf32>
    %241 = vector.extract_strided_slice %238 {offsets = [0, 0], sizes = [8, 128], strides = [1, 1]} : vector<8x384xf32> to vector<8x128xf32>
    %242 = vector.extract_strided_slice %238 {offsets = [0, 128], sizes = [8, 128], strides = [1, 1]} : vector<8x384xf32> to vector<8x128xf32>
    %243 = vector.extract_strided_slice %238 {offsets = [0, 256], sizes = [8, 128], strides = [1, 1]} : vector<8x384xf32> to vector<8x128xf32>
    %244 = arith.mulf %242, %201 : vector<8x128xf32>
    %245 = arith.mulf %241, %240 : vector<8x128xf32>
    %246 = arith.addf %244, %245 : vector<8x128xf32>
    %247 = math.tanh %246 : vector<8x128xf32>
    %248 = arith.mulf %243, %247 : vector<8x128xf32>
    %c32_99 = arith.constant 32 : index
    %c0_100 = arith.constant 0 : index
    %249 = vector.load %arg15[%c32_99, %c0_100] : memref<64x128xf32, #tpu.memory_space<vmem>>, vector<8x128xf32>
    tpu.vector_store %arg15[%c32_99, %c0_100], %248 {strides = array<i32>} : memref<64x128xf32, #tpu.memory_space<vmem>>, vector<8x128xf32>,
    %c40 = arith.constant 40 : index
    %c0_101 = arith.constant 0 : index
    %250 = vector.load %arg14[%c40, %c0_101] : memref<64x512xf32, #tpu.memory_space<vmem>>, vector<8x512xf32>
    %c0_102 = arith.constant 0 : index
    %c0_103 = arith.constant 0 : index
    %251 = vector.load %arg4[%c0_102, %c0_103] : memref<128x512xf32, #tpu.memory_space<vmem>>, vector<128x512xf32>
    %cst_104 = arith.constant dense<0.000000e+00> : vector<8x512xf32>
    %252 = tpu.matmul %224, %251, %cst_104 {dimension_numbers = #tpu.dot_dimension_numbers<[1], [0], [0], [1], [0, 0, 1, 1], [], []>} : vector<8x128xf32>, vector<128x512xf32>, vector<8x512xf32> -> vector<8x512xf32>
    %253 = arith.addf %250, %252 : vector<8x512xf32>
    %254 = vector.extract_strided_slice %253 {offsets = [0, 0], sizes = [8, 384], strides = [1, 1]} : vector<8x512xf32> to vector<8x384xf32>
    %255 = arith.negf %254 : vector<8x384xf32>
    %256 = math.exp %255 : vector<8x384xf32>
    %cst_105 = arith.constant 1.000000e+00 : f32
    %257 = vector.broadcast %cst_105 : f32 to vector<8x384xf32>
    %258 = arith.addf %257, %256 : vector<8x384xf32>
    %259 = arith.divf %257, %258 : vector<8x384xf32>
    %260 = vector.extract_strided_slice %253 {offsets = [0, 384], sizes = [8, 128], strides = [1, 1]} : vector<8x512xf32> to vector<8x128xf32>
    %261 = math.tanh %260 : vector<8x128xf32>
    %262 = vector.extract_strided_slice %259 {offsets = [0, 0], sizes = [8, 128], strides = [1, 1]} : vector<8x384xf32> to vector<8x128xf32>
    %263 = vector.extract_strided_slice %259 {offsets = [0, 128], sizes = [8, 128], strides = [1, 1]} : vector<8x384xf32> to vector<8x128xf32>
    %264 = vector.extract_strided_slice %259 {offsets = [0, 256], sizes = [8, 128], strides = [1, 1]} : vector<8x384xf32> to vector<8x128xf32>
    %265 = arith.mulf %263, %222 : vector<8x128xf32>
    %266 = arith.mulf %262, %261 : vector<8x128xf32>
    %267 = arith.addf %265, %266 : vector<8x128xf32>
    %268 = math.tanh %267 : vector<8x128xf32>
    %269 = arith.mulf %264, %268 : vector<8x128xf32>
    %c0_106 = arith.constant 0 : index
    %c0_107 = arith.constant 0 : index
    %270 = vector.load %arg16[%c0_106, %c0_107] : memref<128x512xf32, #tpu.memory_space<vmem>>, vector<128x512xf32>
    %cst_108 = arith.constant dense<0.000000e+00> : vector<8x512xf32>
    %271 = tpu.matmul %269, %270, %cst_108 {dimension_numbers = #tpu.dot_dimension_numbers<[1], [0], [0], [1], [0, 0, 1, 1], [], []>} : vector<8x128xf32>, vector<128x512xf32>, vector<8x512xf32> -> vector<8x512xf32>
    %c0_109 = arith.constant 0 : index
    %c0_110 = arith.constant 0 : index
    %272 = vector.load %arg8[%c0_109, %c0_110] : memref<1x512xf32, #tpu.memory_space<vmem>>, vector<1x512xf32>
    %273 = vector.broadcast %272 : vector<1x512xf32> to vector<8x512xf32>
    %274 = arith.addf %271, %273 : vector<8x512xf32>
    %c0_111 = arith.constant 0 : index
    %c0_112 = arith.constant 0 : index
    %275 = vector.load %arg17[%c0_111, %c0_112] : memref<128x512xf32, #tpu.memory_space<vmem>>, vector<128x512xf32>
    %cst_113 = arith.constant dense<0.000000e+00> : vector<8x512xf32>
    %276 = tpu.matmul %248, %275, %cst_113 {dimension_numbers = #tpu.dot_dimension_numbers<[1], [0], [0], [1], [0, 0, 1, 1], [], []>} : vector<8x128xf32>, vector<128x512xf32>, vector<8x512xf32> -> vector<8x512xf32>
    %277 = arith.addf %274, %276 : vector<8x512xf32>
    %278 = vector.extract_strided_slice %277 {offsets = [0, 0], sizes = [8, 384], strides = [1, 1]} : vector<8x512xf32> to vector<8x384xf32>
    %279 = arith.negf %278 : vector<8x384xf32>
    %280 = math.exp %279 : vector<8x384xf32>
    %cst_114 = arith.constant 1.000000e+00 : f32
    %281 = vector.broadcast %cst_114 : f32 to vector<8x384xf32>
    %282 = arith.addf %281, %280 : vector<8x384xf32>
    %283 = arith.divf %281, %282 : vector<8x384xf32>
    %284 = vector.extract_strided_slice %277 {offsets = [0, 384], sizes = [8, 128], strides = [1, 1]} : vector<8x512xf32> to vector<8x128xf32>
    %285 = math.tanh %284 : vector<8x128xf32>
    %286 = vector.extract_strided_slice %283 {offsets = [0, 0], sizes = [8, 128], strides = [1, 1]} : vector<8x384xf32> to vector<8x128xf32>
    %287 = vector.extract_strided_slice %283 {offsets = [0, 128], sizes = [8, 128], strides = [1, 1]} : vector<8x384xf32> to vector<8x128xf32>
    %288 = vector.extract_strided_slice %283 {offsets = [0, 256], sizes = [8, 128], strides = [1, 1]} : vector<8x384xf32> to vector<8x128xf32>
    %289 = arith.mulf %287, %246 : vector<8x128xf32>
    %290 = arith.mulf %286, %285 : vector<8x128xf32>
    %291 = arith.addf %289, %290 : vector<8x128xf32>
    %292 = math.tanh %291 : vector<8x128xf32>
    %293 = arith.mulf %288, %292 : vector<8x128xf32>
    %c40_115 = arith.constant 40 : index
    %c0_116 = arith.constant 0 : index
    %294 = vector.load %arg15[%c40_115, %c0_116] : memref<64x128xf32, #tpu.memory_space<vmem>>, vector<8x128xf32>
    tpu.vector_store %arg15[%c40_115, %c0_116], %293 {strides = array<i32>} : memref<64x128xf32, #tpu.memory_space<vmem>>, vector<8x128xf32>,
    %c48 = arith.constant 48 : index
    %c0_117 = arith.constant 0 : index
    %295 = vector.load %arg14[%c48, %c0_117] : memref<64x512xf32, #tpu.memory_space<vmem>>, vector<8x512xf32>
    %c0_118 = arith.constant 0 : index
    %c0_119 = arith.constant 0 : index
    %296 = vector.load %arg4[%c0_118, %c0_119] : memref<128x512xf32, #tpu.memory_space<vmem>>, vector<128x512xf32>
    %cst_120 = arith.constant dense<0.000000e+00> : vector<8x512xf32>
    %297 = tpu.matmul %269, %296, %cst_120 {dimension_numbers = #tpu.dot_dimension_numbers<[1], [0], [0], [1], [0, 0, 1, 1], [], []>} : vector<8x128xf32>, vector<128x512xf32>, vector<8x512xf32> -> vector<8x512xf32>
    %298 = arith.addf %295, %297 : vector<8x512xf32>
    %299 = vector.extract_strided_slice %298 {offsets = [0, 0], sizes = [8, 384], strides = [1, 1]} : vector<8x512xf32> to vector<8x384xf32>
    %300 = arith.negf %299 : vector<8x384xf32>
    %301 = math.exp %300 : vector<8x384xf32>
    %cst_121 = arith.constant 1.000000e+00 : f32
    %302 = vector.broadcast %cst_121 : f32 to vector<8x384xf32>
    %303 = arith.addf %302, %301 : vector<8x384xf32>
    %304 = arith.divf %302, %303 : vector<8x384xf32>
    %305 = vector.extract_strided_slice %298 {offsets = [0, 384], sizes = [8, 128], strides = [1, 1]} : vector<8x512xf32> to vector<8x128xf32>
    %306 = math.tanh %305 : vector<8x128xf32>
    %307 = vector.extract_strided_slice %304 {offsets = [0, 0], sizes = [8, 128], strides = [1, 1]} : vector<8x384xf32> to vector<8x128xf32>
    %308 = vector.extract_strided_slice %304 {offsets = [0, 128], sizes = [8, 128], strides = [1, 1]} : vector<8x384xf32> to vector<8x128xf32>
    %309 = vector.extract_strided_slice %304 {offsets = [0, 256], sizes = [8, 128], strides = [1, 1]} : vector<8x384xf32> to vector<8x128xf32>
    %310 = arith.mulf %308, %267 : vector<8x128xf32>
    %311 = arith.mulf %307, %306 : vector<8x128xf32>
    %312 = arith.addf %310, %311 : vector<8x128xf32>
    %313 = math.tanh %312 : vector<8x128xf32>
    %314 = arith.mulf %309, %313 : vector<8x128xf32>
    %c0_122 = arith.constant 0 : index
    %c0_123 = arith.constant 0 : index
    %315 = vector.load %arg16[%c0_122, %c0_123] : memref<128x512xf32, #tpu.memory_space<vmem>>, vector<128x512xf32>
    %cst_124 = arith.constant dense<0.000000e+00> : vector<8x512xf32>
    %316 = tpu.matmul %314, %315, %cst_124 {dimension_numbers = #tpu.dot_dimension_numbers<[1], [0], [0], [1], [0, 0, 1, 1], [], []>} : vector<8x128xf32>, vector<128x512xf32>, vector<8x512xf32> -> vector<8x512xf32>
    %c0_125 = arith.constant 0 : index
    %c0_126 = arith.constant 0 : index
    %317 = vector.load %arg8[%c0_125, %c0_126] : memref<1x512xf32, #tpu.memory_space<vmem>>, vector<1x512xf32>
    %318 = vector.broadcast %317 : vector<1x512xf32> to vector<8x512xf32>
    %319 = arith.addf %316, %318 : vector<8x512xf32>
    %c0_127 = arith.constant 0 : index
    %c0_128 = arith.constant 0 : index
    %320 = vector.load %arg17[%c0_127, %c0_128] : memref<128x512xf32, #tpu.memory_space<vmem>>, vector<128x512xf32>
    %cst_129 = arith.constant dense<0.000000e+00> : vector<8x512xf32>
    %321 = tpu.matmul %293, %320, %cst_129 {dimension_numbers = #tpu.dot_dimension_numbers<[1], [0], [0], [1], [0, 0, 1, 1], [], []>} : vector<8x128xf32>, vector<128x512xf32>, vector<8x512xf32> -> vector<8x512xf32>
    %322 = arith.addf %319, %321 : vector<8x512xf32>
    %323 = vector.extract_strided_slice %322 {offsets = [0, 0], sizes = [8, 384], strides = [1, 1]} : vector<8x512xf32> to vector<8x384xf32>
    %324 = arith.negf %323 : vector<8x384xf32>
    %325 = math.exp %324 : vector<8x384xf32>
    %cst_130 = arith.constant 1.000000e+00 : f32
    %326 = vector.broadcast %cst_130 : f32 to vector<8x384xf32>
    %327 = arith.addf %326, %325 : vector<8x384xf32>
    %328 = arith.divf %326, %327 : vector<8x384xf32>
    %329 = vector.extract_strided_slice %322 {offsets = [0, 384], sizes = [8, 128], strides = [1, 1]} : vector<8x512xf32> to vector<8x128xf32>
    %330 = math.tanh %329 : vector<8x128xf32>
    %331 = vector.extract_strided_slice %328 {offsets = [0, 0], sizes = [8, 128], strides = [1, 1]} : vector<8x384xf32> to vector<8x128xf32>
    %332 = vector.extract_strided_slice %328 {offsets = [0, 128], sizes = [8, 128], strides = [1, 1]} : vector<8x384xf32> to vector<8x128xf32>
    %333 = vector.extract_strided_slice %328 {offsets = [0, 256], sizes = [8, 128], strides = [1, 1]} : vector<8x384xf32> to vector<8x128xf32>
    %334 = arith.mulf %332, %291 : vector<8x128xf32>
    %335 = arith.mulf %331, %330 : vector<8x128xf32>
    %336 = arith.addf %334, %335 : vector<8x128xf32>
    %337 = math.tanh %336 : vector<8x128xf32>
    %338 = arith.mulf %333, %337 : vector<8x128xf32>
    %c48_131 = arith.constant 48 : index
    %c0_132 = arith.constant 0 : index
    %339 = vector.load %arg15[%c48_131, %c0_132] : memref<64x128xf32, #tpu.memory_space<vmem>>, vector<8x128xf32>
    tpu.vector_store %arg15[%c48_131, %c0_132], %338 {strides = array<i32>} : memref<64x128xf32, #tpu.memory_space<vmem>>, vector<8x128xf32>,
    %c56 = arith.constant 56 : index
    %c0_133 = arith.constant 0 : index
    %340 = vector.load %arg14[%c56, %c0_133] : memref<64x512xf32, #tpu.memory_space<vmem>>, vector<8x512xf32>
    %c0_134 = arith.constant 0 : index
    %c0_135 = arith.constant 0 : index
    %341 = vector.load %arg4[%c0_134, %c0_135] : memref<128x512xf32, #tpu.memory_space<vmem>>, vector<128x512xf32>
    %cst_136 = arith.constant dense<0.000000e+00> : vector<8x512xf32>
    %342 = tpu.matmul %314, %341, %cst_136 {dimension_numbers = #tpu.dot_dimension_numbers<[1], [0], [0], [1], [0, 0, 1, 1], [], []>} : vector<8x128xf32>, vector<128x512xf32>, vector<8x512xf32> -> vector<8x512xf32>
    %343 = arith.addf %340, %342 : vector<8x512xf32>
    %344 = vector.extract_strided_slice %343 {offsets = [0, 0], sizes = [8, 384], strides = [1, 1]} : vector<8x512xf32> to vector<8x384xf32>
    %345 = arith.negf %344 : vector<8x384xf32>
    %346 = math.exp %345 : vector<8x384xf32>
    %cst_137 = arith.constant 1.000000e+00 : f32
    %347 = vector.broadcast %cst_137 : f32 to vector<8x384xf32>
    %348 = arith.addf %347, %346 : vector<8x384xf32>
    %349 = arith.divf %347, %348 : vector<8x384xf32>
    %350 = vector.extract_strided_slice %343 {offsets = [0, 384], sizes = [8, 128], strides = [1, 1]} : vector<8x512xf32> to vector<8x128xf32>
    %351 = math.tanh %350 : vector<8x128xf32>
    %352 = vector.extract_strided_slice %349 {offsets = [0, 0], sizes = [8, 128], strides = [1, 1]} : vector<8x384xf32> to vector<8x128xf32>
    %353 = vector.extract_strided_slice %349 {offsets = [0, 128], sizes = [8, 128], strides = [1, 1]} : vector<8x384xf32> to vector<8x128xf32>
    %354 = vector.extract_strided_slice %349 {offsets = [0, 256], sizes = [8, 128], strides = [1, 1]} : vector<8x384xf32> to vector<8x128xf32>
    %355 = arith.mulf %353, %312 : vector<8x128xf32>
    %356 = arith.mulf %352, %351 : vector<8x128xf32>
    %357 = arith.addf %355, %356 : vector<8x128xf32>
    %358 = math.tanh %357 : vector<8x128xf32>
    %359 = arith.mulf %354, %358 : vector<8x128xf32>
    %c0_138 = arith.constant 0 : index
    %c0_139 = arith.constant 0 : index
    %360 = vector.load %arg16[%c0_138, %c0_139] : memref<128x512xf32, #tpu.memory_space<vmem>>, vector<128x512xf32>
    %cst_140 = arith.constant dense<0.000000e+00> : vector<8x512xf32>
    %361 = tpu.matmul %359, %360, %cst_140 {dimension_numbers = #tpu.dot_dimension_numbers<[1], [0], [0], [1], [0, 0, 1, 1], [], []>} : vector<8x128xf32>, vector<128x512xf32>, vector<8x512xf32> -> vector<8x512xf32>
    %c0_141 = arith.constant 0 : index
    %c0_142 = arith.constant 0 : index
    %362 = vector.load %arg8[%c0_141, %c0_142] : memref<1x512xf32, #tpu.memory_space<vmem>>, vector<1x512xf32>
    %363 = vector.broadcast %362 : vector<1x512xf32> to vector<8x512xf32>
    %364 = arith.addf %361, %363 : vector<8x512xf32>
    %c0_143 = arith.constant 0 : index
    %c0_144 = arith.constant 0 : index
    %365 = vector.load %arg17[%c0_143, %c0_144] : memref<128x512xf32, #tpu.memory_space<vmem>>, vector<128x512xf32>
    %cst_145 = arith.constant dense<0.000000e+00> : vector<8x512xf32>
    %366 = tpu.matmul %338, %365, %cst_145 {dimension_numbers = #tpu.dot_dimension_numbers<[1], [0], [0], [1], [0, 0, 1, 1], [], []>} : vector<8x128xf32>, vector<128x512xf32>, vector<8x512xf32> -> vector<8x512xf32>
    %367 = arith.addf %364, %366 : vector<8x512xf32>
    %368 = vector.extract_strided_slice %367 {offsets = [0, 0], sizes = [8, 384], strides = [1, 1]} : vector<8x512xf32> to vector<8x384xf32>
    %369 = arith.negf %368 : vector<8x384xf32>
    %370 = math.exp %369 : vector<8x384xf32>
    %cst_146 = arith.constant 1.000000e+00 : f32
    %371 = vector.broadcast %cst_146 : f32 to vector<8x384xf32>
    %372 = arith.addf %371, %370 : vector<8x384xf32>
    %373 = arith.divf %371, %372 : vector<8x384xf32>
    %374 = vector.extract_strided_slice %367 {offsets = [0, 384], sizes = [8, 128], strides = [1, 1]} : vector<8x512xf32> to vector<8x128xf32>
    %375 = math.tanh %374 : vector<8x128xf32>
    %376 = vector.extract_strided_slice %373 {offsets = [0, 0], sizes = [8, 128], strides = [1, 1]} : vector<8x384xf32> to vector<8x128xf32>
    %377 = vector.extract_strided_slice %373 {offsets = [0, 128], sizes = [8, 128], strides = [1, 1]} : vector<8x384xf32> to vector<8x128xf32>
    %378 = vector.extract_strided_slice %373 {offsets = [0, 256], sizes = [8, 128], strides = [1, 1]} : vector<8x384xf32> to vector<8x128xf32>
    %379 = arith.mulf %377, %336 : vector<8x128xf32>
    %380 = arith.mulf %376, %375 : vector<8x128xf32>
    %381 = arith.addf %379, %380 : vector<8x128xf32>
    %382 = math.tanh %381 : vector<8x128xf32>
    %383 = arith.mulf %378, %382 : vector<8x128xf32>
    %c56_147 = arith.constant 56 : index
    %c0_148 = arith.constant 0 : index
    %384 = vector.load %arg15[%c56_147, %c0_148] : memref<64x128xf32, #tpu.memory_space<vmem>>, vector<8x128xf32>
    tpu.vector_store %arg15[%c56_147, %c0_148], %383 {strides = array<i32>} : memref<64x128xf32, #tpu.memory_space<vmem>>, vector<8x128xf32>,
    %c0_149 = arith.constant 0 : index
    %c0_150 = arith.constant 0 : index
    %c0_151 = arith.constant 0 : index
    %385 = vector.load %arg12[%c0_149, %c0_150, %c0_151] : memref<2x8x128xf32, #tpu.memory_space<vmem>>, vector<1x8x128xf32>
    %386 = vector.shape_cast %385 : vector<1x8x128xf32> to vector<8x128xf32>
    %387 = vector.shape_cast %359 : vector<8x128xf32> to vector<1x8x128xf32>
    tpu.vector_store %arg12[%c0_149, %c0_150, %c0_151], %387 {strides = array<i32>} : memref<2x8x128xf32, #tpu.memory_space<vmem>>, vector<1x8x128xf32>,
    %c0_152 = arith.constant 0 : index
    %c0_153 = arith.constant 0 : index
    %c0_154 = arith.constant 0 : index
    %388 = vector.load %arg13[%c0_152, %c0_153, %c0_154] : memref<2x8x128xf32, #tpu.memory_space<vmem>>, vector<1x8x128xf32>
    %389 = vector.shape_cast %388 : vector<1x8x128xf32> to vector<8x128xf32>
    %390 = vector.shape_cast %357 : vector<8x128xf32> to vector<1x8x128xf32>
    tpu.vector_store %arg13[%c0_152, %c0_153, %c0_154], %390 {strides = array<i32>} : memref<2x8x128xf32, #tpu.memory_space<vmem>>, vector<1x8x128xf32>,
    %c1_155 = arith.constant 1 : index
    %c0_156 = arith.constant 0 : index
    %c0_157 = arith.constant 0 : index
    %391 = vector.load %arg12[%c1_155, %c0_156, %c0_157] : memref<2x8x128xf32, #tpu.memory_space<vmem>>, vector<1x8x128xf32>
    %392 = vector.shape_cast %391 : vector<1x8x128xf32> to vector<8x128xf32>
    %393 = vector.shape_cast %383 : vector<8x128xf32> to vector<1x8x128xf32>
    tpu.vector_store %arg12[%c1_155, %c0_156, %c0_157], %393 {strides = array<i32>} : memref<2x8x128xf32, #tpu.memory_space<vmem>>, vector<1x8x128xf32>,
    %c1_158 = arith.constant 1 : index
    %c0_159 = arith.constant 0 : index
    %c0_160 = arith.constant 0 : index
    %394 = vector.load %arg13[%c1_158, %c0_159, %c0_160] : memref<2x8x128xf32, #tpu.memory_space<vmem>>, vector<1x8x128xf32>
    %395 = vector.shape_cast %394 : vector<1x8x128xf32> to vector<8x128xf32>
    %396 = vector.shape_cast %381 : vector<8x128xf32> to vector<1x8x128xf32>
    tpu.vector_store %arg13[%c1_158, %c0_159, %c0_160], %396 {strides = array<i32>} : memref<2x8x128xf32, #tpu.memory_space<vmem>>, vector<1x8x128xf32>,
    %c2_i32_161 = arith.constant 2 : i32
    %397 = tpu.memref_slice %arg19[%c2_i32_161] : memref<3x!tpu.dma_semaphore, #tpu.memory_space<semaphore_mem>> -> memref<1x!tpu.dma_semaphore, #tpu.memory_space<semaphore_mem>>
    %398 = tpu.memref_squeeze %397 : memref<1x!tpu.dma_semaphore, #tpu.memory_space<semaphore_mem>> -> memref<!tpu.dma_semaphore, #tpu.memory_space<semaphore_mem>>
    tpu.wait_dma2 semaphore(%398 : memref<!tpu.dma_semaphore, #tpu.memory_space<semaphore_mem>>) src(%arg9 : memref<128x128xf32, #tpu.memory_space<any>>) dst(%arg18 : memref<128x128xf32, #tpu.memory_space<vmem>>)
    %c0_162 = arith.constant 0 : index
    %c0_163 = arith.constant 0 : index
    %399 = vector.load %arg15[%c0_162, %c0_163] : memref<64x128xf32, #tpu.memory_space<vmem>>, vector<64x128xf32>
    %c0_164 = arith.constant 0 : index
    %c0_165 = arith.constant 0 : index
    %400 = vector.load %arg18[%c0_164, %c0_165] : memref<128x128xf32, #tpu.memory_space<vmem>>, vector<128x128xf32>
    %cst_166 = arith.constant dense<0.000000e+00> : vector<64x128xf32>
    %401 = tpu.matmul %399, %400, %cst_166 {dimension_numbers = #tpu.dot_dimension_numbers<[1], [0], [0], [1], [0, 0, 1, 1], [], []>} : vector<64x128xf32>, vector<128x128xf32>, vector<64x128xf32> -> vector<64x128xf32>
    %c0_167 = arith.constant 0 : index
    %c0_168 = arith.constant 0 : index
    %402 = vector.load %arg10[%c0_167, %c0_168] : memref<1x128xf32, #tpu.memory_space<vmem>>, vector<1x128xf32>
    %403 = vector.broadcast %402 : vector<1x128xf32> to vector<64x128xf32>
    %404 = arith.addf %401, %403 : vector<64x128xf32>
    %c0_169 = arith.constant 0 : index
    %c0_170 = arith.constant 0 : index
    %405 = vector.load %arg11[%c0_169, %c0_170] : memref<64x128xf32, #tpu.memory_space<vmem>>, vector<64x128xf32>
    tpu.vector_store %arg11[%c0_169, %c0_170], %404 {strides = array<i32>} : memref<64x128xf32, #tpu.memory_space<vmem>>, vector<64x128xf32>,
    return
  }
}

</mosaic_0001>

<bundles_post_ra>
// kernel: tpu_custom_call.1
= control target key start
LH: loop header
LB: loop body
LE: loop exit
PB: predicated region body
PF: predicated region fallthrough
CT: control target
= control target key end

     0   :  { %19 = vsyncpa [#allocation9], 0  ;;  %s10842_s0 = inlined_call_operand.hbm [shape: f32[64,164], index: 0, kind: input, shape index: {}]   ;;  %s10843_s1 = inlined_call_operand.hbm [shape: f32[2,8,128], index: 1, kind: input, shape index: {}]   ;;  %s10844_s2 = inlined_call_operand.hbm [shape: f32[2,8,128], index: 2, kind: input, shape index: {}]   ;;  %s10845_s3 = inlined_call_operand.hbm [shape: f32[164,512], index: 3, kind: input, shape index: {}]   ;;  %s10846_s4 = inlined_call_operand.hbm [shape: f32[128,512], index: 4, kind: input, shape index: {}]   ;;  %s10847_s5 = inlined_call_operand.hbm [shape: f32[128,512], index: 5, kind: input, shape index: {}]   ;;  %s10848_s6 = inlined_call_operand.hbm [shape: f32[128,512], index: 6, kind: input, shape index: {}]   ;;  %s10849_s7 = inlined_call_operand.vmem [shape: f32[1,512], index: 7, kind: input, shape index: {}]   ;;  %s10850_s8 = inlined_call_operand.vmem [shape: f32[1,512], index: 8, kind: input, shape index: {}]   ;;  %s10851_s9 = inlined_call_operand.hbm [shape: f32[128,128], index: 9, kind: input, shape index: {}]   ;;  %s10852_s10 = inlined_call_operand.vmem [shape: f32[1,128], index: 10, kind: input, shape index: {}]   ;;  %s10853_s11 = inlined_call_operand.hbm [shape: f32[64,128], index: 11, kind: output, shape index: {0}]   ;;  %s10854_s12 = inlined_call_operand.hbm [shape: f32[2,8,128], index: 12, kind: output, shape index: {1}]   ;;  %s10855_s13 = inlined_call_operand.hbm [shape: f32[2,8,128], index: 13, kind: output, shape index: {2}]  }
   0x1   :  { %20 = vsyncpa [#allocation12], 0 }
   0x2   :  { %21 = vsyncpa [#allocation15], 0 }
   0x3   :  { %22 = vsyncpa [#allocation10], 0 }
   0x4   :  { %23 = vsyncpa [#allocation19], 0  ;;  %s8849_s25 = smov [#allocation11]   ;;  %s8591_s29 = scalar_lea.hbm %s10843_s1, 256 }
   0x5   :  { %s41_s26 = sshll.u32 %s8849_s25, 4  ;;  %p8592_p0 = scmp.ne.s32.totalorder %s10843_s1, %s8591_s29  ;;  %s42_s26 = int_to_ptr.vmem [resolvable:$true] %s41_s26 }
   0x6   :  { %p8595_p1 = scmp.lt.u32.totalorder %s8591_s29, %s10843_s1 }
   0x8   :  { %p8597_p2 = pnand %p8595_p1, %p8592_p0 }
   0xa   :  { %8600 = shalt.err (!%p8597_p2)
}
   0xb   :  { %s8601_s17 = scalar_lea.vmem %s42_s26, 256  ;;  %p8606_p4 = scmp.lt.s32.totalorder %s42_s26, %s42_s26 }
   0xc   :  { %p8602_p3 = scmp.ne.s32.totalorder %s42_s26, %s8601_s17  ;;  %p8607_p5 = scmp.lt.s32.totalorder %s8601_s17, %s8601_s17 }
   0xe   :  { %p8608_p6 = por %p8607_p5, %p8606_p4 }
  0x10   :  { %p8609_p7 = pnand %p8608_p6, %p8602_p3 }
  0x12   :  { %8612 = shalt.err (!%p8609_p7)
}
  0x13   :  { %s8850_s18 = smov 128   ;;  %s8851_s19 = smov 8  }
  0x14   :  { %47 = dma.hbm_to_vmem [thread:$0]  %s10843_s1, 256, %s42_s26, [#allocation12], %s8850_s18, %s8850_s18, %s8851_s19  }
  0x15   :  { %s8852_s22 = smov [#allocation14]   ;;  %s8613_s27 = scalar_lea.hbm %s10845_s3, 10752 }
  0x16   :  { %s65_s23 = sshll.u32 %s8852_s22, 4  ;;  %p8614_p8 = scmp.ne.s32.totalorder %s10845_s3, %s8613_s27  ;;  %s66_s23 = int_to_ptr.vmem [resolvable:$true] %s65_s23 }
  0x17   :  { %p8617_p9 = scmp.lt.u32.totalorder %s8613_s27, %s10845_s3 }
  0x19   :  { %p8619_p10 = pnand %p8617_p9, %p8614_p8 }
  0x1b   :  { %8622 = shalt.err (!%p8619_p10)
}
  0x1c   :  { %s8623_s15 = scalar_lea.vmem %s66_s23, 10752  ;;  %p8628_p12 = scmp.lt.s32.totalorder %s66_s23, %s66_s23 }
  0x1d   :  { %p8624_p11 = scmp.ne.s32.totalorder %s66_s23, %s8623_s15  ;;  %p8629_p13 = scmp.lt.s32.totalorder %s8623_s15, %s8623_s15 }
  0x1f   :  { %p8630_p0 = por %p8629_p13, %p8628_p12 }
  0x21   :  { %p8631_p1 = pnand %p8630_p0, %p8624_p11 }
  0x23   :  { %8634 = shalt.err (!%p8631_p1)
}
  0x24   :  { %s10856_s1 = smov 512   ;;  %s8854_s26 = smov 32  }
  0x25   :  { %71 = dma.hbm_to_vmem [thread:$0]  %s10845_s3, 10752, %s66_s23, [#allocation15], %s10856_s1, %s10856_s1, %s8854_s26  }
  0x26   :  { %s8855_s20 = smov [#allocation8]   ;;  %s8635_s25 = scalar_lea.hbm %s10842_s0, 2048 }
  0x27   :  { %s29_s21 = sshll.u32 %s8855_s20, 4  ;;  %p8636_p2 = scmp.ne.s32.totalorder %s10842_s0, %s8635_s25  ;;  %s30_s21 = int_to_ptr.vmem [resolvable:$true] %s29_s21 }
  0x28   :  { %p8639_p3 = scmp.lt.u32.totalorder %s8635_s25, %s10842_s0 }
  0x2a   :  { %p8641_p4 = pnand %p8639_p3, %p8636_p2 }
  0x2c   :  { %8644 = shalt.err (!%p8641_p4)
}
  0x2d   :  { %s8645_s14 = scalar_lea.vmem %s30_s21, 2048  ;;  %p8650_p6 = scmp.lt.s32.totalorder %s30_s21, %s30_s21 }
  0x2e   :  { %p8646_p5 = scmp.ne.s32.totalorder %s30_s21, %s8645_s14  ;;  %p8651_p7 = scmp.lt.s32.totalorder %s8645_s14, %s8645_s14 }
  0x30   :  { %p8652_p8 = por %p8651_p7, %p8650_p6 }
  0x32   :  { %p8653_p9 = pnand %p8652_p8, %p8646_p5 }
  0x34   :  { %8656 = shalt.err (!%p8653_p9)
}
  0x35   :  { %s8856_s3 = smov 256   ;;  %s8857_s23 = smov 16  }
  0x36   :  { %35 = dma.hbm_to_vmem [thread:$0]  %s10842_s0, 2048, %s30_s21, [#allocation9], %s8856_s3, %s8856_s3, %s8857_s23  }
  0x37   :  { %s8858_s17 = smov [#allocation13]   ;;  %s8859_s22 = smov [#allocation16]  }
  0x38   :  { %s53_s20 = sshll.u32 %s8858_s17, 4  ;;  %s77_s24 = sshll.u32 %s8859_s22, 4  ;;  %s54_s20 = int_to_ptr.vmem [resolvable:$true] %s53_s20  ;;  %s78_s24 = int_to_ptr.vmem [resolvable:$true] %s77_s24 }
  0x39   :  { %s8657_s28 = scalar_lea.hbm %s10844_s2, 256 }
  0x3a   :  { %p8658_p10 = scmp.ne.s32.totalorder %s10844_s2, %s8657_s28  ;;  %p8661_p11 = scmp.lt.u32.totalorder %s8657_s28, %s10844_s2 }
  0x3c   :  { %p8663_p12 = pnand %p8661_p11, %p8658_p10 }
  0x3e   :  { %8666 = shalt.err (!%p8663_p12)
}
  0x3f   :  { %s8667_s0 = scalar_lea.vmem %s54_s20, 256  ;;  %p8672_p0 = scmp.lt.s32.totalorder %s54_s20, %s54_s20 }
  0x40   :  { %p8668_p13 = scmp.ne.s32.totalorder %s54_s20, %s8667_s0  ;;  %p8673_p1 = scmp.lt.s32.totalorder %s8667_s0, %s8667_s0 }
  0x42   :  { %p8674_p2 = por %p8673_p1, %p8672_p0 }
  0x44   :  { %p8675_p3 = pnand %p8674_p2, %p8668_p13 }
  0x46   :  { %8678 = shalt.err (!%p8675_p3)
}
  0x47   :  { %59 = dma.hbm_to_vmem [thread:$0]  %s10844_s2, 256, %s54_s20, [#allocation12], %s8850_s18, %s8850_s18, %s8851_s19  }
  0x48   :  { %s8679_s15 = scalar_lea.hbm %s10846_s4, 8192 }
  0x49   :  { %p8680_p4 = scmp.ne.s32.totalorder %s10846_s4, %s8679_s15  ;;  %p8683_p5 = scmp.lt.u32.totalorder %s8679_s15, %s10846_s4 }
  0x4b   :  { %p8685_p6 = pnand %p8683_p5, %p8680_p4 }
  0x4d   :  { %8688 = shalt.err (!%p8685_p6)
}
  0x4e   :  { %s8689_s27 = scalar_lea.vmem %s78_s24, 8192  ;;  %p8694_p8 = scmp.lt.s32.totalorder %s78_s24, %s78_s24 }
  0x4f   :  { %p8690_p7 = scmp.ne.s32.totalorder %s78_s24, %s8689_s27  ;;  %p8695_p9 = scmp.lt.s32.totalorder %s8689_s27, %s8689_s27 }
  0x51   :  { %p8696_p10 = por %p8695_p9, %p8694_p8 }
  0x53   :  { %p8697_p11 = pnand %p8696_p10, %p8690_p7 }
  0x55   :  { %8700 = shalt.err (!%p8697_p11)
}
  0x56   :  { %s11072_s2 = smov 512  }
  0x57   :  { %83 = dma.hbm_to_vmem [thread:$0]  %s10846_s4, 8192, %s78_s24, [#allocation15], %s11072_s2, %s11072_s2, %s8854_s26  }
  0x58   :  { %8833 = dma.done.wait [#allocation9], 2048  }
  0x59   :  { %8834 = vsyncadd [#allocation9], 4294965248 }
  0x5a   :  { %8835 = dma.done.wait [#allocation12], 512  }
  0x5b   :  { %8836 = vsyncadd [#allocation12], 4294966784 }
  0x5c   :  { %8837 = dma.done.wait [#allocation15], 18944  }
  0x5d   :  { %8838 = vsyncadd [#allocation15], 4294948352  ;;  %v9009_v0 = vld [vmem:[#allocation11 + $0x8] sm:$0xff]  ;;  %v9011_v1 = vld [vmem:[#allocation13 + $0x8] sm:$0xff]  ;;  %vm262_vm0 = vcmask 293888   ;;  %vm287_vm1 = vcmask 1043456  }
  0x5e   :  { %v159_v2 = vld [vmem:[#allocation14 + $0x18] sm:$0xff]  ;;  %v158_v4 = vld [vmem:[#allocation14 + $0x10] sm:$0xff]  ;;  %v157_v27 = vld [vmem:[#allocation14 + $0x8] sm:$0xff]  ;;  %s8861_s4 = smov [#allocation4]   ;;  %s8862_s24 = smov [#allocation5]  }
  0x5f   :  { %v163_v3 = vld [vmem:[#allocation14 + $0x38] sm:$0xff]  ;;  %v162_v5 = vld [vmem:[#allocation14 + $0x30] sm:$0xff]  ;;  %v161_v28 = vld [vmem:[#allocation14 + $0x28] sm:$0xff]  ;;  %s112_s26 = sshll.u32 %s8861_s4, 4  ;;  %s124_s29 = sshll.u32 %s8862_s24, 4  ;;  %s113_s26 = int_to_ptr.vmem [resolvable:$true] %s112_s26  ;;  %s125_s29 = int_to_ptr.vmem [resolvable:$true] %s124_s29 }
  0x60   :  { %v6581_v6 = vpack.c.bf16 %v163_v3, %v159_v2  ;;  %v6583_v7 = vpack.c.bf16 %v162_v5, %v158_v4  ;;  %v167_v8 = vld [vmem:[#allocation14 + $0x58] sm:$0xff]  ;;  %v166_v10 = vld [vmem:[#allocation14 + $0x50] sm:$0xff]  ;;  %v6541_v29 = vpack.c.bf16 %v161_v28, %v157_v27  ;;  %v156_v30 = vld [vmem:[#allocation14] sm:$0xff]  ;;  %s8701_s0 = scalar_lea.hbm %s10847_s5, 8192 }
  0x61   :  { %v171_v9 = vld [vmem:[#allocation14 + $0x78] sm:$0xff]  ;;  %v170_v12 = vld [vmem:[#allocation14 + $0x70] sm:$0xff]  ;;  %v160_v31 = vld [vmem:[#allocation14 + $0x20] sm:$0xff]  ;;  %p8702_p12 = scmp.ne.s32.totalorder %s10847_s5, %s8701_s0  ;;  %p8705_p13 = scmp.lt.u32.totalorder %s8701_s0, %s10847_s5 }
  0x62   :  { %v6585_v11 = vpack.c.bf16 %v171_v9, %v167_v8  ;;  %v175_v13 = vld [vmem:[#allocation14 + $0x98] sm:$0xff]  ;;  %6582 = vmatprep.subr.bf16.mxu1 %v6581_v6  ;;  %v6587_v15 = vpack.c.bf16 %v170_v12, %v166_v10  ;;  %v174_v17 = vld [vmem:[#allocation14 + $0x90] sm:$0xff]  ;;  %v6543_v35 = vpack.c.bf16 %v160_v31, %v156_v30  ;;  %6542 = vmatprep.subr.bf16.mxu0 %v6541_v29  ;;  %v165_v37 = vld [vmem:[#allocation14 + $0x48] sm:$0xff] }
  0x63   :  { %v179_v14 = vld [vmem:[#allocation14 + $0xb8] sm:$0xff]  ;;  %6584 = vmatpush1.bf16.msra.mxu1 %v6583_v7  ;;  %v178_v18 = vld [vmem:[#allocation14 + $0xb0] sm:$0xff]  ;;  %v169_v38 = vld [vmem:[#allocation14 + $0x68] sm:$0xff]  ;;  %p8707_p0 = pnand %p8705_p13, %p8702_p12 }
  0x64   :  { %6586 = vmatprep.subr.bf16.mxu1 %v6585_v11  ;;  %v6589_v16 = vpack.c.bf16 %v179_v14, %v175_v13  ;;  %v183_v19 = vld [vmem:[#allocation14 + $0xd8] sm:$0xff]  ;;  %v6591_v21 = vpack.c.bf16 %v178_v18, %v174_v17  ;;  %v182_v23 = vld [vmem:[#allocation14 + $0xd0] sm:$0xff]  ;;  %v164_v39 = vld [vmem:[#allocation14 + $0x40] sm:$0xff]  ;;  %6544 = vmatpush1.bf16.msra.mxu0 %v6543_v35  ;;  %v6545_v42 = vpack.c.bf16 %v169_v38, %v165_v37 }
  0x65   :  { %v187_v20 = vld [vmem:[#allocation14 + $0xf8] sm:$0xff]  ;;  %v186_v24 = vld [vmem:[#allocation14 + $0xf0] sm:$0xff]  ;;  %v168_v43 = vld [vmem:[#allocation14 + $0x60] sm:$0xff] }
  0x66   :  { %v6593_v22 = vpack.c.bf16 %v187_v20, %v183_v19  ;;  %v191_v25 = vld [vmem:[#allocation14 + $0x118] sm:$0xff]  ;;  %v6595_v32 = vpack.c.bf16 %v186_v24, %v182_v23  ;;  %v190_v33 = vld [vmem:[#allocation14 + $0x110] sm:$0xff]  ;;  %v6547_v45 = vpack.c.bf16 %v168_v43, %v164_v39  ;;  %v173_v46 = vld [vmem:[#allocation14 + $0x88] sm:$0xff]  ;;  %6546 = vmatprep.subr.bf16.mxu0 %v6545_v42 }
  0x67   :  { %6588 = vmatpush1.bf16.msra.mxu1 %v6587_v15  ;;  %v195_v26 = vld [vmem:[#allocation14 + $0x138] sm:$0xff]  ;;  %v194_v34 = vld [vmem:[#allocation14 + $0x130] sm:$0xff]  ;;  %v177_v48 = vld [vmem:[#allocation14 + $0xa8] sm:$0xff] }
  0x68   :  { %6590 = vmatprep.subr.bf16.mxu1 %v6589_v16  ;;  %v6597_v36 = vpack.c.bf16 %v195_v26, %v191_v25  ;;  %v199_v40 = vld [vmem:[#allocation14 + $0x158] sm:$0xff]  ;;  %v198_v44 = vld [vmem:[#allocation14 + $0x150] sm:$0xff]  ;;  %v6599_v47 = vpack.c.bf16 %v194_v34, %v190_v33  ;;  %v172_v49 = vld [vmem:[#allocation14 + $0x80] sm:$0xff]  ;;  %v6549_v54 = vpack.c.bf16 %v177_v48, %v173_v46  ;;  %6548 = vmatpush1.bf16.msra.mxu0 %v6547_v45 }
  0x69   :  { %v203_v41 = vld [vmem:[#allocation14 + $0x178] sm:$0xff]  ;;  %v176_v50 = vld [vmem:[#allocation14 + $0xa0] sm:$0xff]  ;;  %v202_v52 = vld [vmem:[#allocation14 + $0x170] sm:$0xff] }
  0x6a   :  { %v6601_v51 = vpack.c.bf16 %v203_v41, %v199_v40  ;;  %v207_v53 = vld [vmem:[#allocation14 + $0x198] sm:$0xff]  ;;  %v141_v55 = vld [vmem:[#allocation8 + $0x8] sm:$0xff]  ;;  %v6551_v57 = vpack.c.bf16 %v176_v50, %v172_v49  ;;  %6550 = vmatprep.subr.bf16.mxu0 %v6549_v54  ;;  %v180_v61 = vld [vmem:[#allocation14 + $0xc0] sm:$0xff]  ;;  %v6603_v62 = vpack.c.bf16 %v202_v52, %v198_v44 }
  0x6b   :  { %6592 = vmatpush1.bf16.msra.mxu1 %v6591_v21  ;;  %v211_v56 = vld [vmem:[#allocation14 + $0x1b8] sm:$0xff]  ;;  %6413 = vmatprep.mubr.msk.f32.mxu1 %vm262_vm0, %v141_v55  ;;  %v181_v58 = vld [vmem:[#allocation14 + $0xc8] sm:$0xff]  ;;  %v206_v63 = vld [vmem:[#allocation14 + $0x190] sm:$0xff] }
  0x6c   :  { %6594 = vmatprep.subr.bf16.mxu1 %v6593_v22  ;;  %v185_v59 = vld [vmem:[#allocation14 + $0xe8] sm:$0xff]  ;;  %6403 = vmatprep.mubr.msk.f32.mxu0 %vm262_vm0, %v141_v55  ;;  %v184_v2 = vld [vmem:[#allocation14 + $0xe0] sm:$0xff]  ;;  %v6605_v3 = vpack.c.bf16 %v211_v56, %v207_v53  ;;  %v210_v4 = vld [vmem:[#allocation14 + $0x1b0] sm:$0xff] }
  0x6d   :  { %v6553_v60 = vpack.c.bf16 %v185_v59, %v181_v58  ;;  %v189_v5 = vld [vmem:[#allocation14 + $0x108] sm:$0xff]  ;;  %v215_v7 = vld [vmem:[#allocation14 + $0x1d8] sm:$0xff]  ;;  %6552 = vmatpush1.bf16.msra.mxu0 %v6551_v57  ;;  %v6555_v9 = vpack.c.bf16 %v184_v2, %v180_v61  ;;  %v188_v11 = vld [vmem:[#allocation14 + $0x100] sm:$0xff]  ;;  %v6607_v13 = vpack.c.bf16 %v210_v4, %v206_v63 }
  0x6e   :  { %v193_v6 = vld [vmem:[#allocation14 + $0x128] sm:$0xff]  ;;  %v219_v8 = vld [vmem:[#allocation14 + $0x1f8] sm:$0xff]  ;;  %v192_v12 = vld [vmem:[#allocation14 + $0x120] sm:$0xff] }
  0x6f   :  { %6596 = vmatpush1.bf16.msra.mxu1 %v6595_v32  ;;  %6554 = vmatprep.subr.bf16.mxu0 %v6553_v60  ;;  %v6557_v10 = vpack.c.bf16 %v193_v6, %v189_v5  ;;  %v197_v14 = vld [vmem:[#allocation14 + $0x148] sm:$0xff]  ;;  %v6609_v15 = vpack.c.bf16 %v219_v8, %v215_v7  ;;  %v214_v16 = vld [vmem:[#allocation14 + $0x1d0] sm:$0xff]  ;;  %v223_v19 = vld [vmem:[#allocation14 + $0x218] sm:$0xff]  ;;  %v6559_v21 = vpack.c.bf16 %v192_v12, %v188_v11 }
  0x70   :  { %6598 = vmatprep.subr.bf16.mxu1 %v6597_v36  ;;  %v218_v17 = vld [vmem:[#allocation14 + $0x1f0] sm:$0xff]  ;;  %v201_v18 = vld [vmem:[#allocation14 + $0x168] sm:$0xff]  ;;  %v227_v20 = vld [vmem:[#allocation14 + $0x238] sm:$0xff] }
  0x71   :  { %6556 = vmatpush1.bf16.msra.mxu0 %v6555_v9  ;;  %v6561_v22 = vpack.c.bf16 %v201_v18, %v197_v14  ;;  %v196_v23 = vld [vmem:[#allocation14 + $0x140] sm:$0xff]  ;;  %v6611_v25 = vpack.c.bf16 %v218_v17, %v214_v16  ;;  %v205_v26 = vld [vmem:[#allocation14 + $0x188] sm:$0xff]  ;;  %v6613_v28 = vpack.c.bf16 %v227_v20, %v223_v19  ;;  %v222_v29 = vld [vmem:[#allocation14 + $0x210] sm:$0xff] }
  0x72   :  { %6558 = vmatprep.subr.bf16.mxu0 %v6557_v10  ;;  %v200_v24 = vld [vmem:[#allocation14 + $0x160] sm:$0xff]  ;;  %v209_v27 = vld [vmem:[#allocation14 + $0x1a8] sm:$0xff]  ;;  %v226_v30 = vld [vmem:[#allocation14 + $0x230] sm:$0xff] }
  0x73   :  { %6600 = vmatpush1.bf16.msra.mxu1 %v6599_v47  ;;  %v231_v31 = vld [vmem:[#allocation14 + $0x258] sm:$0xff]  ;;  %v6563_v33 = vpack.c.bf16 %v200_v24, %v196_v23  ;;  %v6565_v34 = vpack.c.bf16 %v209_v27, %v205_v26  ;;  %v204_v35 = vld [vmem:[#allocation14 + $0x180] sm:$0xff]  ;;  %v6615_v37 = vpack.c.bf16 %v226_v30, %v222_v29  ;;  %v213_v38 = vld [vmem:[#allocation14 + $0x1c8] sm:$0xff] }
  0x74   :  { %6602 = vmatprep.subr.bf16.mxu1 %v6601_v51  ;;  %v235_v32 = vld [vmem:[#allocation14 + $0x278] sm:$0xff]  ;;  %v208_v36 = vld [vmem:[#allocation14 + $0x1a0] sm:$0xff]  ;;  %v217_v39 = vld [vmem:[#allocation14 + $0x1e8] sm:$0xff] }
  0x75   :  { %6560 = vmatpush1.bf16.msra.mxu0 %v6559_v21  ;;  %v6617_v40 = vpack.c.bf16 %v235_v32, %v231_v31  ;;  %v230_v41 = vld [vmem:[#allocation14 + $0x250] sm:$0xff]  ;;  %v6567_v43 = vpack.c.bf16 %v208_v36, %v204_v35  ;;  %v6569_v44 = vpack.c.bf16 %v217_v39, %v213_v38  ;;  %v212_v45 = vld [vmem:[#allocation14 + $0x1c0] sm:$0xff]  ;;  %v221_v48 = vld [vmem:[#allocation14 + $0x208] sm:$0xff] }
  0x76   :  { %6562 = vmatprep.subr.bf16.mxu0 %v6561_v22  ;;  %v234_v42 = vld [vmem:[#allocation14 + $0x270] sm:$0xff]  ;;  %v216_v46 = vld [vmem:[#allocation14 + $0x1e0] sm:$0xff]  ;;  %v225_v49 = vld [vmem:[#allocation14 + $0x228] sm:$0xff] }
  0x77   :  { %6604 = vmatpush1.bf16.msra.mxu1 %v6603_v62  ;;  %v6619_v47 = vpack.c.bf16 %v234_v42, %v230_v41  ;;  %v239_v50 = vld [vmem:[#allocation14 + $0x298] sm:$0xf]  ;;  %v569_v51 = vld [vmem:[#allocation16 + $0x8] sm:$0xff]  ;;  %v6571_v53 = vpack.c.bf16 %v216_v46, %v212_v45  ;;  %v568_v54 = vld [vmem:[#allocation16] sm:$0xff]  ;;  %v6573_v57 = vpack.c.bf16 %v225_v49, %v221_v48 }
  0x78   :  { %6606 = vmatprep.subr.bf16.mxu1 %v6605_v3  ;;  %v573_v52 = vld [vmem:[#allocation16 + $0x28] sm:$0xff]  ;;  %v572_v55 = vld [vmem:[#allocation16 + $0x20] sm:$0xff]  ;;  %v238_v61 = vld [vmem:[#allocation14 + $0x290] sm:$0xf] }
  0x79   :  { %6564 = vmatpush1.bf16.msra.mxu0 %v6563_v33  ;;  %v577_v56 = vld [vmem:[#allocation16 + $0x48] sm:$0xff]  ;;  %v220_v59 = vld [vmem:[#allocation14 + $0x200] sm:$0xff]  ;;  %v6621_v62 = vpack.c.bf16 %v573_v52, %v569_v51  ;;  %v6623_v4 = vpack.c.bf16 %v572_v55, %v568_v54  ;;  %v143_v5 = vld [vmem:[#allocation8 + $0x18] sm:$0xff] }
  0x7a   :  { %6566 = vmatprep.subr.bf16.mxu0 %v6565_v34  ;;  %v581_v58 = vld [vmem:[#allocation16 + $0x68] sm:$0xff]  ;;  %v224_v60 = vld [vmem:[#allocation14 + $0x220] sm:$0xff]  ;;  %v147_v27 = vld [vmem:[#allocation8 + $0x38] sm:$0xff] }
  0x7b   :  { %6608 = vmatpush1.bf16.msra.mxu1 %v6607_v13  ;;  %v229_v63 = vld [vmem:[#allocation14 + $0x248] sm:$0xff]  ;;  %v140_v3 = vld [vmem:[#allocation8] sm:$0xff]  ;;  %v6625_v6 = vpack.c.bf16 %v581_v58, %v577_v56  ;;  %v6575_v10 = vpack.c.bf16 %v224_v60, %v220_v59  ;;  %v146_v34 = vld [vmem:[#allocation8 + $0x30] sm:$0xff] }
  0x7c   :  { %6610 = vmatprep.subr.bf16.mxu1 %v6609_v15  ;;  %v233_v2 = vld [vmem:[#allocation14 + $0x268] sm:$0xff]  ;;  %v576_v7 = vld [vmem:[#allocation16 + $0x40] sm:$0xff]  ;;  %v142_v15 = vld [vmem:[#allocation8 + $0x10] sm:$0xff] }
  0x7d   :  { %6568 = vmatpush1.bf16.msra.mxu0 %v6567_v43  ;;  %v580_v8 = vld [vmem:[#allocation16 + $0x60] sm:$0xff]  ;;  %v585_v9 = vld [vmem:[#allocation16 + $0x88] sm:$0xff]  ;;  %v6577_v12 = vpack.c.bf16 %v233_v2, %v229_v63  ;;  %v155_v60 = vld [vmem:[#allocation8 + $0x78] sm:$0xff] }
  0x7e   :  { %6570 = vmatprep.subr.bf16.mxu0 %v6569_v44  ;;  %v589_v11 = vld [vmem:[#allocation16 + $0xa8] sm:$0xff]  ;;  %v228_v13 = vld [vmem:[#allocation14 + $0x240] sm:$0xff]  ;;  %v6627_v16 = vpack.c.bf16 %v580_v8, %v576_v7  ;;  %v151_v44 = vld [vmem:[#allocation8 + $0x58] sm:$0xff] }
  0x7f   :  { %6612 = vmatpush1.bf16.msra.mxu1 %v6611_v25  ;;  %v232_v14 = vld [vmem:[#allocation14 + $0x260] sm:$0xff]  ;;  %v145_v17 = vld [vmem:[#allocation8 + $0x28] sm:$0xff]  ;;  %v6629_v18 = vpack.c.bf16 %v589_v11, %v585_v9  ;;  %v571_v2 = vld [vmem:[#allocation16 + $0x18] sm:$0xff]  ;;  %v10857_v11 = vmov 0.0  }
  0x80   :  { %6614 = vmatprep.subr.bf16.mxu1 %v6613_v28  ;;  %v584_v19 = vld [vmem:[#allocation16 + $0x80] sm:$0xff]  ;;  %v6579_v21 = vpack.c.bf16 %v232_v14, %v228_v13  ;;  %v593_v22 = vld [vmem:[#allocation16 + $0xc8] sm:$0xff]  ;;  %v570_v7 = vld [vmem:[#allocation16 + $0x10] sm:$0xff] }
  0x81   :  { %6572 = vmatpush1.bf16.msra.mxu0 %v6571_v53  ;;  %v588_v20 = vld [vmem:[#allocation16 + $0xa0] sm:$0xff]  ;;  %v597_v23 = vld [vmem:[#allocation16 + $0xe8] sm:$0xff]  ;;  %v574_v8 = vld [vmem:[#allocation16 + $0x30] sm:$0xff] }
  0x82   :  { %6574 = vmatprep.subr.bf16.mxu0 %v6573_v57  ;;  %v237_v24 = vld [vmem:[#allocation14 + $0x288] sm:$0xf]  ;;  %v144_v25 = vld [vmem:[#allocation8 + $0x20] sm:$0xff]  ;;  %v6631_v26 = vpack.c.bf16 %v588_v20, %v584_v19  ;;  %v6633_v28 = vpack.c.bf16 %v597_v23, %v593_v22  ;;  %v579_v9 = vld [vmem:[#allocation16 + $0x58] sm:$0xff]  ;;  %v6655_v13 = vpack.c.bf16 %v574_v8, %v570_v7 }
  0x83   :  { %6616 = vmatpush1.bf16.msra.mxu1 %v6615_v37  ;;  %v592_v29 = vld [vmem:[#allocation16 + $0xc0] sm:$0xff]  ;;  %v601_v31 = vld [vmem:[#allocation16 + $0x108] sm:$0xff]  ;;  %v590_v22 = vld [vmem:[#allocation16 + $0xb0] sm:$0xff] }
  0x84   :  { %6618 = vmatprep.subr.bf16.mxu1 %v6617_v40  ;;  %v596_v30 = vld [vmem:[#allocation16 + $0xe0] sm:$0xff]  ;;  %v605_v32 = vld [vmem:[#allocation16 + $0x128] sm:$0xff]  ;;  %v595_v23 = vld [vmem:[#allocation16 + $0xd8] sm:$0xff] }
  0x85   :  { %6576 = vmatpush1.bf16.msra.mxu0 %v6575_v10  ;;  %v236_v33 = vld [vmem:[#allocation14 + $0x280] sm:$0xf]  ;;  %v6635_v35 = vpack.c.bf16 %v596_v30, %v592_v29  ;;  %v149_v36 = vld [vmem:[#allocation8 + $0x48] sm:$0xff]  ;;  %v6637_v37 = vpack.c.bf16 %v605_v32, %v601_v31  ;;  %v583_v10 = vld [vmem:[#allocation16 + $0x78] sm:$0xff] }
  0x86   :  { %6578 = vmatprep.subr.bf16.mxu0 %v6577_v12  ;;  %v600_v38 = vld [vmem:[#allocation16 + $0x100] sm:$0xff]  ;;  %v609_v40 = vld [vmem:[#allocation16 + $0x148] sm:$0xff]  ;;  %v6657_v14 = vpack.c.bf16 %v583_v10, %v579_v9  ;;  %v603_v29 = vld [vmem:[#allocation16 + $0x118] sm:$0xff] }
  0x87   :  { %6620 = vmatpush1.bf16.msra.mxu1 %v6619_v47  ;;  %v604_v39 = vld [vmem:[#allocation16 + $0x120] sm:$0xff]  ;;  %v613_v41 = vld [vmem:[#allocation16 + $0x168] sm:$0xff]  ;;  %v607_v30 = vld [vmem:[#allocation16 + $0x138] sm:$0xff] }
  0x88   :  { %6411 = vmatprep.subr.msk.mxu1 %vm287_vm1, %v239_v50  ;;  %v148_v42 = vld [vmem:[#allocation8 + $0x40] sm:$0xff]  ;;  %v6639_v43 = vpack.c.bf16 %v604_v39, %v600_v38  ;;  %v6641_v45 = vpack.c.bf16 %v613_v41, %v609_v40  ;;  %v617_v48 = vld [vmem:[#allocation16 + $0x188] sm:$0xff]  ;;  %v150_v50 = vld [vmem:[#allocation8 + $0x50] sm:$0xff]  ;;  %v6669_v32 = vpack.c.bf16 %v607_v30, %v603_v29 }
  0x89   :  { %6580 = vmatpush1.bf16.msra.mxu0 %v6579_v21  ;;  %v608_v46 = vld [vmem:[#allocation16 + $0x140] sm:$0xff]  ;;  %v621_v49 = vld [vmem:[#allocation16 + $0x1a8] sm:$0xff]  ;;  %v586_v21 = vld [vmem:[#allocation16 + $0x90] sm:$0xff] }
  0x8a   :  { %6401 = vmatprep.subr.msk.mxu0 %vm287_vm1, %v237_v24  ;;  %v612_v47 = vld [vmem:[#allocation16 + $0x160] sm:$0xff]  ;;  %v153_v52 = vld [vmem:[#allocation8 + $0x68] sm:$0xff]  ;;  %v6645_v53 = vpack.c.bf16 %v621_v49, %v617_v48  ;;  %v599_v24 = vld [vmem:[#allocation16 + $0xf8] sm:$0xff] }
  0x8b   :  { %6412 = vmatpush1.msk.msra.mxu1 %vm287_vm1, %v238_v61  ;;  %v6643_v51 = vpack.c.bf16 %v612_v47, %v608_v46  ;;  %v616_v54 = vld [vmem:[#allocation16 + $0x180] sm:$0xff]  ;;  %v625_v56 = vld [vmem:[#allocation16 + $0x1c8] sm:$0xff]  ;;  %v610_v39 = vld [vmem:[#allocation16 + $0x150] sm:$0xff] }
  0x8c   :  { %478 = vmatmul.mubr.f32.vlgmr.msra.gmra.mrb[0].mxu1 %v140_v3  ;;  %6622 = vmatprep.subr.bf16.mxu1 %v6621_v62  ;;  %v620_v55 = vld [vmem:[#allocation16 + $0x1a0] sm:$0xff]  ;;  %v629_v57 = vld [vmem:[#allocation16 + $0x1e8] sm:$0xff]  ;;  %v614_v40 = vld [vmem:[#allocation16 + $0x170] sm:$0xff] }
  0x8d   :  { %6624 = vmatpush1.bf16.msra.mxu1 %v6623_v4  ;;  %6414 = vmatprep.mubr.msk.f32.mxu1 %vm262_vm0, %v143_v5  ;;  %v152_v58 = vld [vmem:[#allocation8 + $0x60] sm:$0xff]  ;;  %v6647_v59 = vpack.c.bf16 %v620_v55, %v616_v54  ;;  %v6649_v61 = vpack.c.bf16 %v629_v57, %v625_v56  ;;  %v154_v4 = vld [vmem:[#allocation8 + $0x70] sm:$0xff]  ;;  %v619_v41 = vld [vmem:[#allocation16 + $0x198] sm:$0xff] }
  0x8e   :  { %6626 = vmatprep.subr.bf16.mxu1 %v6625_v6  ;;  %6402 = vmatpush1.msk.msra.mxu0 %vm287_vm1, %v236_v33  ;;  %v624_v62 = vld [vmem:[#allocation16 + $0x1c0] sm:$0xff]  ;;  %v602_v33 = vld [vmem:[#allocation16 + $0x110] sm:$0xff]  ;;  %v627_v47 = vld [vmem:[#allocation16 + $0x1d8] sm:$0xff] }
  0x8f   :  { %365 = vmatmul.mubr.f32.vlgmr.msra.gmra.mrb[0].mxu0 %v140_v3  ;;  %v628_v63 = vld [vmem:[#allocation16 + $0x1e0] sm:$0xff]  ;;  %v575_v3 = vld [vmem:[#allocation16 + $0x38] sm:$0xff]  ;;  %v622_v46 = vld [vmem:[#allocation16 + $0x1b0] sm:$0xff] }
  0x90   :  { %484 = vmatmul.mubr.f32.gmra.mrb[2].mxu1 %v142_v15  ;;  %6404 = vmatprep.mubr.msk.f32.mxu0 %vm262_vm0, %v143_v5  ;;  %v6651_v5 = vpack.c.bf16 %v628_v63, %v624_v62  ;;  %v6653_v6 = vpack.c.bf16 %v575_v3, %v571_v2  ;;  %v9032_v12 = vld [vmem:[#allocation11] sm:$0xff]  ;;  %v631_v48 = vld [vmem:[#allocation16 + $0x1f8] sm:$0xff] }
  0x91   :  { %6628 = vmatpush1.bf16.msra.mxu1 %v6627_v16  ;;  %6415 = vmatprep.mubr.msk.f32.mxu1 %vm262_vm0, %v145_v17  ;;  %v582_v16 = vld [vmem:[#allocation16 + $0x70] sm:$0xff] }
  0x92   :  { %6630 = vmatprep.subr.bf16.mxu1 %v6629_v18  ;;  %v591_v18 = vld [vmem:[#allocation16 + $0xb8] sm:$0xff] }
  0x93   :  { %371 = vmatmul.mubr.f32.gmra.mrb[2].mxu0 %v142_v15  ;;  %v578_v15 = vld [vmem:[#allocation16 + $0x50] sm:$0xff] }
  0x94   :  { %490 = vmatmul.mubr.f32.gmra.mrb[4].mxu1 %v144_v25  ;;  %6405 = vmatprep.mubr.msk.f32.mxu0 %vm262_vm0, %v145_v17  ;;  %v587_v17 = vld [vmem:[#allocation16 + $0x98] sm:$0xff]  ;;  %v6659_v19 = vpack.c.bf16 %v582_v16, %v578_v15 }
  0x95   :  { %6632 = vmatpush1.bf16.msra.mxu1 %v6631_v26  ;;  %6416 = vmatprep.mubr.msk.f32.mxu1 %vm262_vm0, %v147_v27  ;;  %v6661_v20 = vpack.c.bf16 %v591_v18, %v587_v17  ;;  %v6665_v26 = vpack.c.bf16 %v599_v24, %v595_v23 }
  0x96   :  { %6634 = vmatprep.subr.bf16.mxu1 %v6633_v28  ;;  %v598_v28 = vld [vmem:[#allocation16 + $0xf0] sm:$0xff] }
  0x97   :  { %377 = vmatmul.mubr.f32.gmra.mrb[4].mxu0 %v144_v25  ;;  %v6663_v25 = vpack.c.bf16 %v590_v22, %v586_v21 }
  0x98   :  { %496 = vmatmul.mubr.f32.gmra.mrb[6].mxu1 %v146_v34  ;;  %6406 = vmatprep.mubr.msk.f32.mxu0 %vm262_vm0, %v147_v27  ;;  %v594_v27 = vld [vmem:[#allocation16 + $0xd0] sm:$0xff] }
  0x99   :  { %6636 = vmatpush1.bf16.msra.mxu1 %v6635_v35  ;;  %6417 = vmatprep.mubr.msk.f32.mxu1 %vm262_vm0, %v149_v36  ;;  %v6667_v31 = vpack.c.bf16 %v598_v28, %v594_v27  ;;  %v611_v35 = vld [vmem:[#allocation16 + $0x158] sm:$0xff] }
  0x9a   :  { %6638 = vmatprep.subr.bf16.mxu1 %v6637_v37 }
  0x9b   :  { %383 = vmatmul.mubr.f32.gmra.mrb[6].mxu0 %v146_v34  ;;  %v606_v34 = vld [vmem:[#allocation16 + $0x130] sm:$0xff] }
  0x9c   :  { %502 = vmatmul.mubr.f32.gmra.mrb[8].mxu1 %v148_v42  ;;  %6407 = vmatprep.mubr.msk.f32.mxu0 %vm262_vm0, %v149_v36  ;;  %v615_v36 = vld [vmem:[#allocation16 + $0x178] sm:$0xff]  ;;  %v6671_v37 = vpack.c.bf16 %v606_v34, %v602_v33 }
  0x9d   :  { %6640 = vmatpush1.bf16.msra.mxu1 %v6639_v43  ;;  %6418 = vmatprep.mubr.msk.f32.mxu1 %vm262_vm0, %v151_v44  ;;  %v6673_v38 = vpack.c.bf16 %v615_v36, %v611_v35  ;;  %v6675_v43 = vpack.c.bf16 %v614_v40, %v610_v39 }
  0x9e   :  { %6642 = vmatprep.subr.bf16.mxu1 %v6641_v45  ;;  %v618_v45 = vld [vmem:[#allocation16 + $0x190] sm:$0xff] }
  0x9f   :  { %389 = vmatmul.mubr.f32.gmra.mrb[8].mxu0 %v148_v42  ;;  %v623_v42 = vld [vmem:[#allocation16 + $0x1b8] sm:$0xff]  ;;  %v6679_v49 = vpack.c.bf16 %v622_v46, %v618_v45 }
  0xa0   :  { %508 = vmatmul.mubr.f32.gmra.mrb[10].mxu1 %v150_v50  ;;  %6408 = vmatprep.mubr.msk.f32.mxu0 %vm262_vm0, %v151_v44  ;;  %v6677_v44 = vpack.c.bf16 %v623_v42, %v619_v41 }
  0xa1   :  { %6644 = vmatpush1.bf16.msra.mxu1 %v6643_v51  ;;  %6419 = vmatprep.mubr.msk.f32.mxu1 %vm262_vm0, %v153_v52  ;;  %v626_v51 = vld [vmem:[#allocation16 + $0x1d0] sm:$0xff] }
  0xa2   :  { %6646 = vmatprep.subr.bf16.mxu1 %v6645_v53 }
  0xa3   :  { %395 = vmatmul.mubr.f32.gmra.mrb[10].mxu0 %v150_v50  ;;  %v6681_v50 = vpack.c.bf16 %v631_v48, %v627_v47 }
  0xa4   :  { %514 = vmatmul.mubr.f32.gmra.mrb[12].mxu1 %v152_v58  ;;  %6409 = vmatprep.mubr.msk.f32.mxu0 %vm262_vm0, %v153_v52  ;;  %v630_v52 = vld [vmem:[#allocation16 + $0x1f0] sm:$0xff] }
  0xa5   :  { %6648 = vmatpush1.bf16.msra.mxu1 %v6647_v59  ;;  %6420 = vmatprep.mubr.msk.f32.mxu1 %vm262_vm0, %v155_v60  ;;  %v6683_v53 = vpack.c.bf16 %v630_v52, %v626_v51 }
  0xa6   :  { %6650 = vmatprep.subr.bf16.mxu1 %v6649_v61 }
  0xa7   :  { %401 = vmatmul.mubr.f32.gmra.mrb[12].mxu0 %v152_v58 }
  0xa8   :  { %520 = vmatmul.mubr.f32.gmra.mrb[14].mxu1 %v154_v4  ;;  %6410 = vmatprep.mubr.msk.f32.mxu0 %vm262_vm0, %v155_v60 }
  0xa9   :  { %6652 = vmatpush1.bf16.msra.mxu1 %v6651_v5  ;;  %696 = vmatprep.mubr.f32.mxu1 %v10857_v11 }
  0xaa   :  { %6654 = vmatprep.subr.bf16.mxu1 %v6653_v6 }
  0xab   :  { %407 = vmatmul.mubr.f32.gmra.mrb[14].mxu0 %v154_v4 }
  0xac   :  { %697 = vmatmul.mubr.f32.vlgmr.msra.gmra.mrb[16].mxu1 %v9032_v12 }
  0xad   :  { %6656 = vmatpush1.bf16.msra.mxu1 %v6655_v13  ;;  %767 = vmatprep.mubr.f32.mxu1 %v10857_v11 }
  0xae   :  { %6658 = vmatprep.subr.bf16.mxu1 %v6657_v14 }
  0xb1   :  { %6660 = vmatpush1.bf16.msra.mxu1 %v6659_v19 }
  0xb2   :  { %6662 = vmatprep.subr.bf16.mxu1 %v6661_v20 }
  0xb5   :  { %6664 = vmatpush1.bf16.msra.mxu1 %v6663_v25 }
  0xb6   :  { %6666 = vmatprep.subr.bf16.mxu1 %v6665_v26 }
  0xb9   :  { %6668 = vmatpush1.bf16.msra.mxu1 %v6667_v31 }
  0xba   :  { %6670 = vmatprep.subr.bf16.mxu1 %v6669_v32 }
  0xbd   :  { %6672 = vmatpush1.bf16.msra.mxu1 %v6671_v37 }
  0xbe   :  { %6674 = vmatprep.subr.bf16.mxu1 %v6673_v38 }
  0xc1   :  { %6676 = vmatpush1.bf16.msra.mxu1 %v6675_v43 }
  0xc2   :  { %6678 = vmatprep.subr.bf16.mxu1 %v6677_v44 }
  0xc5   :  { %6680 = vmatpush1.bf16.msra.mxu1 %v6679_v49 }
  0xc6   :  { %6682 = vmatprep.subr.bf16.mxu1 %v6681_v50 }
  0xc9   :  { %6684 = vmatpush1.bf16.msra.mxu1 %v6683_v53 }
  0xcc   :  { %768 = vmatmul.mubr.f32.vlgmr.msra.gmra.mrb[0].mxu1 %v9032_v12 }
  0xcd   :  { %8710 = shalt.err (!%p8707_p0)  }
  0xce   :  { %s8711_s15 = scalar_lea.vmem %s113_s26, 8192  ;;  %p8716_p2 = scmp.lt.s32.totalorder %s113_s26, %s113_s26 }
  0xcf   :  { %p8712_p1 = scmp.ne.s32.totalorder %s113_s26, %s8711_s15  ;;  %p8717_p3 = scmp.lt.s32.totalorder %s8711_s15, %s8711_s15 }
  0xd1   :  { %p8718_p4 = por %p8717_p3, %p8716_p2 }
  0xd3   :  { %p8719_p5 = pnand %p8718_p4, %p8712_p1 }
  0xd5   :  { %8722 = shalt.err (!%p8719_p5)  }
  0xd6   :  { %115 = dma.hbm_to_vmem [thread:$0]  %s10847_s5, 8192, %s113_s26, [#allocation7] }
  0xd7   :  { %s8723_s27 = scalar_lea.hbm %s10848_s6, 8192 }
  0xd8   :  { %p8724_p6 = scmp.ne.s32.totalorder %s10848_s6, %s8723_s27  ;;  %p8727_p7 = scmp.lt.u32.totalorder %s8723_s27, %s10848_s6 }
  0xda   :  { %p8729_p8 = pnand %p8727_p7, %p8724_p6 }
  0xdc   :  { %8732 = shalt.err (!%p8729_p8)  }
  0xdd   :  { %s8733_s24 = scalar_lea.vmem %s125_s29, 8192  ;;  %p8738_p10 = scmp.lt.s32.totalorder %s125_s29, %s125_s29 }
  0xde   :  { %p8734_p9 = scmp.ne.s32.totalorder %s125_s29, %s8733_s24  ;;  %p8739_p11 = scmp.lt.s32.totalorder %s8733_s24, %s8733_s24 }
  0xe0   :  { %p8740_p12 = por %p8739_p11, %p8738_p10 }
  0xe2   :  { %p8741_p13 = pnand %p8740_p12, %p8734_p9 }
  0xe4   :  { %8744 = shalt.err (!%p8741_p13)  }
  0xe5   :  { %127 = dma.hbm_to_vmem [thread:$0]  %s10848_s6, 8192, %s125_s29, [#allocation7 + $0x1] }
  0xe6   :  { %s8863_s30 = smov [#allocation6]   ;;  %s8745_s3 = scalar_lea.hbm %s10851_s9, 2048 }
  0xe7   :  { %s136_s14 = sshll.u32 %s8863_s30, 4  ;;  %p8746_p0 = scmp.ne.s32.totalorder %s10851_s9, %s8745_s3  ;;  %s137_s14 = int_to_ptr.vmem [resolvable:$true] %s136_s14 }
  0xe8   :  { %p8749_p1 = scmp.lt.u32.totalorder %s8745_s3, %s10851_s9 }
  0xea   :  { %p8751_p2 = pnand %p8749_p1, %p8746_p0 }
  0xec   :  { %8754 = shalt.err (!%p8751_p2)  }
  0xed   :  { %s8755_s17 = scalar_lea.vmem %s137_s14, 2048  ;;  %p8760_p4 = scmp.lt.s32.totalorder %s137_s14, %s137_s14 }
  0xee   :  { %p8756_p3 = scmp.ne.s32.totalorder %s137_s14, %s8755_s17  ;;  %p8761_p5 = scmp.lt.s32.totalorder %s8755_s17, %s8755_s17 }
  0xf0   :  { %p8762_p6 = por %p8761_p5, %p8760_p4 }
  0xf2   :  { %p8763_p7 = pnand %p8762_p6, %p8756_p3 }
  0xf4   :  { %8766 = shalt.err (!%p8763_p7)  }
  0xf5   :  { %139 = dma.hbm_to_vmem [thread:$0]  %s10851_s9, 2048, %s137_s14, [#allocation7 + $0x2]  ;;  %v242_v56 = vlaneseq  ;;  %v240_v59 = vld [vmem:[%s10849_s7] sm:$0xf]  ;;  %v561_v24 = vld [vmem:[#allocation13] sm:$0xff] }
  0xf7   :  { %v243_v57 = vshrl.u32 %v242_v56, 7 }
  0xf9   :  { %v9075_v58 = vsub.s32 0, %v243_v57  ;;  %v9080_v60 = vsub.s32 1, %v243_v57  ;;  %v9090_v9 = vsub.s32 2, %v243_v57  ;;  %v9092_v10 = vsub.s32 3, %v243_v57 }
  0xfb   :  { %11073 = vst [vmem:[#allocation37_spill] sm:$0xff] %v9080_v60  ;;  %v9083_v61 = vrot.slane %v240_v59, %v9075_v58  ;;  %v9086_v62 = vrot.slane %v240_v59, %v9080_v60  ;;  %11076 = vst [vmem:[#allocation40_spill] sm:$0xff] %v9090_v9  ;;  %v9095_v14 = vrot.slane %v240_v59, %v9090_v9 }
  0xfc   :  { %11077 = vst [vmem:[#allocation41_spill] sm:$0xff] %v9092_v10  ;;  %v9098_v16 = vrot.slane %v240_v59, %v9092_v10 }
  0xfd   :  { %11074 = vst [vmem:[#allocation38_spill] sm:$0xff] %v9083_v61  ;;  %11075 = vst [vmem:[#allocation39_spill] sm:$0xff] %v9086_v62 }
  0xfe   :  { %11078 = vst [vmem:[#allocation42_spill] sm:$0xff] %v9095_v14  ;;  %11079 = vst [vmem:[#allocation43_spill] sm:$0xff] %v9098_v16 }
 0x162   :  { %v366_v54 = vpop.f32.mrb[0].mxu0 }
 0x163   :  { %v368_v55 = vpop.f32.mrb[1].mxu0  ;;  %v367_v63 = vadd.f32 %v366_v54, %v9083_v61 }
 0x164   :  { %v369_v2 = vadd.f32 %v368_v55, %v9086_v62 }
 0x17f   :  { %v698_v3 = vpop.f32.mrb[16].mxu1 }
 0x180   :  { %v774_v4 = vadd.f32 %v698_v3, %v367_v63  ;;  %v700_v5 = vpop.f32.mrb[17].mxu1 }
 0x181   :  { %v775_v6 = vadd.f32 %v700_v5, %v369_v2 }
 0x182   :  { %v6421_v8 = vmul.f32 -1.442695, %v774_v4 }
 0x183   :  { %v6422_v7 = vmul.f32 -1.442695, %v775_v6 }
 0x185   :  { %8335 = vpow2.f32 %v6422_v7 }
 0x186   :  { %8337 = vpow2.f32 %v6421_v8 }
 0x18f   :  { %v8336_v12 = vpop.eup %8335 }
 0x190   :  { %v8338_v13 = vpop.eup %8337  ;;  %v788_v15 = vadd.f32 1.0, %v8336_v12 }
 0x191   :  { %v787_v17 = vadd.f32 1.0, %v8338_v13 }
 0x192   :  { %8339 = vrcp.f32 %v788_v15 }
 0x193   :  { %8341 = vrcp.f32 %v787_v17 }
 0x19c   :  { %v8340_v23 = vpop.eup %8339 }
 0x19d   :  { %v8342_v25 = vpop.eup %8341  ;;  %v797_v28 = vmul.f32 %v8340_v23, %v561_v24 }
 0x19f   :  { %v769_v18 = vpop.f32.mrb[0].mxu1 }
 0x1a0   :  { %v8207_v19 = vadd.f32 %v769_v18, %v9095_v14  ;;  %v771_v20 = vpop.f32.mrb[1].mxu1 }
 0x1a1   :  { %v8208_v21 = vadd.f32 %v771_v20, %v9098_v16 }
 0x1a2   :  { %v6423_v22 = vmul.f32 -1.442695, %v8207_v19 }
 0x1a3   :  { %8343 = vtanh.f32 %v8208_v21 }
 0x1a4   :  { %8345 = vpow2.f32 %v6423_v22 }
 0x1ad   :  { %v8344_v26 = vpop.eup %8343 }
 0x1ae   :  { %v8346_v27 = vpop.eup %8345  ;;  %v798_v29 = vmul.f32 %v8344_v26, %v8342_v25 }
 0x1af   :  { %v789_v30 = vadd.f32 1.0, %v8346_v27 }
 0x1b0   :  { %v9102_v31 = vadd.f32 %v798_v29, %v797_v28 }
 0x1b1   :  { %8347 = vrcp.f32 %v789_v30 }
 0x1b2   :  { %11080 = vst [vmem:[#allocation44_spill] sm:$0xff] %v9102_v31  ;;  %8349 = vtanh.f32 %v9102_v31 }
 0x1bb   :  { %v8348_v32 = vpop.eup %8347 }
 0x1bc   :  { %v8350_v33 = vpop.eup %8349 }
 0x1bd   :  { %v9105_v34 = vmul.f32 %v8350_v33, %v8348_v32 }
 0x1be   :  { %8839 = dma.done.wait [#allocation7], 8192 }
 0x1bf   :  { %8840 = vsyncadd [#allocation7], 4294959104 }
 0x1c0   :  { %8841 = dma.done.wait [#allocation7 + $0x1], 8192 }
 0x1c1   :  { %8842 = vsyncadd [#allocation7 + $0x1], 4294959104  ;;  %958 = vmatprep.mubr.f32.mxu0 %v10857_v11  ;;  %1029 = vmatprep.mubr.f32.mxu1 %v10857_v11  ;;  %v809_v35 = vld [vmem:[#allocation4 + $0x8] sm:$0xff]  ;;  %v811_v37 = vld [vmem:[#allocation4 + $0x18] sm:$0xff] }
 0x1c2   :  { %v813_v36 = vld [vmem:[#allocation4 + $0x28] sm:$0xff]  ;;  %v815_v39 = vld [vmem:[#allocation4 + $0x38] sm:$0xff]  ;;  %v808_v40 = vld [vmem:[#allocation4] sm:$0xff] }
 0x1c3   :  { %v9109_v38 = vpack.c.bf16 %v813_v36, %v809_v35  ;;  %v812_v41 = vld [vmem:[#allocation4 + $0x20] sm:$0xff]  ;;  %v9111_v42 = vpack.c.bf16 %v815_v39, %v811_v37  ;;  %v810_v44 = vld [vmem:[#allocation4 + $0x10] sm:$0xff]  ;;  %v817_v46 = vld [vmem:[#allocation4 + $0x48] sm:$0xff] }
 0x1c4   :  { %v9113_v43 = vpack.c.bf16 %v812_v41, %v808_v40  ;;  %v814_v45 = vld [vmem:[#allocation4 + $0x30] sm:$0xff]  ;;  %v821_v48 = vld [vmem:[#allocation4 + $0x68] sm:$0xff]  ;;  %v819_v49 = vld [vmem:[#allocation4 + $0x58] sm:$0xff] }
 0x1c5   :  { %6686 = vmatprep.subr.bf16.mxu0 %v9109_v38  ;;  %v9116_v47 = vpack.c.bf16 %v814_v45, %v810_v44  ;;  %v823_v50 = vld [vmem:[#allocation4 + $0x78] sm:$0xff]  ;;  %6718 = vmatprep.subr.bf16.mxu1 %v9111_v42  ;;  %v9120_v51 = vpack.c.bf16 %v821_v48, %v817_v46  ;;  %v816_v53 = vld [vmem:[#allocation4 + $0x40] sm:$0xff]  ;;  %v818_v55 = vld [vmem:[#allocation4 + $0x50] sm:$0xff] }
 0x1c6   :  { %6688 = vmatpush1.bf16.msra.mxu0 %v9113_v43  ;;  %v9122_v52 = vpack.c.bf16 %v823_v50, %v819_v49  ;;  %v820_v54 = vld [vmem:[#allocation4 + $0x60] sm:$0xff]  ;;  %v822_v57 = vld [vmem:[#allocation4 + $0x70] sm:$0xff]  ;;  %v825_v59 = vld [vmem:[#allocation4 + $0x88] sm:$0xff] }
 0x1c7   :  { %6720 = vmatpush1.bf16.msra.mxu1 %v9116_v47  ;;  %v9125_v56 = vpack.c.bf16 %v820_v54, %v816_v53  ;;  %v829_v63 = vld [vmem:[#allocation4 + $0xa8] sm:$0xff]  ;;  %6690 = vmatprep.subr.bf16.mxu0 %v9120_v51  ;;  %v9129_v2 = vpack.c.bf16 %v822_v57, %v818_v55  ;;  %v827_v4 = vld [vmem:[#allocation4 + $0x98] sm:$0xff]  ;;  %v824_v6 = vld [vmem:[#allocation4 + $0x80] sm:$0xff] }
 0x1c8   :  { %6722 = vmatprep.subr.bf16.mxu1 %v9122_v52  ;;  %v9131_v3 = vpack.c.bf16 %v829_v63, %v825_v59  ;;  %v831_v5 = vld [vmem:[#allocation4 + $0xb8] sm:$0xff]  ;;  %v828_v8 = vld [vmem:[#allocation4 + $0xa0] sm:$0xff]  ;;  %v826_v12 = vld [vmem:[#allocation4 + $0x90] sm:$0xff] }
 0x1c9   :  { %v9133_v7 = vpack.c.bf16 %v831_v5, %v827_v4  ;;  %v830_v13 = vld [vmem:[#allocation4 + $0xb0] sm:$0xff]  ;;  %v9136_v15 = vpack.c.bf16 %v828_v8, %v824_v6  ;;  %v833_v17 = vld [vmem:[#allocation4 + $0xc8] sm:$0xff]  ;;  %v835_v19 = vld [vmem:[#allocation4 + $0xd8] sm:$0xff] }
 0x1ca   :  { %6692 = vmatpush1.bf16.msra.mxu0 %v9125_v56  ;;  %v837_v18 = vld [vmem:[#allocation4 + $0xe8] sm:$0xff]  ;;  %v9140_v20 = vpack.c.bf16 %v830_v13, %v826_v12  ;;  %v839_v22 = vld [vmem:[#allocation4 + $0xf8] sm:$0xff]  ;;  %v832_v23 = vld [vmem:[#allocation4 + $0xc0] sm:$0xff] }
 0x1cb   :  { %6724 = vmatpush1.bf16.msra.mxu1 %v9129_v2  ;;  %6694 = vmatprep.subr.bf16.mxu0 %v9131_v3  ;;  %v9142_v21 = vpack.c.bf16 %v837_v18, %v833_v17  ;;  %v836_v24 = vld [vmem:[#allocation4 + $0xe0] sm:$0xff]  ;;  %v9145_v25 = vpack.c.bf16 %v839_v22, %v835_v19  ;;  %v834_v26 = vld [vmem:[#allocation4 + $0xd0] sm:$0xff]  ;;  %v841_v28 = vld [vmem:[#allocation4 + $0x108] sm:$0xff] }
 0x1cc   :  { %6726 = vmatprep.subr.bf16.mxu1 %v9133_v7  ;;  %v838_v27 = vld [vmem:[#allocation4 + $0xf0] sm:$0xff]  ;;  %v845_v29 = vld [vmem:[#allocation4 + $0x128] sm:$0xff]  ;;  %v843_v30 = vld [vmem:[#allocation4 + $0x118] sm:$0xff]  ;;  %v9148_v33 = vpack.c.bf16 %v836_v24, %v832_v23 }
 0x1cd   :  { %v847_v32 = vld [vmem:[#allocation4 + $0x138] sm:$0xff]  ;;  %v9152_v35 = vpack.c.bf16 %v838_v27, %v834_v26  ;;  %v9154_v36 = vpack.c.bf16 %v845_v29, %v841_v28  ;;  %v840_v37 = vld [vmem:[#allocation4 + $0x100] sm:$0xff]  ;;  %v842_v40 = vld [vmem:[#allocation4 + $0x110] sm:$0xff] }
 0x1ce   :  { %6696 = vmatpush1.bf16.msra.mxu0 %v9136_v15  ;;  %v844_v39 = vld [vmem:[#allocation4 + $0x120] sm:$0xff]  ;;  %v9157_v41 = vpack.c.bf16 %v847_v32, %v843_v30  ;;  %v846_v44 = vld [vmem:[#allocation4 + $0x130] sm:$0xff]  ;;  %v849_v45 = vld [vmem:[#allocation4 + $0x148] sm:$0xff] }
 0x1cf   :  { %6728 = vmatpush1.bf16.msra.mxu1 %v9140_v20  ;;  %6698 = vmatprep.subr.bf16.mxu0 %v9142_v21  ;;  %v853_v46 = vld [vmem:[#allocation4 + $0x168] sm:$0xff]  ;;  %v851_v48 = vld [vmem:[#allocation4 + $0x158] sm:$0xff]  ;;  %v9160_v50 = vpack.c.bf16 %v844_v39, %v840_v37  ;;  %v9164_v53 = vpack.c.bf16 %v846_v44, %v842_v40  ;;  %v848_v55 = vld [vmem:[#allocation4 + $0x140] sm:$0xff] }
 0x1d0   :  { %6730 = vmatprep.subr.bf16.mxu1 %v9145_v25  ;;  %v855_v49 = vld [vmem:[#allocation4 + $0x178] sm:$0xff]  ;;  %v9166_v54 = vpack.c.bf16 %v853_v46, %v849_v45  ;;  %v852_v57 = vld [vmem:[#allocation4 + $0x160] sm:$0xff]  ;;  %v850_v59 = vld [vmem:[#allocation4 + $0x150] sm:$0xff] }
 0x1d1   :  { %v9169_v63 = vpack.c.bf16 %v855_v49, %v851_v48  ;;  %v854_v4 = vld [vmem:[#allocation4 + $0x170] sm:$0xff]  ;;  %v857_v5 = vld [vmem:[#allocation4 + $0x188] sm:$0xff]  ;;  %v859_v8 = vld [vmem:[#allocation4 + $0x198] sm:$0xff]  ;;  %v9172_v13 = vpack.c.bf16 %v852_v57, %v848_v55 }
 0x1d2   :  { %6700 = vmatpush1.bf16.msra.mxu0 %v9148_v33  ;;  %v861_v6 = vld [vmem:[#allocation4 + $0x1a8] sm:$0xff]  ;;  %v863_v12 = vld [vmem:[#allocation4 + $0x1b8] sm:$0xff]  ;;  %v9176_v17 = vpack.c.bf16 %v854_v4, %v850_v59  ;;  %v856_v19 = vld [vmem:[#allocation4 + $0x180] sm:$0xff] }
 0x1d3   :  { %6732 = vmatpush1.bf16.msra.mxu1 %v9152_v35  ;;  %6702 = vmatprep.subr.bf16.mxu0 %v9154_v36  ;;  %v9178_v18 = vpack.c.bf16 %v861_v6, %v857_v5  ;;  %v860_v22 = vld [vmem:[#allocation4 + $0x1a0] sm:$0xff]  ;;  %v858_v23 = vld [vmem:[#allocation4 + $0x190] sm:$0xff]  ;;  %v9181_v24 = vpack.c.bf16 %v863_v12, %v859_v8  ;;  %v865_v27 = vld [vmem:[#allocation4 + $0x1c8] sm:$0xff] }
 0x1d4   :  { %6734 = vmatprep.subr.bf16.mxu1 %v9157_v41  ;;  %v862_v26 = vld [vmem:[#allocation4 + $0x1b0] sm:$0xff]  ;;  %v869_v28 = vld [vmem:[#allocation4 + $0x1e8] sm:$0xff]  ;;  %v867_v29 = vld [vmem:[#allocation4 + $0x1d8] sm:$0xff]  ;;  %v9184_v32 = vpack.c.bf16 %v860_v22, %v856_v19 }
 0x1d5   :  { %v871_v30 = vld [vmem:[#allocation4 + $0x1f8] sm:$0xff]  ;;  %v9188_v37 = vpack.c.bf16 %v862_v26, %v858_v23  ;;  %v9190_v39 = vpack.c.bf16 %v869_v28, %v865_v27  ;;  %v864_v40 = vld [vmem:[#allocation4 + $0x1c0] sm:$0xff]  ;;  %v866_v45 = vld [vmem:[#allocation4 + $0x1d0] sm:$0xff] }
 0x1d6   :  { %6704 = vmatpush1.bf16.msra.mxu0 %v9160_v50  ;;  %v868_v44 = vld [vmem:[#allocation4 + $0x1e0] sm:$0xff]  ;;  %v9193_v46 = vpack.c.bf16 %v871_v30, %v867_v29  ;;  %v870_v48 = vld [vmem:[#allocation4 + $0x1f0] sm:$0xff]  ;;  %v1037_v49 = vld [vmem:[#allocation5 + $0x8] sm:$0xff] }
 0x1d7   :  { %6736 = vmatpush1.bf16.msra.mxu1 %v9164_v53  ;;  %6706 = vmatprep.subr.bf16.mxu0 %v9166_v54  ;;  %v1041_v55 = vld [vmem:[#allocation5 + $0x28] sm:$0xff]  ;;  %v1039_v57 = vld [vmem:[#allocation5 + $0x18] sm:$0xff]  ;;  %v9196_v4 = vpack.c.bf16 %v868_v44, %v864_v40  ;;  %v9200_v5 = vpack.c.bf16 %v870_v48, %v866_v45  ;;  %v1036_v8 = vld [vmem:[#allocation5] sm:$0xff] }
 0x1d8   :  { %6738 = vmatprep.subr.bf16.mxu1 %v9169_v63  ;;  %v1043_v59 = vld [vmem:[#allocation5 + $0x38] sm:$0xff]  ;;  %v9202_v6 = vpack.c.bf16 %v1041_v55, %v1037_v49  ;;  %v1040_v12 = vld [vmem:[#allocation5 + $0x20] sm:$0xff]  ;;  %v1038_v19 = vld [vmem:[#allocation5 + $0x10] sm:$0xff] }
 0x1d9   :  { %v9205_v22 = vpack.c.bf16 %v1043_v59, %v1039_v57  ;;  %v1042_v23 = vld [vmem:[#allocation5 + $0x30] sm:$0xff]  ;;  %v1045_v26 = vld [vmem:[#allocation5 + $0x48] sm:$0xff]  ;;  %v1047_v28 = vld [vmem:[#allocation5 + $0x58] sm:$0xff]  ;;  %v9208_v30 = vpack.c.bf16 %v1040_v12, %v1036_v8 }
 0x1da   :  { %6708 = vmatpush1.bf16.msra.mxu0 %v9172_v13  ;;  %v1049_v27 = vld [vmem:[#allocation5 + $0x68] sm:$0xff]  ;;  %v1051_v29 = vld [vmem:[#allocation5 + $0x78] sm:$0xff]  ;;  %v9212_v40 = vpack.c.bf16 %v1042_v23, %v1038_v19  ;;  %v1044_v45 = vld [vmem:[#allocation5 + $0x40] sm:$0xff] }
 0x1db   :  { %6740 = vmatpush1.bf16.msra.mxu1 %v9176_v17  ;;  %6710 = vmatprep.subr.bf16.mxu0 %v9178_v18  ;;  %11081 = vst [vmem:[#allocation45_spill] sm:$0xff] %v9208_v30  ;;  %v9214_v44 = vpack.c.bf16 %v1049_v27, %v1045_v26  ;;  %v1048_v48 = vld [vmem:[#allocation5 + $0x60] sm:$0xff]  ;;  %v1046_v49 = vld [vmem:[#allocation5 + $0x50] sm:$0xff]  ;;  %v9217_v55 = vpack.c.bf16 %v1051_v29, %v1047_v28  ;;  %v1053_v59 = vld [vmem:[#allocation5 + $0x88] sm:$0xff] }
 0x1dc   :  { %6742 = vmatprep.subr.bf16.mxu1 %v9181_v24  ;;  %11082 = vst [vmem:[#allocation46_spill] sm:$0xff] %v9212_v40  ;;  %v1050_v57 = vld [vmem:[#allocation5 + $0x70] sm:$0xff]  ;;  %v1057_v11 = vld [vmem:[#allocation5 + $0xa8] sm:$0xff]  ;;  %v1055_v8 = vld [vmem:[#allocation5 + $0x98] sm:$0xff]  ;;  %v9222_v19 = vpack.c.bf16 %v1048_v48, %v1044_v45  ;;  %v11089_v45 = vmov 0.0  }
 0x1dd   :  { %11083 = vst [vmem:[#allocation47_spill] sm:$0xff] %v9214_v44  ;;  %11084 = vst [vmem:[#allocation48_spill] sm:$0xff] %v9217_v55  ;;  %v1059_v12 = vld [vmem:[#allocation5 + $0xb8] sm:$0xff]  ;;  %v9226_v23 = vpack.c.bf16 %v1050_v57, %v1046_v49  ;;  %v9228_v26 = vpack.c.bf16 %v1057_v11, %v1053_v59  ;;  %v1052_v27 = vld [vmem:[#allocation5 + $0x80] sm:$0xff] }
 0x1de   :  { %6712 = vmatpush1.bf16.msra.mxu0 %v9184_v32  ;;  %11085 = vst [vmem:[#allocation49_spill] sm:$0xff] %v9222_v19  ;;  %v1056_v28 = vld [vmem:[#allocation5 + $0xa0] sm:$0xff]  ;;  %v1054_v29 = vld [vmem:[#allocation5 + $0x90] sm:$0xff]  ;;  %v9231_v9 = vpack.c.bf16 %v1059_v12, %v1055_v8  ;;  %v1061_v16 = vld [vmem:[#allocation5 + $0xc8] sm:$0xff] }
 0x1df   :  { %6744 = vmatpush1.bf16.msra.mxu1 %v9188_v37  ;;  %6714 = vmatprep.subr.bf16.mxu0 %v9190_v39  ;;  %11086 = vst [vmem:[#allocation50_spill] sm:$0xff] %v9226_v23  ;;  %11087 = vst [vmem:[#allocation51_spill] sm:$0xff] %v9228_v26  ;;  %v1058_v31 = vld [vmem:[#allocation5 + $0xb0] sm:$0xff]  ;;  %v1063_v48 = vld [vmem:[#allocation5 + $0xd8] sm:$0xff]  ;;  %v9236_v11 = vpack.c.bf16 %v1056_v28, %v1052_v27 }
 0x1e0   :  { %6746 = vmatprep.subr.bf16.mxu1 %v9193_v46  ;;  %11088 = vst [vmem:[#allocation52_spill] sm:$0xff] %v9231_v9  ;;  %v9240_v49 = vpack.c.bf16 %v1058_v31, %v1054_v29  ;;  %v1060_v59 = vld [vmem:[#allocation5 + $0xc0] sm:$0xff]  ;;  %v1062_v12 = vld [vmem:[#allocation5 + $0xd0] sm:$0xff]  ;;  %v1069_v14 = vld [vmem:[#allocation5 + $0x108] sm:$0xff] }
 0x1e1   :  { %11090 = vst [vmem:[#allocation53_spill] sm:$0xff] %v9236_v11  ;;  %v1064_v8 = vld [vmem:[#allocation5 + $0xe0] sm:$0xff]  ;;  %v1071_v27 = vld [vmem:[#allocation5 + $0x118] sm:$0xff]  ;;  %v1070_v29 = vld [vmem:[#allocation5 + $0x110] sm:$0xff] }
 0x1e2   :  { %6716 = vmatpush1.bf16.msra.mxu0 %v9196_v4  ;;  %11091 = vst [vmem:[#allocation54_spill] sm:$0xff] %v9240_v49  ;;  %v1075_v28 = vld [vmem:[#allocation5 + $0x138] sm:$0xff] }
 0x1e3   :  { %6748 = vmatpush1.bf16.msra.mxu1 %v9200_v5  ;;  %6750 = vmatprep.subr.bf16.mxu0 %v9202_v6 }
 0x1e4   :  { %6782 = vmatprep.subr.bf16.mxu1 %v9205_v22 }
 0x1e5   :  { %959 = vmatmul.mubr.f32.vlgmr.msra.gmra.mrb[16].mxu0 %v9105_v34 }
 0x1e6   :  { %1030 = vmatmul.mubr.f32.vlgmr.msra.gmra.mrb[18].mxu1 %v9105_v34  ;;  %6752 = vmatpush1.bf16.msra.mxu0 %v9208_v30  ;;  %v1065_v30 = vld [vmem:[#allocation5 + $0xe8] sm:$0xff] }
 0x1e7   :  { %6784 = vmatpush1.bf16.msra.mxu1 %v9212_v40  ;;  %6754 = vmatprep.subr.bf16.mxu0 %v9214_v44  ;;  %v1067_v40 = vld [vmem:[#allocation5 + $0xf8] sm:$0xff]  ;;  %v9242_v57 = vpack.c.bf16 %v1065_v30, %v1061_v16  ;;  %v1066_v44 = vld [vmem:[#allocation5 + $0xf0] sm:$0xff]  ;;  %v1068_v30 = vld [vmem:[#allocation5 + $0x100] sm:$0xff] }
 0x1e8   :  { %6786 = vmatprep.subr.bf16.mxu1 %v9217_v55  ;;  %1164 = vmatprep.mubr.f32.mxu0 %v11089_v45  ;;  %v9245_v55 = vpack.c.bf16 %v1067_v40, %v1063_v48  ;;  %v9252_v16 = vpack.c.bf16 %v1066_v44, %v1062_v12  ;;  %v1072_v40 = vld [vmem:[#allocation5 + $0x120] sm:$0xff]  ;;  %v9257_v48 = vpack.c.bf16 %v1075_v28, %v1071_v27  ;;  %v1078_v27 = vld [vmem:[#allocation5 + $0x150] sm:$0xff] }
 0x1e9   :  { %1235 = vmatprep.mubr.f32.mxu1 %v11089_v45  ;;  %11092 = vst [vmem:[#allocation55_spill] sm:$0xff] %v9242_v57  ;;  %v1080_v12 = vld [vmem:[#allocation5 + $0x160] sm:$0xff] }
 0x1ea   :  { %6756 = vmatpush1.bf16.msra.mxu0 %v9222_v19  ;;  %11093 = vst [vmem:[#allocation56_spill] sm:$0xff] %v9245_v55  ;;  %v1073_v19 = vld [vmem:[#allocation5 + $0x128] sm:$0xff]  ;;  %11095 = vst [vmem:[#allocation58_spill] sm:$0xff] %v9252_v16 }
 0x1eb   :  { %6788 = vmatpush1.bf16.msra.mxu1 %v9226_v23  ;;  %6758 = vmatprep.subr.bf16.mxu0 %v9228_v26  ;;  %v9248_v23 = vpack.c.bf16 %v1064_v8, %v1060_v59  ;;  %v9254_v31 = vpack.c.bf16 %v1073_v19, %v1069_v14  ;;  %11097 = vst [vmem:[#allocation60_spill] sm:$0xff] %v9257_v48  ;;  %v1077_v26 = vld [vmem:[#allocation5 + $0x148] sm:$0xff]  ;;  %v1079_v59 = vld [vmem:[#allocation5 + $0x158] sm:$0xff]  ;;  %v1076_v19 = vld [vmem:[#allocation5 + $0x140] sm:$0xff] }
 0x1ec   :  { %6790 = vmatprep.subr.bf16.mxu1 %v9231_v9  ;;  %v1074_v9 = vld [vmem:[#allocation5 + $0x130] sm:$0xff]  ;;  %v1083_v8 = vld [vmem:[#allocation5 + $0x178] sm:$0xff] }
 0x1ed   :  { %11094 = vst [vmem:[#allocation57_spill] sm:$0xff] %v9248_v23  ;;  %11096 = vst [vmem:[#allocation59_spill] sm:$0xff] %v9254_v31  ;;  %v9264_v14 = vpack.c.bf16 %v1074_v9, %v1070_v29  ;;  %v9269_v28 = vpack.c.bf16 %v1083_v8, %v1079_v59  ;;  %v1088_v29 = vld [vmem:[#allocation5 + $0x1a0] sm:$0xff]  ;;  %v1086_v59 = vld [vmem:[#allocation5 + $0x190] sm:$0xff] }
 0x1ee   :  { %6760 = vmatpush1.bf16.msra.mxu0 %v9236_v11  ;;  %v1081_v11 = vld [vmem:[#allocation5 + $0x168] sm:$0xff] }
 0x1ef   :  { %6792 = vmatpush1.bf16.msra.mxu1 %v9240_v49  ;;  %6762 = vmatprep.subr.bf16.mxu0 %v9242_v57  ;;  %v9260_v49 = vpack.c.bf16 %v1072_v40, %v1068_v30  ;;  %11099 = vst [vmem:[#allocation62_spill] sm:$0xff] %v9264_v14  ;;  %v9266_v44 = vpack.c.bf16 %v1081_v11, %v1077_v26  ;;  %11101 = vst [vmem:[#allocation64_spill] sm:$0xff] %v9269_v28  ;;  %v1085_v57 = vld [vmem:[#allocation5 + $0x188] sm:$0xff]  ;;  %v1087_v30 = vld [vmem:[#allocation5 + $0x198] sm:$0xff] }
 0x1f0   :  { %6794 = vmatprep.subr.bf16.mxu1 %v9245_v55  ;;  %v1082_v55 = vld [vmem:[#allocation5 + $0x170] sm:$0xff]  ;;  %v1091_v40 = vld [vmem:[#allocation5 + $0x1b8] sm:$0xff]  ;;  %v1084_v11 = vld [vmem:[#allocation5 + $0x180] sm:$0xff] }
 0x1f1   :  { %11098 = vst [vmem:[#allocation61_spill] sm:$0xff] %v9260_v49  ;;  %11100 = vst [vmem:[#allocation63_spill] sm:$0xff] %v9266_v44  ;;  %v9276_v9 = vpack.c.bf16 %v1082_v55, %v1078_v27  ;;  %v9281_v8 = vpack.c.bf16 %v1091_v40, %v1087_v30  ;;  %v1096_v27 = vld [vmem:[#allocation5 + $0x1e0] sm:$0xff]  ;;  %v1094_v30 = vld [vmem:[#allocation5 + $0x1d0] sm:$0xff] }
 0x1f2   :  { %6764 = vmatpush1.bf16.msra.mxu0 %v9248_v23  ;;  %v1089_v23 = vld [vmem:[#allocation5 + $0x1a8] sm:$0xff] }
 0x1f3   :  { %6796 = vmatpush1.bf16.msra.mxu1 %v9252_v16  ;;  %6766 = vmatprep.subr.bf16.mxu0 %v9254_v31  ;;  %v9272_v16 = vpack.c.bf16 %v1080_v12, %v1076_v19  ;;  %11103 = vst [vmem:[#allocation66_spill] sm:$0xff] %v9276_v9  ;;  %v9278_v26 = vpack.c.bf16 %v1089_v23, %v1085_v57  ;;  %11105 = vst [vmem:[#allocation68_spill] sm:$0xff] %v9281_v8  ;;  %v1093_v31 = vld [vmem:[#allocation5 + $0x1c8] sm:$0xff]  ;;  %v1095_v19 = vld [vmem:[#allocation5 + $0x1d8] sm:$0xff] }
 0x1f4   :  { %6798 = vmatprep.subr.bf16.mxu1 %v9257_v48  ;;  %v1090_v48 = vld [vmem:[#allocation5 + $0x1b0] sm:$0xff]  ;;  %v1099_v12 = vld [vmem:[#allocation5 + $0x1f8] sm:$0xff]  ;;  %v1092_v57 = vld [vmem:[#allocation5 + $0x1c0] sm:$0xff] }
 0x1f5   :  { %11102 = vst [vmem:[#allocation65_spill] sm:$0xff] %v9272_v16  ;;  %11104 = vst [vmem:[#allocation67_spill] sm:$0xff] %v9278_v26  ;;  %v9288_v55 = vpack.c.bf16 %v1090_v48, %v1086_v59  ;;  %v9293_v40 = vpack.c.bf16 %v1099_v12, %v1095_v19  ;;  %v1275_v48 = vld [vmem:[#allocation16] sm:$0xff]  ;;  %v1284_v19 = vld [vmem:[#allocation16 + $0x48] sm:$0xff] }
 0x1f6   :  { %6768 = vmatpush1.bf16.msra.mxu0 %v9260_v49  ;;  %v1097_v49 = vld [vmem:[#allocation5 + $0x1e8] sm:$0xff]  ;;  %v1279_v59 = vld [vmem:[#allocation16 + $0x20] sm:$0xff] }
 0x1f7   :  { %6800 = vmatpush1.bf16.msra.mxu1 %v9264_v14  ;;  %6770 = vmatprep.subr.bf16.mxu0 %v9266_v44  ;;  %v9284_v14 = vpack.c.bf16 %v1088_v29, %v1084_v11  ;;  %11107 = vst [vmem:[#allocation70_spill] sm:$0xff] %v9288_v55  ;;  %v9290_v23 = vpack.c.bf16 %v1097_v49, %v1093_v31  ;;  %11109 = vst [vmem:[#allocation72_spill] sm:$0xff] %v9293_v40  ;;  %v1276_v44 = vld [vmem:[#allocation16 + $0x8] sm:$0xff]  ;;  %v1278_v11 = vld [vmem:[#allocation16 + $0x18] sm:$0xff] }
 0x1f8   :  { %6802 = vmatprep.subr.bf16.mxu1 %v9269_v28  ;;  %v1098_v28 = vld [vmem:[#allocation5 + $0x1f0] sm:$0xff]  ;;  %v1282_v29 = vld [vmem:[#allocation16 + $0x38] sm:$0xff]  ;;  %v1288_v12 = vld [vmem:[#allocation16 + $0x68] sm:$0xff] }
 0x1f9   :  { %11106 = vst [vmem:[#allocation69_spill] sm:$0xff] %v9284_v14  ;;  %11108 = vst [vmem:[#allocation71_spill] sm:$0xff] %v9290_v23  ;;  %v9300_v49 = vpack.c.bf16 %v1098_v28, %v1094_v30  ;;  %v1287_v28 = vld [vmem:[#allocation16 + $0x60] sm:$0xff]  ;;  %v1292_v30 = vld [vmem:[#allocation16 + $0x88] sm:$0xff] }
 0x1fa   :  { %6772 = vmatpush1.bf16.msra.mxu0 %v9272_v16  ;;  %v1280_v16 = vld [vmem:[#allocation16 + $0x28] sm:$0xff] }
 0x1fb   :  { %6804 = vmatpush1.bf16.msra.mxu1 %v9276_v9  ;;  %6774 = vmatprep.subr.bf16.mxu0 %v9278_v26  ;;  %v9296_v9 = vpack.c.bf16 %v1096_v27, %v1092_v57  ;;  %v9302_v31 = vpack.c.bf16 %v1280_v16, %v1276_v44  ;;  %v1277_v26 = vld [vmem:[#allocation16 + $0x10] sm:$0xff]  ;;  %v1286_v57 = vld [vmem:[#allocation16 + $0x58] sm:$0xff]  ;;  %v9312_v16 = vpack.c.bf16 %v1288_v12, %v1284_v19  ;;  %v1283_v44 = vld [vmem:[#allocation16 + $0x40] sm:$0xff] }
 0x1fc   :  { %6806 = vmatprep.subr.bf16.mxu1 %v9281_v8  ;;  %v9305_v8 = vpack.c.bf16 %v1282_v29, %v1278_v11  ;;  %v1290_v27 = vld [vmem:[#allocation16 + $0x78] sm:$0xff]  ;;  %v1296_v11 = vld [vmem:[#allocation16 + $0xa8] sm:$0xff]  ;;  %v9322_v19 = vpack.c.bf16 %v1287_v28, %v1283_v44  ;;  %v1295_v12 = vld [vmem:[#allocation16 + $0xa0] sm:$0xff] }
 0x1fd   :  { %11110 = vst [vmem:[#allocation73_spill] sm:$0xff] %v9296_v9  ;;  %11111 = vst [vmem:[#allocation74_spill] sm:$0xff] %v9302_v31  ;;  %v9317_v29 = vpack.c.bf16 %v1290_v27, %v1286_v57  ;;  %v1300_v57 = vld [vmem:[#allocation16 + $0xc8] sm:$0xff]  ;;  %v1302_v44 = vld [vmem:[#allocation16 + $0xd8] sm:$0xff] }
 0x1fe   :  { %6776 = vmatpush1.bf16.msra.mxu0 %v9284_v14  ;;  %11112 = vst [vmem:[#allocation75_spill] sm:$0xff] %v9305_v8  ;;  %v1281_v14 = vld [vmem:[#allocation16 + $0x30] sm:$0xff]  ;;  %11114 = vst [vmem:[#allocation77_spill] sm:$0xff] %v9312_v16  ;;  %v1306_v28 = vld [vmem:[#allocation16 + $0xf8] sm:$0xff] }
 0x1ff   :  { %6808 = vmatpush1.bf16.msra.mxu1 %v9288_v55  ;;  %6778 = vmatprep.subr.bf16.mxu0 %v9290_v23  ;;  %v9308_v55 = vpack.c.bf16 %v1279_v59, %v1275_v48  ;;  %11116 = vst [vmem:[#allocation79_spill] sm:$0xff] %v9317_v29  ;;  %v1285_v23 = vld [vmem:[#allocation16 + $0x50] sm:$0xff]  ;;  %v1294_v48 = vld [vmem:[#allocation16 + $0x98] sm:$0xff]  ;;  %11117 = vst [vmem:[#allocation80_spill] sm:$0xff] %v9322_v19 }
 0x200   :  { %6810 = vmatprep.subr.bf16.mxu1 %v9293_v40  ;;  %v9314_v40 = vpack.c.bf16 %v1281_v14, %v1277_v26  ;;  %v1298_v59 = vld [vmem:[#allocation16 + $0xb8] sm:$0xff]  ;;  %v9325_v14 = vpack.c.bf16 %v1296_v11, %v1292_v30  ;;  %v1291_v26 = vld [vmem:[#allocation16 + $0x80] sm:$0xff] }
 0x201   :  { %11113 = vst [vmem:[#allocation76_spill] sm:$0xff] %v9308_v55  ;;  %v9336_v30 = vpack.c.bf16 %v1295_v12, %v1291_v26  ;;  %v1303_v11 = vld [vmem:[#allocation16 + $0xe0] sm:$0xff]  ;;  %v1310_v26 = vld [vmem:[#allocation16 + $0x118] sm:$0xff] }
 0x202   :  { %6780 = vmatpush1.bf16.msra.mxu0 %v9296_v9  ;;  %11115 = vst [vmem:[#allocation78_spill] sm:$0xff] %v9314_v40  ;;  %v1289_v9 = vld [vmem:[#allocation16 + $0x70] sm:$0xff]  ;;  %11118 = vst [vmem:[#allocation81_spill] sm:$0xff] %v9325_v14  ;;  %v1314_v12 = vld [vmem:[#allocation16 + $0x138] sm:$0xff] }
 0x203   :  { %6812 = vmatpush1.bf16.msra.mxu1 %v9300_v49  ;;  %6814 = vmatprep.subr.bf16.mxu0 %v9302_v31  ;;  %v9328_v27 = vpack.c.bf16 %v1289_v9, %v1285_v23  ;;  %v9331_v31 = vpack.c.bf16 %v1298_v59, %v1294_v48  ;;  %11121 = vst [vmem:[#allocation84_spill] sm:$0xff] %v9336_v30  ;;  %v1299_v23 = vld [vmem:[#allocation16 + $0xc0] sm:$0xff]  ;;  %v1308_v48 = vld [vmem:[#allocation16 + $0x108] sm:$0xff] }
 0x204   :  { %6846 = vmatprep.subr.bf16.mxu1 %v9305_v8  ;;  %v1304_v8 = vld [vmem:[#allocation16 + $0xe8] sm:$0xff] }
 0x205   :  { %1165 = vmatmul.mubr.f32.vlgmr.msra.gmra.mrb[16].mxu0 %v9009_v0  ;;  %11119 = vst [vmem:[#allocation82_spill] sm:$0xff] %v9328_v27  ;;  %11120 = vst [vmem:[#allocation83_spill] sm:$0xff] %v9331_v31  ;;  %v9339_v9 = vpack.c.bf16 %v1304_v8, %v1300_v57  ;;  %v9348_v8 = vpack.c.bf16 %v1303_v11, %v1299_v23  ;;  %v1318_v23 = vld [vmem:[#allocation16 + $0x158] sm:$0xff] }
 0x206   :  { %1236 = vmatmul.mubr.f32.vlgmr.msra.gmra.mrb[18].mxu1 %v9009_v0  ;;  %6816 = vmatpush1.bf16.msra.mxu0 %v9308_v55  ;;  %v1293_v0 = vld [vmem:[#allocation16 + $0x90] sm:$0xff]  ;;  %v1322_v11 = vld [vmem:[#allocation16 + $0x178] sm:$0xff] }
 0x207   :  { %6818 = vmatprep.subr.bf16.mxu0 %v9312_v16  ;;  %6848 = vmatpush1.bf16.msra.mxu1 %v9314_v40  ;;  %v1297_v55 = vld [vmem:[#allocation16 + $0xb0] sm:$0xff]  ;;  %11122 = vst [vmem:[#allocation85_spill] sm:$0xff] %v9339_v9  ;;  %v9345_v16 = vpack.c.bf16 %v1306_v28, %v1302_v44  ;;  %11125 = vst [vmem:[#allocation88_spill] sm:$0xff] %v9348_v8  ;;  %v1320_v44 = vld [vmem:[#allocation16 + $0x168] sm:$0xff]  ;;  %v9357_v28 = vpack.c.bf16 %v1314_v12, %v1310_v26 }
 0x208   :  { %6850 = vmatprep.subr.bf16.mxu1 %v9317_v29  ;;  %1403 = vmatprep.mubr.f32.mxu0 %v11089_v45  ;;  %v9342_v59 = vpack.c.bf16 %v1297_v55, %v1293_v0  ;;  %v1312_v29 = vld [vmem:[#allocation16 + $0x128] sm:$0xff]  ;;  %v1301_v40 = vld [vmem:[#allocation16 + $0xd0] sm:$0xff]  ;;  %v1311_v55 = vld [vmem:[#allocation16 + $0x120] sm:$0xff]  ;;  %v9369_v12 = vpack.c.bf16 %v1322_v11, %v1318_v23 }
 0x209   :  { %1474 = vmatprep.mubr.f32.mxu1 %v11089_v45  ;;  %11124 = vst [vmem:[#allocation87_spill] sm:$0xff] %v9345_v16  ;;  %v9351_v57 = vpack.c.bf16 %v1312_v29, %v1308_v48  ;;  %v1316_v0 = vld [vmem:[#allocation16 + $0x148] sm:$0xff]  ;;  %11128 = vst [vmem:[#allocation91_spill] sm:$0xff] %v9357_v28 }
 0x20a   :  { %6820 = vmatpush1.bf16.msra.mxu0 %v9322_v19  ;;  %11123 = vst [vmem:[#allocation86_spill] sm:$0xff] %v9342_v59  ;;  %v1305_v19 = vld [vmem:[#allocation16 + $0xf0] sm:$0xff]  ;;  %v9363_v48 = vpack.c.bf16 %v1320_v44, %v1316_v0  ;;  %v1328_v26 = vld [vmem:[#allocation16 + $0x1a8] sm:$0xff]  ;;  %11131 = vst [vmem:[#allocation94_spill] sm:$0xff] %v9369_v12 }
 0x20b   :  { %6822 = vmatprep.subr.bf16.mxu0 %v9325_v14  ;;  %6852 = vmatpush1.bf16.msra.mxu1 %v9328_v27  ;;  %11126 = vst [vmem:[#allocation89_spill] sm:$0xff] %v9351_v57  ;;  %v1307_v14 = vld [vmem:[#allocation16 + $0x100] sm:$0xff]  ;;  %v1309_v27 = vld [vmem:[#allocation16 + $0x110] sm:$0xff]  ;;  %v1336_v23 = vld [vmem:[#allocation16 + $0x1e8] sm:$0xff] }
 0x20c   :  { %6854 = vmatprep.subr.bf16.mxu1 %v9331_v31  ;;  %v9354_v31 = vpack.c.bf16 %v1305_v19, %v1301_v40  ;;  %v9360_v29 = vpack.c.bf16 %v1311_v55, %v1307_v14  ;;  %11130 = vst [vmem:[#allocation93_spill] sm:$0xff] %v9363_v48  ;;  %v1319_v40 = vld [vmem:[#allocation16 + $0x160] sm:$0xff]  ;;  %v1324_v19 = vld [vmem:[#allocation16 + $0x188] sm:$0xff]  ;;  %v1326_v14 = vld [vmem:[#allocation16 + $0x198] sm:$0xff] }
 0x20d   :  { %v1330_v55 = vld [vmem:[#allocation16 + $0x1b8] sm:$0xff]  ;;  %v9375_v44 = vpack.c.bf16 %v1328_v26, %v1324_v19 }
 0x20e   :  { %6824 = vmatpush1.bf16.msra.mxu0 %v9336_v30  ;;  %11127 = vst [vmem:[#allocation90_spill] sm:$0xff] %v9354_v31  ;;  %v1313_v30 = vld [vmem:[#allocation16 + $0x130] sm:$0xff]  ;;  %11129 = vst [vmem:[#allocation92_spill] sm:$0xff] %v9360_v29  ;;  %v9381_v11 = vpack.c.bf16 %v1330_v55, %v1326_v14 }
 0x20f   :  { %6826 = vmatprep.subr.bf16.mxu0 %v9339_v9  ;;  %6856 = vmatpush1.bf16.msra.mxu1 %v9342_v59  ;;  %v1315_v9 = vld [vmem:[#allocation16 + $0x140] sm:$0xff]  ;;  %v1317_v59 = vld [vmem:[#allocation16 + $0x150] sm:$0xff] }
 0x210   :  { %6858 = vmatprep.subr.bf16.mxu1 %v9345_v16  ;;  %v9366_v16 = vpack.c.bf16 %v1313_v30, %v1309_v27  ;;  %v9372_v0 = vpack.c.bf16 %v1319_v40, %v1315_v9  ;;  %v1327_v27 = vld [vmem:[#allocation16 + $0x1a0] sm:$0xff]  ;;  %v1332_v30 = vld [vmem:[#allocation16 + $0x1c8] sm:$0xff]  ;;  %v1334_v9 = vld [vmem:[#allocation16 + $0x1d8] sm:$0xff] }
 0x211   :  { %v1338_v40 = vld [vmem:[#allocation16 + $0x1f8] sm:$0xff]  ;;  %v9387_v26 = vpack.c.bf16 %v1336_v23, %v1332_v30  ;;  %v1333_v55 = vld [vmem:[#allocation16 + $0x1d0] sm:$0xff] }
 0x212   :  { %6828 = vmatpush1.bf16.msra.mxu0 %v9348_v8  ;;  %v1321_v8 = vld [vmem:[#allocation16 + $0x170] sm:$0xff]  ;;  %v9393_v14 = vpack.c.bf16 %v1338_v40, %v1334_v9 }
 0x213   :  { %6830 = vmatprep.subr.bf16.mxu0 %v9351_v57  ;;  %6860 = vmatpush1.bf16.msra.mxu1 %v9354_v31  ;;  %v1323_v57 = vld [vmem:[#allocation16 + $0x180] sm:$0xff]  ;;  %v1325_v31 = vld [vmem:[#allocation16 + $0x190] sm:$0xff] }
 0x214   :  { %6862 = vmatprep.subr.bf16.mxu1 %v9357_v28  ;;  %v9378_v28 = vpack.c.bf16 %v1321_v8, %v1317_v59  ;;  %v9384_v19 = vpack.c.bf16 %v1327_v27, %v1323_v57  ;;  %v1335_v59 = vld [vmem:[#allocation16 + $0x1e0] sm:$0xff] }
 0x216   :  { %6832 = vmatpush1.bf16.msra.mxu0 %v9360_v29  ;;  %v1329_v29 = vld [vmem:[#allocation16 + $0x1b0] sm:$0xff] }
 0x217   :  { %6834 = vmatprep.subr.bf16.mxu0 %v9363_v48  ;;  %6864 = vmatpush1.bf16.msra.mxu1 %v9366_v16  ;;  %v1331_v48 = vld [vmem:[#allocation16 + $0x1c0] sm:$0xff]  ;;  %v9390_v8 = vpack.c.bf16 %v1329_v29, %v1325_v31 }
 0x218   :  { %6866 = vmatprep.subr.bf16.mxu1 %v9369_v12  ;;  %v1337_v12 = vld [vmem:[#allocation16 + $0x1f0] sm:$0xff]  ;;  %v9396_v57 = vpack.c.bf16 %v1335_v59, %v1331_v48 }
 0x219   :  { %v9400_v27 = vpack.c.bf16 %v1337_v12, %v1333_v55 }
 0x21a   :  { %6836 = vmatpush1.bf16.msra.mxu0 %v9372_v0 }
 0x21b   :  { %6838 = vmatprep.subr.bf16.mxu0 %v9375_v44  ;;  %6868 = vmatpush1.bf16.msra.mxu1 %v9378_v28 }
 0x21c   :  { %6870 = vmatprep.subr.bf16.mxu1 %v9381_v11 }
 0x21e   :  { %6840 = vmatpush1.bf16.msra.mxu0 %v9384_v19 }
 0x21f   :  { %6842 = vmatprep.subr.bf16.mxu0 %v9387_v26  ;;  %6872 = vmatpush1.bf16.msra.mxu1 %v9390_v8 }
 0x220   :  { %6874 = vmatprep.subr.bf16.mxu1 %v9393_v14 }
 0x222   :  { %6844 = vmatpush1.bf16.msra.mxu0 %v9396_v57 }
 0x223   :  { %6876 = vmatpush1.bf16.msra.mxu1 %v9400_v27  ;;  %6878 = vmatprep.subr.bf16.mxu0 %v9109_v38 }
 0x224   :  { %6910 = vmatprep.subr.bf16.mxu1 %v9111_v42 }
 0x225   :  { %1404 = vmatmul.mubr.f32.vlgmr.msra.gmra.mrb[2].mxu0 %v9105_v34 }
 0x226   :  { %1475 = vmatmul.mubr.f32.vlgmr.msra.gmra.mrb[2].mxu1 %v9105_v34  ;;  %6880 = vmatpush1.bf16.msra.mxu0 %v9113_v43  ;;  %v872_v34 = vld [vmem:[%s10850_s8] sm:$0xf] }
 0x227   :  { %6912 = vmatpush1.bf16.msra.mxu1 %v9116_v47  ;;  %6882 = vmatprep.subr.bf16.mxu0 %v9120_v51  ;;  %v877_v38 = vrot.slane %v872_v34, %v9075_v58  ;;  %v881_v42 = vrot.slane %v872_v34, %v9080_v60 }
 0x228   :  { %6914 = vmatprep.subr.bf16.mxu1 %v9122_v52  ;;  %1659 = vmatprep.mubr.f32.mxu0 %v11089_v45 }
 0x229   :  { %1730 = vmatprep.mubr.f32.mxu1 %v11089_v45 }
 0x22a   :  { %6884 = vmatpush1.bf16.msra.mxu0 %v9125_v56 }
 0x22b   :  { %6916 = vmatpush1.bf16.msra.mxu1 %v9129_v2  ;;  %6886 = vmatprep.subr.bf16.mxu0 %v9131_v3 }
 0x22c   :  { %6918 = vmatprep.subr.bf16.mxu1 %v9133_v7 }
 0x22e   :  { %6888 = vmatpush1.bf16.msra.mxu0 %v9136_v15  ;;  %v889_v15 = vrot.slane %v872_v34, %v9092_v10 }
 0x22f   :  { %6920 = vmatpush1.bf16.msra.mxu1 %v9140_v20  ;;  %6890 = vmatprep.subr.bf16.mxu0 %v9142_v21 }
 0x230   :  { %6922 = vmatprep.subr.bf16.mxu1 %v9145_v25 }
 0x232   :  { %6892 = vmatpush1.bf16.msra.mxu0 %v9148_v33 }
 0x233   :  { %6924 = vmatpush1.bf16.msra.mxu1 %v9152_v35  ;;  %6894 = vmatprep.subr.bf16.mxu0 %v9154_v36 }
 0x234   :  { %6926 = vmatprep.subr.bf16.mxu1 %v9157_v41 }
 0x236   :  { %6896 = vmatpush1.bf16.msra.mxu0 %v9160_v50 }
 0x237   :  { %6928 = vmatpush1.bf16.msra.mxu1 %v9164_v53  ;;  %6898 = vmatprep.subr.bf16.mxu0 %v9166_v54 }
 0x238   :  { %6930 = vmatprep.subr.bf16.mxu1 %v9169_v63 }
 0x23a   :  { %6900 = vmatpush1.bf16.msra.mxu0 %v9172_v13 }
 0x23b   :  { %6932 = vmatpush1.bf16.msra.mxu1 %v9176_v17  ;;  %6902 = vmatprep.subr.bf16.mxu0 %v9178_v18 }
 0x23c   :  { %6934 = vmatprep.subr.bf16.mxu1 %v9181_v24 }
 0x23e   :  { %6904 = vmatpush1.bf16.msra.mxu0 %v9184_v32 }
 0x23f   :  { %6936 = vmatpush1.bf16.msra.mxu1 %v9188_v37  ;;  %6906 = vmatprep.subr.bf16.mxu0 %v9190_v39 }
 0x240   :  { %6938 = vmatprep.subr.bf16.mxu1 %v9193_v46 }
 0x242   :  { %6908 = vmatpush1.bf16.msra.mxu0 %v9196_v4  ;;  %v11132_v4 = vld [vmem:[#allocation42_spill] sm:$0xff] }
 0x243   :  { %6940 = vmatpush1.bf16.msra.mxu1 %v9200_v5  ;;  %6942 = vmatprep.subr.bf16.mxu0 %v9202_v6 }
 0x244   :  { %6974 = vmatprep.subr.bf16.mxu1 %v9205_v22  ;;  %v11133_v22 = vld [vmem:[#allocation43_spill] sm:$0xff] }
 0x2d8   :  { %v1166_v43 = vpop.f32.mrb[16].mxu0 }
 0x2d9   :  { %v8223_v47 = vadd.f32 %v1166_v43, %v877_v38  ;;  %v1237_v51 = vpop.f32.mrb[18].mxu1  ;;  %v1168_v52 = vpop.f32.mrb[17].mxu0  ;;  %v11134_v38 = vld [vmem:[#allocation44_spill] sm:$0xff] }
 0x2da   :  { %v8224_v56 = vadd.f32 %v1168_v52, %v881_v42  ;;  %v1239_v2 = vpop.f32.mrb[19].mxu1 }
 0x2db   :  { %v6424_v3 = vmul.f32 -1.442695, %v8223_v47  ;;  %v8226_v20 = vadd.f32 %v1239_v2, %v889_v15  ;;  %v11135_v47 = vld [vmem:[#allocation40_spill] sm:$0xff] }
 0x2dc   :  { %v6425_v7 = vmul.f32 -1.442695, %v8224_v56  ;;  %v885_v52 = vrot.slane %v872_v34, %v11135_v47  ;;  %v11140_v34 = vld [vmem:[#allocation49_spill] sm:$0xff] }
 0x2dd   :  { %8351 = vpow2.f32 %v6424_v3 }
 0x2de   :  { %8353 = vpow2.f32 %v6425_v7  ;;  %v8225_v56 = vadd.f32 %v1237_v51, %v885_v52  ;;  %v11141_v51 = vld [vmem:[#allocation50_spill] sm:$0xff]  ;;  %v11167_v52 = vld [vmem:[#allocation75_spill] sm:$0xff] }
 0x2df   :  { %8355 = vtanh.f32 %v8226_v20  ;;  %v11136_v20 = vld [vmem:[#allocation45_spill] sm:$0xff] }
 0x2e0   :  { %v6426_v7 = vmul.f32 -1.442695, %v8225_v56  ;;  %v11168_v56 = vld [vmem:[#allocation76_spill] sm:$0xff] }
 0x2e7   :  { %v8352_v21 = vpop.eup %8351 }
 0x2e8   :  { %v1255_v25 = vadd.f32 1.0, %v8352_v21  ;;  %v8354_v33 = vpop.eup %8353  ;;  %v11137_v21 = vld [vmem:[#allocation46_spill] sm:$0xff] }
 0x2e9   :  { %v1256_v35 = vadd.f32 1.0, %v8354_v33  ;;  %v8356_v36 = vpop.eup %8355  ;;  %v11139_v33 = vld [vmem:[#allocation48_spill] sm:$0xff] }
 0x2ea   :  { %8357 = vrcp.f32 %v1255_v25  ;;  %v11138_v25 = vld [vmem:[#allocation47_spill] sm:$0xff] }
 0x2eb   :  { %8359 = vrcp.f32 %v1256_v35  ;;  %v11142_v35 = vld [vmem:[#allocation51_spill] sm:$0xff] }
 0x2f4   :  { %v8358_v41 = vpop.eup %8357 }
 0x2f5   :  { %v1266_v50 = vmul.f32 %v8358_v41, %v8356_v36  ;;  %v8360_v53 = vpop.eup %8359  ;;  %v11143_v36 = vld [vmem:[#allocation52_spill] sm:$0xff]  ;;  %v11144_v41 = vld [vmem:[#allocation53_spill] sm:$0xff] }
 0x2f6   :  { %v1265_v54 = vmul.f32 %v8360_v53, %v9011_v1  ;;  %v11146_v53 = vld [vmem:[#allocation55_spill] sm:$0xff] }
 0x2f8   :  { %v1405_v63 = vpop.f32.mrb[2].mxu0  ;;  %v9450_v13 = vadd.f32 %v1266_v50, %v1265_v54  ;;  %v11145_v50 = vld [vmem:[#allocation54_spill] sm:$0xff]  ;;  %v11147_v54 = vld [vmem:[#allocation56_spill] sm:$0xff] }
 0x2f9   :  { %v8193_v17 = vadd.f32 %v1405_v63, %v9083_v61  ;;  %v1407_v18 = vpop.f32.mrb[3].mxu0  ;;  %v1476_v24 = vpop.f32.mrb[2].mxu1 }
 0x2fa   :  { %v8194_v32 = vadd.f32 %v1407_v18, %v9086_v62  ;;  %v1478_v37 = vpop.f32.mrb[3].mxu1  ;;  %v8209_v5 = vadd.f32 %v1476_v24, %v11132_v4  ;;  %v11149_v18 = vld [vmem:[#allocation58_spill] sm:$0xff]  ;;  %v11150_v24 = vld [vmem:[#allocation59_spill] sm:$0xff] }
 0x2fb   :  { %v6427_v39 = vmul.f32 -1.442695, %v8193_v17  ;;  %v8210_v31 = vadd.f32 %v1478_v37, %v11133_v22  ;;  %v11148_v17 = vld [vmem:[#allocation57_spill] sm:$0xff] }
 0x2fc   :  { %v6428_v46 = vmul.f32 -1.442695, %v8194_v32  ;;  %v6429_v6 = vmul.f32 -1.442695, %v8209_v5  ;;  %v11151_v32 = vld [vmem:[#allocation60_spill] sm:$0xff]  ;;  %v11154_v5 = vld [vmem:[#allocation63_spill] sm:$0xff] }
 0x2fd   :  { %8361 = vpow2.f32 %v6427_v39  ;;  %v11152_v39 = vld [vmem:[#allocation61_spill] sm:$0xff] }
 0x2fe   :  { %8363 = vpow2.f32 %v6428_v46  ;;  %v11153_v46 = vld [vmem:[#allocation62_spill] sm:$0xff] }
 0x2ff   :  { %8365 = vpow2.f32 %v6429_v6  ;;  %v11155_v6 = vld [vmem:[#allocation64_spill] sm:$0xff] }
 0x300   :  { %8367 = vtanh.f32 %v8210_v31  ;;  %v11156_v31 = vld [vmem:[#allocation65_spill] sm:$0xff] }
 0x307   :  { %v8362_v1 = vpop.eup %8361 }
 0x308   :  { %v8364_v29 = vpop.eup %8363  ;;  %v1494_v48 = vadd.f32 1.0, %v8362_v1  ;;  %v11157_v1 = vld [vmem:[#allocation66_spill] sm:$0xff] }
 0x309   :  { %v1495_v12 = vadd.f32 1.0, %v8364_v29  ;;  %v8366_v30 = vpop.eup %8365  ;;  %v11158_v29 = vld [vmem:[#allocation67_spill] sm:$0xff] }
 0x30a   :  { %8369 = vrcp.f32 %v1494_v48  ;;  %v8368_v23 = vpop.eup %8367  ;;  %v1496_v40 = vadd.f32 1.0, %v8366_v30  ;;  %v11159_v48 = vld [vmem:[#allocation68_spill] sm:$0xff]  ;;  %v11161_v30 = vld [vmem:[#allocation70_spill] sm:$0xff] }
 0x30b   :  { %8371 = vrcp.f32 %v1495_v12  ;;  %v11160_v12 = vld [vmem:[#allocation69_spill] sm:$0xff] }
 0x30c   :  { %8373 = vrcp.f32 %v1496_v40 }
 0x314   :  { %v8370_v9 = vpop.eup %8369 }
 0x315   :  { %v8372_v59 = vpop.eup %8371  ;;  %v1505_v55 = vmul.f32 %v8370_v9, %v8368_v23  ;;  %v11162_v23 = vld [vmem:[#allocation71_spill] sm:$0xff]  ;;  %v11163_v9 = vld [vmem:[#allocation72_spill] sm:$0xff] }
 0x316   :  { %v1504_v42 = vmul.f32 %v8372_v59, %v11134_v38  ;;  %v8374_v2 = vpop.eup %8373 }
 0x318   :  { %v9457_v43 = vadd.f32 %v1505_v55, %v1504_v42  ;;  %v11164_v55 = vld [vmem:[#allocation73_spill] sm:$0xff]  ;;  %v11166_v42 = vld [vmem:[#allocation74_spill] sm:$0xff] }
 0x31a   :  { %8375 = vtanh.f32 %v9457_v43 }
 0x31b   :  { %8377 = vpow2.f32 %v6426_v7  ;;  %v11171_v7 = vld [vmem:[#allocation79_spill] sm:$0xff] }
 0x31c   :  { %8379 = vtanh.f32 %v9450_v13 }
 0x324   :  { %v8376_v3 = vpop.eup %8375 }
 0x325   :  { %v9461_v15 = vmul.f32 %v8376_v3, %v8374_v2  ;;  %v8378_v63 = vpop.eup %8377  ;;  %v11169_v2 = vld [vmem:[#allocation78_spill] sm:$0xff]  ;;  %v11170_v3 = vld [vmem:[#allocation77_spill] sm:$0xff] }
 0x326   :  { %v1257_v37 = vadd.f32 1.0, %v8378_v63  ;;  %v8380_v40 = vpop.eup %8379  ;;  %v11185_v63 = vld [vmem:[#allocation93_spill] sm:$0xff] }
 0x327   :  { %1660 = vmatmul.mubr.f32.vlgmr.msra.gmra.mrb[18].mxu0 %v9461_v15  ;;  %1731 = vmatmul.mubr.f32.vlgmr.msra.gmra.mrb[20].mxu1 %v9461_v15 }
 0x328   :  { %6944 = vmatpush1.bf16.msra.mxu0 %v11136_v20  ;;  %6976 = vmatpush1.bf16.msra.mxu1 %v11137_v21  ;;  %8381 = vrcp.f32 %v1257_v37  ;;  %v11173_v20 = vld [vmem:[#allocation82_spill] sm:$0xff]  ;;  %v11174_v21 = vld [vmem:[#allocation81_spill] sm:$0xff] }
 0x329   :  { %6946 = vmatprep.subr.bf16.mxu0 %v11138_v25  ;;  %6978 = vmatprep.subr.bf16.mxu1 %v11139_v33  ;;  %v11175_v25 = vld [vmem:[#allocation83_spill] sm:$0xff]  ;;  %v11176_v33 = vld [vmem:[#allocation84_spill] sm:$0xff] }
 0x32a   :  { %1865 = vmatprep.mubr.f32.mxu0 %v11089_v45  ;;  %1936 = vmatprep.mubr.f32.mxu1 %v11089_v45 }
 0x32c   :  { %6948 = vmatpush1.bf16.msra.mxu0 %v11140_v34  ;;  %6980 = vmatpush1.bf16.msra.mxu1 %v11141_v51  ;;  %v11177_v34 = vld [vmem:[#allocation86_spill] sm:$0xff]  ;;  %v11178_v51 = vld [vmem:[#allocation85_spill] sm:$0xff] }
 0x32d   :  { %6950 = vmatprep.subr.bf16.mxu0 %v11142_v35  ;;  %6982 = vmatprep.subr.bf16.mxu1 %v11143_v36  ;;  %v11179_v35 = vld [vmem:[#allocation87_spill] sm:$0xff]  ;;  %v11180_v36 = vld [vmem:[#allocation88_spill] sm:$0xff] }
 0x330   :  { %6952 = vmatpush1.bf16.msra.mxu0 %v11144_v41  ;;  %6984 = vmatpush1.bf16.msra.mxu1 %v11145_v50  ;;  %v11181_v41 = vld [vmem:[#allocation90_spill] sm:$0xff]  ;;  %v11182_v50 = vld [vmem:[#allocation89_spill] sm:$0xff] }
 0x331   :  { %6954 = vmatprep.subr.bf16.mxu0 %v11146_v53  ;;  %6986 = vmatprep.subr.bf16.mxu1 %v11147_v54  ;;  %v11183_v53 = vld [vmem:[#allocation91_spill] sm:$0xff]  ;;  %v11184_v54 = vld [vmem:[#allocation92_spill] sm:$0xff] }
 0x332   :  { %v8382_v59 = vpop.eup %8381 }
 0x333   :  { %v9498_v38 = vmul.f32 %v8382_v59, %v8380_v40  ;;  %v2233_v40 = vld [vmem:[#allocation4 + $0xb8] sm:$0xff]  ;;  %v2226_v59 = vld [vmem:[#allocation4 + $0x80] sm:$0xff] }
 0x334   :  { %6956 = vmatpush1.bf16.msra.mxu0 %v11148_v17  ;;  %6988 = vmatpush1.bf16.msra.mxu1 %v11149_v18  ;;  %v11186_v17 = vld [vmem:[#allocation94_spill] sm:$0xff] }
 0x335   :  { %6958 = vmatprep.subr.bf16.mxu0 %v11150_v24  ;;  %6990 = vmatprep.subr.bf16.mxu1 %v11151_v32  ;;  %11165 = vst [vmem:[#allocation44_spill] sm:$0xff] %v9498_v38  ;;  %v2219_v18 = vld [vmem:[#allocation4 + $0x48] sm:$0xff]  ;;  %v2221_v32 = vld [vmem:[#allocation4 + $0x58] sm:$0xff] }
 0x336   :  { %v2223_v24 = vld [vmem:[#allocation4 + $0x68] sm:$0xff] }
 0x337   :  { %v9552_v37 = vpack.c.bf16 %v2223_v24, %v2219_v18  ;;  %v2251_v18 = vld [vmem:[#allocation4 + $0x148] sm:$0xff] }
 0x338   :  { %6960 = vmatpush1.bf16.msra.mxu0 %v11152_v39  ;;  %6992 = vmatpush1.bf16.msra.mxu1 %v11153_v46  ;;  %v2225_v39 = vld [vmem:[#allocation4 + $0x78] sm:$0xff]  ;;  %v2218_v46 = vld [vmem:[#allocation4 + $0x40] sm:$0xff]  ;;  %v2255_v24 = vld [vmem:[#allocation4 + $0x168] sm:$0xff] }
 0x339   :  { %6962 = vmatprep.subr.bf16.mxu0 %v11154_v5  ;;  %6994 = vmatprep.subr.bf16.mxu1 %v11155_v6  ;;  %v2222_v5 = vld [vmem:[#allocation4 + $0x60] sm:$0xff]  ;;  %v9554_v6 = vpack.c.bf16 %v2225_v39, %v2221_v32  ;;  %v2253_v32 = vld [vmem:[#allocation4 + $0x158] sm:$0xff]  ;;  %v9600_v39 = vpack.c.bf16 %v2255_v24, %v2251_v18  ;;  %v2268_v18 = vld [vmem:[#allocation4 + $0x1d0] sm:$0xff] }
 0x33a   :  { %v2272_v24 = vld [vmem:[#allocation4 + $0x1f0] sm:$0xff] }
 0x33c   :  { %6964 = vmatpush1.bf16.msra.mxu0 %v11156_v31  ;;  %6996 = vmatpush1.bf16.msra.mxu1 %v11157_v1  ;;  %v9556_v31 = vpack.c.bf16 %v2222_v5, %v2218_v46  ;;  %v2220_v1 = vld [vmem:[#allocation4 + $0x50] sm:$0xff]  ;;  %v2257_v46 = vld [vmem:[#allocation4 + $0x178] sm:$0xff]  ;;  %v2250_v5 = vld [vmem:[#allocation4 + $0x140] sm:$0xff] }
 0x33d   :  { %6966 = vmatprep.subr.bf16.mxu0 %v11158_v29  ;;  %6998 = vmatprep.subr.bf16.mxu1 %v11159_v48  ;;  %v2224_v29 = vld [vmem:[#allocation4 + $0x70] sm:$0xff] }
 0x33e   :  { %v9559_v48 = vpack.c.bf16 %v2224_v29, %v2220_v1  ;;  %v2254_v1 = vld [vmem:[#allocation4 + $0x160] sm:$0xff]  ;;  %v9602_v29 = vpack.c.bf16 %v2257_v46, %v2253_v32  ;;  %v2439_v46 = vld [vmem:[#allocation5 + $0x8] sm:$0xff] }
 0x340   :  { %6968 = vmatpush1.bf16.msra.mxu0 %v11160_v12  ;;  %7000 = vmatpush1.bf16.msra.mxu1 %v11161_v30  ;;  %v2227_v12 = vld [vmem:[#allocation4 + $0x88] sm:$0xff] }
 0x341   :  { %6970 = vmatprep.subr.bf16.mxu0 %v11162_v23  ;;  %7002 = vmatprep.subr.bf16.mxu1 %v11163_v9  ;;  %v2231_v30 = vld [vmem:[#allocation4 + $0xa8] sm:$0xff]  ;;  %v2229_v23 = vld [vmem:[#allocation4 + $0x98] sm:$0xff] }
 0x342   :  { %v9564_v9 = vpack.c.bf16 %v2231_v30, %v2227_v12  ;;  %v9604_v12 = vpack.c.bf16 %v2254_v1, %v2250_v5  ;;  %v2252_v30 = vld [vmem:[#allocation4 + $0x150] sm:$0xff]  ;;  %v2443_v5 = vld [vmem:[#allocation5 + $0x28] sm:$0xff]  ;;  %v2441_v1 = vld [vmem:[#allocation5 + $0x18] sm:$0xff] }
 0x344   :  { %6972 = vmatpush1.bf16.msra.mxu0 %v11164_v55  ;;  %7004 = vmatpush1.bf16.msra.mxu1 %v9300_v49  ;;  %v11172_v49 = vld [vmem:[#allocation80_spill] sm:$0xff]  ;;  %v2230_v55 = vld [vmem:[#allocation4 + $0xa0] sm:$0xff] }
 0x345   :  { %7006 = vmatprep.subr.bf16.mxu0 %v11166_v42  ;;  %7038 = vmatprep.subr.bf16.mxu1 %v11167_v52  ;;  %v9566_v42 = vpack.c.bf16 %v2233_v40, %v2229_v23  ;;  %v9568_v52 = vpack.c.bf16 %v2230_v55, %v2226_v59  ;;  %v2256_v23 = vld [vmem:[#allocation4 + $0x170] sm:$0xff]  ;;  %v2259_v40 = vld [vmem:[#allocation4 + $0x188] sm:$0xff] }
 0x346   :  { %v9607_v59 = vpack.c.bf16 %v2256_v23, %v2252_v30  ;;  %v2263_v55 = vld [vmem:[#allocation4 + $0x1a8] sm:$0xff]  ;;  %v9631_v30 = vpack.c.bf16 %v2272_v24, %v2268_v18  ;;  %v9633_v23 = vpack.c.bf16 %v2443_v5, %v2439_v46 }
 0x347   :  { %1866 = vmatmul.mubr.f32.vlgmr.msra.gmra.mrb[18].mxu0 %v9498_v38  ;;  %1937 = vmatmul.mubr.f32.vlgmr.msra.gmra.mrb[20].mxu1 %v9498_v38 }
 0x348   :  { %7008 = vmatpush1.bf16.msra.mxu0 %v11168_v56  ;;  %7040 = vmatpush1.bf16.msra.mxu1 %v11169_v2  ;;  %v2228_v56 = vld [vmem:[#allocation4 + $0x90] sm:$0xff] }
 0x349   :  { %7010 = vmatprep.subr.bf16.mxu0 %v11170_v3  ;;  %7042 = vmatprep.subr.bf16.mxu1 %v11171_v7  ;;  %v2232_v2 = vld [vmem:[#allocation4 + $0xb0] sm:$0xff]  ;;  %v2235_v7 = vld [vmem:[#allocation4 + $0xc8] sm:$0xff] }
 0x34a   :  { %2104 = vmatprep.mubr.f32.mxu0 %v11089_v45  ;;  %2175 = vmatprep.mubr.f32.mxu1 %v11089_v45  ;;  %v9571_v3 = vpack.c.bf16 %v2232_v2, %v2228_v56  ;;  %v2261_v56 = vld [vmem:[#allocation4 + $0x198] sm:$0xff] }
 0x34b   :  { %v2265_v2 = vld [vmem:[#allocation4 + $0x1b8] sm:$0xff] }
 0x34c   :  { %7012 = vmatpush1.bf16.msra.mxu0 %v11172_v49  ;;  %7044 = vmatpush1.bf16.msra.mxu1 %v11173_v20  ;;  %v2239_v49 = vld [vmem:[#allocation4 + $0xe8] sm:$0xff]  ;;  %v2237_v20 = vld [vmem:[#allocation4 + $0xd8] sm:$0xff] }
 0x34d   :  { %7014 = vmatprep.subr.bf16.mxu0 %v11174_v21  ;;  %7046 = vmatprep.subr.bf16.mxu1 %v11175_v25  ;;  %v9576_v21 = vpack.c.bf16 %v2239_v49, %v2235_v7  ;;  %v2241_v25 = vld [vmem:[#allocation4 + $0xf8] sm:$0xff]  ;;  %v9611_v7 = vpack.c.bf16 %v2263_v55, %v2259_v40  ;;  %v9613_v49 = vpack.c.bf16 %v2265_v2, %v2261_v56  ;;  %v9645_v56 = vld [vmem:[%s10850_s8] sm:$0xf] }
 0x34e   :  { %v2445_v40 = vld [vmem:[#allocation5 + $0x38] sm:$0xff]  ;;  %v1578_v2 = vrot.slane %v9645_v56, %v9075_v58 }
 0x34f   :  { %v9636_v55 = vpack.c.bf16 %v2445_v40, %v2441_v1 }
 0x350   :  { %7016 = vmatpush1.bf16.msra.mxu0 %v11176_v33  ;;  %7048 = vmatpush1.bf16.msra.mxu1 %v11177_v34  ;;  %v2234_v33 = vld [vmem:[#allocation4 + $0xc0] sm:$0xff] }
 0x351   :  { %7018 = vmatprep.subr.bf16.mxu0 %v11178_v51  ;;  %7050 = vmatprep.subr.bf16.mxu1 %v11179_v35  ;;  %v2238_v34 = vld [vmem:[#allocation4 + $0xe0] sm:$0xff]  ;;  %v9578_v51 = vpack.c.bf16 %v2241_v25, %v2237_v20 }
 0x352   :  { %v9580_v35 = vpack.c.bf16 %v2238_v34, %v2234_v33  ;;  %v2258_v20 = vld [vmem:[#allocation4 + $0x180] sm:$0xff]  ;;  %v2260_v33 = vld [vmem:[#allocation4 + $0x190] sm:$0xff] }
 0x353   :  { %v2262_v25 = vld [vmem:[#allocation4 + $0x1a0] sm:$0xff] }
 0x354   :  { %7020 = vmatpush1.bf16.msra.mxu0 %v11180_v36  ;;  %7052 = vmatpush1.bf16.msra.mxu1 %v11181_v41  ;;  %v2236_v36 = vld [vmem:[#allocation4 + $0xd0] sm:$0xff]  ;;  %v9616_v34 = vpack.c.bf16 %v2262_v25, %v2258_v20  ;;  %v1582_v20 = vrot.slane %v9645_v56, %v9080_v60 }
 0x355   :  { %7022 = vmatprep.subr.bf16.mxu0 %v11182_v50  ;;  %7054 = vmatprep.subr.bf16.mxu1 %v11183_v53  ;;  %v2240_v41 = vld [vmem:[#allocation4 + $0xf0] sm:$0xff]  ;;  %v2243_v53 = vld [vmem:[#allocation4 + $0x108] sm:$0xff] }
 0x356   :  { %v9583_v50 = vpack.c.bf16 %v2240_v41, %v2236_v36  ;;  %v2264_v36 = vld [vmem:[#allocation4 + $0x1b0] sm:$0xff]  ;;  %v2267_v41 = vld [vmem:[#allocation4 + $0x1c8] sm:$0xff] }
 0x358   :  { %7024 = vmatpush1.bf16.msra.mxu0 %v11184_v54  ;;  %7056 = vmatpush1.bf16.msra.mxu1 %v9366_v16  ;;  %v2211_v16 = vld [vmem:[#allocation4 + $0x8] sm:$0xff] }
 0x359   :  { %7026 = vmatprep.subr.bf16.mxu0 %v11185_v63  ;;  %7058 = vmatprep.subr.bf16.mxu1 %v11186_v17  ;;  %v2247_v54 = vld [vmem:[#allocation4 + $0x128] sm:$0xff]  ;;  %v2245_v63 = vld [vmem:[#allocation4 + $0x118] sm:$0xff] }
 0x35a   :  { %v9588_v17 = vpack.c.bf16 %v2247_v54, %v2243_v53  ;;  %v2271_v53 = vld [vmem:[#allocation4 + $0x1e8] sm:$0xff]  ;;  %v9620_v54 = vpack.c.bf16 %v2264_v36, %v2260_v33 }
 0x35c   :  { %7028 = vmatpush1.bf16.msra.mxu0 %v9372_v0  ;;  %7060 = vmatpush1.bf16.msra.mxu1 %v9378_v28  ;;  %v2215_v28 = vld [vmem:[#allocation4 + $0x28] sm:$0xff]  ;;  %v2213_v0 = vld [vmem:[#allocation4 + $0x18] sm:$0xff] }
 0x35d   :  { %7030 = vmatprep.subr.bf16.mxu0 %v9375_v44  ;;  %7062 = vmatprep.subr.bf16.mxu1 %v9381_v11  ;;  %v9540_v44 = vpack.c.bf16 %v2215_v28, %v2211_v16  ;;  %v2217_v11 = vld [vmem:[#allocation4 + $0x38] sm:$0xff]  ;;  %v2242_v28 = vld [vmem:[#allocation4 + $0x100] sm:$0xff] }
 0x35e   :  { %v2249_v16 = vld [vmem:[#allocation4 + $0x138] sm:$0xff] }
 0x360   :  { %7032 = vmatpush1.bf16.msra.mxu0 %v9384_v19  ;;  %7064 = vmatpush1.bf16.msra.mxu1 %v9390_v8  ;;  %v2210_v19 = vld [vmem:[#allocation4] sm:$0xff]  ;;  %v9542_v8 = vpack.c.bf16 %v2217_v11, %v2213_v0  ;;  %v9590_v11 = vpack.c.bf16 %v2249_v16, %v2245_v63  ;;  %v9622_v63 = vpack.c.bf16 %v2271_v53, %v2267_v41  ;;  %v2269_v16 = vld [vmem:[#allocation4 + $0x1d8] sm:$0xff] }
 0x361   :  { %7034 = vmatprep.subr.bf16.mxu0 %v9387_v26  ;;  %7066 = vmatprep.subr.bf16.mxu1 %v9393_v14  ;;  %v2214_v26 = vld [vmem:[#allocation4 + $0x20] sm:$0xff] }
 0x362   :  { %v9544_v14 = vpack.c.bf16 %v2214_v26, %v2210_v19  ;;  %v2246_v0 = vld [vmem:[#allocation4 + $0x120] sm:$0xff]  ;;  %v2244_v26 = vld [vmem:[#allocation4 + $0x110] sm:$0xff] }
 0x363   :  { %v9592_v19 = vpack.c.bf16 %v2246_v0, %v2242_v28  ;;  %v2273_v28 = vld [vmem:[#allocation4 + $0x1f8] sm:$0xff]  ;;  %v2266_v0 = vld [vmem:[#allocation4 + $0x1c0] sm:$0xff] }
 0x364   :  { %7036 = vmatpush1.bf16.msra.mxu0 %v9396_v57  ;;  %7068 = vmatpush1.bf16.msra.mxu1 %v9400_v27  ;;  %v2212_v57 = vld [vmem:[#allocation4 + $0x10] sm:$0xff] }
 0x365   :  { %v2216_v27 = vld [vmem:[#allocation4 + $0x30] sm:$0xff]  ;;  %7070 = vmatprep.subr.bf16.mxu0 %v9540_v44  ;;  %7102 = vmatprep.subr.bf16.mxu1 %v9542_v8 }
 0x367   :  { %2105 = vmatmul.mubr.f32.vlgmr.msra.gmra.mrb[4].mxu0 %v9461_v15  ;;  %2176 = vmatmul.mubr.f32.vlgmr.msra.gmra.mrb[4].mxu1 %v9461_v15  ;;  %v9547_v15 = vpack.c.bf16 %v2216_v27, %v2212_v57  ;;  %v2248_v57 = vld [vmem:[#allocation4 + $0x130] sm:$0xff] }
 0x368   :  { %2360 = vmatprep.mubr.f32.mxu0 %v11089_v45  ;;  %2431 = vmatprep.mubr.f32.mxu1 %v11089_v45  ;;  %v9595_v27 = vpack.c.bf16 %v2248_v57, %v2244_v26  ;;  %v9624_v26 = vpack.c.bf16 %v2273_v28, %v2269_v16  ;;  %v2270_v57 = vld [vmem:[#allocation4 + $0x1e0] sm:$0xff] }
 0x369   :  { %7072 = vmatpush1.bf16.msra.mxu0 %v9544_v14  ;;  %7104 = vmatpush1.bf16.msra.mxu1 %v9547_v15  ;;  %v9627_v32 = vpack.c.bf16 %v2270_v57, %v2266_v0  ;;  %v1590_v57 = vrot.slane %v9645_v56, %v9092_v10 }
 0x36a   :  { %7074 = vmatprep.subr.bf16.mxu0 %v9552_v37  ;;  %7106 = vmatprep.subr.bf16.mxu1 %v9554_v6 }
 0x36d   :  { %7076 = vmatpush1.bf16.msra.mxu0 %v9556_v31  ;;  %7108 = vmatpush1.bf16.msra.mxu1 %v9559_v48 }
 0x36e   :  { %7078 = vmatprep.subr.bf16.mxu0 %v9564_v9  ;;  %7110 = vmatprep.subr.bf16.mxu1 %v9566_v42 }
 0x371   :  { %7080 = vmatpush1.bf16.msra.mxu0 %v9568_v52  ;;  %7112 = vmatpush1.bf16.msra.mxu1 %v9571_v3 }
 0x372   :  { %7082 = vmatprep.subr.bf16.mxu0 %v9576_v21  ;;  %7114 = vmatprep.subr.bf16.mxu1 %v9578_v51 }
 0x375   :  { %7084 = vmatpush1.bf16.msra.mxu0 %v9580_v35  ;;  %7116 = vmatpush1.bf16.msra.mxu1 %v9583_v50 }
 0x376   :  { %7086 = vmatprep.subr.bf16.mxu0 %v9588_v17  ;;  %7118 = vmatprep.subr.bf16.mxu1 %v9590_v11 }
 0x379   :  { %7088 = vmatpush1.bf16.msra.mxu0 %v9592_v19  ;;  %7120 = vmatpush1.bf16.msra.mxu1 %v9595_v27 }
 0x37a   :  { %7090 = vmatprep.subr.bf16.mxu0 %v9600_v39  ;;  %7122 = vmatprep.subr.bf16.mxu1 %v9602_v29 }
 0x37d   :  { %7092 = vmatpush1.bf16.msra.mxu0 %v9604_v12  ;;  %7124 = vmatpush1.bf16.msra.mxu1 %v9607_v59 }
 0x37e   :  { %7094 = vmatprep.subr.bf16.mxu0 %v9611_v7  ;;  %7126 = vmatprep.subr.bf16.mxu1 %v9613_v49 }
 0x381   :  { %7096 = vmatpush1.bf16.msra.mxu0 %v9616_v34  ;;  %7128 = vmatpush1.bf16.msra.mxu1 %v9620_v54 }
 0x382   :  { %7098 = vmatprep.subr.bf16.mxu0 %v9622_v63  ;;  %7130 = vmatprep.subr.bf16.mxu1 %v9624_v26 }
 0x385   :  { %7100 = vmatpush1.bf16.msra.mxu0 %v9627_v32  ;;  %7132 = vmatpush1.bf16.msra.mxu1 %v9631_v30 }
 0x386   :  { %7134 = vmatprep.subr.bf16.mxu0 %v9633_v23  ;;  %7166 = vmatprep.subr.bf16.mxu1 %v9636_v55 }
 0x41a   :  { %v1867_v25 = vpop.f32.mrb[18].mxu0  ;;  %v1938_v33 = vpop.f32.mrb[20].mxu1 }
 0x41b   :  { %v8227_v36 = vadd.f32 %v1867_v25, %v1578_v2  ;;  %v1869_v41 = vpop.f32.mrb[19].mxu0  ;;  %v1940_v53 = vpop.f32.mrb[21].mxu1 }
 0x41c   :  { %v8228_v16 = vadd.f32 %v1869_v41, %v1582_v20  ;;  %v8230_v18 = vadd.f32 %v1940_v53, %v1590_v57 }
 0x41d   :  { %v6430_v28 = vmul.f32 -1.442695, %v8227_v36 }
 0x41e   :  { %v6431_v0 = vmul.f32 -1.442695, %v8228_v16 }
 0x41f   :  { %8383 = vpow2.f32 %v6430_v28 }
 0x420   :  { %8385 = vpow2.f32 %v6431_v0 }
 0x421   :  { %8387 = vtanh.f32 %v8230_v18 }
 0x429   :  { %v8384_v24 = vpop.eup %8383 }
 0x42a   :  { %v1956_v46 = vadd.f32 1.0, %v8384_v24  ;;  %v8386_v5 = vpop.eup %8385 }
 0x42b   :  { %v1957_v1 = vadd.f32 1.0, %v8386_v5  ;;  %v8388_v40 = vpop.eup %8387 }
 0x42c   :  { %8389 = vrcp.f32 %v1956_v46 }
 0x42d   :  { %8391 = vrcp.f32 %v1957_v1 }
 0x436   :  { %v8390_v2 = vpop.eup %8389 }
 0x437   :  { %v1967_v25 = vmul.f32 %v8390_v2, %v8388_v40  ;;  %v8392_v38 = vpop.eup %8391 }
 0x438   :  { %v1966_v20 = vmul.f32 %v8392_v38, %v9450_v13 }
 0x43a   :  { %v2106_v36 = vpop.f32.mrb[4].mxu0  ;;  %v2177_v41 = vpop.f32.mrb[4].mxu1  ;;  %v9654_v16 = vadd.f32 %v1967_v25, %v1966_v20 }
 0x43b   :  { %v8195_v28 = vadd.f32 %v2106_v36, %v9083_v61  ;;  %v2108_v53 = vpop.f32.mrb[5].mxu0  ;;  %v2179_v0 = vpop.f32.mrb[5].mxu1  ;;  %v8211_v46 = vadd.f32 %v2177_v41, %v11132_v4  ;;  %v2459_v4 = vld [vmem:[#allocation5 + $0xa8] sm:$0xff]  ;;  %v2461_v61 = vld [vmem:[#allocation5 + $0xb8] sm:$0xff] }
 0x43c   :  { %v8196_v57 = vadd.f32 %v2108_v53, %v9086_v62  ;;  %v8212_v5 = vadd.f32 %v2179_v0, %v11133_v22  ;;  %v1586_v0 = vrot.slane %v9645_v56, %v11135_v47  ;;  %v2452_v47 = vld [vmem:[#allocation5 + $0x70] sm:$0xff]  ;;  %v2455_v22 = vld [vmem:[#allocation5 + $0x88] sm:$0xff]  ;;  %v2457_v62 = vld [vmem:[#allocation5 + $0x98] sm:$0xff] }
 0x43d   :  { %v6433_v18 = vmul.f32 -1.442695, %v8195_v28  ;;  %v6435_v1 = vmul.f32 -1.442695, %v8211_v46  ;;  %v2442_v46 = vld [vmem:[#allocation5 + $0x20] sm:$0xff] }
 0x43e   :  { %v6434_v24 = vmul.f32 -1.442695, %v8196_v57 }
 0x43f   :  { %8393 = vpow2.f32 %v6433_v18 }
 0x440   :  { %8395 = vpow2.f32 %v6434_v24  ;;  %v2438_v24 = vld [vmem:[#allocation5] sm:$0xff] }
 0x441   :  { %8397 = vtanh.f32 %v8212_v5  ;;  %v8229_v5 = vadd.f32 %v1938_v33, %v1586_v0  ;;  %v2448_v0 = vld [vmem:[#allocation5 + $0x50] sm:$0xff] }
 0x442   :  { %8399 = vpow2.f32 %v6435_v1  ;;  %v2440_v1 = vld [vmem:[#allocation5 + $0x10] sm:$0xff] }
 0x449   :  { %v8394_v13 = vpop.eup %8393 }
 0x44a   :  { %v2195_v38 = vadd.f32 1.0, %v8394_v13  ;;  %v8396_v40 = vpop.eup %8395  ;;  %v2444_v13 = vld [vmem:[#allocation5 + $0x30] sm:$0xff] }
 0x44b   :  { %v2196_v2 = vadd.f32 1.0, %v8396_v40  ;;  %v8398_v25 = vpop.eup %8397  ;;  %v2451_v40 = vld [vmem:[#allocation5 + $0x68] sm:$0xff] }
 0x44c   :  { %8401 = vrcp.f32 %v2195_v38  ;;  %v8400_v20 = vpop.eup %8399  ;;  %v2447_v38 = vld [vmem:[#allocation5 + $0x48] sm:$0xff] }
 0x44d   :  { %8403 = vrcp.f32 %v2196_v2  ;;  %v2197_v57 = vadd.f32 1.0, %v8400_v20  ;;  %v2449_v2 = vld [vmem:[#allocation5 + $0x58] sm:$0xff]  ;;  %v9672_v56 = vpack.c.bf16 %v2451_v40, %v2447_v38  ;;  %v9688_v38 = vpack.c.bf16 %v2461_v61, %v2457_v62  ;;  %v2456_v40 = vld [vmem:[#allocation5 + $0x90] sm:$0xff]  ;;  %v2462_v61 = vld [vmem:[#allocation5 + $0xc0] sm:$0xff] }
 0x44e   :  { %v2466_v62 = vld [vmem:[#allocation5 + $0xe0] sm:$0xff] }
 0x44f   :  { %8405 = vrcp.f32 %v2197_v57  ;;  %v2450_v57 = vld [vmem:[#allocation5 + $0x60] sm:$0xff]  ;;  %11189 = vst [vmem:[#allocation47_spill] sm:$0xff] %v9672_v56  ;;  %11194 = vst [vmem:[#allocation52_spill] sm:$0xff] %v9688_v38 }
 0x456   :  { %v8402_v36 = vpop.eup %8401 }
 0x457   :  { %v2206_v28 = vmul.f32 %v8402_v36, %v8398_v25  ;;  %v8404_v53 = vpop.eup %8403  ;;  %v2453_v25 = vld [vmem:[#allocation5 + $0x78] sm:$0xff] }
 0x458   :  { %v2205_v18 = vmul.f32 %v8404_v53, %v9457_v43  ;;  %v9666_v43 = vpack.c.bf16 %v2442_v46, %v2438_v24  ;;  %v2446_v53 = vld [vmem:[#allocation5 + $0x40] sm:$0xff]  ;;  %v9674_v33 = vpack.c.bf16 %v2453_v25, %v2449_v2  ;;  %v9682_v46 = vpack.c.bf16 %v2452_v47, %v2448_v0  ;;  %v2460_v2 = vld [vmem:[#allocation5 + $0xb0] sm:$0xff]  ;;  %v2463_v25 = vld [vmem:[#allocation5 + $0xc8] sm:$0xff] }
 0x459   :  { %v8406_v20 = vpop.eup %8405  ;;  %v9680_v24 = vpack.c.bf16 %v2450_v57, %v2446_v53  ;;  %v2469_v53 = vld [vmem:[#allocation5 + $0xf8] sm:$0xff]  ;;  %v2468_v0 = vld [vmem:[#allocation5 + $0xf0] sm:$0xff] }
 0x45a   :  { %v9661_v41 = vadd.f32 %v2206_v28, %v2205_v18  ;;  %v9668_v28 = vpack.c.bf16 %v2444_v13, %v2440_v1  ;;  %v6432_v18 = vmul.f32 -1.442695, %v8229_v5  ;;  %11190 = vst [vmem:[#allocation48_spill] sm:$0xff] %v9674_v33  ;;  %11192 = vst [vmem:[#allocation50_spill] sm:$0xff] %v9682_v46  ;;  %v2454_v5 = vld [vmem:[#allocation5 + $0x80] sm:$0xff]  ;;  %v9686_v13 = vpack.c.bf16 %v2459_v4, %v2455_v22 }
 0x45b   :  { %11191 = vst [vmem:[#allocation49_spill] sm:$0xff] %v9680_v24  ;;  %v2458_v1 = vld [vmem:[#allocation5 + $0xa0] sm:$0xff]  ;;  %v9696_v4 = vpack.c.bf16 %v2460_v2, %v2456_v40 }
 0x45c   :  { %11187 = vst [vmem:[#allocation45_spill] sm:$0xff] %v9661_v41  ;;  %8407 = vtanh.f32 %v9661_v41  ;;  %11188 = vst [vmem:[#allocation46_spill] sm:$0xff] %v9668_v28  ;;  %v9694_v47 = vpack.c.bf16 %v2458_v1, %v2454_v5  ;;  %v9706_v5 = vpack.c.bf16 %v2466_v62, %v2462_v61  ;;  %v2470_v40 = vld [vmem:[#allocation5 + $0x100] sm:$0xff] }
 0x45d   :  { %8409 = vpow2.f32 %v6432_v18  ;;  %11193 = vst [vmem:[#allocation51_spill] sm:$0xff] %v9686_v13  ;;  %11196 = vst [vmem:[#allocation54_spill] sm:$0xff] %v9696_v4  ;;  %v2464_v18 = vld [vmem:[#allocation5 + $0xd0] sm:$0xff]  ;;  %v2474_v2 = vld [vmem:[#allocation5 + $0x120] sm:$0xff] }
 0x45e   :  { %11195 = vst [vmem:[#allocation53_spill] sm:$0xff] %v9694_v47  ;;  %11199 = vst [vmem:[#allocation57_spill] sm:$0xff] %v9706_v5  ;;  %v9708_v1 = vpack.c.bf16 %v2468_v0, %v2464_v18  ;;  %v9718_v62 = vpack.c.bf16 %v2474_v2, %v2470_v40  ;;  %v2478_v0 = vld [vmem:[#allocation5 + $0x140] sm:$0xff]  ;;  %v2493_v40 = vld [vmem:[#allocation5 + $0x1b8] sm:$0xff]  ;;  %8411 = vtanh.f32 %v9654_v16 }
 0x460   :  { %11200 = vst [vmem:[#allocation58_spill] sm:$0xff] %v9708_v1  ;;  %11203 = vst [vmem:[#allocation61_spill] sm:$0xff] %v9718_v62 }
 0x466   :  { %v8408_v36 = vpop.eup %8407 }
 0x467   :  { %v9670_v41 = vmul.f32 %v8408_v36, %v8406_v20  ;;  %v2467_v20 = vld [vmem:[#allocation5 + $0xe8] sm:$0xff]  ;;  %v2465_v36 = vld [vmem:[#allocation5 + $0xd8] sm:$0xff]  ;;  %v8410_v61 = vpop.eup %8409 }
 0x468   :  { %v9700_v22 = vpack.c.bf16 %v2467_v20, %v2463_v25  ;;  %v9702_v57 = vpack.c.bf16 %v2469_v53, %v2465_v36  ;;  %v2472_v36 = vld [vmem:[#allocation5 + $0x110] sm:$0xff] }
 0x469   :  { %2361 = vmatmul.mubr.f32.vlgmr.msra.gmra.mrb[20].mxu0 %v9670_v41  ;;  %2432 = vmatmul.mubr.f32.vlgmr.msra.gmra.mrb[22].mxu1 %v9670_v41  ;;  %v2476_v53 = vld [vmem:[#allocation5 + $0x130] sm:$0xff] }
 0x46a   :  { %7136 = vmatpush1.bf16.msra.mxu0 %v9666_v43  ;;  %7168 = vmatpush1.bf16.msra.mxu1 %v9668_v28  ;;  %11197 = vst [vmem:[#allocation55_spill] sm:$0xff] %v9700_v22  ;;  %11198 = vst [vmem:[#allocation56_spill] sm:$0xff] %v9702_v57  ;;  %v9720_v18 = vpack.c.bf16 %v2476_v53, %v2472_v36  ;;  %v2491_v28 = vld [vmem:[#allocation5 + $0x1a8] sm:$0xff]  ;;  %v2488_v53 = vld [vmem:[#allocation5 + $0x190] sm:$0xff] }
 0x46b   :  { %7138 = vmatprep.subr.bf16.mxu0 %v9672_v56  ;;  %7170 = vmatprep.subr.bf16.mxu1 %v9674_v33  ;;  %v2471_v33 = vld [vmem:[#allocation5 + $0x108] sm:$0xff]  ;;  %v2473_v56 = vld [vmem:[#allocation5 + $0x118] sm:$0xff] }
 0x46c   :  { %2566 = vmatprep.mubr.f32.mxu0 %v11089_v45  ;;  %2637 = vmatprep.mubr.f32.mxu1 %v11089_v45  ;;  %11204 = vst [vmem:[#allocation62_spill] sm:$0xff] %v9720_v18 }
 0x46e   :  { %7140 = vmatpush1.bf16.msra.mxu0 %v9680_v24  ;;  %7172 = vmatpush1.bf16.msra.mxu1 %v9682_v46  ;;  %v2475_v24 = vld [vmem:[#allocation5 + $0x128] sm:$0xff]  ;;  %v2477_v46 = vld [vmem:[#allocation5 + $0x138] sm:$0xff] }
 0x46f   :  { %7142 = vmatprep.subr.bf16.mxu0 %v9686_v13  ;;  %7174 = vmatprep.subr.bf16.mxu1 %v9688_v38  ;;  %v9712_v25 = vpack.c.bf16 %v2475_v24, %v2471_v33  ;;  %v9714_v20 = vpack.c.bf16 %v2477_v46, %v2473_v56  ;;  %v2479_v38 = vld [vmem:[#allocation5 + $0x148] sm:$0xff]  ;;  %v2481_v13 = vld [vmem:[#allocation5 + $0x158] sm:$0xff]  ;;  %v2482_v33 = vld [vmem:[#allocation5 + $0x160] sm:$0xff] }
 0x470   :  { %v2480_v46 = vld [vmem:[#allocation5 + $0x150] sm:$0xff]  ;;  %v9731_v2 = vpack.c.bf16 %v2482_v33, %v2478_v0  ;;  %v2501_v0 = vld [vmem:[#allocation5 + $0x1f8] sm:$0xff] }
 0x471   :  { %11201 = vst [vmem:[#allocation59_spill] sm:$0xff] %v9712_v25  ;;  %11202 = vst [vmem:[#allocation60_spill] sm:$0xff] %v9714_v20 }
 0x472   :  { %7144 = vmatpush1.bf16.msra.mxu0 %v9694_v47  ;;  %7176 = vmatpush1.bf16.msra.mxu1 %v9696_v4  ;;  %v2483_v47 = vld [vmem:[#allocation5 + $0x168] sm:$0xff]  ;;  %v2485_v4 = vld [vmem:[#allocation5 + $0x178] sm:$0xff]  ;;  %11207 = vst [vmem:[#allocation65_spill] sm:$0xff] %v9731_v2 }
 0x473   :  { %7146 = vmatprep.subr.bf16.mxu0 %v9700_v22  ;;  %7178 = vmatprep.subr.bf16.mxu1 %v9702_v57  ;;  %v9724_v56 = vpack.c.bf16 %v2483_v47, %v2479_v38  ;;  %v9726_v24 = vpack.c.bf16 %v2485_v4, %v2481_v13  ;;  %v2484_v57 = vld [vmem:[#allocation5 + $0x170] sm:$0xff]  ;;  %v2487_v22 = vld [vmem:[#allocation5 + $0x188] sm:$0xff]  ;;  %v2486_v38 = vld [vmem:[#allocation5 + $0x180] sm:$0xff] }
 0x474   :  { %v9733_v36 = vpack.c.bf16 %v2484_v57, %v2480_v46  ;;  %v2490_v13 = vld [vmem:[#allocation5 + $0x1a0] sm:$0xff]  ;;  %v9737_v47 = vpack.c.bf16 %v2491_v28, %v2487_v22 }
 0x475   :  { %11205 = vst [vmem:[#allocation63_spill] sm:$0xff] %v9724_v56  ;;  %11206 = vst [vmem:[#allocation64_spill] sm:$0xff] %v9726_v24  ;;  %v9743_v57 = vpack.c.bf16 %v2490_v13, %v2486_v38  ;;  %v2494_v46 = vld [vmem:[#allocation5 + $0x1c0] sm:$0xff] }
 0x476   :  { %7148 = vmatpush1.bf16.msra.mxu0 %v9706_v5  ;;  %7180 = vmatpush1.bf16.msra.mxu1 %v9708_v1  ;;  %v1958_v5 = vadd.f32 1.0, %v8410_v61  ;;  %v2489_v1 = vld [vmem:[#allocation5 + $0x198] sm:$0xff]  ;;  %11208 = vst [vmem:[#allocation66_spill] sm:$0xff] %v9733_v36  ;;  %11209 = vst [vmem:[#allocation67_spill] sm:$0xff] %v9737_v47  ;;  %v2492_v61 = vld [vmem:[#allocation5 + $0x1b0] sm:$0xff] }
 0x477   :  { %7150 = vmatprep.subr.bf16.mxu0 %v9712_v25  ;;  %7182 = vmatprep.subr.bf16.mxu1 %v9714_v20  ;;  %v9739_v4 = vpack.c.bf16 %v2493_v40, %v2489_v1  ;;  %v2495_v20 = vld [vmem:[#allocation5 + $0x1c8] sm:$0xff]  ;;  %11211 = vst [vmem:[#allocation69_spill] sm:$0xff] %v9743_v57  ;;  %v9745_v33 = vpack.c.bf16 %v2492_v61, %v2488_v53  ;;  %v2498_v28 = vld [vmem:[#allocation5 + $0x1e0] sm:$0xff]  ;;  %v2496_v1 = vld [vmem:[#allocation5 + $0x1d0] sm:$0xff] }
 0x478   :  { %8413 = vrcp.f32 %v1958_v5  ;;  %v2500_v40 = vld [vmem:[#allocation5 + $0x1f0] sm:$0xff]  ;;  %v9755_v38 = vpack.c.bf16 %v2498_v28, %v2494_v46  ;;  %v2677_v53 = vld [vmem:[#allocation16] sm:$0xff]  ;;  %v2692_v46 = vld [vmem:[#allocation16 + $0x78] sm:$0xff] }
 0x479   :  { %11210 = vst [vmem:[#allocation68_spill] sm:$0xff] %v9739_v4  ;;  %11212 = vst [vmem:[#allocation70_spill] sm:$0xff] %v9745_v33  ;;  %v9757_v13 = vpack.c.bf16 %v2500_v40, %v2496_v1  ;;  %v2681_v61 = vld [vmem:[#allocation16 + $0x20] sm:$0xff]  ;;  %v2694_v25 = vld [vmem:[#allocation16 + $0x88] sm:$0xff] }
 0x47a   :  { %7152 = vmatpush1.bf16.msra.mxu0 %v9718_v62  ;;  %7184 = vmatpush1.bf16.msra.mxu1 %v9720_v18  ;;  %v2499_v62 = vld [vmem:[#allocation5 + $0x1e8] sm:$0xff]  ;;  %v2497_v18 = vld [vmem:[#allocation5 + $0x1d8] sm:$0xff]  ;;  %11215 = vst [vmem:[#allocation73_spill] sm:$0xff] %v9755_v38  ;;  %v9767_v1 = vpack.c.bf16 %v2681_v61, %v2677_v53 }
 0x47b   :  { %7154 = vmatprep.subr.bf16.mxu0 %v9724_v56  ;;  %7186 = vmatprep.subr.bf16.mxu1 %v9726_v24  ;;  %v9749_v22 = vpack.c.bf16 %v2499_v62, %v2495_v20  ;;  %v9751_v5 = vpack.c.bf16 %v2501_v0, %v2497_v18  ;;  %v2678_v24 = vld [vmem:[#allocation16 + $0x8] sm:$0xff]  ;;  %v2680_v56 = vld [vmem:[#allocation16 + $0x18] sm:$0xff]  ;;  %11216 = vst [vmem:[#allocation74_spill] sm:$0xff] %v9757_v13  ;;  %v2679_v18 = vld [vmem:[#allocation16 + $0x10] sm:$0xff] }
 0x47c   :  { %v2683_v0 = vld [vmem:[#allocation16 + $0x30] sm:$0xff]  ;;  %11218 = vst [vmem:[#allocation76_spill] sm:$0xff] %v9767_v1  ;;  %v2696_v53 = vld [vmem:[#allocation16 + $0x98] sm:$0xff] }
 0x47d   :  { %11213 = vst [vmem:[#allocation71_spill] sm:$0xff] %v9749_v22  ;;  %11214 = vst [vmem:[#allocation72_spill] sm:$0xff] %v9751_v5  ;;  %v9769_v40 = vpack.c.bf16 %v2683_v0, %v2679_v18  ;;  %v2700_v61 = vld [vmem:[#allocation16 + $0xb8] sm:$0xff] }
 0x47e   :  { %7156 = vmatpush1.bf16.msra.mxu0 %v9731_v2  ;;  %7188 = vmatpush1.bf16.msra.mxu1 %v9733_v36  ;;  %v2682_v2 = vld [vmem:[#allocation16 + $0x28] sm:$0xff]  ;;  %v2684_v36 = vld [vmem:[#allocation16 + $0x38] sm:$0xff]  ;;  %v9791_v0 = vpack.c.bf16 %v2700_v61, %v2696_v53  ;;  %v2703_v53 = vld [vmem:[#allocation16 + $0xd0] sm:$0xff] }
 0x47f   :  { %7158 = vmatprep.subr.bf16.mxu0 %v9737_v47  ;;  %7190 = vmatprep.subr.bf16.mxu1 %v9739_v4  ;;  %v9761_v20 = vpack.c.bf16 %v2682_v2, %v2678_v24  ;;  %v9763_v62 = vpack.c.bf16 %v2684_v36, %v2680_v56  ;;  %v2686_v4 = vld [vmem:[#allocation16 + $0x48] sm:$0xff]  ;;  %11219 = vst [vmem:[#allocation78_spill] sm:$0xff] %v9769_v40  ;;  %v2685_v24 = vld [vmem:[#allocation16 + $0x40] sm:$0xff]  ;;  %v2707_v61 = vld [vmem:[#allocation16 + $0xf0] sm:$0xff] }
 0x480   :  { %v2690_v47 = vld [vmem:[#allocation16 + $0x68] sm:$0xff]  ;;  %v2689_v2 = vld [vmem:[#allocation16 + $0x60] sm:$0xff]  ;;  %11226 = vst [vmem:[#allocation84_spill] sm:$0xff] %v9791_v0 }
 0x481   :  { %11217 = vst [vmem:[#allocation75_spill] sm:$0xff] %v9763_v62  ;;  %v9775_v36 = vpack.c.bf16 %v2690_v47, %v2686_v4  ;;  %v2693_v4 = vld [vmem:[#allocation16 + $0x80] sm:$0xff] }
 0x482   :  { %7160 = vmatpush1.bf16.msra.mxu0 %v9743_v57  ;;  %7192 = vmatpush1.bf16.msra.mxu1 %v9745_v33  ;;  %v8412_v57 = vpop.eup %8411  ;;  %v2688_v33 = vld [vmem:[#allocation16 + $0x58] sm:$0xff] }
 0x483   :  { %7162 = vmatprep.subr.bf16.mxu0 %v9749_v22  ;;  %7194 = vmatprep.subr.bf16.mxu1 %v9751_v5  ;;  %v8414_v28 = vpop.eup %8413  ;;  %11221 = vst [vmem:[#allocation79_spill] sm:$0xff] %v9775_v36  ;;  %v9777_v5 = vpack.c.bf16 %v2692_v46, %v2688_v33  ;;  %v2687_v22 = vld [vmem:[#allocation16 + $0x50] sm:$0xff]  ;;  %v2697_v33 = vld [vmem:[#allocation16 + $0xa0] sm:$0xff] }
 0x484   :  { %v9771_v56 = vmul.f32 %v8414_v28, %v8412_v57  ;;  %v9783_v57 = vpack.c.bf16 %v2689_v2, %v2685_v24  ;;  %v2695_v46 = vld [vmem:[#allocation16 + $0x90] sm:$0xff] }
 0x485   :  { %11222 = vst [vmem:[#allocation80_spill] sm:$0xff] %v9777_v5  ;;  %v2699_v28 = vld [vmem:[#allocation16 + $0xb0] sm:$0xff] }
 0x486   :  { %7164 = vmatpush1.bf16.msra.mxu0 %v9755_v38  ;;  %7196 = vmatpush1.bf16.msra.mxu1 %v9757_v13  ;;  %11220 = vst [vmem:[#allocation77_spill] sm:$0xff] %v9771_v56  ;;  %v2691_v38 = vld [vmem:[#allocation16 + $0x70] sm:$0xff]  ;;  %v2698_v13 = vld [vmem:[#allocation16 + $0xa8] sm:$0xff]  ;;  %11223 = vst [vmem:[#allocation82_spill] sm:$0xff] %v9783_v57 }
 0x487   :  { %7198 = vmatprep.subr.bf16.mxu0 %v9761_v20  ;;  %7230 = vmatprep.subr.bf16.mxu1 %v9763_v62  ;;  %v9785_v47 = vpack.c.bf16 %v2691_v38, %v2687_v22  ;;  %v9789_v18 = vpack.c.bf16 %v2698_v13, %v2694_v25  ;;  %v2704_v62 = vld [vmem:[#allocation16 + $0xd8] sm:$0xff]  ;;  %v9797_v22 = vpack.c.bf16 %v2697_v33, %v2693_v4  ;;  %v2701_v38 = vld [vmem:[#allocation16 + $0xc0] sm:$0xff] }
 0x488   :  { %v9799_v25 = vpack.c.bf16 %v2699_v28, %v2695_v46  ;;  %v2705_v13 = vld [vmem:[#allocation16 + $0xe0] sm:$0xff]  ;;  %v9811_v33 = vpack.c.bf16 %v2707_v61, %v2703_v53 }
 0x489   :  { %2567 = vmatmul.mubr.f32.vlgmr.msra.gmra.mrb[20].mxu0 %v9771_v56  ;;  %2638 = vmatmul.mubr.f32.vlgmr.msra.gmra.mrb[22].mxu1 %v9771_v56  ;;  %11224 = vst [vmem:[#allocation81_spill] sm:$0xff] %v9785_v47  ;;  %11225 = vst [vmem:[#allocation83_spill] sm:$0xff] %v9789_v18  ;;  %v2702_v56 = vld [vmem:[#allocation16 + $0xc8] sm:$0xff]  ;;  %v9809_v4 = vpack.c.bf16 %v2705_v13, %v2701_v38  ;;  %v2709_v46 = vld [vmem:[#allocation16 + $0x100] sm:$0xff] }
 0x48a   :  { %7200 = vmatpush1.bf16.msra.mxu0 %v9767_v1  ;;  %7232 = vmatpush1.bf16.msra.mxu1 %v9769_v40  ;;  %v2706_v1 = vld [vmem:[#allocation16 + $0xe8] sm:$0xff]  ;;  %v2708_v40 = vld [vmem:[#allocation16 + $0xf8] sm:$0xff]  ;;  %11227 = vst [vmem:[#allocation86_spill] sm:$0xff] %v9797_v22  ;;  %11228 = vst [vmem:[#allocation85_spill] sm:$0xff] %v9799_v25 }
 0x48b   :  { %7202 = vmatprep.subr.bf16.mxu0 %v9775_v36  ;;  %7234 = vmatprep.subr.bf16.mxu1 %v9777_v5  ;;  %v9803_v24 = vpack.c.bf16 %v2706_v1, %v2702_v56  ;;  %v9805_v2 = vpack.c.bf16 %v2708_v40, %v2704_v62  ;;  %v2710_v5 = vld [vmem:[#allocation16 + $0x108] sm:$0xff]  ;;  %v2712_v36 = vld [vmem:[#allocation16 + $0x118] sm:$0xff]  ;;  %11231 = vst [vmem:[#allocation90_spill] sm:$0xff] %v9809_v4  ;;  %11232 = vst [vmem:[#allocation89_spill] sm:$0xff] %v9811_v33 }
 0x48c   :  { %2805 = vmatprep.mubr.f32.mxu0 %v11089_v45  ;;  %2876 = vmatprep.mubr.f32.mxu1 %v11089_v45  ;;  %v2713_v28 = vld [vmem:[#allocation16 + $0x120] sm:$0xff]  ;;  %v2711_v40 = vld [vmem:[#allocation16 + $0x110] sm:$0xff] }
 0x48d   :  { %11229 = vst [vmem:[#allocation87_spill] sm:$0xff] %v9803_v24  ;;  %11230 = vst [vmem:[#allocation88_spill] sm:$0xff] %v9805_v2  ;;  %v2715_v56 = vld [vmem:[#allocation16 + $0x130] sm:$0xff]  ;;  %v9821_v38 = vpack.c.bf16 %v2713_v28, %v2709_v46  ;;  %v2717_v53 = vld [vmem:[#allocation16 + $0x140] sm:$0xff] }
 0x48e   :  { %7204 = vmatpush1.bf16.msra.mxu0 %v9783_v57  ;;  %7236 = vmatpush1.bf16.msra.mxu1 %v9785_v47  ;;  %v2714_v57 = vld [vmem:[#allocation16 + $0x128] sm:$0xff]  ;;  %v2716_v47 = vld [vmem:[#allocation16 + $0x138] sm:$0xff]  ;;  %v9823_v13 = vpack.c.bf16 %v2715_v56, %v2711_v40  ;;  %v2721_v61 = vld [vmem:[#allocation16 + $0x160] sm:$0xff] }
 0x48f   :  { %7206 = vmatprep.subr.bf16.mxu0 %v9789_v18  ;;  %7238 = vmatprep.subr.bf16.mxu1 %v9791_v0  ;;  %v9815_v62 = vpack.c.bf16 %v2714_v57, %v2710_v5  ;;  %v9817_v1 = vpack.c.bf16 %v2716_v47, %v2712_v36  ;;  %v2718_v0 = vld [vmem:[#allocation16 + $0x148] sm:$0xff]  ;;  %v2720_v18 = vld [vmem:[#allocation16 + $0x158] sm:$0xff]  ;;  %11235 = vst [vmem:[#allocation93_spill] sm:$0xff] %v9821_v38  ;;  %v2719_v57 = vld [vmem:[#allocation16 + $0x150] sm:$0xff] }
 0x490   :  { %11236 = vst [vmem:[#allocation94_spill] sm:$0xff] %v9823_v13  ;;  %v2723_v47 = vld [vmem:[#allocation16 + $0x170] sm:$0xff]  ;;  %v9833_v46 = vpack.c.bf16 %v2721_v61, %v2717_v53  ;;  %v2725_v40 = vld [vmem:[#allocation16 + $0x180] sm:$0xff] }
 0x491   :  { %11233 = vst [vmem:[#allocation91_spill] sm:$0xff] %v9815_v62  ;;  %11234 = vst [vmem:[#allocation92_spill] sm:$0xff] %v9817_v1  ;;  %v9835_v28 = vpack.c.bf16 %v2723_v47, %v2719_v57  ;;  %v2729_v56 = vld [vmem:[#allocation16 + $0x1a0] sm:$0xff]  ;;  %v2739_v47 = vld [vmem:[#allocation16 + $0x1f0] sm:$0xff] }
 0x492   :  { %7208 = vmatpush1.bf16.msra.mxu0 %v9797_v22  ;;  %7240 = vmatpush1.bf16.msra.mxu1 %v9799_v25  ;;  %v2722_v22 = vld [vmem:[#allocation16 + $0x168] sm:$0xff]  ;;  %v2724_v25 = vld [vmem:[#allocation16 + $0x178] sm:$0xff]  ;;  %v9845_v53 = vpack.c.bf16 %v2729_v56, %v2725_v40  ;;  %v2733_v57 = vld [vmem:[#allocation16 + $0x1c0] sm:$0xff] }
 0x493   :  { %7210 = vmatprep.subr.bf16.mxu0 %v9803_v24  ;;  %7242 = vmatprep.subr.bf16.mxu1 %v9805_v2  ;;  %v9827_v5 = vpack.c.bf16 %v2722_v22, %v2718_v0  ;;  %v9829_v36 = vpack.c.bf16 %v2724_v25, %v2720_v18  ;;  %v2726_v2 = vld [vmem:[#allocation16 + $0x188] sm:$0xff]  ;;  %v2728_v24 = vld [vmem:[#allocation16 + $0x198] sm:$0xff]  ;;  %v2727_v22 = vld [vmem:[#allocation16 + $0x190] sm:$0xff] }
 0x494   :  { %v2731_v25 = vld [vmem:[#allocation16 + $0x1b0] sm:$0xff] }
 0x495   :  { %v9847_v61 = vpack.c.bf16 %v2731_v25, %v2727_v22 }
 0x496   :  { %7212 = vmatpush1.bf16.msra.mxu0 %v9809_v4  ;;  %7244 = vmatpush1.bf16.msra.mxu1 %v9811_v33  ;;  %v2730_v4 = vld [vmem:[#allocation16 + $0x1a8] sm:$0xff]  ;;  %v2732_v33 = vld [vmem:[#allocation16 + $0x1b8] sm:$0xff] }
 0x497   :  { %7214 = vmatprep.subr.bf16.mxu0 %v9815_v62  ;;  %7246 = vmatprep.subr.bf16.mxu1 %v9817_v1  ;;  %v9839_v18 = vpack.c.bf16 %v2730_v4, %v2726_v2  ;;  %v9841_v0 = vpack.c.bf16 %v2732_v33, %v2728_v24  ;;  %v2734_v1 = vld [vmem:[#allocation16 + $0x1c8] sm:$0xff]  ;;  %v2736_v62 = vld [vmem:[#allocation16 + $0x1d8] sm:$0xff]  ;;  %v2737_v4 = vld [vmem:[#allocation16 + $0x1e0] sm:$0xff] }
 0x498   :  { %v2735_v33 = vld [vmem:[#allocation16 + $0x1d0] sm:$0xff]  ;;  %v9857_v40 = vpack.c.bf16 %v2737_v4, %v2733_v57 }
 0x499   :  { %v9859_v56 = vpack.c.bf16 %v2739_v47, %v2735_v33 }
 0x49a   :  { %7216 = vmatpush1.bf16.msra.mxu0 %v9821_v38  ;;  %7248 = vmatpush1.bf16.msra.mxu1 %v9823_v13  ;;  %v2738_v38 = vld [vmem:[#allocation16 + $0x1e8] sm:$0xff]  ;;  %v2740_v13 = vld [vmem:[#allocation16 + $0x1f8] sm:$0xff] }
 0x49b   :  { %7218 = vmatprep.subr.bf16.mxu0 %v9827_v5  ;;  %7250 = vmatprep.subr.bf16.mxu1 %v9829_v36  ;;  %v9851_v24 = vpack.c.bf16 %v2738_v38, %v2734_v1  ;;  %v9853_v2 = vpack.c.bf16 %v2740_v13, %v2736_v62  ;;  %v11240_v62 = vld [vmem:[#allocation43_spill] sm:$0xff] }
 0x49e   :  { %7220 = vmatpush1.bf16.msra.mxu0 %v9833_v46  ;;  %7252 = vmatpush1.bf16.msra.mxu1 %v9835_v28 }
 0x49f   :  { %7222 = vmatprep.subr.bf16.mxu0 %v9839_v18  ;;  %7254 = vmatprep.subr.bf16.mxu1 %v9841_v0 }
 0x4a2   :  { %7224 = vmatpush1.bf16.msra.mxu0 %v9845_v53  ;;  %7256 = vmatpush1.bf16.msra.mxu1 %v9847_v61 }
 0x4a3   :  { %7226 = vmatprep.subr.bf16.mxu0 %v9851_v24  ;;  %7258 = vmatprep.subr.bf16.mxu1 %v9853_v2 }
 0x4a6   :  { %7228 = vmatpush1.bf16.msra.mxu0 %v9857_v40  ;;  %7260 = vmatpush1.bf16.msra.mxu1 %v9859_v56 }
 0x4a7   :  { %7262 = vmatprep.subr.bf16.mxu0 %v9540_v44  ;;  %7294 = vmatprep.subr.bf16.mxu1 %v9542_v8  ;;  %v2274_v44 = vld [vmem:[%s10850_s8] sm:$0xf] }
 0x4a8   :  { %v2279_v8 = vrot.slane %v2274_v44, %v9075_v58 }
 0x4a9   :  { %2806 = vmatmul.mubr.f32.vlgmr.msra.gmra.mrb[6].mxu0 %v9670_v41  ;;  %2877 = vmatmul.mubr.f32.vlgmr.msra.gmra.mrb[6].mxu1 %v9670_v41 }
 0x4aa   :  { %7264 = vmatpush1.bf16.msra.mxu0 %v9544_v14  ;;  %7296 = vmatpush1.bf16.msra.mxu1 %v9547_v15  ;;  %v2283_v14 = vrot.slane %v2274_v44, %v9080_v60 }
 0x4ab   :  { %7266 = vmatprep.subr.bf16.mxu0 %v9552_v37  ;;  %7298 = vmatprep.subr.bf16.mxu1 %v9554_v6 }
 0x4ac   :  { %3061 = vmatprep.mubr.f32.mxu0 %v11089_v45  ;;  %3132 = vmatprep.mubr.f32.mxu1 %v11089_v45 }
 0x4ae   :  { %7268 = vmatpush1.bf16.msra.mxu0 %v9556_v31  ;;  %7300 = vmatpush1.bf16.msra.mxu1 %v9559_v48 }
 0x4af   :  { %7270 = vmatprep.subr.bf16.mxu0 %v9564_v9  ;;  %7302 = vmatprep.subr.bf16.mxu1 %v9566_v42 }
 0x4b2   :  { %7272 = vmatpush1.bf16.msra.mxu0 %v9568_v52  ;;  %7304 = vmatpush1.bf16.msra.mxu1 %v9571_v3  ;;  %v2291_v3 = vrot.slane %v2274_v44, %v9092_v10 }
 0x4b3   :  { %7274 = vmatprep.subr.bf16.mxu0 %v9576_v21  ;;  %7306 = vmatprep.subr.bf16.mxu1 %v9578_v51 }
 0x4b6   :  { %7276 = vmatpush1.bf16.msra.mxu0 %v9580_v35  ;;  %7308 = vmatpush1.bf16.msra.mxu1 %v9583_v50 }
 0x4b7   :  { %7278 = vmatprep.subr.bf16.mxu0 %v9588_v17  ;;  %7310 = vmatprep.subr.bf16.mxu1 %v9590_v11 }
 0x4ba   :  { %7280 = vmatpush1.bf16.msra.mxu0 %v9592_v19  ;;  %7312 = vmatpush1.bf16.msra.mxu1 %v9595_v27 }
 0x4bb   :  { %7282 = vmatprep.subr.bf16.mxu0 %v9600_v39  ;;  %7314 = vmatprep.subr.bf16.mxu1 %v9602_v29 }
 0x4be   :  { %7284 = vmatpush1.bf16.msra.mxu0 %v9604_v12  ;;  %7316 = vmatpush1.bf16.msra.mxu1 %v9607_v59 }
 0x4bf   :  { %7286 = vmatprep.subr.bf16.mxu0 %v9611_v7  ;;  %7318 = vmatprep.subr.bf16.mxu1 %v9613_v49  ;;  %v11237_v49 = vld [vmem:[#allocation38_spill] sm:$0xff] }
 0x4c2   :  { %7288 = vmatpush1.bf16.msra.mxu0 %v9616_v34  ;;  %7320 = vmatpush1.bf16.msra.mxu1 %v9620_v54 }
 0x4c3   :  { %7290 = vmatprep.subr.bf16.mxu0 %v9622_v63  ;;  %7322 = vmatprep.subr.bf16.mxu1 %v9624_v26  ;;  %v11238_v26 = vld [vmem:[#allocation39_spill] sm:$0xff] }
 0x4c6   :  { %7292 = vmatpush1.bf16.msra.mxu0 %v9627_v32  ;;  %7324 = vmatpush1.bf16.msra.mxu1 %v9631_v30 }
 0x4c7   :  { %7326 = vmatprep.subr.bf16.mxu0 %v9633_v23  ;;  %7358 = vmatprep.subr.bf16.mxu1 %v9636_v55  ;;  %v11239_v55 = vld [vmem:[#allocation42_spill] sm:$0xff] }
 0x55c   :  { %v2568_v15 = vpop.f32.mrb[20].mxu0  ;;  %v2639_v37 = vpop.f32.mrb[22].mxu1 }
 0x55d   :  { %v8231_v6 = vadd.f32 %v2568_v15, %v2279_v8  ;;  %v2570_v31 = vpop.f32.mrb[21].mxu0  ;;  %v2641_v48 = vpop.f32.mrb[23].mxu1  ;;  %v11241_v15 = vld [vmem:[#allocation45_spill] sm:$0xff] }
 0x55e   :  { %v8232_v9 = vadd.f32 %v2570_v31, %v2283_v14  ;;  %v8234_v21 = vadd.f32 %v2641_v48, %v2291_v3  ;;  %v11242_v48 = vld [vmem:[#allocation40_spill] sm:$0xff] }
 0x55f   :  { %v6436_v42 = vmul.f32 -1.442695, %v8231_v6 }
 0x560   :  { %v6437_v52 = vmul.f32 -1.442695, %v8232_v9  ;;  %v2287_v9 = vrot.slane %v2274_v44, %v11242_v48  ;;  %v11246_v44 = vld [vmem:[#allocation49_spill] sm:$0xff] }
 0x561   :  { %8415 = vpow2.f32 %v6436_v42 }
 0x562   :  { %8417 = vpow2.f32 %v6437_v52  ;;  %v8233_v42 = vadd.f32 %v2639_v37, %v2287_v9  ;;  %v11247_v37 = vld [vmem:[#allocation50_spill] sm:$0xff]  ;;  %v11273_v9 = vld [vmem:[#allocation75_spill] sm:$0xff] }
 0x563   :  { %8419 = vtanh.f32 %v8234_v21 }
 0x564   :  { %v6438_v21 = vmul.f32 -1.442695, %v8233_v42  ;;  %v11274_v42 = vld [vmem:[#allocation76_spill] sm:$0xff] }
 0x56b   :  { %v8416_v51 = vpop.eup %8415 }
 0x56c   :  { %v2657_v35 = vadd.f32 1.0, %v8416_v51  ;;  %v8418_v50 = vpop.eup %8417 }
 0x56d   :  { %v2658_v17 = vadd.f32 1.0, %v8418_v50  ;;  %v8420_v11 = vpop.eup %8419  ;;  %v11244_v50 = vld [vmem:[#allocation47_spill] sm:$0xff] }
 0x56e   :  { %8421 = vrcp.f32 %v2657_v35  ;;  %v11243_v35 = vld [vmem:[#allocation46_spill] sm:$0xff] }
 0x56f   :  { %8423 = vrcp.f32 %v2658_v17  ;;  %v11245_v17 = vld [vmem:[#allocation48_spill] sm:$0xff] }
 0x578   :  { %v8422_v19 = vpop.eup %8421 }
 0x579   :  { %v2668_v27 = vmul.f32 %v8422_v19, %v8420_v11  ;;  %v8424_v39 = vpop.eup %8423  ;;  %v11248_v11 = vld [vmem:[#allocation51_spill] sm:$0xff]  ;;  %v11249_v19 = vld [vmem:[#allocation52_spill] sm:$0xff] }
 0x57a   :  { %v2667_v29 = vmul.f32 %v8424_v39, %v9654_v16  ;;  %v11252_v39 = vld [vmem:[#allocation55_spill] sm:$0xff] }
 0x57c   :  { %v2807_v12 = vpop.f32.mrb[6].mxu0  ;;  %v2878_v59 = vpop.f32.mrb[6].mxu1  ;;  %v9910_v7 = vadd.f32 %v2668_v27, %v2667_v29  ;;  %v11251_v27 = vld [vmem:[#allocation54_spill] sm:$0xff]  ;;  %v11253_v29 = vld [vmem:[#allocation56_spill] sm:$0xff] }
 0x57d   :  { %v8197_v34 = vadd.f32 %v2807_v12, %v11237_v49  ;;  %v2809_v54 = vpop.f32.mrb[7].mxu0  ;;  %v2880_v63 = vpop.f32.mrb[7].mxu1  ;;  %v8213_v41 = vadd.f32 %v2878_v59, %v11239_v55  ;;  %v11254_v59 = vld [vmem:[#allocation57_spill] sm:$0xff] }
 0x57e   :  { %v8198_v32 = vadd.f32 %v2809_v54, %v11238_v26  ;;  %v8214_v1 = vadd.f32 %v2880_v63, %v11240_v62  ;;  %v11256_v54 = vld [vmem:[#allocation59_spill] sm:$0xff]  ;;  %v11257_v63 = vld [vmem:[#allocation60_spill] sm:$0xff] }
 0x57f   :  { %v6439_v30 = vmul.f32 -1.442695, %v8197_v34  ;;  %v6441_v38 = vmul.f32 -1.442695, %v8213_v41  ;;  %v11255_v34 = vld [vmem:[#allocation58_spill] sm:$0xff]  ;;  %v11260_v41 = vld [vmem:[#allocation63_spill] sm:$0xff] }
 0x580   :  { %v6440_v23 = vmul.f32 -1.442695, %v8198_v32 }
 0x581   :  { %8425 = vpow2.f32 %v6439_v30  ;;  %v11258_v30 = vld [vmem:[#allocation61_spill] sm:$0xff] }
 0x582   :  { %8427 = vpow2.f32 %v6440_v23  ;;  %v11259_v23 = vld [vmem:[#allocation62_spill] sm:$0xff] }
 0x583   :  { %8429 = vtanh.f32 %v8214_v1  ;;  %v11261_v1 = vld [vmem:[#allocation64_spill] sm:$0xff] }
 0x584   :  { %8431 = vpow2.f32 %v6441_v38  ;;  %v11262_v38 = vld [vmem:[#allocation65_spill] sm:$0xff] }
 0x58b   :  { %v8426_v16 = vpop.eup %8425 }
 0x58c   :  { %v2896_v13 = vadd.f32 1.0, %v8426_v16  ;;  %v8428_v22 = vpop.eup %8427  ;;  %v11263_v16 = vld [vmem:[#allocation66_spill] sm:$0xff] }
 0x58d   :  { %v2897_v25 = vadd.f32 1.0, %v8428_v22  ;;  %v8430_v57 = vpop.eup %8429  ;;  %v11265_v22 = vld [vmem:[#allocation68_spill] sm:$0xff] }
 0x58e   :  { %8433 = vrcp.f32 %v2896_v13  ;;  %v8432_v4 = vpop.eup %8431  ;;  %v11264_v13 = vld [vmem:[#allocation67_spill] sm:$0xff] }
 0x58f   :  { %8435 = vrcp.f32 %v2897_v25  ;;  %v2898_v14 = vadd.f32 1.0, %v8432_v4  ;;  %v11266_v25 = vld [vmem:[#allocation69_spill] sm:$0xff]  ;;  %v11268_v4 = vld [vmem:[#allocation71_spill] sm:$0xff] }
 0x591   :  { %8437 = vrcp.f32 %v2898_v14  ;;  %v11270_v14 = vld [vmem:[#allocation73_spill] sm:$0xff] }
 0x598   :  { %v8434_v33 = vpop.eup %8433 }
 0x599   :  { %v2907_v47 = vmul.f32 %v8434_v33, %v8430_v57  ;;  %v8436_v8 = vpop.eup %8435  ;;  %v11267_v57 = vld [vmem:[#allocation70_spill] sm:$0xff]  ;;  %v11269_v33 = vld [vmem:[#allocation72_spill] sm:$0xff] }
 0x59a   :  { %v2906_v6 = vmul.f32 %v8436_v8, %v11241_v15  ;;  %v11271_v15 = vld [vmem:[#allocation74_spill] sm:$0xff] }
 0x59b   :  { %v8438_v52 = vpop.eup %8437 }
 0x59c   :  { %v9917_v31 = vadd.f32 %v2907_v47, %v2906_v6 }
 0x59e   :  { %8439 = vtanh.f32 %v9917_v31 }
 0x59f   :  { %8441 = vpow2.f32 %v6438_v21  ;;  %v11277_v21 = vld [vmem:[#allocation80_spill] sm:$0xff] }
 0x5a0   :  { %8443 = vtanh.f32 %v9910_v7 }
 0x5a8   :  { %v8440_v3 = vpop.eup %8439 }
 0x5a9   :  { %v9921_v51 = vmul.f32 %v8440_v3, %v8438_v52  ;;  %v8442_v12 = vpop.eup %8441  ;;  %v11275_v52 = vld [vmem:[#allocation78_spill] sm:$0xff]  ;;  %v11276_v3 = vld [vmem:[#allocation79_spill] sm:$0xff] }
 0x5aa   :  { %v2659_v32 = vadd.f32 1.0, %v8442_v12  ;;  %v8444_v47 = vpop.eup %8443  ;;  %v11290_v12 = vld [vmem:[#allocation93_spill] sm:$0xff] }
 0x5ab   :  { %3062 = vmatmul.mubr.f32.vlgmr.msra.gmra.mrb[22].mxu0 %v9921_v51  ;;  %3133 = vmatmul.mubr.f32.vlgmr.msra.gmra.mrb[24].mxu1 %v9921_v51 }
 0x5ac   :  { %7328 = vmatpush1.bf16.msra.mxu0 %v9666_v43  ;;  %7360 = vmatpush1.bf16.msra.mxu1 %v11243_v35  ;;  %v11250_v43 = vld [vmem:[#allocation53_spill] sm:$0xff]  ;;  %8445 = vrcp.f32 %v2659_v32  ;;  %v11278_v35 = vld [vmem:[#allocation82_spill] sm:$0xff]  ;;  %v3627_v32 = vld [vmem:[#allocation4 + $0x78] sm:$0xff] }
 0x5ad   :  { %7330 = vmatprep.subr.bf16.mxu0 %v11244_v50  ;;  %7362 = vmatprep.subr.bf16.mxu1 %v11245_v17  ;;  %v11280_v50 = vld [vmem:[#allocation83_spill] sm:$0xff]  ;;  %v11281_v17 = vld [vmem:[#allocation84_spill] sm:$0xff] }
 0x5ae   :  { %3267 = vmatprep.mubr.f32.mxu0 %v11089_v45  ;;  %3338 = vmatprep.mubr.f32.mxu1 %v11089_v45 }
 0x5b0   :  { %7332 = vmatpush1.bf16.msra.mxu0 %v11246_v44  ;;  %7364 = vmatpush1.bf16.msra.mxu1 %v11247_v37  ;;  %v11282_v44 = vld [vmem:[#allocation86_spill] sm:$0xff]  ;;  %v11283_v37 = vld [vmem:[#allocation85_spill] sm:$0xff] }
 0x5b1   :  { %7334 = vmatprep.subr.bf16.mxu0 %v11248_v11  ;;  %7366 = vmatprep.subr.bf16.mxu1 %v11249_v19  ;;  %v11284_v11 = vld [vmem:[#allocation87_spill] sm:$0xff]  ;;  %v11285_v19 = vld [vmem:[#allocation88_spill] sm:$0xff] }
 0x5b4   :  { %7336 = vmatpush1.bf16.msra.mxu0 %v11250_v43  ;;  %7368 = vmatpush1.bf16.msra.mxu1 %v11251_v27  ;;  %v11286_v43 = vld [vmem:[#allocation90_spill] sm:$0xff]  ;;  %v11287_v27 = vld [vmem:[#allocation89_spill] sm:$0xff] }
 0x5b5   :  { %7338 = vmatprep.subr.bf16.mxu0 %v11252_v39  ;;  %7370 = vmatprep.subr.bf16.mxu1 %v11253_v29  ;;  %v11288_v39 = vld [vmem:[#allocation91_spill] sm:$0xff]  ;;  %v11289_v29 = vld [vmem:[#allocation92_spill] sm:$0xff] }
 0x5b6   :  { %v8446_v8 = vpop.eup %8445 }
 0x5b7   :  { %v9958_v6 = vmul.f32 %v8446_v8, %v8444_v47  ;;  %v3628_v47 = vld [vmem:[#allocation4 + $0x80] sm:$0xff] }
 0x5b8   :  { %7340 = vmatpush1.bf16.msra.mxu0 %v11254_v59  ;;  %7372 = vmatpush1.bf16.msra.mxu1 %v11255_v34  ;;  %v11291_v59 = vld [vmem:[#allocation94_spill] sm:$0xff]  ;;  %v3632_v8 = vld [vmem:[#allocation4 + $0xa0] sm:$0xff] }
 0x5b9   :  { %7342 = vmatprep.subr.bf16.mxu0 %v11256_v54  ;;  %7374 = vmatprep.subr.bf16.mxu1 %v11257_v63  ;;  %11272 = vst [vmem:[#allocation45_spill] sm:$0xff] %v9958_v6  ;;  %v3625_v34 = vld [vmem:[#allocation4 + $0x68] sm:$0xff]  ;;  %v3623_v54 = vld [vmem:[#allocation4 + $0x58] sm:$0xff] }
 0x5bc   :  { %7344 = vmatpush1.bf16.msra.mxu0 %v11258_v30  ;;  %7376 = vmatpush1.bf16.msra.mxu1 %v11259_v23  ;;  %v3620_v30 = vld [vmem:[#allocation4 + $0x40] sm:$0xff] }
 0x5bd   :  { %7346 = vmatprep.subr.bf16.mxu0 %v11260_v41  ;;  %7378 = vmatprep.subr.bf16.mxu1 %v11261_v1  ;;  %v3624_v23 = vld [vmem:[#allocation4 + $0x60] sm:$0xff]  ;;  %v10014_v41 = vpack.c.bf16 %v3627_v32, %v3623_v54  ;;  %v3655_v54 = vld [vmem:[#allocation4 + $0x158] sm:$0xff] }
 0x5be   :  { %v10016_v1 = vpack.c.bf16 %v3624_v23, %v3620_v30  ;;  %v3659_v30 = vld [vmem:[#allocation4 + $0x178] sm:$0xff]  ;;  %v3652_v23 = vld [vmem:[#allocation4 + $0x140] sm:$0xff] }
 0x5c0   :  { %7348 = vmatpush1.bf16.msra.mxu0 %v11262_v38  ;;  %7380 = vmatpush1.bf16.msra.mxu1 %v11263_v16  ;;  %v3622_v38 = vld [vmem:[#allocation4 + $0x50] sm:$0xff] }
 0x5c1   :  { %7350 = vmatprep.subr.bf16.mxu0 %v11264_v13  ;;  %7382 = vmatprep.subr.bf16.mxu1 %v11265_v22  ;;  %v3626_v16 = vld [vmem:[#allocation4 + $0x70] sm:$0xff]  ;;  %v3629_v22 = vld [vmem:[#allocation4 + $0x88] sm:$0xff] }
 0x5c2   :  { %v10019_v13 = vpack.c.bf16 %v3626_v16, %v3622_v38  ;;  %v3656_v38 = vld [vmem:[#allocation4 + $0x160] sm:$0xff]  ;;  %v10062_v16 = vpack.c.bf16 %v3659_v30, %v3655_v54  ;;  %v3674_v54 = vld [vmem:[#allocation4 + $0x1f0] sm:$0xff]  ;;  %v3841_v30 = vld [vmem:[#allocation5 + $0x8] sm:$0xff] }
 0x5c4   :  { %7352 = vmatpush1.bf16.msra.mxu0 %v11266_v25  ;;  %7384 = vmatpush1.bf16.msra.mxu1 %v11267_v57  ;;  %v3633_v25 = vld [vmem:[#allocation4 + $0xa8] sm:$0xff]  ;;  %v3631_v57 = vld [vmem:[#allocation4 + $0x98] sm:$0xff] }
 0x5c5   :  { %7354 = vmatprep.subr.bf16.mxu0 %v11268_v4  ;;  %7386 = vmatprep.subr.bf16.mxu1 %v11269_v33  ;;  %v10024_v4 = vpack.c.bf16 %v3633_v25, %v3629_v22  ;;  %v3635_v33 = vld [vmem:[#allocation4 + $0xb8] sm:$0xff]  ;;  %v10064_v22 = vpack.c.bf16 %v3656_v38, %v3652_v23  ;;  %v3654_v25 = vld [vmem:[#allocation4 + $0x150] sm:$0xff]  ;;  %v3845_v23 = vld [vmem:[#allocation5 + $0x28] sm:$0xff] }
 0x5c8   :  { %7356 = vmatpush1.bf16.msra.mxu0 %v11270_v14  ;;  %7388 = vmatpush1.bf16.msra.mxu1 %v11271_v15  ;;  %v10026_v14 = vpack.c.bf16 %v3635_v33, %v3631_v57  ;;  %v10028_v15 = vpack.c.bf16 %v3632_v8, %v3628_v47  ;;  %v3658_v57 = vld [vmem:[#allocation4 + $0x170] sm:$0xff]  ;;  %v3661_v47 = vld [vmem:[#allocation4 + $0x188] sm:$0xff] }
 0x5c9   :  { %7390 = vmatprep.subr.bf16.mxu0 %v9761_v20  ;;  %7422 = vmatprep.subr.bf16.mxu1 %v11273_v9  ;;  %v11279_v20 = vld [vmem:[#allocation81_spill] sm:$0xff]  ;;  %v3630_v9 = vld [vmem:[#allocation4 + $0x90] sm:$0xff]  ;;  %v10067_v33 = vpack.c.bf16 %v3658_v57, %v3654_v25  ;;  %v3665_v8 = vld [vmem:[#allocation4 + $0x1a8] sm:$0xff]  ;;  %v10093_v25 = vpack.c.bf16 %v3845_v23, %v3841_v30 }
 0x5ca   :  { %v3843_v57 = vld [vmem:[#allocation5 + $0x18] sm:$0xff] }
 0x5cb   :  { %3268 = vmatmul.mubr.f32.vlgmr.msra.gmra.mrb[22].mxu0 %v9958_v6  ;;  %3339 = vmatmul.mubr.f32.vlgmr.msra.gmra.mrb[24].mxu1 %v9958_v6 }
 0x5cc   :  { %7392 = vmatpush1.bf16.msra.mxu0 %v11274_v42  ;;  %7424 = vmatpush1.bf16.msra.mxu1 %v11275_v52  ;;  %v3634_v42 = vld [vmem:[#allocation4 + $0xb0] sm:$0xff] }
 0x5cd   :  { %7394 = vmatprep.subr.bf16.mxu0 %v11276_v3  ;;  %7426 = vmatprep.subr.bf16.mxu1 %v11277_v21  ;;  %v10031_v52 = vpack.c.bf16 %v3634_v42, %v3630_v9  ;;  %v3637_v3 = vld [vmem:[#allocation4 + $0xc8] sm:$0xff]  ;;  %v3663_v9 = vld [vmem:[#allocation4 + $0x198] sm:$0xff]  ;;  %v10071_v42 = vpack.c.bf16 %v3665_v8, %v3661_v47 }
 0x5ce   :  { %3506 = vmatprep.mubr.f32.mxu0 %v11089_v45  ;;  %3577 = vmatprep.mubr.f32.mxu1 %v11089_v45  ;;  %v3641_v21 = vld [vmem:[#allocation4 + $0xe8] sm:$0xff]  ;;  %v3847_v47 = vld [vmem:[#allocation5 + $0x38] sm:$0xff] }
 0x5cf   :  { %v10096_v8 = vpack.c.bf16 %v3847_v47, %v3843_v57 }
 0x5d0   :  { %7396 = vmatpush1.bf16.msra.mxu0 %v11278_v35  ;;  %7428 = vmatpush1.bf16.msra.mxu1 %v11279_v20  ;;  %v3639_v35 = vld [vmem:[#allocation4 + $0xd8] sm:$0xff]  ;;  %v10036_v20 = vpack.c.bf16 %v3641_v21, %v3637_v3  ;;  %v3660_v21 = vld [vmem:[#allocation4 + $0x180] sm:$0xff] }
 0x5d1   :  { %7398 = vmatprep.subr.bf16.mxu0 %v11280_v50  ;;  %7430 = vmatprep.subr.bf16.mxu1 %v11281_v17  ;;  %v3643_v50 = vld [vmem:[#allocation4 + $0xf8] sm:$0xff]  ;;  %v3636_v17 = vld [vmem:[#allocation4 + $0xc0] sm:$0xff] }
 0x5d2   :  { %v3667_v3 = vld [vmem:[#allocation4 + $0x1b8] sm:$0xff] }
 0x5d4   :  { %7400 = vmatpush1.bf16.msra.mxu0 %v11282_v44  ;;  %7432 = vmatpush1.bf16.msra.mxu1 %v11283_v37  ;;  %v3640_v44 = vld [vmem:[#allocation4 + $0xe0] sm:$0xff]  ;;  %v10038_v37 = vpack.c.bf16 %v3643_v50, %v3639_v35  ;;  %v10074_v50 = vpack.c.bf16 %v3667_v3, %v3663_v9 }
 0x5d5   :  { %7402 = vmatprep.subr.bf16.mxu0 %v11284_v11  ;;  %7434 = vmatprep.subr.bf16.mxu1 %v11285_v19  ;;  %v10040_v11 = vpack.c.bf16 %v3640_v44, %v3636_v17  ;;  %v3638_v19 = vld [vmem:[#allocation4 + $0xd0] sm:$0xff]  ;;  %v3664_v35 = vld [vmem:[#allocation4 + $0x1a0] sm:$0xff] }
 0x5d6   :  { %v10076_v17 = vpack.c.bf16 %v3664_v35, %v3660_v21  ;;  %v3662_v44 = vld [vmem:[#allocation4 + $0x190] sm:$0xff]  ;;  %v10105_v9 = vld [vmem:[%s10850_s8] sm:$0xf] }
 0x5d7   :  { %v2980_v3 = vrot.slane %v10105_v9, %v9075_v58  ;;  %v2984_v21 = vrot.slane %v10105_v9, %v9080_v60 }
 0x5d8   :  { %7404 = vmatpush1.bf16.msra.mxu0 %v11286_v43  ;;  %7436 = vmatpush1.bf16.msra.mxu1 %v11287_v27  ;;  %v3642_v43 = vld [vmem:[#allocation4 + $0xf0] sm:$0xff] }
 0x5d9   :  { %7406 = vmatprep.subr.bf16.mxu0 %v11288_v39  ;;  %7438 = vmatprep.subr.bf16.mxu1 %v11289_v29  ;;  %v10043_v27 = vpack.c.bf16 %v3642_v43, %v3638_v19  ;;  %v3645_v39 = vld [vmem:[#allocation4 + $0x108] sm:$0xff]  ;;  %v3666_v19 = vld [vmem:[#allocation4 + $0x1b0] sm:$0xff] }
 0x5da   :  { %v3649_v29 = vld [vmem:[#allocation4 + $0x128] sm:$0xff] }
 0x5db   :  { %v3669_v43 = vld [vmem:[#allocation4 + $0x1c8] sm:$0xff] }
 0x5dc   :  { %7408 = vmatpush1.bf16.msra.mxu0 %v11290_v12  ;;  %7440 = vmatpush1.bf16.msra.mxu1 %v11291_v59  ;;  %v3647_v12 = vld [vmem:[#allocation4 + $0x118] sm:$0xff]  ;;  %v10048_v59 = vpack.c.bf16 %v3649_v29, %v3645_v39  ;;  %v10079_v39 = vpack.c.bf16 %v3666_v19, %v3662_v44  ;;  %v3673_v29 = vld [vmem:[#allocation4 + $0x1e8] sm:$0xff] }
 0x5dd   :  { %7410 = vmatprep.subr.bf16.mxu0 %v9827_v5  ;;  %7442 = vmatprep.subr.bf16.mxu1 %v9829_v36  ;;  %v3613_v5 = vld [vmem:[#allocation4 + $0x8] sm:$0xff] }
 0x5de   :  { %v3617_v36 = vld [vmem:[#allocation4 + $0x28] sm:$0xff] }
 0x5e0   :  { %7412 = vmatpush1.bf16.msra.mxu0 %v9833_v46  ;;  %7444 = vmatpush1.bf16.msra.mxu1 %v9835_v28  ;;  %v3615_v46 = vld [vmem:[#allocation4 + $0x18] sm:$0xff]  ;;  %v10000_v28 = vpack.c.bf16 %v3617_v36, %v3613_v5  ;;  %v3644_v36 = vld [vmem:[#allocation4 + $0x100] sm:$0xff] }
 0x5e1   :  { %7414 = vmatprep.subr.bf16.mxu0 %v9839_v18  ;;  %7446 = vmatprep.subr.bf16.mxu1 %v9841_v0  ;;  %v3619_v18 = vld [vmem:[#allocation4 + $0x38] sm:$0xff]  ;;  %v3612_v0 = vld [vmem:[#allocation4] sm:$0xff] }
 0x5e2   :  { %v3651_v5 = vld [vmem:[#allocation4 + $0x138] sm:$0xff] }
 0x5e4   :  { %7416 = vmatpush1.bf16.msra.mxu0 %v9845_v53  ;;  %7448 = vmatpush1.bf16.msra.mxu1 %v9847_v61  ;;  %v3616_v53 = vld [vmem:[#allocation4 + $0x20] sm:$0xff]  ;;  %v10002_v61 = vpack.c.bf16 %v3619_v18, %v3615_v46  ;;  %v10050_v18 = vpack.c.bf16 %v3651_v5, %v3647_v12  ;;  %v3671_v12 = vld [vmem:[#allocation4 + $0x1d8] sm:$0xff] }
 0x5e5   :  { %7418 = vmatprep.subr.bf16.mxu0 %v9851_v24  ;;  %7450 = vmatprep.subr.bf16.mxu1 %v9853_v2  ;;  %v10004_v24 = vpack.c.bf16 %v3616_v53, %v3612_v0  ;;  %v3614_v2 = vld [vmem:[#allocation4 + $0x10] sm:$0xff]  ;;  %v3648_v46 = vld [vmem:[#allocation4 + $0x120] sm:$0xff]  ;;  %v3675_v5 = vld [vmem:[#allocation4 + $0x1f8] sm:$0xff] }
 0x5e6   :  { %v10052_v0 = vpack.c.bf16 %v3648_v46, %v3644_v36  ;;  %v3646_v53 = vld [vmem:[#allocation4 + $0x110] sm:$0xff]  ;;  %v10082_v36 = vpack.c.bf16 %v3673_v29, %v3669_v43  ;;  %v10084_v46 = vpack.c.bf16 %v3675_v5, %v3671_v12 }
 0x5e8   :  { %7420 = vmatpush1.bf16.msra.mxu0 %v9857_v40  ;;  %7452 = vmatpush1.bf16.msra.mxu1 %v9859_v56  ;;  %v3618_v40 = vld [vmem:[#allocation4 + $0x30] sm:$0xff] }
 0x5e9   :  { %7454 = vmatprep.subr.bf16.mxu0 %v10000_v28  ;;  %v10007_v56 = vpack.c.bf16 %v3618_v40, %v3614_v2  ;;  %7486 = vmatprep.subr.bf16.mxu1 %v10002_v61  ;;  %v3650_v2 = vld [vmem:[#allocation4 + $0x130] sm:$0xff] }
 0x5ea   :  { %v10055_v40 = vpack.c.bf16 %v3650_v2, %v3646_v53  ;;  %v3668_v53 = vld [vmem:[#allocation4 + $0x1c0] sm:$0xff] }
 0x5eb   :  { %3507 = vmatmul.mubr.f32.vlgmr.msra.gmra.mrb[8].mxu0 %v9921_v51  ;;  %3578 = vmatmul.mubr.f32.vlgmr.msra.gmra.mrb[8].mxu1 %v9921_v51  ;;  %v3621_v51 = vld [vmem:[#allocation4 + $0x48] sm:$0xff]  ;;  %v3672_v2 = vld [vmem:[#allocation4 + $0x1e0] sm:$0xff] }
 0x5ec   :  { %3762 = vmatprep.mubr.f32.mxu0 %v11089_v45  ;;  %3833 = vmatprep.mubr.f32.mxu1 %v11089_v45  ;;  %v10012_v63 = vpack.c.bf16 %v3625_v34, %v3621_v51  ;;  %v3653_v51 = vld [vmem:[#allocation4 + $0x148] sm:$0xff] }
 0x5ed   :  { %7456 = vmatpush1.bf16.msra.mxu0 %v10004_v24  ;;  %7488 = vmatpush1.bf16.msra.mxu1 %v10007_v56  ;;  %v3657_v34 = vld [vmem:[#allocation4 + $0x168] sm:$0xff] }
 0x5ee   :  { %7458 = vmatprep.subr.bf16.mxu0 %v10012_v63  ;;  %7490 = vmatprep.subr.bf16.mxu1 %v10014_v41  ;;  %v10060_v32 = vpack.c.bf16 %v3657_v34, %v3653_v51  ;;  %v3670_v51 = vld [vmem:[#allocation4 + $0x1d0] sm:$0xff]  ;;  %v10087_v34 = vpack.c.bf16 %v3672_v2, %v3668_v53  ;;  %v2992_v2 = vrot.slane %v10105_v9, %v9092_v10 }
 0x5ef   :  { %v10091_v38 = vpack.c.bf16 %v3674_v54, %v3670_v51 }
 0x5f1   :  { %7460 = vmatpush1.bf16.msra.mxu0 %v10016_v1  ;;  %7492 = vmatpush1.bf16.msra.mxu1 %v10019_v13 }
 0x5f2   :  { %7462 = vmatprep.subr.bf16.mxu0 %v10024_v4  ;;  %7494 = vmatprep.subr.bf16.mxu1 %v10026_v14 }
 0x5f5   :  { %7464 = vmatpush1.bf16.msra.mxu0 %v10028_v15  ;;  %7496 = vmatpush1.bf16.msra.mxu1 %v10031_v52 }
 0x5f6   :  { %7466 = vmatprep.subr.bf16.mxu0 %v10036_v20  ;;  %7498 = vmatprep.subr.bf16.mxu1 %v10038_v37 }
 0x5f9   :  { %7468 = vmatpush1.bf16.msra.mxu0 %v10040_v11  ;;  %7500 = vmatpush1.bf16.msra.mxu1 %v10043_v27 }
 0x5fa   :  { %7470 = vmatprep.subr.bf16.mxu0 %v10048_v59  ;;  %7502 = vmatprep.subr.bf16.mxu1 %v10050_v18 }
 0x5fd   :  { %7472 = vmatpush1.bf16.msra.mxu0 %v10052_v0  ;;  %7504 = vmatpush1.bf16.msra.mxu1 %v10055_v40 }
 0x5fe   :  { %7474 = vmatprep.subr.bf16.mxu0 %v10060_v32  ;;  %7506 = vmatprep.subr.bf16.mxu1 %v10062_v16 }
 0x601   :  { %7476 = vmatpush1.bf16.msra.mxu0 %v10064_v22  ;;  %7508 = vmatpush1.bf16.msra.mxu1 %v10067_v33 }
 0x602   :  { %7478 = vmatprep.subr.bf16.mxu0 %v10071_v42  ;;  %7510 = vmatprep.subr.bf16.mxu1 %v10074_v50 }
 0x605   :  { %7480 = vmatpush1.bf16.msra.mxu0 %v10076_v17  ;;  %7512 = vmatpush1.bf16.msra.mxu1 %v10079_v39 }
 0x606   :  { %7482 = vmatprep.subr.bf16.mxu0 %v10082_v36  ;;  %7514 = vmatprep.subr.bf16.mxu1 %v10084_v46 }
 0x609   :  { %7484 = vmatpush1.bf16.msra.mxu0 %v10087_v34  ;;  %7516 = vmatpush1.bf16.msra.mxu1 %v10091_v38 }
 0x60a   :  { %7518 = vmatprep.subr.bf16.mxu0 %v10093_v25  ;;  %7550 = vmatprep.subr.bf16.mxu1 %v10096_v8 }
 0x69e   :  { %v3269_v35 = vpop.f32.mrb[22].mxu0  ;;  %v3340_v44 = vpop.f32.mrb[24].mxu1 }
 0x69f   :  { %v8235_v19 = vadd.f32 %v3269_v35, %v2980_v3  ;;  %v3271_v43 = vpop.f32.mrb[23].mxu0  ;;  %v3342_v29 = vpop.f32.mrb[25].mxu1 }
 0x6a0   :  { %v8236_v12 = vadd.f32 %v3271_v43, %v2984_v21  ;;  %v8238_v51 = vadd.f32 %v3342_v29, %v2992_v2 }
 0x6a1   :  { %v6442_v5 = vmul.f32 -1.442695, %v8235_v19 }
 0x6a2   :  { %v6443_v53 = vmul.f32 -1.442695, %v8236_v12 }
 0x6a3   :  { %8447 = vpow2.f32 %v6442_v5 }
 0x6a4   :  { %8449 = vpow2.f32 %v6443_v53 }
 0x6a5   :  { %8451 = vtanh.f32 %v8238_v51 }
 0x6ad   :  { %v8448_v54 = vpop.eup %8447 }
 0x6ae   :  { %v3358_v30 = vadd.f32 1.0, %v8448_v54  ;;  %v8450_v23 = vpop.eup %8449 }
 0x6af   :  { %v3359_v57 = vadd.f32 1.0, %v8450_v23  ;;  %v8452_v47 = vpop.eup %8451 }
 0x6b0   :  { %8453 = vrcp.f32 %v3358_v30 }
 0x6b1   :  { %8455 = vrcp.f32 %v3359_v57 }
 0x6ba   :  { %v8454_v3 = vpop.eup %8453 }
 0x6bb   :  { %v3369_v35 = vmul.f32 %v8454_v3, %v8452_v47  ;;  %v8456_v6 = vpop.eup %8455 }
 0x6bc   :  { %v3368_v21 = vmul.f32 %v8456_v6, %v9910_v7 }
 0x6be   :  { %v3508_v19 = vpop.f32.mrb[8].mxu0  ;;  %v3579_v43 = vpop.f32.mrb[8].mxu1  ;;  %v10114_v12 = vadd.f32 %v3369_v35, %v3368_v21 }
 0x6bf   :  { %v8199_v5 = vadd.f32 %v3508_v19, %v11237_v49  ;;  %v3510_v29 = vpop.f32.mrb[9].mxu0  ;;  %v3581_v53 = vpop.f32.mrb[9].mxu1  ;;  %v8215_v30 = vadd.f32 %v3579_v43, %v11239_v55  ;;  %v3861_v55 = vld [vmem:[#allocation5 + $0xa8] sm:$0xff]  ;;  %v3863_v49 = vld [vmem:[#allocation5 + $0xb8] sm:$0xff] }
 0x6c0   :  { %v8200_v2 = vadd.f32 %v3510_v29, %v11238_v26  ;;  %v8216_v23 = vadd.f32 %v3581_v53, %v11240_v62  ;;  %v2988_v53 = vrot.slane %v10105_v9, %v11242_v48  ;;  %v3854_v48 = vld [vmem:[#allocation5 + $0x70] sm:$0xff]  ;;  %v3857_v62 = vld [vmem:[#allocation5 + $0x88] sm:$0xff]  ;;  %v3859_v26 = vld [vmem:[#allocation5 + $0x98] sm:$0xff] }
 0x6c1   :  { %v6445_v51 = vmul.f32 -1.442695, %v8199_v5  ;;  %v6447_v57 = vmul.f32 -1.442695, %v8215_v30  ;;  %v3844_v30 = vld [vmem:[#allocation5 + $0x20] sm:$0xff] }
 0x6c2   :  { %v6446_v54 = vmul.f32 -1.442695, %v8200_v2 }
 0x6c3   :  { %8457 = vpow2.f32 %v6445_v51 }
 0x6c4   :  { %8459 = vpow2.f32 %v6446_v54  ;;  %v3840_v54 = vld [vmem:[#allocation5] sm:$0xff] }
 0x6c5   :  { %8461 = vtanh.f32 %v8216_v23  ;;  %v8237_v23 = vadd.f32 %v3340_v44, %v2988_v53  ;;  %v3850_v53 = vld [vmem:[#allocation5 + $0x50] sm:$0xff] }
 0x6c6   :  { %8463 = vpow2.f32 %v6447_v57  ;;  %v3842_v57 = vld [vmem:[#allocation5 + $0x10] sm:$0xff] }
 0x6cd   :  { %v8458_v7 = vpop.eup %8457 }
 0x6ce   :  { %v3597_v6 = vadd.f32 1.0, %v8458_v7  ;;  %v8460_v47 = vpop.eup %8459  ;;  %v3846_v7 = vld [vmem:[#allocation5 + $0x30] sm:$0xff] }
 0x6cf   :  { %v3598_v3 = vadd.f32 1.0, %v8460_v47  ;;  %v8462_v35 = vpop.eup %8461  ;;  %v3853_v47 = vld [vmem:[#allocation5 + $0x68] sm:$0xff] }
 0x6d0   :  { %8465 = vrcp.f32 %v3597_v6  ;;  %v8464_v21 = vpop.eup %8463  ;;  %v3849_v6 = vld [vmem:[#allocation5 + $0x48] sm:$0xff] }
 0x6d1   :  { %8467 = vrcp.f32 %v3598_v3  ;;  %v3599_v2 = vadd.f32 1.0, %v8464_v21  ;;  %v3851_v3 = vld [vmem:[#allocation5 + $0x58] sm:$0xff]  ;;  %v10132_v9 = vpack.c.bf16 %v3853_v47, %v3849_v6  ;;  %v10148_v6 = vpack.c.bf16 %v3863_v49, %v3859_v26  ;;  %v3858_v47 = vld [vmem:[#allocation5 + $0x90] sm:$0xff]  ;;  %v3864_v49 = vld [vmem:[#allocation5 + $0xc0] sm:$0xff] }
 0x6d2   :  { %v3868_v26 = vld [vmem:[#allocation5 + $0xe0] sm:$0xff] }
 0x6d3   :  { %8469 = vrcp.f32 %v3599_v2  ;;  %v3852_v2 = vld [vmem:[#allocation5 + $0x60] sm:$0xff]  ;;  %11294 = vst [vmem:[#allocation48_spill] sm:$0xff] %v10132_v9  ;;  %11299 = vst [vmem:[#allocation53_spill] sm:$0xff] %v10148_v6 }
 0x6da   :  { %v8466_v19 = vpop.eup %8465 }
 0x6db   :  { %v3608_v5 = vmul.f32 %v8466_v19, %v8462_v35  ;;  %v8468_v29 = vpop.eup %8467  ;;  %v3855_v35 = vld [vmem:[#allocation5 + $0x78] sm:$0xff] }
 0x6dc   :  { %v3607_v51 = vmul.f32 %v8468_v29, %v9917_v31  ;;  %v10126_v31 = vpack.c.bf16 %v3844_v30, %v3840_v54  ;;  %v3848_v29 = vld [vmem:[#allocation5 + $0x40] sm:$0xff]  ;;  %v10134_v44 = vpack.c.bf16 %v3855_v35, %v3851_v3  ;;  %v10142_v30 = vpack.c.bf16 %v3854_v48, %v3850_v53  ;;  %v3862_v3 = vld [vmem:[#allocation5 + $0xb0] sm:$0xff]  ;;  %v3865_v35 = vld [vmem:[#allocation5 + $0xc8] sm:$0xff] }
 0x6dd   :  { %v8470_v21 = vpop.eup %8469  ;;  %v10140_v54 = vpack.c.bf16 %v3852_v2, %v3848_v29  ;;  %v3871_v29 = vld [vmem:[#allocation5 + $0xf8] sm:$0xff]  ;;  %v3870_v53 = vld [vmem:[#allocation5 + $0xf0] sm:$0xff] }
 0x6de   :  { %v10121_v43 = vadd.f32 %v3608_v5, %v3607_v51  ;;  %v10128_v5 = vpack.c.bf16 %v3846_v7, %v3842_v57  ;;  %v6444_v51 = vmul.f32 -1.442695, %v8237_v23  ;;  %11295 = vst [vmem:[#allocation49_spill] sm:$0xff] %v10134_v44  ;;  %11297 = vst [vmem:[#allocation51_spill] sm:$0xff] %v10142_v30  ;;  %v3856_v23 = vld [vmem:[#allocation5 + $0x80] sm:$0xff]  ;;  %v10146_v7 = vpack.c.bf16 %v3861_v55, %v3857_v62 }
 0x6df   :  { %11296 = vst [vmem:[#allocation50_spill] sm:$0xff] %v10140_v54  ;;  %v3860_v57 = vld [vmem:[#allocation5 + $0xa0] sm:$0xff]  ;;  %v10156_v55 = vpack.c.bf16 %v3862_v3, %v3858_v47 }
 0x6e0   :  { %11292 = vst [vmem:[#allocation46_spill] sm:$0xff] %v10121_v43  ;;  %8471 = vtanh.f32 %v10121_v43  ;;  %11293 = vst [vmem:[#allocation47_spill] sm:$0xff] %v10128_v5  ;;  %v10154_v48 = vpack.c.bf16 %v3860_v57, %v3856_v23  ;;  %v10166_v23 = vpack.c.bf16 %v3868_v26, %v3864_v49  ;;  %v3872_v47 = vld [vmem:[#allocation5 + $0x100] sm:$0xff] }
 0x6e1   :  { %8473 = vpow2.f32 %v6444_v51  ;;  %11298 = vst [vmem:[#allocation52_spill] sm:$0xff] %v10146_v7  ;;  %11301 = vst [vmem:[#allocation55_spill] sm:$0xff] %v10156_v55  ;;  %v3866_v51 = vld [vmem:[#allocation5 + $0xd0] sm:$0xff]  ;;  %v3876_v3 = vld [vmem:[#allocation5 + $0x120] sm:$0xff] }
 0x6e2   :  { %11300 = vst [vmem:[#allocation54_spill] sm:$0xff] %v10154_v48  ;;  %11304 = vst [vmem:[#allocation58_spill] sm:$0xff] %v10166_v23  ;;  %v10168_v57 = vpack.c.bf16 %v3870_v53, %v3866_v51  ;;  %v10178_v26 = vpack.c.bf16 %v3876_v3, %v3872_v47  ;;  %v3880_v53 = vld [vmem:[#allocation5 + $0x140] sm:$0xff]  ;;  %v3895_v47 = vld [vmem:[#allocation5 + $0x1b8] sm:$0xff]  ;;  %8475 = vtanh.f32 %v10114_v12 }
 0x6e4   :  { %11305 = vst [vmem:[#allocation59_spill] sm:$0xff] %v10168_v57  ;;  %11308 = vst [vmem:[#allocation62_spill] sm:$0xff] %v10178_v26 }
 0x6ea   :  { %v8472_v19 = vpop.eup %8471 }
 0x6eb   :  { %v10130_v43 = vmul.f32 %v8472_v19, %v8470_v21  ;;  %v3869_v21 = vld [vmem:[#allocation5 + $0xe8] sm:$0xff]  ;;  %v3867_v19 = vld [vmem:[#allocation5 + $0xd8] sm:$0xff]  ;;  %v8474_v49 = vpop.eup %8473 }
 0x6ec   :  { %v10160_v62 = vpack.c.bf16 %v3869_v21, %v3865_v35  ;;  %v10162_v2 = vpack.c.bf16 %v3871_v29, %v3867_v19  ;;  %v3874_v19 = vld [vmem:[#allocation5 + $0x110] sm:$0xff] }
 0x6ed   :  { %3763 = vmatmul.mubr.f32.vlgmr.msra.gmra.mrb[24].mxu0 %v10130_v43  ;;  %3834 = vmatmul.mubr.f32.vlgmr.msra.gmra.mrb[26].mxu1 %v10130_v43  ;;  %v3878_v29 = vld [vmem:[#allocation5 + $0x130] sm:$0xff] }
 0x6ee   :  { %7520 = vmatpush1.bf16.msra.mxu0 %v10126_v31  ;;  %7552 = vmatpush1.bf16.msra.mxu1 %v10128_v5  ;;  %11302 = vst [vmem:[#allocation56_spill] sm:$0xff] %v10160_v62  ;;  %11303 = vst [vmem:[#allocation57_spill] sm:$0xff] %v10162_v2  ;;  %v10180_v51 = vpack.c.bf16 %v3878_v29, %v3874_v19  ;;  %v3893_v5 = vld [vmem:[#allocation5 + $0x1a8] sm:$0xff]  ;;  %v3890_v29 = vld [vmem:[#allocation5 + $0x190] sm:$0xff] }
 0x6ef   :  { %7522 = vmatprep.subr.bf16.mxu0 %v10132_v9  ;;  %7554 = vmatprep.subr.bf16.mxu1 %v10134_v44  ;;  %v3873_v44 = vld [vmem:[#allocation5 + $0x108] sm:$0xff]  ;;  %v3875_v9 = vld [vmem:[#allocation5 + $0x118] sm:$0xff] }
 0x6f0   :  { %3968 = vmatprep.mubr.f32.mxu0 %v11089_v45  ;;  %4039 = vmatprep.mubr.f32.mxu1 %v11089_v45  ;;  %11309 = vst [vmem:[#allocation63_spill] sm:$0xff] %v10180_v51 }
 0x6f2   :  { %7524 = vmatpush1.bf16.msra.mxu0 %v10140_v54  ;;  %7556 = vmatpush1.bf16.msra.mxu1 %v10142_v30  ;;  %v3877_v54 = vld [vmem:[#allocation5 + $0x128] sm:$0xff]  ;;  %v3879_v30 = vld [vmem:[#allocation5 + $0x138] sm:$0xff] }
 0x6f3   :  { %7526 = vmatprep.subr.bf16.mxu0 %v10146_v7  ;;  %7558 = vmatprep.subr.bf16.mxu1 %v10148_v6  ;;  %v10172_v35 = vpack.c.bf16 %v3877_v54, %v3873_v44  ;;  %v10174_v21 = vpack.c.bf16 %v3879_v30, %v3875_v9  ;;  %v3881_v6 = vld [vmem:[#allocation5 + $0x148] sm:$0xff]  ;;  %v3883_v7 = vld [vmem:[#allocation5 + $0x158] sm:$0xff]  ;;  %v3884_v44 = vld [vmem:[#allocation5 + $0x160] sm:$0xff] }
 0x6f4   :  { %v3882_v30 = vld [vmem:[#allocation5 + $0x150] sm:$0xff]  ;;  %v10191_v3 = vpack.c.bf16 %v3884_v44, %v3880_v53  ;;  %v3903_v53 = vld [vmem:[#allocation5 + $0x1f8] sm:$0xff] }
 0x6f5   :  { %11306 = vst [vmem:[#allocation60_spill] sm:$0xff] %v10172_v35  ;;  %11307 = vst [vmem:[#allocation61_spill] sm:$0xff] %v10174_v21 }
 0x6f6   :  { %7528 = vmatpush1.bf16.msra.mxu0 %v10154_v48  ;;  %7560 = vmatpush1.bf16.msra.mxu1 %v10156_v55  ;;  %v3885_v48 = vld [vmem:[#allocation5 + $0x168] sm:$0xff]  ;;  %v3887_v55 = vld [vmem:[#allocation5 + $0x178] sm:$0xff]  ;;  %11312 = vst [vmem:[#allocation66_spill] sm:$0xff] %v10191_v3 }
 0x6f7   :  { %7530 = vmatprep.subr.bf16.mxu0 %v10160_v62  ;;  %7562 = vmatprep.subr.bf16.mxu1 %v10162_v2  ;;  %v10184_v9 = vpack.c.bf16 %v3885_v48, %v3881_v6  ;;  %v10186_v54 = vpack.c.bf16 %v3887_v55, %v3883_v7  ;;  %v3886_v2 = vld [vmem:[#allocation5 + $0x170] sm:$0xff]  ;;  %v3889_v62 = vld [vmem:[#allocation5 + $0x188] sm:$0xff]  ;;  %v3888_v6 = vld [vmem:[#allocation5 + $0x180] sm:$0xff] }
 0x6f8   :  { %v10193_v19 = vpack.c.bf16 %v3886_v2, %v3882_v30  ;;  %v3892_v7 = vld [vmem:[#allocation5 + $0x1a0] sm:$0xff]  ;;  %v10197_v48 = vpack.c.bf16 %v3893_v5, %v3889_v62 }
 0x6f9   :  { %11310 = vst [vmem:[#allocation64_spill] sm:$0xff] %v10184_v9  ;;  %11311 = vst [vmem:[#allocation65_spill] sm:$0xff] %v10186_v54  ;;  %v10203_v2 = vpack.c.bf16 %v3892_v7, %v3888_v6  ;;  %v3896_v30 = vld [vmem:[#allocation5 + $0x1c0] sm:$0xff] }
 0x6fa   :  { %7532 = vmatpush1.bf16.msra.mxu0 %v10166_v23  ;;  %7564 = vmatpush1.bf16.msra.mxu1 %v10168_v57  ;;  %v3360_v23 = vadd.f32 1.0, %v8474_v49  ;;  %v3891_v57 = vld [vmem:[#allocation5 + $0x198] sm:$0xff]  ;;  %11313 = vst [vmem:[#allocation67_spill] sm:$0xff] %v10193_v19  ;;  %11314 = vst [vmem:[#allocation68_spill] sm:$0xff] %v10197_v48  ;;  %v3894_v49 = vld [vmem:[#allocation5 + $0x1b0] sm:$0xff] }
 0x6fb   :  { %7534 = vmatprep.subr.bf16.mxu0 %v10172_v35  ;;  %7566 = vmatprep.subr.bf16.mxu1 %v10174_v21  ;;  %v10199_v55 = vpack.c.bf16 %v3895_v47, %v3891_v57  ;;  %v3897_v21 = vld [vmem:[#allocation5 + $0x1c8] sm:$0xff]  ;;  %11316 = vst [vmem:[#allocation70_spill] sm:$0xff] %v10203_v2  ;;  %v10205_v44 = vpack.c.bf16 %v3894_v49, %v3890_v29  ;;  %v3900_v5 = vld [vmem:[#allocation5 + $0x1e0] sm:$0xff]  ;;  %v3898_v57 = vld [vmem:[#allocation5 + $0x1d0] sm:$0xff] }
 0x6fc   :  { %8477 = vrcp.f32 %v3360_v23  ;;  %v3902_v47 = vld [vmem:[#allocation5 + $0x1f0] sm:$0xff]  ;;  %v10215_v6 = vpack.c.bf16 %v3900_v5, %v3896_v30  ;;  %v4079_v29 = vld [vmem:[#allocation16] sm:$0xff]  ;;  %v4094_v30 = vld [vmem:[#allocation16 + $0x78] sm:$0xff] }
 0x6fd   :  { %11315 = vst [vmem:[#allocation69_spill] sm:$0xff] %v10199_v55  ;;  %11317 = vst [vmem:[#allocation71_spill] sm:$0xff] %v10205_v44  ;;  %v10217_v7 = vpack.c.bf16 %v3902_v47, %v3898_v57  ;;  %v4083_v49 = vld [vmem:[#allocation16 + $0x20] sm:$0xff]  ;;  %v4096_v35 = vld [vmem:[#allocation16 + $0x88] sm:$0xff] }
 0x6fe   :  { %7536 = vmatpush1.bf16.msra.mxu0 %v10178_v26  ;;  %7568 = vmatpush1.bf16.msra.mxu1 %v10180_v51  ;;  %v3901_v26 = vld [vmem:[#allocation5 + $0x1e8] sm:$0xff]  ;;  %v3899_v51 = vld [vmem:[#allocation5 + $0x1d8] sm:$0xff]  ;;  %11320 = vst [vmem:[#allocation74_spill] sm:$0xff] %v10215_v6  ;;  %v10227_v57 = vpack.c.bf16 %v4083_v49, %v4079_v29 }
 0x6ff   :  { %7538 = vmatprep.subr.bf16.mxu0 %v10184_v9  ;;  %7570 = vmatprep.subr.bf16.mxu1 %v10186_v54  ;;  %v10209_v62 = vpack.c.bf16 %v3901_v26, %v3897_v21  ;;  %v10211_v23 = vpack.c.bf16 %v3903_v53, %v3899_v51  ;;  %v4080_v54 = vld [vmem:[#allocation16 + $0x8] sm:$0xff]  ;;  %v4082_v9 = vld [vmem:[#allocation16 + $0x18] sm:$0xff]  ;;  %11321 = vst [vmem:[#allocation75_spill] sm:$0xff] %v10217_v7  ;;  %v4081_v51 = vld [vmem:[#allocation16 + $0x10] sm:$0xff] }
 0x700   :  { %v4085_v53 = vld [vmem:[#allocation16 + $0x30] sm:$0xff]  ;;  %11323 = vst [vmem:[#allocation78_spill] sm:$0xff] %v10227_v57  ;;  %v4098_v29 = vld [vmem:[#allocation16 + $0x98] sm:$0xff] }
 0x701   :  { %11318 = vst [vmem:[#allocation72_spill] sm:$0xff] %v10209_v62  ;;  %11319 = vst [vmem:[#allocation73_spill] sm:$0xff] %v10211_v23  ;;  %v10229_v47 = vpack.c.bf16 %v4085_v53, %v4081_v51  ;;  %v4102_v49 = vld [vmem:[#allocation16 + $0xb8] sm:$0xff] }
 0x702   :  { %7540 = vmatpush1.bf16.msra.mxu0 %v10191_v3  ;;  %7572 = vmatpush1.bf16.msra.mxu1 %v10193_v19  ;;  %v4084_v3 = vld [vmem:[#allocation16 + $0x28] sm:$0xff]  ;;  %v4086_v19 = vld [vmem:[#allocation16 + $0x38] sm:$0xff]  ;;  %v10251_v53 = vpack.c.bf16 %v4102_v49, %v4098_v29  ;;  %v4105_v29 = vld [vmem:[#allocation16 + $0xd0] sm:$0xff] }
 0x703   :  { %7542 = vmatprep.subr.bf16.mxu0 %v10197_v48  ;;  %7574 = vmatprep.subr.bf16.mxu1 %v10199_v55  ;;  %v10221_v21 = vpack.c.bf16 %v4084_v3, %v4080_v54  ;;  %v10223_v26 = vpack.c.bf16 %v4086_v19, %v4082_v9  ;;  %v4088_v55 = vld [vmem:[#allocation16 + $0x48] sm:$0xff]  ;;  %11324 = vst [vmem:[#allocation79_spill] sm:$0xff] %v10229_v47  ;;  %v4087_v54 = vld [vmem:[#allocation16 + $0x40] sm:$0xff]  ;;  %v4109_v49 = vld [vmem:[#allocation16 + $0xf0] sm:$0xff] }
 0x704   :  { %v4092_v48 = vld [vmem:[#allocation16 + $0x68] sm:$0xff]  ;;  %v4091_v3 = vld [vmem:[#allocation16 + $0x60] sm:$0xff]  ;;  %11331 = vst [vmem:[#allocation85_spill] sm:$0xff] %v10251_v53 }
 0x705   :  { %11322 = vst [vmem:[#allocation76_spill] sm:$0xff] %v10223_v26  ;;  %v10235_v19 = vpack.c.bf16 %v4092_v48, %v4088_v55  ;;  %v4095_v55 = vld [vmem:[#allocation16 + $0x80] sm:$0xff] }
 0x706   :  { %7544 = vmatpush1.bf16.msra.mxu0 %v10203_v2  ;;  %7576 = vmatpush1.bf16.msra.mxu1 %v10205_v44  ;;  %v8476_v2 = vpop.eup %8475  ;;  %v4090_v44 = vld [vmem:[#allocation16 + $0x58] sm:$0xff] }
 0x707   :  { %7546 = vmatprep.subr.bf16.mxu0 %v10209_v62  ;;  %7578 = vmatprep.subr.bf16.mxu1 %v10211_v23  ;;  %v8478_v5 = vpop.eup %8477  ;;  %11326 = vst [vmem:[#allocation82_spill] sm:$0xff] %v10235_v19  ;;  %v10237_v23 = vpack.c.bf16 %v4094_v30, %v4090_v44  ;;  %v4089_v62 = vld [vmem:[#allocation16 + $0x50] sm:$0xff]  ;;  %v4099_v44 = vld [vmem:[#allocation16 + $0xa0] sm:$0xff] }
 0x708   :  { %v10231_v9 = vmul.f32 %v8478_v5, %v8476_v2  ;;  %v10243_v2 = vpack.c.bf16 %v4091_v3, %v4087_v54  ;;  %v4097_v30 = vld [vmem:[#allocation16 + $0x90] sm:$0xff] }
 0x709   :  { %11327 = vst [vmem:[#allocation81_spill] sm:$0xff] %v10237_v23  ;;  %v4101_v5 = vld [vmem:[#allocation16 + $0xb0] sm:$0xff] }
 0x70a   :  { %7548 = vmatpush1.bf16.msra.mxu0 %v10215_v6  ;;  %7580 = vmatpush1.bf16.msra.mxu1 %v10217_v7  ;;  %11325 = vst [vmem:[#allocation80_spill] sm:$0xff] %v10231_v9  ;;  %v4093_v6 = vld [vmem:[#allocation16 + $0x70] sm:$0xff]  ;;  %v4100_v7 = vld [vmem:[#allocation16 + $0xa8] sm:$0xff]  ;;  %11328 = vst [vmem:[#allocation83_spill] sm:$0xff] %v10243_v2 }
 0x70b   :  { %7582 = vmatprep.subr.bf16.mxu0 %v10221_v21  ;;  %7614 = vmatprep.subr.bf16.mxu1 %v10223_v26  ;;  %v10245_v48 = vpack.c.bf16 %v4093_v6, %v4089_v62  ;;  %v10249_v51 = vpack.c.bf16 %v4100_v7, %v4096_v35  ;;  %v4106_v26 = vld [vmem:[#allocation16 + $0xd8] sm:$0xff]  ;;  %v10257_v62 = vpack.c.bf16 %v4099_v44, %v4095_v55  ;;  %v4103_v6 = vld [vmem:[#allocation16 + $0xc0] sm:$0xff] }
 0x70c   :  { %v10259_v35 = vpack.c.bf16 %v4101_v5, %v4097_v30  ;;  %v4107_v7 = vld [vmem:[#allocation16 + $0xe0] sm:$0xff]  ;;  %v10271_v44 = vpack.c.bf16 %v4109_v49, %v4105_v29 }
 0x70d   :  { %3969 = vmatmul.mubr.f32.vlgmr.msra.gmra.mrb[24].mxu0 %v10231_v9  ;;  %4040 = vmatmul.mubr.f32.vlgmr.msra.gmra.mrb[26].mxu1 %v10231_v9  ;;  %11329 = vst [vmem:[#allocation84_spill] sm:$0xff] %v10245_v48  ;;  %11330 = vst [vmem:[#allocation86_spill] sm:$0xff] %v10249_v51  ;;  %v4104_v9 = vld [vmem:[#allocation16 + $0xc8] sm:$0xff]  ;;  %v10269_v55 = vpack.c.bf16 %v4107_v7, %v4103_v6  ;;  %v4111_v30 = vld [vmem:[#allocation16 + $0x100] sm:$0xff] }
 0x70e   :  { %7584 = vmatpush1.bf16.msra.mxu0 %v10227_v57  ;;  %7616 = vmatpush1.bf16.msra.mxu1 %v10229_v47  ;;  %v4108_v57 = vld [vmem:[#allocation16 + $0xe8] sm:$0xff]  ;;  %v4110_v47 = vld [vmem:[#allocation16 + $0xf8] sm:$0xff]  ;;  %11332 = vst [vmem:[#allocation87_spill] sm:$0xff] %v10257_v62  ;;  %11333 = vst [vmem:[#allocation88_spill] sm:$0xff] %v10259_v35 }
 0x70f   :  { %7586 = vmatprep.subr.bf16.mxu0 %v10235_v19  ;;  %7618 = vmatprep.subr.bf16.mxu1 %v10237_v23  ;;  %v10263_v54 = vpack.c.bf16 %v4108_v57, %v4104_v9  ;;  %v10265_v3 = vpack.c.bf16 %v4110_v47, %v4106_v26  ;;  %v4112_v23 = vld [vmem:[#allocation16 + $0x108] sm:$0xff]  ;;  %v4114_v19 = vld [vmem:[#allocation16 + $0x118] sm:$0xff]  ;;  %11336 = vst [vmem:[#allocation91_spill] sm:$0xff] %v10269_v55  ;;  %11337 = vst [vmem:[#allocation92_spill] sm:$0xff] %v10271_v44 }
 0x710   :  { %4207 = vmatprep.mubr.f32.mxu0 %v11089_v45  ;;  %4278 = vmatprep.mubr.f32.mxu1 %v11089_v45  ;;  %v4115_v5 = vld [vmem:[#allocation16 + $0x120] sm:$0xff]  ;;  %v4113_v47 = vld [vmem:[#allocation16 + $0x110] sm:$0xff] }
 0x711   :  { %11334 = vst [vmem:[#allocation90_spill] sm:$0xff] %v10263_v54  ;;  %11335 = vst [vmem:[#allocation89_spill] sm:$0xff] %v10265_v3  ;;  %v4117_v9 = vld [vmem:[#allocation16 + $0x130] sm:$0xff]  ;;  %v10281_v6 = vpack.c.bf16 %v4115_v5, %v4111_v30  ;;  %v4119_v29 = vld [vmem:[#allocation16 + $0x140] sm:$0xff] }
 0x712   :  { %7588 = vmatpush1.bf16.msra.mxu0 %v10243_v2  ;;  %7620 = vmatpush1.bf16.msra.mxu1 %v10245_v48  ;;  %v4116_v2 = vld [vmem:[#allocation16 + $0x128] sm:$0xff]  ;;  %v4118_v48 = vld [vmem:[#allocation16 + $0x138] sm:$0xff]  ;;  %v10283_v7 = vpack.c.bf16 %v4117_v9, %v4113_v47  ;;  %v4123_v49 = vld [vmem:[#allocation16 + $0x160] sm:$0xff] }
 0x713   :  { %7590 = vmatprep.subr.bf16.mxu0 %v10249_v51  ;;  %7622 = vmatprep.subr.bf16.mxu1 %v10251_v53  ;;  %v10275_v26 = vpack.c.bf16 %v4116_v2, %v4112_v23  ;;  %v10277_v57 = vpack.c.bf16 %v4118_v48, %v4114_v19  ;;  %v4120_v53 = vld [vmem:[#allocation16 + $0x148] sm:$0xff]  ;;  %v4122_v51 = vld [vmem:[#allocation16 + $0x158] sm:$0xff]  ;;  %11340 = vst [vmem:[#allocation95_spill] sm:$0xff] %v10281_v6  ;;  %v4121_v2 = vld [vmem:[#allocation16 + $0x150] sm:$0xff] }
 0x714   :  { %11341 = vst [vmem:[#allocation96_spill] sm:$0xff] %v10283_v7  ;;  %v4125_v48 = vld [vmem:[#allocation16 + $0x170] sm:$0xff]  ;;  %v10293_v30 = vpack.c.bf16 %v4123_v49, %v4119_v29  ;;  %v4127_v47 = vld [vmem:[#allocation16 + $0x180] sm:$0xff] }
 0x715   :  { %11338 = vst [vmem:[#allocation93_spill] sm:$0xff] %v10275_v26  ;;  %11339 = vst [vmem:[#allocation94_spill] sm:$0xff] %v10277_v57  ;;  %v10295_v5 = vpack.c.bf16 %v4125_v48, %v4121_v2  ;;  %v4131_v9 = vld [vmem:[#allocation16 + $0x1a0] sm:$0xff]  ;;  %v4141_v48 = vld [vmem:[#allocation16 + $0x1f0] sm:$0xff] }
 0x716   :  { %7592 = vmatpush1.bf16.msra.mxu0 %v10257_v62  ;;  %7624 = vmatpush1.bf16.msra.mxu1 %v10259_v35  ;;  %v4124_v62 = vld [vmem:[#allocation16 + $0x168] sm:$0xff]  ;;  %v4126_v35 = vld [vmem:[#allocation16 + $0x178] sm:$0xff]  ;;  %v10305_v29 = vpack.c.bf16 %v4131_v9, %v4127_v47  ;;  %v4135_v2 = vld [vmem:[#allocation16 + $0x1c0] sm:$0xff] }
 0x717   :  { %7594 = vmatprep.subr.bf16.mxu0 %v10263_v54  ;;  %7626 = vmatprep.subr.bf16.mxu1 %v10265_v3  ;;  %v10287_v23 = vpack.c.bf16 %v4124_v62, %v4120_v53  ;;  %v10289_v19 = vpack.c.bf16 %v4126_v35, %v4122_v51  ;;  %v4128_v3 = vld [vmem:[#allocation16 + $0x188] sm:$0xff]  ;;  %v4130_v54 = vld [vmem:[#allocation16 + $0x198] sm:$0xff]  ;;  %v4129_v62 = vld [vmem:[#allocation16 + $0x190] sm:$0xff] }
 0x718   :  { %v4133_v35 = vld [vmem:[#allocation16 + $0x1b0] sm:$0xff] }
 0x719   :  { %v10307_v49 = vpack.c.bf16 %v4133_v35, %v4129_v62 }
 0x71a   :  { %7596 = vmatpush1.bf16.msra.mxu0 %v10269_v55  ;;  %7628 = vmatpush1.bf16.msra.mxu1 %v10271_v44  ;;  %v4132_v55 = vld [vmem:[#allocation16 + $0x1a8] sm:$0xff]  ;;  %v4134_v44 = vld [vmem:[#allocation16 + $0x1b8] sm:$0xff] }
 0x71b   :  { %7598 = vmatprep.subr.bf16.mxu0 %v10275_v26  ;;  %7630 = vmatprep.subr.bf16.mxu1 %v10277_v57  ;;  %v10299_v51 = vpack.c.bf16 %v4132_v55, %v4128_v3  ;;  %v10301_v53 = vpack.c.bf16 %v4134_v44, %v4130_v54  ;;  %v4136_v57 = vld [vmem:[#allocation16 + $0x1c8] sm:$0xff]  ;;  %v4138_v26 = vld [vmem:[#allocation16 + $0x1d8] sm:$0xff]  ;;  %v4139_v55 = vld [vmem:[#allocation16 + $0x1e0] sm:$0xff] }
 0x71c   :  { %v4137_v44 = vld [vmem:[#allocation16 + $0x1d0] sm:$0xff]  ;;  %v10317_v47 = vpack.c.bf16 %v4139_v55, %v4135_v2 }
 0x71d   :  { %v10319_v9 = vpack.c.bf16 %v4141_v48, %v4137_v44 }
 0x71e   :  { %7600 = vmatpush1.bf16.msra.mxu0 %v10281_v6  ;;  %7632 = vmatpush1.bf16.msra.mxu1 %v10283_v7  ;;  %v4140_v6 = vld [vmem:[#allocation16 + $0x1e8] sm:$0xff]  ;;  %v4142_v7 = vld [vmem:[#allocation16 + $0x1f8] sm:$0xff] }
 0x71f   :  { %7602 = vmatprep.subr.bf16.mxu0 %v10287_v23  ;;  %7634 = vmatprep.subr.bf16.mxu1 %v10289_v19  ;;  %v10311_v54 = vpack.c.bf16 %v4140_v6, %v4136_v57  ;;  %v10313_v3 = vpack.c.bf16 %v4142_v7, %v4138_v26  ;;  %v11345_v26 = vld [vmem:[#allocation43_spill] sm:$0xff] }
 0x722   :  { %7604 = vmatpush1.bf16.msra.mxu0 %v10293_v30  ;;  %7636 = vmatpush1.bf16.msra.mxu1 %v10295_v5 }
 0x723   :  { %7606 = vmatprep.subr.bf16.mxu0 %v10299_v51  ;;  %7638 = vmatprep.subr.bf16.mxu1 %v10301_v53 }
 0x726   :  { %7608 = vmatpush1.bf16.msra.mxu0 %v10305_v29  ;;  %7640 = vmatpush1.bf16.msra.mxu1 %v10307_v49 }
 0x727   :  { %7610 = vmatprep.subr.bf16.mxu0 %v10311_v54  ;;  %7642 = vmatprep.subr.bf16.mxu1 %v10313_v3 }
 0x72a   :  { %7612 = vmatpush1.bf16.msra.mxu0 %v10317_v47  ;;  %7644 = vmatpush1.bf16.msra.mxu1 %v10319_v9 }
 0x72b   :  { %7646 = vmatprep.subr.bf16.mxu0 %v10000_v28  ;;  %7678 = vmatprep.subr.bf16.mxu1 %v10002_v61  ;;  %v3676_v28 = vld [vmem:[%s10850_s8] sm:$0xf] }
 0x72c   :  { %v3681_v61 = vrot.slane %v3676_v28, %v9075_v58 }
 0x72d   :  { %4208 = vmatmul.mubr.f32.vlgmr.msra.gmra.mrb[10].mxu0 %v10130_v43  ;;  %4279 = vmatmul.mubr.f32.vlgmr.msra.gmra.mrb[10].mxu1 %v10130_v43 }
 0x72e   :  { %7648 = vmatpush1.bf16.msra.mxu0 %v10004_v24  ;;  %7680 = vmatpush1.bf16.msra.mxu1 %v10007_v56  ;;  %v3685_v24 = vrot.slane %v3676_v28, %v9080_v60 }
 0x72f   :  { %7650 = vmatprep.subr.bf16.mxu0 %v10012_v63  ;;  %7682 = vmatprep.subr.bf16.mxu1 %v10014_v41 }
 0x730   :  { %4463 = vmatprep.mubr.f32.mxu0 %v11089_v45  ;;  %4534 = vmatprep.mubr.f32.mxu1 %v11089_v45 }
 0x732   :  { %7652 = vmatpush1.bf16.msra.mxu0 %v10016_v1  ;;  %7684 = vmatpush1.bf16.msra.mxu1 %v10019_v13 }
 0x733   :  { %7654 = vmatprep.subr.bf16.mxu0 %v10024_v4  ;;  %7686 = vmatprep.subr.bf16.mxu1 %v10026_v14 }
 0x736   :  { %7656 = vmatpush1.bf16.msra.mxu0 %v10028_v15  ;;  %7688 = vmatpush1.bf16.msra.mxu1 %v10031_v52  ;;  %v3693_v52 = vrot.slane %v3676_v28, %v9092_v10 }
 0x737   :  { %7658 = vmatprep.subr.bf16.mxu0 %v10036_v20  ;;  %7690 = vmatprep.subr.bf16.mxu1 %v10038_v37 }
 0x73a   :  { %7660 = vmatpush1.bf16.msra.mxu0 %v10040_v11  ;;  %7692 = vmatpush1.bf16.msra.mxu1 %v10043_v27 }
 0x73b   :  { %7662 = vmatprep.subr.bf16.mxu0 %v10048_v59  ;;  %7694 = vmatprep.subr.bf16.mxu1 %v10050_v18 }
 0x73e   :  { %7664 = vmatpush1.bf16.msra.mxu0 %v10052_v0  ;;  %7696 = vmatpush1.bf16.msra.mxu1 %v10055_v40 }
 0x73f   :  { %7666 = vmatprep.subr.bf16.mxu0 %v10060_v32  ;;  %7698 = vmatprep.subr.bf16.mxu1 %v10062_v16 }
 0x742   :  { %7668 = vmatpush1.bf16.msra.mxu0 %v10064_v22  ;;  %7700 = vmatpush1.bf16.msra.mxu1 %v10067_v33 }
 0x743   :  { %7670 = vmatprep.subr.bf16.mxu0 %v10071_v42  ;;  %7702 = vmatprep.subr.bf16.mxu1 %v10074_v50  ;;  %v11342_v50 = vld [vmem:[#allocation38_spill] sm:$0xff] }
 0x746   :  { %7672 = vmatpush1.bf16.msra.mxu0 %v10076_v17  ;;  %7704 = vmatpush1.bf16.msra.mxu1 %v10079_v39 }
 0x747   :  { %7674 = vmatprep.subr.bf16.mxu0 %v10082_v36  ;;  %7706 = vmatprep.subr.bf16.mxu1 %v10084_v46  ;;  %v11343_v46 = vld [vmem:[#allocation39_spill] sm:$0xff] }
 0x74a   :  { %7676 = vmatpush1.bf16.msra.mxu0 %v10087_v34  ;;  %7708 = vmatpush1.bf16.msra.mxu1 %v10091_v38 }
 0x74b   :  { %7710 = vmatprep.subr.bf16.mxu0 %v10093_v25  ;;  %7742 = vmatprep.subr.bf16.mxu1 %v10096_v8  ;;  %v11344_v8 = vld [vmem:[#allocation42_spill] sm:$0xff] }
 0x7e0   :  { %v3970_v56 = vpop.f32.mrb[24].mxu0  ;;  %v4041_v63 = vpop.f32.mrb[26].mxu1 }
 0x7e1   :  { %v8239_v41 = vadd.f32 %v3970_v56, %v3681_v61  ;;  %v3972_v1 = vpop.f32.mrb[25].mxu0  ;;  %v4043_v13 = vpop.f32.mrb[27].mxu1  ;;  %v11346_v56 = vld [vmem:[#allocation46_spill] sm:$0xff] }
 0x7e2   :  { %v8240_v4 = vadd.f32 %v3972_v1, %v3685_v24  ;;  %v8242_v20 = vadd.f32 %v4043_v13, %v3693_v52  ;;  %v11347_v13 = vld [vmem:[#allocation40_spill] sm:$0xff] }
 0x7e3   :  { %v6448_v14 = vmul.f32 -1.442695, %v8239_v41 }
 0x7e4   :  { %v6449_v15 = vmul.f32 -1.442695, %v8240_v4  ;;  %v3689_v4 = vrot.slane %v3676_v28, %v11347_v13  ;;  %v11351_v28 = vld [vmem:[#allocation50_spill] sm:$0xff] }
 0x7e5   :  { %8479 = vpow2.f32 %v6448_v14 }
 0x7e6   :  { %8481 = vpow2.f32 %v6449_v15  ;;  %v8241_v14 = vadd.f32 %v4041_v63, %v3689_v4  ;;  %v11352_v63 = vld [vmem:[#allocation51_spill] sm:$0xff]  ;;  %v11378_v4 = vld [vmem:[#allocation76_spill] sm:$0xff] }
 0x7e7   :  { %8483 = vtanh.f32 %v8242_v20 }
 0x7e8   :  { %v6450_v20 = vmul.f32 -1.442695, %v8241_v14  ;;  %v11379_v14 = vld [vmem:[#allocation78_spill] sm:$0xff] }
 0x7ef   :  { %v8480_v37 = vpop.eup %8479 }
 0x7f0   :  { %v4059_v11 = vadd.f32 1.0, %v8480_v37  ;;  %v8482_v27 = vpop.eup %8481 }
 0x7f1   :  { %v4060_v59 = vadd.f32 1.0, %v8482_v27  ;;  %v8484_v18 = vpop.eup %8483  ;;  %v11349_v27 = vld [vmem:[#allocation48_spill] sm:$0xff] }
 0x7f2   :  { %8485 = vrcp.f32 %v4059_v11  ;;  %v11348_v11 = vld [vmem:[#allocation47_spill] sm:$0xff] }
 0x7f3   :  { %8487 = vrcp.f32 %v4060_v59  ;;  %v11350_v59 = vld [vmem:[#allocation49_spill] sm:$0xff] }
 0x7fc   :  { %v8486_v0 = vpop.eup %8485 }
 0x7fd   :  { %v4070_v40 = vmul.f32 %v8486_v0, %v8484_v18  ;;  %v8488_v32 = vpop.eup %8487  ;;  %v11353_v18 = vld [vmem:[#allocation52_spill] sm:$0xff]  ;;  %v11354_v0 = vld [vmem:[#allocation53_spill] sm:$0xff] }
 0x7fe   :  { %v4069_v16 = vmul.f32 %v8488_v32, %v10114_v12  ;;  %v11357_v32 = vld [vmem:[#allocation56_spill] sm:$0xff] }
 0x800   :  { %v4209_v22 = vpop.f32.mrb[10].mxu0  ;;  %v4280_v33 = vpop.f32.mrb[10].mxu1  ;;  %v10370_v42 = vadd.f32 %v4070_v40, %v4069_v16  ;;  %v11356_v40 = vld [vmem:[#allocation55_spill] sm:$0xff]  ;;  %v11358_v16 = vld [vmem:[#allocation57_spill] sm:$0xff] }
 0x801   :  { %v8201_v17 = vadd.f32 %v4209_v22, %v11342_v50  ;;  %v4211_v39 = vpop.f32.mrb[11].mxu0  ;;  %v4282_v36 = vpop.f32.mrb[11].mxu1  ;;  %v8217_v43 = vadd.f32 %v4280_v33, %v11344_v8  ;;  %v11359_v33 = vld [vmem:[#allocation58_spill] sm:$0xff] }
 0x802   :  { %v8202_v34 = vadd.f32 %v4211_v39, %v11343_v46  ;;  %v8218_v57 = vadd.f32 %v4282_v36, %v11345_v26  ;;  %v11361_v39 = vld [vmem:[#allocation60_spill] sm:$0xff]  ;;  %v11362_v36 = vld [vmem:[#allocation61_spill] sm:$0xff] }
 0x803   :  { %v6451_v38 = vmul.f32 -1.442695, %v8201_v17  ;;  %v6453_v6 = vmul.f32 -1.442695, %v8217_v43  ;;  %v11360_v17 = vld [vmem:[#allocation59_spill] sm:$0xff]  ;;  %v11365_v43 = vld [vmem:[#allocation64_spill] sm:$0xff] }
 0x804   :  { %v6452_v25 = vmul.f32 -1.442695, %v8202_v34 }
 0x805   :  { %8489 = vpow2.f32 %v6451_v38  ;;  %v11363_v38 = vld [vmem:[#allocation62_spill] sm:$0xff] }
 0x806   :  { %8491 = vpow2.f32 %v6452_v25  ;;  %v11364_v25 = vld [vmem:[#allocation63_spill] sm:$0xff] }
 0x807   :  { %8493 = vtanh.f32 %v8218_v57  ;;  %v11366_v57 = vld [vmem:[#allocation65_spill] sm:$0xff] }
 0x808   :  { %8495 = vpow2.f32 %v6453_v6  ;;  %v11367_v6 = vld [vmem:[#allocation66_spill] sm:$0xff] }
 0x80f   :  { %v8490_v12 = vpop.eup %8489 }
 0x810   :  { %v4298_v7 = vadd.f32 1.0, %v8490_v12  ;;  %v8492_v62 = vpop.eup %8491  ;;  %v11368_v12 = vld [vmem:[#allocation67_spill] sm:$0xff] }
 0x811   :  { %v4299_v35 = vadd.f32 1.0, %v8492_v62  ;;  %v8494_v2 = vpop.eup %8493  ;;  %v11370_v62 = vld [vmem:[#allocation69_spill] sm:$0xff] }
 0x812   :  { %8497 = vrcp.f32 %v4298_v7  ;;  %v8496_v55 = vpop.eup %8495  ;;  %v11369_v7 = vld [vmem:[#allocation68_spill] sm:$0xff] }
 0x813   :  { %8499 = vrcp.f32 %v4299_v35  ;;  %v4300_v24 = vadd.f32 1.0, %v8496_v55  ;;  %v11371_v35 = vld [vmem:[#allocation70_spill] sm:$0xff]  ;;  %v11373_v55 = vld [vmem:[#allocation72_spill] sm:$0xff] }
 0x815   :  { %8501 = vrcp.f32 %v4300_v24  ;;  %v11375_v24 = vld [vmem:[#allocation74_spill] sm:$0xff] }
 0x81c   :  { %v8498_v44 = vpop.eup %8497 }
 0x81d   :  { %v4309_v48 = vmul.f32 %v8498_v44, %v8494_v2  ;;  %v8500_v61 = vpop.eup %8499  ;;  %v11372_v2 = vld [vmem:[#allocation71_spill] sm:$0xff]  ;;  %v11374_v44 = vld [vmem:[#allocation73_spill] sm:$0xff] }
 0x81e   :  { %v4308_v41 = vmul.f32 %v8500_v61, %v11346_v56  ;;  %v11376_v56 = vld [vmem:[#allocation75_spill] sm:$0xff] }
 0x81f   :  { %v8502_v15 = vpop.eup %8501 }
 0x820   :  { %v10377_v1 = vadd.f32 %v4309_v48, %v4308_v41 }
 0x822   :  { %8503 = vtanh.f32 %v10377_v1 }
 0x823   :  { %8505 = vpow2.f32 %v6450_v20  ;;  %v11382_v20 = vld [vmem:[#allocation81_spill] sm:$0xff] }
 0x824   :  { %8507 = vtanh.f32 %v10370_v42 }
 0x82c   :  { %v8504_v52 = vpop.eup %8503 }
 0x82d   :  { %v10381_v37 = vmul.f32 %v8504_v52, %v8502_v15  ;;  %v8506_v22 = vpop.eup %8505  ;;  %v11380_v15 = vld [vmem:[#allocation79_spill] sm:$0xff]  ;;  %v11381_v52 = vld [vmem:[#allocation82_spill] sm:$0xff] }
 0x82e   :  { %v4061_v34 = vadd.f32 1.0, %v8506_v22  ;;  %v8508_v48 = vpop.eup %8507  ;;  %v11395_v22 = vld [vmem:[#allocation95_spill] sm:$0xff] }
 0x82f   :  { %4464 = vmatmul.mubr.f32.vlgmr.msra.gmra.mrb[26].mxu0 %v10381_v37  ;;  %4535 = vmatmul.mubr.f32.vlgmr.msra.gmra.mrb[28].mxu1 %v10381_v37 }
 0x830   :  { %7712 = vmatpush1.bf16.msra.mxu0 %v10126_v31  ;;  %7744 = vmatpush1.bf16.msra.mxu1 %v11348_v11  ;;  %v11355_v31 = vld [vmem:[#allocation54_spill] sm:$0xff]  ;;  %8509 = vrcp.f32 %v4061_v34  ;;  %v11383_v11 = vld [vmem:[#allocation83_spill] sm:$0xff]  ;;  %v5029_v34 = vld [vmem:[#allocation4 + $0x78] sm:$0xff] }
 0x831   :  { %7714 = vmatprep.subr.bf16.mxu0 %v11349_v27  ;;  %7746 = vmatprep.subr.bf16.mxu1 %v11350_v59  ;;  %v11385_v27 = vld [vmem:[#allocation86_spill] sm:$0xff]  ;;  %v11386_v59 = vld [vmem:[#allocation85_spill] sm:$0xff] }
 0x832   :  { %4669 = vmatprep.mubr.f32.mxu0 %v11089_v45  ;;  %4740 = vmatprep.mubr.f32.mxu1 %v11089_v45 }
 0x834   :  { %7716 = vmatpush1.bf16.msra.mxu0 %v11351_v28  ;;  %7748 = vmatpush1.bf16.msra.mxu1 %v11352_v63  ;;  %v11387_v28 = vld [vmem:[#allocation87_spill] sm:$0xff]  ;;  %v11388_v63 = vld [vmem:[#allocation88_spill] sm:$0xff] }
 0x835   :  { %7718 = vmatprep.subr.bf16.mxu0 %v11353_v18  ;;  %7750 = vmatprep.subr.bf16.mxu1 %v11354_v0  ;;  %v11389_v18 = vld [vmem:[#allocation90_spill] sm:$0xff]  ;;  %v11390_v0 = vld [vmem:[#allocation89_spill] sm:$0xff] }
 0x838   :  { %7720 = vmatpush1.bf16.msra.mxu0 %v11355_v31  ;;  %7752 = vmatpush1.bf16.msra.mxu1 %v11356_v40  ;;  %v11391_v31 = vld [vmem:[#allocation91_spill] sm:$0xff]  ;;  %v11392_v40 = vld [vmem:[#allocation92_spill] sm:$0xff] }
 0x839   :  { %7722 = vmatprep.subr.bf16.mxu0 %v11357_v32  ;;  %7754 = vmatprep.subr.bf16.mxu1 %v11358_v16  ;;  %v11393_v32 = vld [vmem:[#allocation93_spill] sm:$0xff]  ;;  %v11394_v16 = vld [vmem:[#allocation94_spill] sm:$0xff] }
 0x83a   :  { %v8510_v61 = vpop.eup %8509 }
 0x83b   :  { %v10418_v41 = vmul.f32 %v8510_v61, %v8508_v48  ;;  %v5030_v48 = vld [vmem:[#allocation4 + $0x80] sm:$0xff] }
 0x83c   :  { %7724 = vmatpush1.bf16.msra.mxu0 %v11359_v33  ;;  %7756 = vmatpush1.bf16.msra.mxu1 %v11360_v17  ;;  %v11396_v33 = vld [vmem:[#allocation96_spill] sm:$0xff]  ;;  %v5027_v17 = vld [vmem:[#allocation4 + $0x68] sm:$0xff]  ;;  %v5034_v61 = vld [vmem:[#allocation4 + $0xa0] sm:$0xff] }
 0x83d   :  { %7726 = vmatprep.subr.bf16.mxu0 %v11361_v39  ;;  %7758 = vmatprep.subr.bf16.mxu1 %v11362_v36  ;;  %11377 = vst [vmem:[#allocation46_spill] sm:$0xff] %v10418_v41  ;;  %v5025_v39 = vld [vmem:[#allocation4 + $0x58] sm:$0xff] }
 0x840   :  { %7728 = vmatpush1.bf16.msra.mxu0 %v11363_v38  ;;  %7760 = vmatpush1.bf16.msra.mxu1 %v11364_v25  ;;  %v5022_v38 = vld [vmem:[#allocation4 + $0x40] sm:$0xff] }
 0x841   :  { %7730 = vmatprep.subr.bf16.mxu0 %v11365_v43  ;;  %7762 = vmatprep.subr.bf16.mxu1 %v11366_v57  ;;  %v5026_v25 = vld [vmem:[#allocation4 + $0x60] sm:$0xff]  ;;  %v10474_v43 = vpack.c.bf16 %v5029_v34, %v5025_v39  ;;  %v5057_v39 = vld [vmem:[#allocation4 + $0x158] sm:$0xff] }
 0x842   :  { %v10476_v57 = vpack.c.bf16 %v5026_v25, %v5022_v38  ;;  %v5061_v38 = vld [vmem:[#allocation4 + $0x178] sm:$0xff]  ;;  %v5054_v25 = vld [vmem:[#allocation4 + $0x140] sm:$0xff] }
 0x844   :  { %7732 = vmatpush1.bf16.msra.mxu0 %v11367_v6  ;;  %7764 = vmatpush1.bf16.msra.mxu1 %v11368_v12  ;;  %v5024_v6 = vld [vmem:[#allocation4 + $0x50] sm:$0xff] }
 0x845   :  { %7734 = vmatprep.subr.bf16.mxu0 %v11369_v7  ;;  %7766 = vmatprep.subr.bf16.mxu1 %v11370_v62  ;;  %v5028_v12 = vld [vmem:[#allocation4 + $0x70] sm:$0xff]  ;;  %v5031_v62 = vld [vmem:[#allocation4 + $0x88] sm:$0xff] }
 0x846   :  { %v10479_v7 = vpack.c.bf16 %v5028_v12, %v5024_v6  ;;  %v5058_v6 = vld [vmem:[#allocation4 + $0x160] sm:$0xff]  ;;  %v10522_v12 = vpack.c.bf16 %v5061_v38, %v5057_v39  ;;  %v5076_v39 = vld [vmem:[#allocation4 + $0x1f0] sm:$0xff]  ;;  %v5243_v38 = vld [vmem:[#allocation5 + $0x8] sm:$0xff] }
 0x848   :  { %7736 = vmatpush1.bf16.msra.mxu0 %v11371_v35  ;;  %7768 = vmatpush1.bf16.msra.mxu1 %v11372_v2  ;;  %v5035_v35 = vld [vmem:[#allocation4 + $0xa8] sm:$0xff]  ;;  %v5033_v2 = vld [vmem:[#allocation4 + $0x98] sm:$0xff] }
 0x849   :  { %7738 = vmatprep.subr.bf16.mxu0 %v11373_v55  ;;  %7770 = vmatprep.subr.bf16.mxu1 %v11374_v44  ;;  %v10484_v55 = vpack.c.bf16 %v5035_v35, %v5031_v62  ;;  %v5037_v44 = vld [vmem:[#allocation4 + $0xb8] sm:$0xff]  ;;  %v10524_v62 = vpack.c.bf16 %v5058_v6, %v5054_v25  ;;  %v5056_v35 = vld [vmem:[#allocation4 + $0x150] sm:$0xff]  ;;  %v5247_v25 = vld [vmem:[#allocation5 + $0x28] sm:$0xff] }
 0x84c   :  { %7740 = vmatpush1.bf16.msra.mxu0 %v11375_v24  ;;  %7772 = vmatpush1.bf16.msra.mxu1 %v11376_v56  ;;  %v10486_v24 = vpack.c.bf16 %v5037_v44, %v5033_v2  ;;  %v10488_v56 = vpack.c.bf16 %v5034_v61, %v5030_v48  ;;  %v5060_v2 = vld [vmem:[#allocation4 + $0x170] sm:$0xff]  ;;  %v5063_v48 = vld [vmem:[#allocation4 + $0x188] sm:$0xff] }
 0x84d   :  { %7774 = vmatprep.subr.bf16.mxu0 %v10221_v21  ;;  %7806 = vmatprep.subr.bf16.mxu1 %v11378_v4  ;;  %v11384_v21 = vld [vmem:[#allocation84_spill] sm:$0xff]  ;;  %v5032_v4 = vld [vmem:[#allocation4 + $0x90] sm:$0xff]  ;;  %v10527_v44 = vpack.c.bf16 %v5060_v2, %v5056_v35  ;;  %v5067_v61 = vld [vmem:[#allocation4 + $0x1a8] sm:$0xff]  ;;  %v10553_v35 = vpack.c.bf16 %v5247_v25, %v5243_v38 }
 0x84e   :  { %v5245_v2 = vld [vmem:[#allocation5 + $0x18] sm:$0xff] }
 0x84f   :  { %4670 = vmatmul.mubr.f32.vlgmr.msra.gmra.mrb[26].mxu0 %v10418_v41  ;;  %4741 = vmatmul.mubr.f32.vlgmr.msra.gmra.mrb[28].mxu1 %v10418_v41 }
 0x850   :  { %7776 = vmatpush1.bf16.msra.mxu0 %v11379_v14  ;;  %7808 = vmatpush1.bf16.msra.mxu1 %v11380_v15  ;;  %v5036_v14 = vld [vmem:[#allocation4 + $0xb0] sm:$0xff] }
 0x851   :  { %7778 = vmatprep.subr.bf16.mxu0 %v11381_v52  ;;  %7810 = vmatprep.subr.bf16.mxu1 %v11382_v20  ;;  %v10491_v15 = vpack.c.bf16 %v5036_v14, %v5032_v4  ;;  %v5039_v52 = vld [vmem:[#allocation4 + $0xc8] sm:$0xff]  ;;  %v5065_v4 = vld [vmem:[#allocation4 + $0x198] sm:$0xff]  ;;  %v10531_v14 = vpack.c.bf16 %v5067_v61, %v5063_v48 }
 0x852   :  { %4908 = vmatprep.mubr.f32.mxu0 %v11089_v45  ;;  %4979 = vmatprep.mubr.f32.mxu1 %v11089_v45  ;;  %v5043_v20 = vld [vmem:[#allocation4 + $0xe8] sm:$0xff]  ;;  %v5249_v48 = vld [vmem:[#allocation5 + $0x38] sm:$0xff] }
 0x853   :  { %v10556_v61 = vpack.c.bf16 %v5249_v48, %v5245_v2 }
 0x854   :  { %7780 = vmatpush1.bf16.msra.mxu0 %v11383_v11  ;;  %7812 = vmatpush1.bf16.msra.mxu1 %v11384_v21  ;;  %v5041_v11 = vld [vmem:[#allocation4 + $0xd8] sm:$0xff]  ;;  %v10496_v21 = vpack.c.bf16 %v5043_v20, %v5039_v52  ;;  %v5062_v20 = vld [vmem:[#allocation4 + $0x180] sm:$0xff] }
 0x855   :  { %7782 = vmatprep.subr.bf16.mxu0 %v11385_v27  ;;  %7814 = vmatprep.subr.bf16.mxu1 %v11386_v59  ;;  %v5045_v27 = vld [vmem:[#allocation4 + $0xf8] sm:$0xff]  ;;  %v5038_v59 = vld [vmem:[#allocation4 + $0xc0] sm:$0xff] }
 0x856   :  { %v5069_v52 = vld [vmem:[#allocation4 + $0x1b8] sm:$0xff] }
 0x858   :  { %7784 = vmatpush1.bf16.msra.mxu0 %v11387_v28  ;;  %7816 = vmatpush1.bf16.msra.mxu1 %v11388_v63  ;;  %v5042_v28 = vld [vmem:[#allocation4 + $0xe0] sm:$0xff]  ;;  %v10498_v63 = vpack.c.bf16 %v5045_v27, %v5041_v11  ;;  %v10534_v27 = vpack.c.bf16 %v5069_v52, %v5065_v4 }
 0x859   :  { %7786 = vmatprep.subr.bf16.mxu0 %v11389_v18  ;;  %7818 = vmatprep.subr.bf16.mxu1 %v11390_v0  ;;  %v10500_v18 = vpack.c.bf16 %v5042_v28, %v5038_v59  ;;  %v5040_v0 = vld [vmem:[#allocation4 + $0xd0] sm:$0xff]  ;;  %v5066_v11 = vld [vmem:[#allocation4 + $0x1a0] sm:$0xff] }
 0x85a   :  { %v10536_v59 = vpack.c.bf16 %v5066_v11, %v5062_v20  ;;  %v5064_v28 = vld [vmem:[#allocation4 + $0x190] sm:$0xff]  ;;  %v10565_v4 = vld [vmem:[%s10850_s8] sm:$0xf] }
 0x85b   :  { %v4382_v52 = vrot.slane %v10565_v4, %v9075_v58  ;;  %v4386_v20 = vrot.slane %v10565_v4, %v9080_v60  ;;  %v5504_v60 = vld [vmem:[#allocation16 + $0xb8] sm:$0xff] }
 0x85c   :  { %7788 = vmatpush1.bf16.msra.mxu0 %v11391_v31  ;;  %7820 = vmatpush1.bf16.msra.mxu1 %v11392_v40  ;;  %v5044_v31 = vld [vmem:[#allocation4 + $0xf0] sm:$0xff] }
 0x85d   :  { %7790 = vmatprep.subr.bf16.mxu0 %v11393_v32  ;;  %7822 = vmatprep.subr.bf16.mxu1 %v11394_v16  ;;  %v10503_v40 = vpack.c.bf16 %v5044_v31, %v5040_v0  ;;  %v5047_v32 = vld [vmem:[#allocation4 + $0x108] sm:$0xff]  ;;  %v5068_v0 = vld [vmem:[#allocation4 + $0x1b0] sm:$0xff] }
 0x85e   :  { %v5051_v16 = vld [vmem:[#allocation4 + $0x128] sm:$0xff] }
 0x85f   :  { %v5071_v31 = vld [vmem:[#allocation4 + $0x1c8] sm:$0xff] }
 0x860   :  { %7792 = vmatpush1.bf16.msra.mxu0 %v11395_v22  ;;  %7824 = vmatpush1.bf16.msra.mxu1 %v11396_v33  ;;  %v5049_v22 = vld [vmem:[#allocation4 + $0x118] sm:$0xff]  ;;  %v10508_v33 = vpack.c.bf16 %v5051_v16, %v5047_v32  ;;  %v10539_v32 = vpack.c.bf16 %v5068_v0, %v5064_v28  ;;  %v5075_v16 = vld [vmem:[#allocation4 + $0x1e8] sm:$0xff] }
 0x861   :  { %7794 = vmatprep.subr.bf16.mxu0 %v10287_v23  ;;  %7826 = vmatprep.subr.bf16.mxu1 %v10289_v19  ;;  %v5015_v23 = vld [vmem:[#allocation4 + $0x8] sm:$0xff] }
 0x862   :  { %v5019_v19 = vld [vmem:[#allocation4 + $0x28] sm:$0xff] }
 0x864   :  { %7796 = vmatpush1.bf16.msra.mxu0 %v10293_v30  ;;  %7828 = vmatpush1.bf16.msra.mxu1 %v10295_v5  ;;  %v5017_v30 = vld [vmem:[#allocation4 + $0x18] sm:$0xff]  ;;  %v10460_v5 = vpack.c.bf16 %v5019_v19, %v5015_v23  ;;  %v5046_v19 = vld [vmem:[#allocation4 + $0x100] sm:$0xff] }
 0x865   :  { %7798 = vmatprep.subr.bf16.mxu0 %v10299_v51  ;;  %7830 = vmatprep.subr.bf16.mxu1 %v10301_v53  ;;  %v5021_v51 = vld [vmem:[#allocation4 + $0x38] sm:$0xff]  ;;  %v5014_v53 = vld [vmem:[#allocation4] sm:$0xff] }
 0x866   :  { %v5053_v23 = vld [vmem:[#allocation4 + $0x138] sm:$0xff] }
 0x868   :  { %7800 = vmatpush1.bf16.msra.mxu0 %v10305_v29  ;;  %7832 = vmatpush1.bf16.msra.mxu1 %v10307_v49  ;;  %v5018_v29 = vld [vmem:[#allocation4 + $0x20] sm:$0xff]  ;;  %v10462_v49 = vpack.c.bf16 %v5021_v51, %v5017_v30  ;;  %v10510_v51 = vpack.c.bf16 %v5053_v23, %v5049_v22  ;;  %v5073_v22 = vld [vmem:[#allocation4 + $0x1d8] sm:$0xff] }
 0x869   :  { %7802 = vmatprep.subr.bf16.mxu0 %v10311_v54  ;;  %7834 = vmatprep.subr.bf16.mxu1 %v10313_v3  ;;  %v10464_v54 = vpack.c.bf16 %v5018_v29, %v5014_v53  ;;  %v5016_v3 = vld [vmem:[#allocation4 + $0x10] sm:$0xff]  ;;  %v5050_v30 = vld [vmem:[#allocation4 + $0x120] sm:$0xff]  ;;  %v5077_v23 = vld [vmem:[#allocation4 + $0x1f8] sm:$0xff] }
 0x86a   :  { %v10512_v53 = vpack.c.bf16 %v5050_v30, %v5046_v19  ;;  %v5048_v29 = vld [vmem:[#allocation4 + $0x110] sm:$0xff]  ;;  %v10542_v19 = vpack.c.bf16 %v5075_v16, %v5071_v31  ;;  %v10544_v30 = vpack.c.bf16 %v5077_v23, %v5073_v22 }
 0x86c   :  { %7804 = vmatpush1.bf16.msra.mxu0 %v10317_v47  ;;  %7836 = vmatpush1.bf16.msra.mxu1 %v10319_v9  ;;  %v5020_v47 = vld [vmem:[#allocation4 + $0x30] sm:$0xff] }
 0x86d   :  { %7838 = vmatprep.subr.bf16.mxu0 %v10460_v5  ;;  %v10467_v9 = vpack.c.bf16 %v5020_v47, %v5016_v3  ;;  %7870 = vmatprep.subr.bf16.mxu1 %v10462_v49  ;;  %v5052_v3 = vld [vmem:[#allocation4 + $0x130] sm:$0xff] }
 0x86e   :  { %v10515_v47 = vpack.c.bf16 %v5052_v3, %v5048_v29  ;;  %v5070_v29 = vld [vmem:[#allocation4 + $0x1c0] sm:$0xff] }
 0x86f   :  { %4909 = vmatmul.mubr.f32.vlgmr.msra.gmra.mrb[12].mxu0 %v10381_v37  ;;  %4980 = vmatmul.mubr.f32.vlgmr.msra.gmra.mrb[12].mxu1 %v10381_v37  ;;  %v5023_v37 = vld [vmem:[#allocation4 + $0x48] sm:$0xff]  ;;  %v5074_v3 = vld [vmem:[#allocation4 + $0x1e0] sm:$0xff] }
 0x870   :  { %5164 = vmatprep.mubr.f32.mxu0 %v11089_v45  ;;  %5235 = vmatprep.mubr.f32.mxu1 %v11089_v45  ;;  %v10472_v36 = vpack.c.bf16 %v5027_v17, %v5023_v37  ;;  %v5055_v37 = vld [vmem:[#allocation4 + $0x148] sm:$0xff] }
 0x871   :  { %7840 = vmatpush1.bf16.msra.mxu0 %v10464_v54  ;;  %7872 = vmatpush1.bf16.msra.mxu1 %v10467_v9  ;;  %v5059_v17 = vld [vmem:[#allocation4 + $0x168] sm:$0xff] }
 0x872   :  { %7842 = vmatprep.subr.bf16.mxu0 %v10472_v36  ;;  %7874 = vmatprep.subr.bf16.mxu1 %v10474_v43  ;;  %v10520_v34 = vpack.c.bf16 %v5059_v17, %v5055_v37  ;;  %v5072_v37 = vld [vmem:[#allocation4 + $0x1d0] sm:$0xff]  ;;  %v10547_v17 = vpack.c.bf16 %v5074_v3, %v5070_v29  ;;  %v4394_v3 = vrot.slane %v10565_v4, %v9092_v10  ;;  %v5500_v10 = vld [vmem:[#allocation16 + $0x98] sm:$0xff] }
 0x873   :  { %v10551_v6 = vpack.c.bf16 %v5076_v39, %v5072_v37 }
 0x875   :  { %7844 = vmatpush1.bf16.msra.mxu0 %v10476_v57  ;;  %7876 = vmatpush1.bf16.msra.mxu1 %v10479_v7 }
 0x876   :  { %7846 = vmatprep.subr.bf16.mxu0 %v10484_v55  ;;  %7878 = vmatprep.subr.bf16.mxu1 %v10486_v24 }
 0x879   :  { %7848 = vmatpush1.bf16.msra.mxu0 %v10488_v56  ;;  %7880 = vmatpush1.bf16.msra.mxu1 %v10491_v15 }
 0x87a   :  { %7850 = vmatprep.subr.bf16.mxu0 %v10496_v21  ;;  %7882 = vmatprep.subr.bf16.mxu1 %v10498_v63 }
 0x87d   :  { %7852 = vmatpush1.bf16.msra.mxu0 %v10500_v18  ;;  %7884 = vmatpush1.bf16.msra.mxu1 %v10503_v40 }
 0x87e   :  { %7854 = vmatprep.subr.bf16.mxu0 %v10508_v33  ;;  %7886 = vmatprep.subr.bf16.mxu1 %v10510_v51 }
 0x881   :  { %7856 = vmatpush1.bf16.msra.mxu0 %v10512_v53  ;;  %7888 = vmatpush1.bf16.msra.mxu1 %v10515_v47 }
 0x882   :  { %7858 = vmatprep.subr.bf16.mxu0 %v10520_v34  ;;  %7890 = vmatprep.subr.bf16.mxu1 %v10522_v12 }
 0x885   :  { %7860 = vmatpush1.bf16.msra.mxu0 %v10524_v62  ;;  %7892 = vmatpush1.bf16.msra.mxu1 %v10527_v44 }
 0x886   :  { %7862 = vmatprep.subr.bf16.mxu0 %v10531_v14  ;;  %7894 = vmatprep.subr.bf16.mxu1 %v10534_v27 }
 0x889   :  { %7864 = vmatpush1.bf16.msra.mxu0 %v10536_v59  ;;  %7896 = vmatpush1.bf16.msra.mxu1 %v10539_v32 }
 0x88a   :  { %7866 = vmatprep.subr.bf16.mxu0 %v10542_v19  ;;  %7898 = vmatprep.subr.bf16.mxu1 %v10544_v30 }
 0x88d   :  { %7868 = vmatpush1.bf16.msra.mxu0 %v10547_v17  ;;  %7900 = vmatpush1.bf16.msra.mxu1 %v10551_v6 }
 0x88e   :  { %7902 = vmatprep.subr.bf16.mxu0 %v10553_v35  ;;  %7934 = vmatprep.subr.bf16.mxu1 %v10556_v61 }
 0x922   :  { %v4671_v11 = vpop.f32.mrb[26].mxu0  ;;  %v4742_v28 = vpop.f32.mrb[28].mxu1 }
 0x923   :  { %v8243_v0 = vadd.f32 %v4671_v11, %v4382_v52  ;;  %v4673_v31 = vpop.f32.mrb[27].mxu0  ;;  %v4744_v16 = vpop.f32.mrb[29].mxu1 }
 0x924   :  { %v8244_v22 = vadd.f32 %v4673_v31, %v4386_v20  ;;  %v8246_v37 = vadd.f32 %v4744_v16, %v4394_v3 }
 0x925   :  { %v6454_v23 = vmul.f32 -1.442695, %v8243_v0 }
 0x926   :  { %v6455_v29 = vmul.f32 -1.442695, %v8244_v22 }
 0x927   :  { %8511 = vpow2.f32 %v6454_v23 }
 0x928   :  { %8513 = vpow2.f32 %v6455_v29 }
 0x929   :  { %8515 = vtanh.f32 %v8246_v37 }
 0x931   :  { %v8512_v39 = vpop.eup %8511 }
 0x932   :  { %v4760_v38 = vadd.f32 1.0, %v8512_v39  ;;  %v8514_v25 = vpop.eup %8513 }
 0x933   :  { %v4761_v2 = vadd.f32 1.0, %v8514_v25  ;;  %v8516_v48 = vpop.eup %8515 }
 0x934   :  { %8517 = vrcp.f32 %v4760_v38 }
 0x935   :  { %8519 = vrcp.f32 %v4761_v2 }
 0x93e   :  { %v8518_v52 = vpop.eup %8517 }
 0x93f   :  { %v4771_v11 = vmul.f32 %v8518_v52, %v8516_v48  ;;  %v8520_v41 = vpop.eup %8519 }
 0x940   :  { %v4770_v20 = vmul.f32 %v8520_v41, %v10370_v42 }
 0x942   :  { %v4910_v0 = vpop.f32.mrb[12].mxu0  ;;  %v4981_v31 = vpop.f32.mrb[12].mxu1  ;;  %v10574_v22 = vadd.f32 %v4771_v11, %v4770_v20 }
 0x943   :  { %v8203_v23 = vadd.f32 %v4910_v0, %v11342_v50  ;;  %v4912_v16 = vpop.f32.mrb[13].mxu0  ;;  %v4983_v29 = vpop.f32.mrb[13].mxu1  ;;  %v8219_v38 = vadd.f32 %v4981_v31, %v11344_v8  ;;  %v5263_v8 = vld [vmem:[#allocation5 + $0xa8] sm:$0xff]  ;;  %v5265_v50 = vld [vmem:[#allocation5 + $0xb8] sm:$0xff] }
 0x944   :  { %11397 = vst [vmem:[#allocation47_spill] sm:$0xff] %v10574_v22  ;;  %v8204_v3 = vadd.f32 %v4912_v16, %v11343_v46  ;;  %v8220_v25 = vadd.f32 %v4983_v29, %v11345_v26  ;;  %v4390_v29 = vrot.slane %v10565_v4, %v11347_v13  ;;  %v5256_v13 = vld [vmem:[#allocation5 + $0x70] sm:$0xff]  ;;  %v5259_v26 = vld [vmem:[#allocation5 + $0x88] sm:$0xff]  ;;  %v5261_v46 = vld [vmem:[#allocation5 + $0x98] sm:$0xff] }
 0x945   :  { %v6457_v37 = vmul.f32 -1.442695, %v8203_v23  ;;  %v6459_v2 = vmul.f32 -1.442695, %v8219_v38  ;;  %v5246_v38 = vld [vmem:[#allocation5 + $0x20] sm:$0xff] }
 0x946   :  { %v6458_v39 = vmul.f32 -1.442695, %v8204_v3 }
 0x947   :  { %8521 = vpow2.f32 %v6457_v37 }
 0x948   :  { %8523 = vpow2.f32 %v6458_v39  ;;  %v5242_v39 = vld [vmem:[#allocation5] sm:$0xff] }
 0x949   :  { %8525 = vtanh.f32 %v8220_v25  ;;  %v8245_v25 = vadd.f32 %v4742_v28, %v4390_v29  ;;  %v5252_v29 = vld [vmem:[#allocation5 + $0x50] sm:$0xff] }
 0x94a   :  { %8527 = vpow2.f32 %v6459_v2  ;;  %v5244_v2 = vld [vmem:[#allocation5 + $0x10] sm:$0xff] }
 0x951   :  { %v8522_v42 = vpop.eup %8521 }
 0x952   :  { %v4999_v41 = vadd.f32 1.0, %v8522_v42  ;;  %v8524_v48 = vpop.eup %8523  ;;  %v5248_v42 = vld [vmem:[#allocation5 + $0x30] sm:$0xff] }
 0x953   :  { %v5000_v52 = vadd.f32 1.0, %v8524_v48  ;;  %v8526_v11 = vpop.eup %8525  ;;  %v5255_v48 = vld [vmem:[#allocation5 + $0x68] sm:$0xff] }
 0x954   :  { %8529 = vrcp.f32 %v4999_v41  ;;  %v8528_v20 = vpop.eup %8527  ;;  %v5251_v41 = vld [vmem:[#allocation5 + $0x48] sm:$0xff] }
 0x955   :  { %8531 = vrcp.f32 %v5000_v52  ;;  %v5001_v3 = vadd.f32 1.0, %v8528_v20  ;;  %v5253_v52 = vld [vmem:[#allocation5 + $0x58] sm:$0xff]  ;;  %v10592_v4 = vpack.c.bf16 %v5255_v48, %v5251_v41  ;;  %v10608_v41 = vpack.c.bf16 %v5265_v50, %v5261_v46  ;;  %v5260_v48 = vld [vmem:[#allocation5 + $0x90] sm:$0xff]  ;;  %v5266_v50 = vld [vmem:[#allocation5 + $0xc0] sm:$0xff] }
 0x956   :  { %v5270_v46 = vld [vmem:[#allocation5 + $0xe0] sm:$0xff] }
 0x957   :  { %8533 = vrcp.f32 %v5001_v3  ;;  %v5254_v3 = vld [vmem:[#allocation5 + $0x60] sm:$0xff]  ;;  %11401 = vst [vmem:[#allocation51_spill] sm:$0xff] %v10592_v4  ;;  %11406 = vst [vmem:[#allocation56_spill] sm:$0xff] %v10608_v41 }
 0x95e   :  { %v8530_v0 = vpop.eup %8529 }
 0x95f   :  { %v5010_v23 = vmul.f32 %v8530_v0, %v8526_v11  ;;  %v8532_v16 = vpop.eup %8531  ;;  %v5257_v11 = vld [vmem:[#allocation5 + $0x78] sm:$0xff] }
 0x960   :  { %v5009_v37 = vmul.f32 %v8532_v16, %v10377_v1  ;;  %v10586_v1 = vpack.c.bf16 %v5246_v38, %v5242_v39  ;;  %v5250_v16 = vld [vmem:[#allocation5 + $0x40] sm:$0xff]  ;;  %v10594_v28 = vpack.c.bf16 %v5257_v11, %v5253_v52  ;;  %v10602_v38 = vpack.c.bf16 %v5256_v13, %v5252_v29  ;;  %v5264_v52 = vld [vmem:[#allocation5 + $0xb0] sm:$0xff]  ;;  %v5267_v11 = vld [vmem:[#allocation5 + $0xc8] sm:$0xff] }
 0x961   :  { %v8534_v20 = vpop.eup %8533  ;;  %v10600_v39 = vpack.c.bf16 %v5254_v3, %v5250_v16  ;;  %v5273_v16 = vld [vmem:[#allocation5 + $0xf8] sm:$0xff]  ;;  %v5272_v29 = vld [vmem:[#allocation5 + $0xf0] sm:$0xff] }
 0x962   :  { %v10581_v31 = vadd.f32 %v5010_v23, %v5009_v37  ;;  %11399 = vst [vmem:[#allocation49_spill] sm:$0xff] %v10586_v1  ;;  %v10588_v23 = vpack.c.bf16 %v5248_v42, %v5244_v2  ;;  %v6456_v37 = vmul.f32 -1.442695, %v8245_v25  ;;  %11402 = vst [vmem:[#allocation52_spill] sm:$0xff] %v10594_v28  ;;  %v5258_v25 = vld [vmem:[#allocation5 + $0x80] sm:$0xff]  ;;  %v10606_v42 = vpack.c.bf16 %v5263_v8, %v5259_v26 }
 0x963   :  { %11403 = vst [vmem:[#allocation53_spill] sm:$0xff] %v10600_v39  ;;  %11404 = vst [vmem:[#allocation54_spill] sm:$0xff] %v10602_v38  ;;  %v5262_v2 = vld [vmem:[#allocation5 + $0xa0] sm:$0xff]  ;;  %v10616_v8 = vpack.c.bf16 %v5264_v52, %v5260_v48 }
 0x964   :  { %11398 = vst [vmem:[#allocation48_spill] sm:$0xff] %v10581_v31  ;;  %8535 = vtanh.f32 %v10581_v31  ;;  %11400 = vst [vmem:[#allocation50_spill] sm:$0xff] %v10588_v23  ;;  %v10614_v13 = vpack.c.bf16 %v5262_v2, %v5258_v25  ;;  %v10626_v25 = vpack.c.bf16 %v5270_v46, %v5266_v50  ;;  %v5274_v48 = vld [vmem:[#allocation5 + $0x100] sm:$0xff] }
 0x965   :  { %8537 = vpow2.f32 %v6456_v37  ;;  %11405 = vst [vmem:[#allocation55_spill] sm:$0xff] %v10606_v42  ;;  %11408 = vst [vmem:[#allocation58_spill] sm:$0xff] %v10616_v8  ;;  %v5268_v37 = vld [vmem:[#allocation5 + $0xd0] sm:$0xff]  ;;  %v5278_v52 = vld [vmem:[#allocation5 + $0x120] sm:$0xff] }
 0x966   :  { %11407 = vst [vmem:[#allocation57_spill] sm:$0xff] %v10614_v13  ;;  %11411 = vst [vmem:[#allocation61_spill] sm:$0xff] %v10626_v25  ;;  %v10628_v2 = vpack.c.bf16 %v5272_v29, %v5268_v37  ;;  %v10638_v46 = vpack.c.bf16 %v5278_v52, %v5274_v48  ;;  %v5282_v29 = vld [vmem:[#allocation5 + $0x140] sm:$0xff]  ;;  %v5297_v48 = vld [vmem:[#allocation5 + $0x1b8] sm:$0xff]  ;;  %8539 = vtanh.f32 %v10574_v22 }
 0x967   :  { %v5502_v22 = vld [vmem:[#allocation16 + $0xa8] sm:$0xff] }
 0x968   :  { %11412 = vst [vmem:[#allocation62_spill] sm:$0xff] %v10628_v2  ;;  %11415 = vst [vmem:[#allocation65_spill] sm:$0xff] %v10638_v46 }
 0x96e   :  { %v8536_v0 = vpop.eup %8535 }
 0x96f   :  { %v10590_v31 = vmul.f32 %v8536_v0, %v8534_v20  ;;  %v5271_v20 = vld [vmem:[#allocation5 + $0xe8] sm:$0xff]  ;;  %v5269_v0 = vld [vmem:[#allocation5 + $0xd8] sm:$0xff]  ;;  %v8538_v50 = vpop.eup %8537 }
 0x970   :  { %v10620_v26 = vpack.c.bf16 %v5271_v20, %v5267_v11  ;;  %v10622_v3 = vpack.c.bf16 %v5273_v16, %v5269_v0  ;;  %v5276_v0 = vld [vmem:[#allocation5 + $0x110] sm:$0xff] }
 0x971   :  { %5165 = vmatmul.mubr.f32.vlgmr.msra.gmra.mrb[28].mxu0 %v10590_v31  ;;  %5236 = vmatmul.mubr.f32.vlgmr.msra.gmra.mrb[30].mxu1 %v10590_v31  ;;  %v5280_v16 = vld [vmem:[#allocation5 + $0x130] sm:$0xff] }
 0x972   :  { %7904 = vmatpush1.bf16.msra.mxu0 %v10586_v1  ;;  %7936 = vmatpush1.bf16.msra.mxu1 %v10588_v23  ;;  %11409 = vst [vmem:[#allocation59_spill] sm:$0xff] %v10620_v26  ;;  %11410 = vst [vmem:[#allocation60_spill] sm:$0xff] %v10622_v3  ;;  %v10640_v37 = vpack.c.bf16 %v5280_v16, %v5276_v0  ;;  %v5295_v23 = vld [vmem:[#allocation5 + $0x1a8] sm:$0xff]  ;;  %v5292_v16 = vld [vmem:[#allocation5 + $0x190] sm:$0xff] }
 0x973   :  { %7906 = vmatprep.subr.bf16.mxu0 %v10592_v4  ;;  %7938 = vmatprep.subr.bf16.mxu1 %v10594_v28  ;;  %v5275_v28 = vld [vmem:[#allocation5 + $0x108] sm:$0xff]  ;;  %v5277_v4 = vld [vmem:[#allocation5 + $0x118] sm:$0xff] }
 0x974   :  { %5370 = vmatprep.mubr.f32.mxu0 %v11089_v45  ;;  %5441 = vmatprep.mubr.f32.mxu1 %v11089_v45  ;;  %11416 = vst [vmem:[#allocation66_spill] sm:$0xff] %v10640_v37  ;;  %v5496_v1 = vld [vmem:[#allocation16 + $0x78] sm:$0xff] }
 0x976   :  { %7908 = vmatpush1.bf16.msra.mxu0 %v10600_v39  ;;  %7940 = vmatpush1.bf16.msra.mxu1 %v10602_v38  ;;  %v5279_v39 = vld [vmem:[#allocation5 + $0x128] sm:$0xff]  ;;  %v5281_v38 = vld [vmem:[#allocation5 + $0x138] sm:$0xff] }
 0x977   :  { %7910 = vmatprep.subr.bf16.mxu0 %v10606_v42  ;;  %7942 = vmatprep.subr.bf16.mxu1 %v10608_v41  ;;  %v10632_v11 = vpack.c.bf16 %v5279_v39, %v5275_v28  ;;  %v10634_v20 = vpack.c.bf16 %v5281_v38, %v5277_v4  ;;  %v5283_v41 = vld [vmem:[#allocation5 + $0x148] sm:$0xff]  ;;  %v5285_v42 = vld [vmem:[#allocation5 + $0x158] sm:$0xff]  ;;  %v5286_v28 = vld [vmem:[#allocation5 + $0x160] sm:$0xff] }
 0x978   :  { %v5284_v38 = vld [vmem:[#allocation5 + $0x150] sm:$0xff]  ;;  %v10651_v52 = vpack.c.bf16 %v5286_v28, %v5282_v29  ;;  %v5305_v29 = vld [vmem:[#allocation5 + $0x1f8] sm:$0xff] }
 0x979   :  { %11413 = vst [vmem:[#allocation63_spill] sm:$0xff] %v10632_v11  ;;  %11414 = vst [vmem:[#allocation64_spill] sm:$0xff] %v10634_v20 }
 0x97a   :  { %7912 = vmatpush1.bf16.msra.mxu0 %v10614_v13  ;;  %7944 = vmatpush1.bf16.msra.mxu1 %v10616_v8  ;;  %v5287_v13 = vld [vmem:[#allocation5 + $0x168] sm:$0xff]  ;;  %v5289_v8 = vld [vmem:[#allocation5 + $0x178] sm:$0xff]  ;;  %11419 = vst [vmem:[#allocation69_spill] sm:$0xff] %v10651_v52 }
 0x97b   :  { %7914 = vmatprep.subr.bf16.mxu0 %v10620_v26  ;;  %7946 = vmatprep.subr.bf16.mxu1 %v10622_v3  ;;  %v10644_v4 = vpack.c.bf16 %v5287_v13, %v5283_v41  ;;  %v10646_v39 = vpack.c.bf16 %v5289_v8, %v5285_v42  ;;  %v5288_v3 = vld [vmem:[#allocation5 + $0x170] sm:$0xff]  ;;  %v5291_v26 = vld [vmem:[#allocation5 + $0x188] sm:$0xff]  ;;  %v5290_v41 = vld [vmem:[#allocation5 + $0x180] sm:$0xff] }
 0x97c   :  { %v10653_v0 = vpack.c.bf16 %v5288_v3, %v5284_v38  ;;  %v5294_v42 = vld [vmem:[#allocation5 + $0x1a0] sm:$0xff]  ;;  %v10657_v13 = vpack.c.bf16 %v5295_v23, %v5291_v26 }
 0x97d   :  { %11417 = vst [vmem:[#allocation67_spill] sm:$0xff] %v10644_v4  ;;  %11418 = vst [vmem:[#allocation68_spill] sm:$0xff] %v10646_v39  ;;  %v10663_v3 = vpack.c.bf16 %v5294_v42, %v5290_v41  ;;  %v5298_v38 = vld [vmem:[#allocation5 + $0x1c0] sm:$0xff] }
 0x97e   :  { %7916 = vmatpush1.bf16.msra.mxu0 %v10626_v25  ;;  %7948 = vmatpush1.bf16.msra.mxu1 %v10628_v2  ;;  %v4762_v25 = vadd.f32 1.0, %v8538_v50  ;;  %v5293_v2 = vld [vmem:[#allocation5 + $0x198] sm:$0xff]  ;;  %11420 = vst [vmem:[#allocation70_spill] sm:$0xff] %v10653_v0  ;;  %11421 = vst [vmem:[#allocation71_spill] sm:$0xff] %v10657_v13  ;;  %v5296_v50 = vld [vmem:[#allocation5 + $0x1b0] sm:$0xff] }
 0x97f   :  { %7918 = vmatprep.subr.bf16.mxu0 %v10632_v11  ;;  %7950 = vmatprep.subr.bf16.mxu1 %v10634_v20  ;;  %v10659_v8 = vpack.c.bf16 %v5297_v48, %v5293_v2  ;;  %v5299_v20 = vld [vmem:[#allocation5 + $0x1c8] sm:$0xff]  ;;  %11423 = vst [vmem:[#allocation73_spill] sm:$0xff] %v10663_v3  ;;  %v10665_v28 = vpack.c.bf16 %v5296_v50, %v5292_v16  ;;  %v5302_v23 = vld [vmem:[#allocation5 + $0x1e0] sm:$0xff]  ;;  %v5300_v2 = vld [vmem:[#allocation5 + $0x1d0] sm:$0xff] }
 0x980   :  { %8541 = vrcp.f32 %v4762_v25  ;;  %v5304_v48 = vld [vmem:[#allocation5 + $0x1f0] sm:$0xff]  ;;  %v10675_v41 = vpack.c.bf16 %v5302_v23, %v5298_v38  ;;  %v5481_v16 = vld [vmem:[#allocation16] sm:$0xff]  ;;  %v5494_v11 = vld [vmem:[#allocation16 + $0x68] sm:$0xff] }
 0x981   :  { %11422 = vst [vmem:[#allocation72_spill] sm:$0xff] %v10659_v8  ;;  %11424 = vst [vmem:[#allocation74_spill] sm:$0xff] %v10665_v28  ;;  %v10677_v42 = vpack.c.bf16 %v5304_v48, %v5300_v2  ;;  %v5485_v50 = vld [vmem:[#allocation16 + $0x20] sm:$0xff] }
 0x982   :  { %7920 = vmatpush1.bf16.msra.mxu0 %v10638_v46  ;;  %7952 = vmatpush1.bf16.msra.mxu1 %v10640_v37  ;;  %v5303_v46 = vld [vmem:[#allocation5 + $0x1e8] sm:$0xff]  ;;  %v5301_v37 = vld [vmem:[#allocation5 + $0x1d8] sm:$0xff]  ;;  %v7967_v38 = vpack.c.bf16 %v5485_v50, %v5481_v16  ;;  %v5489_v2 = vld [vmem:[#allocation16 + $0x40] sm:$0xff] }
 0x983   :  { %7922 = vmatprep.subr.bf16.mxu0 %v10644_v4  ;;  %7954 = vmatprep.subr.bf16.mxu1 %v10646_v39  ;;  %v10669_v26 = vpack.c.bf16 %v5303_v46, %v5299_v20  ;;  %v10671_v25 = vpack.c.bf16 %v5305_v29, %v5301_v37  ;;  %v5482_v39 = vld [vmem:[#allocation16 + $0x8] sm:$0xff]  ;;  %v5484_v4 = vld [vmem:[#allocation16 + $0x18] sm:$0xff]  ;;  %11427 = vst [vmem:[#allocation78_spill] sm:$0xff] %v10677_v42  ;;  %v5483_v37 = vld [vmem:[#allocation16 + $0x10] sm:$0xff] }
 0x984   :  { %v5487_v29 = vld [vmem:[#allocation16 + $0x30] sm:$0xff]  ;;  %v5493_v48 = vld [vmem:[#allocation16 + $0x60] sm:$0xff] }
 0x985   :  { %11425 = vst [vmem:[#allocation75_spill] sm:$0xff] %v10669_v26  ;;  %11426 = vst [vmem:[#allocation76_spill] sm:$0xff] %v10671_v25  ;;  %v7999_v23 = vpack.c.bf16 %v5487_v29, %v5483_v37  ;;  %v7971_v16 = vpack.c.bf16 %v5493_v48, %v5489_v2  ;;  %v5508_v37 = vld [vmem:[#allocation16 + $0xd8] sm:$0xff]  ;;  %v5505_v2 = vld [vmem:[#allocation16 + $0xc0] sm:$0xff] }
 0x986   :  { %7924 = vmatpush1.bf16.msra.mxu0 %v10651_v52  ;;  %7956 = vmatpush1.bf16.msra.mxu1 %v10653_v0  ;;  %v5486_v52 = vld [vmem:[#allocation16 + $0x28] sm:$0xff]  ;;  %v5488_v0 = vld [vmem:[#allocation16 + $0x38] sm:$0xff]  ;;  %v5509_v48 = vld [vmem:[#allocation16 + $0xe0] sm:$0xff] }
 0x987   :  { %7926 = vmatprep.subr.bf16.mxu0 %v10657_v13  ;;  %7958 = vmatprep.subr.bf16.mxu1 %v10659_v8  ;;  %v7965_v20 = vpack.c.bf16 %v5486_v52, %v5482_v39  ;;  %v7997_v46 = vpack.c.bf16 %v5488_v0, %v5484_v4  ;;  %v5490_v8 = vld [vmem:[#allocation16 + $0x48] sm:$0xff]  ;;  %v8540_v13 = vpop.eup %8539  ;;  %v5491_v52 = vld [vmem:[#allocation16 + $0x50] sm:$0xff]  ;;  %v5512_v29 = vld [vmem:[#allocation16 + $0xf8] sm:$0xff] }
 0x988   :  { %v7969_v4 = vpack.c.bf16 %v5494_v11, %v5490_v8  ;;  %v5495_v0 = vld [vmem:[#allocation16 + $0x70] sm:$0xff] }
 0x989   :  { %v8003_v50 = vpack.c.bf16 %v5495_v0, %v5491_v52  ;;  %v5499_v8 = vld [vmem:[#allocation16 + $0x90] sm:$0xff]  ;;  %v5516_v52 = vld [vmem:[#allocation16 + $0x118] sm:$0xff] }
 0x98a   :  { %7928 = vmatpush1.bf16.msra.mxu0 %v10663_v3  ;;  %7960 = vmatpush1.bf16.msra.mxu1 %v10665_v28  ;;  %v5492_v3 = vld [vmem:[#allocation16 + $0x58] sm:$0xff]  ;;  %v8542_v28 = vpop.eup %8541 }
 0x98b   :  { %7930 = vmatprep.subr.bf16.mxu0 %v10669_v26  ;;  %7962 = vmatprep.subr.bf16.mxu1 %v10671_v25  ;;  %v10683_v26 = vmul.f32 %v8542_v28, %v8540_v13  ;;  %v8001_v39 = vpack.c.bf16 %v5496_v1, %v5492_v3  ;;  %v5498_v25 = vld [vmem:[#allocation16 + $0x88] sm:$0xff]  ;;  %v5497_v13 = vld [vmem:[#allocation16 + $0x80] sm:$0xff]  ;;  %v8005_v1 = vpack.c.bf16 %v5504_v60, %v5500_v10  ;;  %v5503_v3 = vld [vmem:[#allocation16 + $0xb0] sm:$0xff] }
 0x98c   :  { %v5501_v28 = vld [vmem:[#allocation16 + $0xa0] sm:$0xff]  ;;  %v7973_v11 = vpack.c.bf16 %v5502_v22, %v5498_v25  ;;  %v8009_v60 = vpack.c.bf16 %v5512_v29, %v5508_v37  ;;  %v5507_v10 = vld [vmem:[#allocation16 + $0xd0] sm:$0xff]  ;;  %v5520_v0 = vld [vmem:[#allocation16 + $0x138] sm:$0xff] }
 0x98d   :  { %11428 = vst [vmem:[#allocation79_spill] sm:$0xff] %v10683_v26  ;;  %v5511_v25 = vld [vmem:[#allocation16 + $0xf0] sm:$0xff] }
 0x98e   :  { %7932 = vmatpush1.bf16.msra.mxu0 %v10675_v41  ;;  %7964 = vmatpush1.bf16.msra.mxu1 %v10677_v42  ;;  %v8011_v42 = vpack.c.bf16 %v5511_v25, %v5507_v10  ;;  %v5530_v10 = vld [vmem:[#allocation16 + $0x188] sm:$0xff] }
 0x98f   :  { %7966 = vmatprep.subr.bf16.mxu0 %v7965_v20  ;;  %7998 = vmatprep.subr.bf16.mxu1 %v7997_v46  ;;  %v5506_v20 = vld [vmem:[#allocation16 + $0xc8] sm:$0xff] }
 0x990   :  { %v5510_v46 = vld [vmem:[#allocation16 + $0xe8] sm:$0xff] }
 0x991   :  { %5371 = vmatmul.mubr.f32.vlgmr.msra.gmra.mrb[28].mxu0 %v10683_v26  ;;  %5442 = vmatmul.mubr.f32.vlgmr.msra.gmra.mrb[30].mxu1 %v10683_v26  ;;  %v7977_v22 = vpack.c.bf16 %v5510_v46, %v5506_v20  ;;  %v7979_v26 = vpack.c.bf16 %v5509_v48, %v5505_v2  ;;  %v5524_v20 = vld [vmem:[#allocation16 + $0x158] sm:$0xff]  ;;  %v5534_v25 = vld [vmem:[#allocation16 + $0x1a8] sm:$0xff] }
 0x992   :  { %7968 = vmatpush1.bf16.msra.mxu0 %v7967_v38  ;;  %8000 = vmatpush1.bf16.msra.mxu1 %v7999_v23  ;;  %v7975_v38 = vpack.c.bf16 %v5501_v28, %v5497_v13  ;;  %v8007_v23 = vpack.c.bf16 %v5503_v3, %v5499_v8  ;;  %v8013_v28 = vpack.c.bf16 %v5520_v0, %v5516_v52  ;;  %v5522_v8 = vld [vmem:[#allocation16 + $0x148] sm:$0xff]  ;;  %v5528_v46 = vld [vmem:[#allocation16 + $0x178] sm:$0xff] }
 0x993   :  { %7970 = vmatprep.subr.bf16.mxu0 %v7969_v4  ;;  %8002 = vmatprep.subr.bf16.mxu1 %v8001_v39  ;;  %v5514_v4 = vld [vmem:[#allocation16 + $0x108] sm:$0xff]  ;;  %v8017_v48 = vpack.c.bf16 %v5528_v46, %v5524_v20 }
 0x994   :  { %5609 = vmatprep.mubr.f32.mxu0 %v11089_v45  ;;  %5680 = vmatprep.mubr.f32.mxu1 %v11089_v45  ;;  %v5518_v39 = vld [vmem:[#allocation16 + $0x128] sm:$0xff] }
 0x995   :  { %v7981_v13 = vpack.c.bf16 %v5518_v39, %v5514_v4  ;;  %v5526_v3 = vld [vmem:[#allocation16 + $0x168] sm:$0xff]  ;;  %v5532_v4 = vld [vmem:[#allocation16 + $0x198] sm:$0xff] }
 0x996   :  { %7972 = vmatpush1.bf16.msra.mxu0 %v7971_v16  ;;  %8004 = vmatpush1.bf16.msra.mxu1 %v8003_v50  ;;  %v5513_v16 = vld [vmem:[#allocation16 + $0x100] sm:$0xff]  ;;  %v7985_v2 = vpack.c.bf16 %v5526_v3, %v5522_v8  ;;  %v5536_v39 = vld [vmem:[#allocation16 + $0x1b8] sm:$0xff] }
 0x997   :  { %7974 = vmatprep.subr.bf16.mxu0 %v7973_v11  ;;  %8006 = vmatprep.subr.bf16.mxu1 %v8005_v1  ;;  %v5517_v50 = vld [vmem:[#allocation16 + $0x120] sm:$0xff]  ;;  %v5515_v11 = vld [vmem:[#allocation16 + $0x110] sm:$0xff]  ;;  %v5540_v8 = vld [vmem:[#allocation16 + $0x1d8] sm:$0xff] }
 0x998   :  { %v5519_v1 = vld [vmem:[#allocation16 + $0x130] sm:$0xff]  ;;  %v7983_v37 = vpack.c.bf16 %v5517_v50, %v5513_v16  ;;  %v7989_v16 = vpack.c.bf16 %v5534_v25, %v5530_v10  ;;  %v8021_v50 = vpack.c.bf16 %v5536_v39, %v5532_v4  ;;  %v5544_v3 = vld [vmem:[#allocation16 + $0x1f8] sm:$0xff]  ;;  %v11434_v25 = vld [vmem:[#allocation42_spill] sm:$0xff] }
 0x999   :  { %v8015_v29 = vpack.c.bf16 %v5519_v1, %v5515_v11  ;;  %v5538_v11 = vld [vmem:[#allocation16 + $0x1c8] sm:$0xff]  ;;  %v11435_v39 = vld [vmem:[#allocation43_spill] sm:$0xff] }
 0x99a   :  { %7976 = vmatpush1.bf16.msra.mxu0 %v7975_v38  ;;  %8008 = vmatpush1.bf16.msra.mxu1 %v8007_v23  ;;  %v5521_v38 = vld [vmem:[#allocation16 + $0x140] sm:$0xff]  ;;  %v5542_v1 = vld [vmem:[#allocation16 + $0x1e8] sm:$0xff] }
 0x99b   :  { %7978 = vmatprep.subr.bf16.mxu0 %v7977_v22  ;;  %8010 = vmatprep.subr.bf16.mxu1 %v8009_v60  ;;  %v5525_v23 = vld [vmem:[#allocation16 + $0x160] sm:$0xff]  ;;  %v5523_v22 = vld [vmem:[#allocation16 + $0x150] sm:$0xff] }
 0x99c   :  { %v5527_v60 = vld [vmem:[#allocation16 + $0x170] sm:$0xff]  ;;  %v7987_v52 = vpack.c.bf16 %v5525_v23, %v5521_v38  ;;  %v8025_v38 = vpack.c.bf16 %v5544_v3, %v5540_v8  ;;  %v5541_v23 = vld [vmem:[#allocation16 + $0x1e0] sm:$0xff] }
 0x99d   :  { %v8019_v0 = vpack.c.bf16 %v5527_v60, %v5523_v22 }
 0x99e   :  { %7980 = vmatpush1.bf16.msra.mxu0 %v7979_v26  ;;  %8012 = vmatpush1.bf16.msra.mxu1 %v8011_v42  ;;  %v5529_v26 = vld [vmem:[#allocation16 + $0x180] sm:$0xff] }
 0x99f   :  { %7982 = vmatprep.subr.bf16.mxu0 %v7981_v13  ;;  %8014 = vmatprep.subr.bf16.mxu1 %v8013_v28  ;;  %v5533_v42 = vld [vmem:[#allocation16 + $0x1a0] sm:$0xff]  ;;  %v5531_v13 = vld [vmem:[#allocation16 + $0x190] sm:$0xff] }
 0x9a0   :  { %v5535_v28 = vld [vmem:[#allocation16 + $0x1b0] sm:$0xff]  ;;  %v7991_v20 = vpack.c.bf16 %v5533_v42, %v5529_v26 }
 0x9a1   :  { %v8023_v46 = vpack.c.bf16 %v5535_v28, %v5531_v13 }
 0x9a2   :  { %7984 = vmatpush1.bf16.msra.mxu0 %v7983_v37  ;;  %8016 = vmatpush1.bf16.msra.mxu1 %v8015_v29  ;;  %v5537_v37 = vld [vmem:[#allocation16 + $0x1c0] sm:$0xff]  ;;  %v7993_v29 = vpack.c.bf16 %v5542_v1, %v5538_v11 }
 0x9a3   :  { %7986 = vmatprep.subr.bf16.mxu0 %v7985_v2  ;;  %8018 = vmatprep.subr.bf16.mxu1 %v8017_v48  ;;  %v5539_v2 = vld [vmem:[#allocation16 + $0x1d0] sm:$0xff]  ;;  %v7995_v22 = vpack.c.bf16 %v5541_v23, %v5537_v37 }
 0x9a4   :  { %v5543_v48 = vld [vmem:[#allocation16 + $0x1f0] sm:$0xff] }
 0x9a5   :  { %v8027_v60 = vpack.c.bf16 %v5543_v48, %v5539_v2 }
 0x9a6   :  { %7988 = vmatpush1.bf16.msra.mxu0 %v7987_v52  ;;  %8020 = vmatpush1.bf16.msra.mxu1 %v8019_v0 }
 0x9a7   :  { %7990 = vmatprep.subr.bf16.mxu0 %v7989_v16  ;;  %8022 = vmatprep.subr.bf16.mxu1 %v8021_v50 }
 0x9aa   :  { %7992 = vmatpush1.bf16.msra.mxu0 %v7991_v20  ;;  %8024 = vmatpush1.bf16.msra.mxu1 %v8023_v46  ;;  %v11436_v20 = vld [vmem:[#allocation48_spill] sm:$0xff] }
 0x9ab   :  { %7994 = vmatprep.subr.bf16.mxu0 %v7993_v29  ;;  %8026 = vmatprep.subr.bf16.mxu1 %v8025_v38  ;;  %v11437_v29 = vld [vmem:[#allocation40_spill] sm:$0xff] }
 0x9ae   :  { %7996 = vmatpush1.bf16.msra.mxu0 %v7995_v22  ;;  %8028 = vmatpush1.bf16.msra.mxu1 %v8027_v60 }
 0x9af   :  { %8030 = vmatprep.subr.bf16.mxu0 %v10460_v5  ;;  %8062 = vmatprep.subr.bf16.mxu1 %v10462_v49  ;;  %v5078_v5 = vld [vmem:[%s10850_s8] sm:$0xf] }
 0x9b0   :  { %v5083_v49 = vrot.slane %v5078_v5, %v9075_v58  ;;  %v5091_v38 = vrot.slane %v5078_v5, %v11437_v29 }
 0x9b1   :  { %5610 = vmatmul.mubr.f32.vlgmr.msra.gmra.mrb[14].mxu0 %v10590_v31  ;;  %5681 = vmatmul.mubr.f32.vlgmr.msra.gmra.mrb[14].mxu1 %v10590_v31 }
 0x9b2   :  { %8032 = vmatpush1.bf16.msra.mxu0 %v10464_v54  ;;  %8064 = vmatpush1.bf16.msra.mxu1 %v10467_v9  ;;  %v11429_v54 = vld [vmem:[#allocation37_spill] sm:$0xff] }
 0x9b3   :  { %8034 = vmatprep.subr.bf16.mxu0 %v10472_v36  ;;  %8066 = vmatprep.subr.bf16.mxu1 %v10474_v43  ;;  %v5087_v9 = vrot.slane %v5078_v5, %v11429_v54 }
 0x9b4   :  { %5865 = vmatprep.mubr.f32.mxu0 %v11089_v45  ;;  %5936 = vmatprep.mubr.f32.mxu1 %v11089_v45 }
 0x9b6   :  { %8036 = vmatpush1.bf16.msra.mxu0 %v10476_v57  ;;  %8068 = vmatpush1.bf16.msra.mxu1 %v10479_v7 }
 0x9b7   :  { %8038 = vmatprep.subr.bf16.mxu0 %v10484_v55  ;;  %8070 = vmatprep.subr.bf16.mxu1 %v10486_v24 }
 0x9ba   :  { %8040 = vmatpush1.bf16.msra.mxu0 %v10488_v56  ;;  %8072 = vmatpush1.bf16.msra.mxu1 %v10491_v15 }
 0x9bb   :  { %8042 = vmatprep.subr.bf16.mxu0 %v10496_v21  ;;  %8074 = vmatprep.subr.bf16.mxu1 %v10498_v63  ;;  %v11430_v21 = vld [vmem:[#allocation41_spill] sm:$0xff] }
 0x9bc   :  { %v5095_v63 = vrot.slane %v5078_v5, %v11430_v21  ;;  %v11442_v5 = vld [vmem:[#allocation53_spill] sm:$0xff] }
 0x9be   :  { %8044 = vmatpush1.bf16.msra.mxu0 %v10500_v18  ;;  %8076 = vmatpush1.bf16.msra.mxu1 %v10503_v40 }
 0x9bf   :  { %8046 = vmatprep.subr.bf16.mxu0 %v10508_v33  ;;  %8078 = vmatprep.subr.bf16.mxu1 %v10510_v51 }
 0x9c2   :  { %8048 = vmatpush1.bf16.msra.mxu0 %v10512_v53  ;;  %8080 = vmatpush1.bf16.msra.mxu1 %v10515_v47 }
 0x9c3   :  { %8050 = vmatprep.subr.bf16.mxu0 %v10520_v34  ;;  %8082 = vmatprep.subr.bf16.mxu1 %v10522_v12 }
 0x9c6   :  { %8052 = vmatpush1.bf16.msra.mxu0 %v10524_v62  ;;  %8084 = vmatpush1.bf16.msra.mxu1 %v10527_v44  ;;  %v11431_v44 = vld [vmem:[#allocation47_spill] sm:$0xff] }
 0x9c7   :  { %8054 = vmatprep.subr.bf16.mxu0 %v10531_v14  ;;  %8086 = vmatprep.subr.bf16.mxu1 %v10534_v27 }
 0x9ca   :  { %8056 = vmatpush1.bf16.msra.mxu0 %v10536_v59  ;;  %8088 = vmatpush1.bf16.msra.mxu1 %v10539_v32 }
 0x9cb   :  { %8058 = vmatprep.subr.bf16.mxu0 %v10542_v19  ;;  %8090 = vmatprep.subr.bf16.mxu1 %v10544_v30  ;;  %v11432_v19 = vld [vmem:[#allocation38_spill] sm:$0xff] }
 0x9ce   :  { %8060 = vmatpush1.bf16.msra.mxu0 %v10547_v17  ;;  %8092 = vmatpush1.bf16.msra.mxu1 %v10551_v6 }
 0x9cf   :  { %8094 = vmatprep.subr.bf16.mxu0 %v10553_v35  ;;  %8126 = vmatprep.subr.bf16.mxu1 %v10556_v61  ;;  %v11433_v35 = vld [vmem:[#allocation39_spill] sm:$0xff] }
 0xa64   :  { %v5372_v36 = vpop.f32.mrb[28].mxu0  ;;  %v5443_v43 = vpop.f32.mrb[30].mxu1 }
 0xa65   :  { %v8247_v57 = vadd.f32 %v5372_v36, %v5083_v49  ;;  %v5374_v7 = vpop.f32.mrb[29].mxu0  ;;  %v5445_v55 = vpop.f32.mrb[31].mxu1  ;;  %v8249_v23 = vadd.f32 %v5443_v43, %v5091_v38  ;;  %v11438_v49 = vld [vmem:[#allocation49_spill] sm:$0xff]  ;;  %v11440_v36 = vld [vmem:[#allocation51_spill] sm:$0xff]  ;;  %v11443_v43 = vld [vmem:[#allocation54_spill] sm:$0xff] }
 0xa66   :  { %v8248_v24 = vadd.f32 %v5374_v7, %v5087_v9  ;;  %v8250_v18 = vadd.f32 %v5445_v55, %v5095_v63  ;;  %v11439_v9 = vld [vmem:[#allocation50_spill] sm:$0xff]  ;;  %v11444_v7 = vld [vmem:[#allocation55_spill] sm:$0xff]  ;;  %v11445_v55 = vld [vmem:[#allocation56_spill] sm:$0xff] }
 0xa67   :  { %v6460_v56 = vmul.f32 -1.442695, %v8247_v57  ;;  %v6462_v22 = vmul.f32 -1.442695, %v8249_v23  ;;  %v11441_v57 = vld [vmem:[#allocation52_spill] sm:$0xff] }
 0xa68   :  { %v6461_v15 = vmul.f32 -1.442695, %v8248_v24  ;;  %v11446_v24 = vld [vmem:[#allocation57_spill] sm:$0xff]  ;;  %v11449_v63 = vld [vmem:[#allocation60_spill] sm:$0xff] }
 0xa69   :  { %8543 = vpow2.f32 %v6460_v56  ;;  %v11447_v56 = vld [vmem:[#allocation58_spill] sm:$0xff] }
 0xa6a   :  { %8545 = vpow2.f32 %v6461_v15  ;;  %v11448_v15 = vld [vmem:[#allocation59_spill] sm:$0xff] }
 0xa6b   :  { %8547 = vtanh.f32 %v8250_v18 }
 0xa73   :  { %v8544_v40 = vpop.eup %8543 }
 0xa74   :  { %v5461_v33 = vadd.f32 1.0, %v8544_v40  ;;  %v8546_v51 = vpop.eup %8545  ;;  %v11450_v40 = vld [vmem:[#allocation61_spill] sm:$0xff] }
 0xa75   :  { %v5462_v53 = vadd.f32 1.0, %v8546_v51  ;;  %v8548_v47 = vpop.eup %8547  ;;  %v11453_v51 = vld [vmem:[#allocation64_spill] sm:$0xff] }
 0xa76   :  { %8549 = vrcp.f32 %v5461_v33  ;;  %v11452_v33 = vld [vmem:[#allocation63_spill] sm:$0xff] }
 0xa77   :  { %8551 = vrcp.f32 %v5462_v53 }
 0xa80   :  { %v8550_v34 = vpop.eup %8549 }
 0xa81   :  { %v5472_v12 = vmul.f32 %v8550_v34, %v8548_v47  ;;  %v8552_v62 = vpop.eup %8551  ;;  %v11454_v47 = vld [vmem:[#allocation65_spill] sm:$0xff]  ;;  %v11455_v34 = vld [vmem:[#allocation66_spill] sm:$0xff] }
 0xa82   :  { %v5471_v14 = vmul.f32 %v8552_v62, %v11431_v44  ;;  %v11457_v62 = vld [vmem:[#allocation68_spill] sm:$0xff]  ;;  %v11458_v44 = vld [vmem:[#allocation69_spill] sm:$0xff] }
 0xa84   :  { %v5611_v27 = vpop.f32.mrb[14].mxu0  ;;  %v5682_v59 = vpop.f32.mrb[14].mxu1  ;;  %v10734_v32 = vadd.f32 %v5472_v12, %v5471_v14  ;;  %v11456_v12 = vld [vmem:[#allocation67_spill] sm:$0xff]  ;;  %v11459_v14 = vld [vmem:[#allocation70_spill] sm:$0xff] }
 0xa85   :  { %v8205_v30 = vadd.f32 %v5611_v27, %v11432_v19  ;;  %v5613_v17 = vpop.f32.mrb[15].mxu0  ;;  %v5684_v6 = vpop.f32.mrb[15].mxu1  ;;  %v8221_v4 = vadd.f32 %v5682_v59, %v11434_v25  ;;  %v11460_v27 = vld [vmem:[#allocation71_spill] sm:$0xff]  ;;  %v11461_v59 = vld [vmem:[#allocation72_spill] sm:$0xff]  ;;  %v11462_v19 = vld [vmem:[#allocation73_spill] sm:$0xff] }
 0xa86   :  { %v8206_v61 = vadd.f32 %v5613_v17, %v11433_v35  ;;  %v8222_v52 = vadd.f32 %v5684_v6, %v11435_v39  ;;  %v11464_v17 = vld [vmem:[#allocation75_spill] sm:$0xff]  ;;  %v11465_v6 = vld [vmem:[#allocation76_spill] sm:$0xff]  ;;  %v5779_v25 = vld [vmem:[%s10850_s8] sm:$0xf] }
 0xa87   :  { %v6463_v31 = vmul.f32 -1.442695, %v8205_v30  ;;  %v6465_v0 = vmul.f32 -1.442695, %v8221_v4  ;;  %v11463_v30 = vld [vmem:[#allocation74_spill] sm:$0xff]  ;;  %v5784_v4 = vrot.slane %v5779_v25, %v9075_v58  ;;  %v5788_v39 = vrot.slane %v5779_v25, %v11429_v54 }
 0xa88   :  { %v6464_v10 = vmul.f32 -1.442695, %v8206_v61 }
 0xa89   :  { %8553 = vpow2.f32 %v6463_v31  ;;  %v11466_v31 = vld [vmem:[#allocation78_spill] sm:$0xff] }
 0xa8a   :  { %8555 = vpow2.f32 %v6464_v10 }
 0xa8b   :  { %8557 = vtanh.f32 %v8222_v52 }
 0xa8c   :  { %8559 = vpow2.f32 %v6465_v0 }
 0xa93   :  { %v8554_v26 = vpop.eup %8553 }
 0xa94   :  { %v5700_v42 = vadd.f32 1.0, %v8554_v26  ;;  %v8556_v16 = vpop.eup %8555 }
 0xa95   :  { %v5701_v50 = vadd.f32 1.0, %v8556_v16  ;;  %v8558_v13 = vpop.eup %8557 }
 0xa96   :  { %8561 = vrcp.f32 %v5700_v42  ;;  %v8560_v28 = vpop.eup %8559 }
 0xa97   :  { %8563 = vrcp.f32 %v5701_v50  ;;  %v5702_v3 = vadd.f32 1.0, %v8560_v28  ;;  %v5792_v28 = vrot.slane %v5779_v25, %v11437_v29 }
 0xa99   :  { %8565 = vrcp.f32 %v5702_v3 }
 0xaa0   :  { %v8562_v11 = vpop.eup %8561 }
 0xaa1   :  { %v5711_v1 = vmul.f32 %v8562_v11, %v8558_v13  ;;  %v8564_v8 = vpop.eup %8563  ;;  %v5796_v11 = vrot.slane %v5779_v25, %v11430_v21 }
 0xaa2   :  { %v5710_v46 = vmul.f32 %v8564_v8, %v11436_v20 }
 0xaa3   :  { %v8566_v2 = vpop.eup %8565 }
 0xaa4   :  { %v5712_v37 = vadd.f32 %v5711_v1, %v5710_v46 }
 0xaa6   :  { %8567 = vtanh.f32 %v5712_v37  ;;  %6179 = vst [vmem:[#allocation20] sm:$0xff] %v5712_v37 }
 0xaa7   :  { %8569 = vpow2.f32 %v6462_v22 }
 0xaa8   :  { %8571 = vtanh.f32 %v10734_v32 }
 0xab0   :  { %v8568_v48 = vpop.eup %8567 }
 0xab1   :  { %v5714_v60 = vmul.f32 %v8568_v48, %v8566_v2  ;;  %v8570_v18 = vpop.eup %8569 }
 0xab2   :  { %v5463_v53 = vadd.f32 1.0, %v8570_v18  ;;  %v8572_v35 = vpop.eup %8571 }
 0xab3   :  { %5866 = vmatmul.mubr.f32.vlgmr.msra.gmra.mrb[30].mxu0 %v5714_v60  ;;  %6178 = vst [vmem:[#allocation18] sm:$0xff] %v5714_v60  ;;  %5937 = vmatmul.mubr.f32.vlgmr.msra.gmra.mrb[32].mxu1 %v5714_v60 }
 0xab4   :  { %8096 = vmatpush1.bf16.msra.mxu0 %v11438_v49  ;;  %8128 = vmatpush1.bf16.msra.mxu1 %v11439_v9  ;;  %8573 = vrcp.f32 %v5463_v53 }
 0xab5   :  { %8098 = vmatprep.subr.bf16.mxu0 %v11440_v36  ;;  %8130 = vmatprep.subr.bf16.mxu1 %v11441_v57 }
 0xab6   :  { %6071 = vmatprep.mubr.f32.mxu0 %v11089_v45  ;;  %6142 = vmatprep.mubr.f32.mxu1 %v11089_v45  ;;  %v11451_v45 = vld [vmem:[#allocation62_spill] sm:$0xff] }
 0xab8   :  { %8100 = vmatpush1.bf16.msra.mxu0 %v11442_v5  ;;  %8132 = vmatpush1.bf16.msra.mxu1 %v11443_v43 }
 0xab9   :  { %8102 = vmatprep.subr.bf16.mxu0 %v11444_v7  ;;  %8134 = vmatprep.subr.bf16.mxu1 %v11445_v55 }
 0xabc   :  { %8104 = vmatpush1.bf16.msra.mxu0 %v11446_v24  ;;  %8136 = vmatpush1.bf16.msra.mxu1 %v11447_v56 }
 0xabd   :  { %8106 = vmatprep.subr.bf16.mxu0 %v11448_v15  ;;  %8138 = vmatprep.subr.bf16.mxu1 %v11449_v63 }
 0xabe   :  { %v8574_v61 = vpop.eup %8573 }
 0xabf   :  { %v10775_v10 = vmul.f32 %v8574_v61, %v8572_v35 }
 0xac0   :  { %8108 = vmatpush1.bf16.msra.mxu0 %v11450_v40  ;;  %8140 = vmatpush1.bf16.msra.mxu1 %v11451_v45 }
 0xac1   :  { %8110 = vmatprep.subr.bf16.mxu0 %v11452_v33  ;;  %8142 = vmatprep.subr.bf16.mxu1 %v11453_v51 }
 0xac4   :  { %8112 = vmatpush1.bf16.msra.mxu0 %v11454_v47  ;;  %8144 = vmatpush1.bf16.msra.mxu1 %v11455_v34 }
 0xac5   :  { %8114 = vmatprep.subr.bf16.mxu0 %v11456_v12  ;;  %8146 = vmatprep.subr.bf16.mxu1 %v11457_v62 }
 0xac8   :  { %8116 = vmatpush1.bf16.msra.mxu0 %v11458_v44  ;;  %8148 = vmatpush1.bf16.msra.mxu1 %v11459_v14 }
 0xac9   :  { %8118 = vmatprep.subr.bf16.mxu0 %v11460_v27  ;;  %8150 = vmatprep.subr.bf16.mxu1 %v11461_v59 }
 0xacc   :  { %8120 = vmatpush1.bf16.msra.mxu0 %v11462_v19  ;;  %8152 = vmatpush1.bf16.msra.mxu1 %v11463_v30 }
 0xacd   :  { %8122 = vmatprep.subr.bf16.mxu0 %v11464_v17  ;;  %8154 = vmatprep.subr.bf16.mxu1 %v11465_v6 }
 0xad0   :  { %8124 = vmatpush1.bf16.msra.mxu0 %v10675_v41  ;;  %8156 = vmatpush1.bf16.msra.mxu1 %v11466_v31 }
 0xad3   :  { %6072 = vmatmul.mubr.f32.vlgmr.msra.gmra.mrb[30].mxu0 %v10775_v10  ;;  %6143 = vmatmul.mubr.f32.vlgmr.msra.gmra.mrb[32].mxu1 %v10775_v10 }
 0xba6   :  { %v6073_v52 = vpop.f32.mrb[30].mxu0  ;;  %v6144_v0 = vpop.f32.mrb[32].mxu1 }
 0xba7   :  { %v8251_v26 = vadd.f32 %v6073_v52, %v5784_v4  ;;  %v6075_v41 = vpop.f32.mrb[31].mxu0  ;;  %v6146_v42 = vpop.f32.mrb[33].mxu1  ;;  %v8253_v1 = vadd.f32 %v6144_v0, %v5792_v28 }
 0xba8   :  { %v8252_v16 = vadd.f32 %v6075_v41, %v5788_v39  ;;  %v8254_v8 = vadd.f32 %v6146_v42, %v5796_v11 }
 0xba9   :  { %v6466_v50 = vmul.f32 -1.442695, %v8251_v26  ;;  %v6468_v3 = vmul.f32 -1.442695, %v8253_v1 }
 0xbaa   :  { %v6467_v13 = vmul.f32 -1.442695, %v8252_v16 }
 0xbab   :  { %8575 = vpow2.f32 %v6466_v50 }
 0xbac   :  { %8577 = vpow2.f32 %v6467_v13 }
 0xbad   :  { %8579 = vtanh.f32 %v8254_v8 }
 0xbae   :  { %8581 = vpow2.f32 %v6468_v3 }
 0xbb5   :  { %v8576_v58 = vpop.eup %8575 }
 0xbb6   :  { %v6162_v20 = vadd.f32 1.0, %v8576_v58  ;;  %v8578_v54 = vpop.eup %8577 }
 0xbb7   :  { %v6163_v46 = vadd.f32 1.0, %v8578_v54  ;;  %v8580_v37 = vpop.eup %8579 }
 0xbb8   :  { %8583 = vrcp.f32 %v6162_v20  ;;  %v8582_v38 = vpop.eup %8581 }
 0xbb9   :  { %8585 = vrcp.f32 %v6163_v46  ;;  %v6164_v29 = vadd.f32 1.0, %v8582_v38 }
 0xbbb   :  { %8587 = vrcp.f32 %v6164_v29 }
 0xbc2   :  { %v8584_v23 = vpop.eup %8583 }
 0xbc3   :  { %v6173_v2 = vmul.f32 %v8584_v23, %v8580_v37  ;;  %v8586_v48 = vpop.eup %8585 }
 0xbc4   :  { %v6172_v22 = vmul.f32 %v8586_v48, %v10734_v32 }
 0xbc5   :  { %v8588_v60 = vpop.eup %8587 }
 0xbc6   :  { %v6174_v21 = vadd.f32 %v6173_v2, %v6172_v22 }
 0xbc8   :  { %8589 = vtanh.f32 %v6174_v21  ;;  %6183 = vst [vmem:[#allocation20 + $0x8] sm:$0xff] %v6174_v21 }
 0xbd2   :  { %v8590_v49 = vpop.eup %8589 }
 0xbd3   :  { %v6176_v9 = vmul.f32 %v8590_v49, %v8588_v60 }
 0xbd5   :  { %6181 = vst [vmem:[#allocation18 + $0x8] sm:$0xff] %v6176_v9 }
 0xbd6   :  { %8843 = dma.done.wait [#allocation7 + $0x2], 2048 }
 0xbd7   :  { %8844 = vsyncadd [#allocation7 + $0x2], 4294965248  ;;  %v11467_v36 = vld [vmem:[#allocation44_spill] sm:$0xff]  ;;  %v6195_v57 = vld [vmem:[#allocation6] sm:$0xff]  ;;  %s8864_s8 = smov [#allocation18]  }
 0xbd8   :  { %6529 = vmatprep.mubr.f32.mxu0 %v11467_v36  ;;  %v6196_v5 = vld [vmem:[#allocation6 + $0x8] sm:$0xff]  ;;  %v6197_v43 = vld [vmem:[#allocation6 + $0x10] sm:$0xff]  ;;  %v6198_v55 = vld [vmem:[#allocation6 + $0x18] sm:$0xff]  ;;  %s6348_s1 = sshll.u32 %s8864_s8, 4  ;;  %s6349_s1 = int_to_ptr.vmem [resolvable:$true] %s6348_s1 }
 0xbd9   :  { %v8157_v7 = vpack.c.bf16 %v6196_v5, %v6195_v57  ;;  %v8161_v24 = vpack.c.bf16 %v6198_v55, %v6197_v43  ;;  %v6199_v56 = vld [vmem:[#allocation6 + $0x20] sm:$0xff]  ;;  %v6200_v32 = vld [vmem:[#allocation6 + $0x28] sm:$0xff]  ;;  %v6201_v63 = vld [vmem:[#allocation6 + $0x30] sm:$0xff]  ;;  %s8767_s15 = scalar_lea.vmem %s6349_s1, 256  ;;  %p8772_p9 = scmp.lt.s32.totalorder %s6349_s1, %s6349_s1 }
 0xbda   :  { %v8165_v15 = vpack.c.bf16 %v6200_v32, %v6199_v56  ;;  %v6202_v18 = vld [vmem:[#allocation6 + $0x38] sm:$0xff]  ;;  %v6203_v45 = vld [vmem:[#allocation6 + $0x40] sm:$0xff]  ;;  %v6204_v33 = vld [vmem:[#allocation6 + $0x48] sm:$0xff]  ;;  %p8768_p8 = scmp.ne.s32.totalorder %s6349_s1, %s8767_s15  ;;  %p8773_p10 = scmp.lt.s32.totalorder %s8767_s15, %s8767_s15 }
 0xbdb   :  { %8158 = vmatprep.subr.bf16.mxu0 %v8157_v7  ;;  %v8169_v40 = vpack.c.bf16 %v6202_v18, %v6201_v63  ;;  %v8173_v51 = vpack.c.bf16 %v6204_v33, %v6203_v45  ;;  %v6205_v53 = vld [vmem:[#allocation6 + $0x50] sm:$0xff]  ;;  %v6206_v47 = vld [vmem:[#allocation6 + $0x58] sm:$0xff]  ;;  %v6207_v12 = vld [vmem:[#allocation6 + $0x60] sm:$0xff] }
 0xbdc   :  { %8160 = vmatpush3.bf16.msra.mxu0 %v8157_v7  ;;  %v8177_v34 = vpack.c.bf16 %v6206_v47, %v6205_v53  ;;  %v6208_v62 = vld [vmem:[#allocation6 + $0x68] sm:$0xff]  ;;  %v6209_v14 = vld [vmem:[#allocation6 + $0x70] sm:$0xff]  ;;  %v6210_v27 = vld [vmem:[#allocation6 + $0x78] sm:$0xff]  ;;  %p8774_p11 = por %p8773_p10, %p8772_p9 }
 0xbdd   :  { %8162 = vmatprep.subr.bf16.mxu0 %v8161_v24  ;;  %v8181_v44 = vpack.c.bf16 %v6208_v62, %v6207_v12  ;;  %v8185_v59 = vpack.c.bf16 %v6210_v27, %v6209_v14  ;;  %v11468_v19 = vld [vmem:[#allocation77_spill] sm:$0xff]  ;;  %v11470_v17 = vld [vmem:[#allocation80_spill] sm:$0xff]  ;;  %v11471_v6 = vld [vmem:[#allocation46_spill] sm:$0xff] }
 0xbde   :  { %v11469_v30 = vld [vmem:[#allocation45_spill] sm:$0xff]  ;;  %v11472_v35 = vld [vmem:[#allocation79_spill] sm:$0xff]  ;;  %p8775_p12 = pnand %p8774_p11, %p8768_p8 }
 0xbe0   :  { %8164 = vmatpush3.bf16.msra.mxu0 %v8161_v24 }
 0xbe1   :  { %8166 = vmatprep.subr.bf16.mxu0 %v8165_v15 }
 0xbe4   :  { %8168 = vmatpush3.bf16.msra.mxu0 %v8165_v15 }
 0xbe5   :  { %8170 = vmatprep.subr.bf16.mxu0 %v8169_v40 }
 0xbe8   :  { %8172 = vmatpush3.bf16.msra.mxu0 %v8169_v40 }
 0xbe9   :  { %8174 = vmatprep.subr.bf16.mxu0 %v8173_v51 }
 0xbec   :  { %8176 = vmatpush3.bf16.msra.mxu0 %v8173_v51 }
 0xbed   :  { %8178 = vmatprep.subr.bf16.mxu0 %v8177_v34 }
 0xbf0   :  { %8180 = vmatpush3.bf16.msra.mxu0 %v8177_v34 }
 0xbf1   :  { %8182 = vmatprep.subr.bf16.mxu0 %v8181_v44 }
 0xbf4   :  { %8184 = vmatpush3.bf16.msra.mxu0 %v8181_v44 }
 0xbf5   :  { %8186 = vmatprep.subr.bf16.mxu0 %v8185_v59 }
 0xbf8   :  { %8188 = vmatpush3.bf16.msra.mxu0 %v8185_v59 }
 0xbfb   :  { %6530 = vmatmul.mubr.f32.vlgmr.msra.gmra.mrb[32].mxu0 %v11468_v19 }
 0xbfc   :  { %6532 = vmatprep.mubr.f32.mxu0 %v11469_v30 }
 0xbff   :  { %6533 = vmatmul.mubr.f32.gmra.mrb[34].mxu0 %v11470_v17 }
 0xc00   :  { %6535 = vmatprep.mubr.f32.mxu0 %v11471_v6 }
 0xc03   :  { %6536 = vmatmul.mubr.f32.gmra.mrb[36].mxu0 %v11472_v35 }
 0xc04   :  { %6538 = vmatprep.mubr.f32.mxu0 %v10775_v10 }
 0xc07   :  { %6539 = vmatmul.mubr.f32.gmra.mrb[38].mxu0 %v6176_v9 }
 0xc08   :  { %8778 = shalt.err (!%p8775_p12)
}
 0xc09   :  { %s8779_s6 = scalar_lea.hbm %s10854_s12, 256 }
 0xc0a   :  { %p8780_p13 = scmp.ne.s32.totalorder %s10854_s12, %s8779_s6  ;;  %p8783_p0 = scmp.lt.u32.totalorder %s8779_s6, %s10854_s12 }
 0xc0c   :  { %p8785_p1 = pnand %p8783_p0, %p8780_p13 }
 0xc0e   :  { %8788 = shalt.err (!%p8785_p1)
}
 0xc0f   :  { %6354 = dma.vmem_to_hbm [thread:$0]  %s6349_s1, 256, %s10854_s12, [#allocation19], %s8850_s18, %s8850_s18, %s8851_s19  }
 0xc10   :  { %s8865_s2 = smov [#allocation20]  }
 0xc11   :  { %s6360_s20 = sshll.u32 %s8865_s2, 4  ;;  %s6361_s20 = int_to_ptr.vmem [resolvable:$true] %s6360_s20 }
 0xc12   :  { %s8789_s28 = scalar_lea.vmem %s6361_s20, 256  ;;  %p8794_p3 = scmp.lt.s32.totalorder %s6361_s20, %s6361_s20 }
 0xc13   :  { %p8790_p2 = scmp.ne.s32.totalorder %s6361_s20, %s8789_s28  ;;  %p8795_p4 = scmp.lt.s32.totalorder %s8789_s28, %s8789_s28 }
 0xc15   :  { %p8796_p5 = por %p8795_p4, %p8794_p3 }
 0xc17   :  { %p8797_p6 = pnand %p8796_p5, %p8790_p2 }
 0xc19   :  { %8800 = shalt.err (!%p8797_p6)
}
 0xc1a   :  { %s8801_s5 = scalar_lea.hbm %s10855_s13, 256 }
 0xc1b   :  { %p8802_p7 = scmp.ne.s32.totalorder %s10855_s13, %s8801_s5  ;;  %p8805_p8 = scmp.lt.u32.totalorder %s8801_s5, %s10855_s13 }
 0xc1d   :  { %p8807_p9 = pnand %p8805_p8, %p8802_p7 }
 0xc1f   :  { %8810 = shalt.err (!%p8807_p9)
}
 0xc20   :  { %6366 = dma.vmem_to_hbm [thread:$0]  %s6361_s20, 256, %s10855_s13, [#allocation19], %s8850_s18, %s8850_s18, %s8851_s19  }
 0xc21   :  { %v6469_v61 = vld [vmem:[%s10852_s10] ss:$0 sm:$0xff]  ;;  %s8866_s13 = smov [#allocation17]  }
 0xc22   :  { %s6336_s8 = sshll.u32 %s8866_s13, 4  ;;  %s6337_s8 = int_to_ptr.vmem [resolvable:$true] %s6336_s8 }
 0xc23   :  { %s8811_s10 = scalar_lea.vmem %s6337_s8, 1024  ;;  %p8816_p11 = scmp.lt.s32.totalorder %s6337_s8, %s6337_s8 }
 0xc24   :  { %p8812_p10 = scmp.ne.s32.totalorder %s6337_s8, %s8811_s10  ;;  %p8817_p12 = scmp.lt.s32.totalorder %s8811_s10, %s8811_s10 }
 0xc26   :  { %p8818_p13 = por %p8817_p12, %p8816_p11 }
 0xc28   :  { %p8819_p0 = pnand %p8818_p13, %p8812_p10 }
 0xcce   :  { %v6531_v31 = vpop.f32.mrb[32].mxu0 }
 0xccf   :  { %v6290_v10 = vadd.f32 %v6531_v31, %v6469_v61  ;;  %v6284_v25 = vpop.f32.mrb[33].mxu0 }
 0xcd0   :  { %v6285_v4 = vadd.f32 %v6469_v61, %v6284_v25 }
 0xcd1   :  { %6324 = vst [vmem:[#allocation17 + $0x8] sm:$0xff] %v6290_v10 }
 0xcd2   :  { %6323 = vst [vmem:[#allocation17] sm:$0xff] %v6285_v4  ;;  %v6534_v39 = vpop.f32.mrb[34].mxu0 }
 0xcd3   :  { %v6300_v52 = vadd.f32 %v6534_v39, %v6469_v61  ;;  %v6294_v0 = vpop.f32.mrb[35].mxu0 }
 0xcd4   :  { %v6295_v26 = vadd.f32 %v6469_v61, %v6294_v0 }
 0xcd5   :  { %6326 = vst [vmem:[#allocation17 + $0x18] sm:$0xff] %v6300_v52 }
 0xcd6   :  { %6325 = vst [vmem:[#allocation17 + $0x10] sm:$0xff] %v6295_v26  ;;  %v6537_v41 = vpop.f32.mrb[36].mxu0 }
 0xcd7   :  { %v6310_v42 = vadd.f32 %v6537_v41, %v6469_v61  ;;  %v6304_v16 = vpop.f32.mrb[37].mxu0 }
 0xcd8   :  { %v6305_v50 = vadd.f32 %v6469_v61, %v6304_v16 }
 0xcd9   :  { %6328 = vst [vmem:[#allocation17 + $0x28] sm:$0xff] %v6310_v42 }
 0xcda   :  { %6327 = vst [vmem:[#allocation17 + $0x20] sm:$0xff] %v6305_v50  ;;  %v6540_v13 = vpop.f32.mrb[38].mxu0 }
 0xcdb   :  { %v6320_v28 = vadd.f32 %v6540_v13, %v6469_v61  ;;  %v6314_v11 = vpop.f32.mrb[39].mxu0 }
 0xcdc   :  { %v6315_v1 = vadd.f32 %v6469_v61, %v6314_v11 }
 0xcdd   :  { %6330 = vst [vmem:[#allocation17 + $0x38] sm:$0xff] %v6320_v28 }
 0xcde   :  { %6329 = vst [vmem:[#allocation17 + $0x30] sm:$0xff] %v6315_v1 }
 0xcdf   :  { %8822 = shalt.err (!%p8819_p0)
}
 0xce0   :  { %s8823_s16 = scalar_lea.hbm %s10853_s11, 1024 }
 0xce1   :  { %p8824_p1 = scmp.ne.s32.totalorder %s10853_s11, %s8823_s16  ;;  %p8827_p2 = scmp.lt.u32.totalorder %s8823_s16, %s10853_s11 }
 0xce3   :  { %p8829_p3 = pnand %p8827_p2, %p8824_p1 }
 0xce5   :  { %8832 = shalt.err (!%p8829_p3)
}
 0xce6   :  { %6342 = dma.vmem_to_hbm [thread:$0]  %s6337_s8, 1024, %s10853_s11, [#allocation10], %s8850_s18, %s8850_s18, %s8851_s19  }
 0xce7   :  { %8845 = dma.done.wait [#allocation10], 1024  }
 0xce8   :  { %8846 = vsyncadd [#allocation10], 4294966272 }
 0xce9   :  { %8847 = dma.done.wait [#allocation19], 512  }
 0xcea   :  { %8848 = vsyncadd [#allocation19], 4294966784 }
 0xceb   :  { %6376 = vsyncpa [#allocation9], 1 }
 0xcec   :  { %6377 = vsyncpa [#allocation12], 1 }
 0xced   :  { %6378 = vsyncpa [#allocation15], 1 }
 0xcee   :  { %6379 = vsyncpa [#allocation10], 1 }
 0xcef   :  { %6380 = vsyncpa [#allocation19], 1 }
 0xcf0   :  { %6381 = vsyncmov [#allocation7] }
 0xcf3   :  { %s6382_s9 = vpop.sfrf %6381 }
 0xcf4   :  { %p6470_p4 = scmp.ne.s32.totalorder %s6382_s9, 0 }
 0xcf6   :  { %6386 = shalt.err (%p6470_p4)  }
 0xcf7   :  { %6388 = vsyncmov [#allocation7 + $0x1] }
 0xcfa   :  { %s6389_s27 = vpop.sfrf %6388 }
 0xcfb   :  { %p6471_p5 = scmp.ne.s32.totalorder %s6389_s27, 0 }
 0xcfd   :  { %6393 = shalt.err (%p6471_p5)  }
 0xcfe   :  { %6395 = vsyncmov [#allocation7 + $0x2] }
 0xd01   :  { %s6396_s2 = vpop.sfrf %6395 }
 0xd02   :  { %p6472_p6 = scmp.ne.s32.totalorder %s6396_s2, 0 }
 0xd04   :  { %6400 = shalt.err (%p6472_p6)  }

</bundles_post_ra>
